<compile_context>
chip_gen: v7x
topology: tpu7x:2x2x1
jax: 0.10.0
libtpu: 0.0.40
codegen_flags: <defaults>
</compile_context>

<pallas_src>
import functools

import numpy as np
import jax
import jax.numpy as jnp
from jax.experimental import pallas as pl
from jax.experimental.pallas import tpu as pltpu

_EPS = 1e-5            # nn.GroupNorm default eps
_IM2COL_MAX_C = 64     # use single im2col matmul only for tiny channel counts


# -----------------------------------------------------------------------------
# 3x3 "SAME" conv on a pre-padded bf16 image value.
#   xp   : (H + 2, W_padded, C) bf16, image interior starts at column `col0 + 1`
#   w_ref: (9*C, Cout) bf16 in im2col row order (k = dy*3 + dx)
# Returns (f32 accumulator (H*W, Cout), center tap (H*W, C) bf16).
# -----------------------------------------------------------------------------
def _conv3x3(xp, w_ref, H, W, col0):
    C = xp.shape[-1]

    def tap(k):
        dy, dx = divmod(k, 3)
        return xp[dy:dy + H, col0 + dx:col0 + dx + W, :].reshape(H * W, C)

    center = tap(4)  # un-padded image in bf16 (reused for the residual conv)

    if C <= _IM2COL_MAX_C:
        # Tiny C: one (H*W, 9C) @ (9C, Cout) matmul keeps the MXU K dim fuller.
        patch = jnp.concatenate(
            [center if k == 4 else tap(k) for k in range(9)], axis=-1)
        acc = jnp.dot(patch, w_ref[...], preferred_element_type=jnp.float32)
    else:
        # Production C: 9 shift-accumulated matmuls, one bf16 tap live at a time
        # (peak VMEM ~ one tap + the f32 accumulator instead of a 9C patch).
        acc = jnp.dot(center, w_ref[4 * C:5 * C, :],
                      preferred_element_type=jnp.float32)
        for k in range(9):
            if k == 4:
                continue
            acc = acc + jnp.dot(tap(k), w_ref[k * C:(k + 1) * C, :],
                                preferred_element_type=jnp.float32)
    return acc, center


# -----------------------------------------------------------------------------
# GroupNorm + affine + SiLU on an (H*W, C) f32 accumulator.
# One row-reduction pass for per-channel sums, one for centered sum-of-squares;
# per-group aggregation happens on tiny (1, C) vectors only.
# -----------------------------------------------------------------------------
def _groupnorm_silu(acc, gamma, beta, groups):
    n, c = acc.shape
    cg = c // groups
    denom = float(n * cg)
    ones = jnp.ones((1, cg), jnp.float32)

    # pass 1: per-channel sums -> per-group mean, broadcast back to (1, C)
    ch_sum = jnp.sum(acc, axis=0, keepdims=True)                       # (1, C)
    mean_c = jnp.concatenate(
        [ones * (jnp.sum(ch_sum[:, g * cg:(g + 1) * cg]) / denom)
         for g in range(groups)], axis=-1)                             # (1, C)

    # pass 2 (centered -> numerically safe): per-channel sum of squares
    cen = acc - mean_c
    ch_ss = jnp.sum(cen * cen, axis=0, keepdims=True)                  # (1, C)
    inv_c = jnp.concatenate(
        [ones * jax.lax.rsqrt(jnp.sum(ch_ss[:, g * cg:(g + 1) * cg]) / denom
                              + _EPS)
         for g in range(groups)], axis=-1)                             # (1, C)

    y = cen * (inv_c * gamma) + beta
    return y * jax.nn.sigmoid(y)                                       # SiLU


# -----------------------------------------------------------------------------
# Fused ResnetBlock kernel (one batch element per grid step)
# -----------------------------------------------------------------------------
def _resnet_block_kernel(groups,
                         xpad_ref, t_ref, w1_ref, w2_ref, rw_ref, p_ref,
                         o_ref, hp_ref):
    # xpad_ref: (1, H+2, W+2, Cin)  bf16  pre-padded NHWC input
    # t_ref:    (1, 1, Cout)        f32   time-embedding additive term
    # w1_ref:   (9*Cin, Cout)       bf16  conv1 weight (im2col row order)
    # w2_ref:   (9*Cout, Cout)      bf16  conv2 weight (im2col row order)
    # rw_ref:   (Cin, Cout)         bf16  residual 1x1 conv weight
    # p_ref:    (8, Cout)           f32   packed [b1, g1, be1, b2, g2, be2, rb, 0]
    # o_ref:    (1, H, W, Cout)     f32
    # hp_ref:   (H+2, W+4, Cout)    bf16  VMEM scratch, image at column offset 2
    H, W, Cout = o_ref.shape[1], o_ref.shape[2], o_ref.shape[3]

    b1, g1, be1 = p_ref[0:1, :], p_ref[1:2, :], p_ref[2:3, :]
    b2, g2, be2 = p_ref[3:4, :], p_ref[4:5, :], p_ref[5:6, :]
    rb = p_ref[6:7, :]

    # ---- block1: conv3x3 directly on the bf16 padded input (no f32 copy)
    xpad = xpad_ref[0]                                    # (H+2, W+2, Cin) bf16
    acc1, x_center = _conv3x3(xpad, w1_ref, H, W, col0=0)
    h1 = _groupnorm_silu(acc1 + b1, g1, be1, groups)

    # ---- residual 1x1 conv reuses conv1's bf16 center tap
    res = jnp.dot(x_center, rw_ref[...],
                  preferred_element_type=jnp.float32) + rb

    # ---- time-embedding add ('b c -> b c 1 1' broadcast), then stage block2
    #      input in the bf16 padded scratch.  Image lives at column offset 2 so
    #      every store is aligned to the bf16 sublane packing; only the 1-pixel
    #      halo is (re)zeroed each step, the interior is fully rewritten.
    h_img = (h1 + t_ref[0]).reshape(H, W, Cout).astype(jnp.bfloat16)
    Wp = W + 4
    zrow = jnp.zeros((1, Wp, Cout), jnp.bfloat16)
    zcol = jnp.zeros((H, 2, Cout), jnp.bfloat16)
    hp_ref[0:1, :, :] = zrow
    hp_ref[H + 1:H + 2, :, :] = zrow
    hp_ref[1:H + 1, 0:2, :] = zcol
    hp_ref[1:H + 1, W + 2:W + 4, :] = zcol
    hp_ref[1:H + 1, 2:W + 2, :] = h_img

    # ---- block2: conv3x3 on the bf16 scratch + GN + SiLU
    hp = hp_ref[...]                                      # (H+2, W+4, Cout) bf16
    acc2, _ = _conv3x3(hp, w2_ref, H, W, col0=1)
    y2 = _groupnorm_silu(acc2 + b2, g2, be2, groups)

    # ---- residual add + store
    o_ref[...] = (y2 + res).reshape(1, H, W, Cout)


def _run_fused(xpad, t, w1, w2, rw, pvec, groups):
    B, Hp2, Wp2, Cin = xpad.shape
    H, W = Hp2 - 2, Wp2 - 2
    Cout = w1.shape[1]
    kernel = functools.partial(_resnet_block_kernel, groups)

    # Advisory cost estimate (per call): 2 convs + residual matmul, 2 SiLUs.
    flops = 2 * B * H * W * Cout * (9 * Cin + 9 * Cout + Cin)
    transcendentals = 2 * B * H * W * Cout
    bytes_accessed = (xpad.size * 2 + B * H * W * Cout * 4
                      + (w1.size + w2.size + rw.size) * 2
                      + (pvec.size + t.size) * 4)

    # Per-step VMEM footprint (double-buffered ins/outs + scratch + live temps);
    # only raise the scoped limit above the 32 MiB default if actually needed.
    in_bytes = Hp2 * Wp2 * Cin * 2
    out_bytes = H * W * Cout * 4
    w_bytes = (w1.size + w2.size + rw.size) * 2 + (pvec.size + Cout) * 4
    scratch_bytes = (H + 2) * (W + 4) * Cout * 2
    if max(Cin, Cout) <= _IM2COL_MAX_C:
        tmp_bytes = H * W * (9 * max(Cin, Cout) * 2 + 4 * Cout * 4)
    else:
        tmp_bytes = H * W * (2 * max(Cin, Cout) * 2 + 4 * Cout * 4)
    step_bytes = 2 * (in_bytes + out_bytes + w_bytes) + scratch_bytes + tmp_bytes
    vmem_limit = int(min(96 * 2 ** 20,
                         max(32 * 2 ** 20, step_bytes + step_bytes // 2)))

    return pl.pallas_call(
        kernel,
        out_shape=jax.ShapeDtypeStruct((B, H, W, Cout), jnp.float32),
        grid_spec=pltpu.PrefetchScalarGridSpec(
            num_scalar_prefetch=0,
            grid=(B,),
            in_specs=[
                pl.BlockSpec((1, Hp2, Wp2, Cin), lambda i: (i, 0, 0, 0)),
                pl.BlockSpec((1, 1, Cout), lambda i: (i, 0, 0)),
                pl.BlockSpec((9 * Cin, Cout), lambda i: (0, 0)),
                pl.BlockSpec((9 * Cout, Cout), lambda i: (0, 0)),
                pl.BlockSpec((Cin, Cout), lambda i: (0, 0)),
                pl.BlockSpec((8, Cout), lambda i: (0, 0)),
            ],
            out_specs=pl.BlockSpec((1, H, W, Cout), lambda i: (i, 0, 0, 0)),
            scratch_shapes=[pltpu.VMEM((H + 2, W + 4, Cout), jnp.bfloat16)],
        ),
        compiler_params=pltpu.CompilerParams(
            dimension_semantics=("parallel",),
            vmem_limit_bytes=vmem_limit),
        cost_estimate=pl.CostEstimate(
            flops=flops, transcendentals=transcendentals,
            bytes_accessed=bytes_accessed),
    )(xpad, t, w1, w2, rw, pvec)


# -----------------------------------------------------------------------------
# ResnetBlock forward (NCHW in / NCHW out, like the PyTorch module)
# -----------------------------------------------------------------------------
def resnet_block_forward(x_nchw, time_emb, params, groups):
    x = jnp.transpose(x_nchw, (0, 2, 3, 1)).astype(jnp.float32)  # NCHW -> NHWC
    B, H, W, Cin = x.shape
    Cout = params["w1"].shape[-1]

    # Pre-pad (conv padding=1) + cast to bf16 in XLA: kernel DMAs bf16 tiles.
    xpad = jnp.pad(x, ((0, 0), (1, 1), (1, 1), (0, 0))).astype(jnp.bfloat16)

    # time MLP: SiLU -> Linear (tiny; plain JAX, fused by XLA)
    if time_emb is not None:
        t = jnp.dot(jax.nn.silu(time_emb.astype(jnp.float32)), params["wt"],
                    precision=jax.lax.Precision.HIGHEST) + params["bt"]
    else:
        t = jnp.zeros((B, Cout), jnp.float32)
    t = t.reshape(B, 1, Cout)

    # Conv weights pre-reshaped to im2col row order + bf16 (f32 acc in-kernel).
    w1 = params["w1"].reshape(9 * Cin, Cout).astype(jnp.bfloat16)
    w2 = params["w2"].reshape(9 * Cout, Cout).astype(jnp.bfloat16)
    rw = params["rw"].astype(jnp.bfloat16)   # identity if dim == dim_out

    # Pack the small per-channel params into one (8, Cout) array (one DMA).
    pvec = jnp.concatenate(
        [params["b1"], params["g1"], params["be1"],
         params["b2"], params["g2"], params["be2"],
         params["rb"], jnp.zeros((1, Cout), jnp.float32)], axis=0)

    out = _run_fused(xpad, t, w1, w2, rw, pvec, groups)
    return jnp.transpose(out, (0, 3, 1, 2))  # NHWC -> NCHW


# -----------------------------------------------------------------------------
# Pure-JAX reference (applies the same bf16 roundings at the same points so the
# check validates the kernel structure with a tight tolerance)
# -----------------------------------------------------------------------------
def _q(a):
    return a.astype(jnp.bfloat16).astype(jnp.float32)


def _ref_gn_silu(y, gamma, beta, groups, eps=_EPS):
    B, H, W, C = y.shape
    cg = C // groups
    yg = y.reshape(B, H, W, groups, cg)
    mu = yg.mean(axis=(1, 2, 4), keepdims=True)
    var = ((yg - mu) ** 2).mean(axis=(1, 2, 4), keepdims=True)
    yn = ((yg - mu) / jnp.sqrt(var + eps)).reshape(B, H, W, C)
    yn = yn * gamma.reshape(1, 1, 1, -1) + beta.reshape(1, 1, 1, -1)
    return yn * jax.nn.sigmoid(yn)


def _ref_forward(x_nchw, time_emb, params, groups):
    x = jnp.transpose(x_nchw, (0, 2, 3, 1)).astype(jnp.float32)
    B = x.shape[0]
    Cout = params["w1"].shape[-1]
    xq = _q(x)
    h = jax.lax.conv_general_dilated(
        xq, _q(params["w1"]), (1, 1), "SAME",
        dimension_numbers=("NHWC", "HWIO", "NHWC"),
        precision=jax.lax.Precision.HIGHEST) + params["b1"].reshape(1, 1, 1, -1)
    h = _ref_gn_silu(h, params["g1"], params["be1"], groups)
    t = jnp.dot(jax.nn.silu(time_emb.astype(jnp.float32)), params["wt"],
                precision=jax.lax.Precision.HIGHEST) + params["bt"]
    h = h + t.reshape(B, 1, 1, Cout)
    h2 = jax.lax.conv_general_dilated(
        _q(h), _q(params["w2"]), (1, 1), "SAME",
        dimension_numbers=("NHWC", "HWIO", "NHWC"),
        precision=jax.lax.Precision.HIGHEST) + params["b2"].reshape(1, 1, 1, -1)
    h2 = _ref_gn_silu(h2, params["g2"], params["be2"], groups)
    res = jnp.einsum("bhwc,cd->bhwd", xq, _q(params["rw"]),
                     precision=jax.lax.Precision.HIGHEST) + params["rb"].reshape(1, 1, 1, -1)
    return jnp.transpose(h2 + res, (0, 3, 1, 2))


if __name__ == "__main__":
    B, dim, dim_out = 2, 4, 8
    H = W = 16
    groups = 4            # dim_out must be divisible by groups
    time_emb_dim = 8

    key = jax.random.PRNGKey(0)
    keys = jax.random.split(key, 16)

    # Inputs (NCHW, like PyTorch Conv2d)
    x = jax.random.normal(keys[0], (B, dim, H, W), jnp.float32)
    temb = jax.random.normal(keys[1], (B, time_emb_dim), jnp.float32)

    def nrm(k, shape, scale=0.1):
        return scale * jax.random.normal(k, shape, jnp.float32)

    params = {
        # block1: Conv2d(dim, dim_out, 3, padding=1) weight stored as HWIO
        # (convert from PyTorch with w.permute(2, 3, 1, 0))
        "w1": nrm(keys[2], (3, 3, dim, dim_out)),
        "b1": nrm(keys[3], (1, dim_out)),
        "g1": 1.0 + nrm(keys[4], (1, dim_out)),
        "be1": nrm(keys[5], (1, dim_out)),
        # time MLP: SiLU -> Linear(time_emb_dim, dim_out)
        "wt": nrm(keys[6], (time_emb_dim, dim_out)),
        "bt": nrm(keys[7], (1, dim_out)),
        # block2: Conv2d(dim_out, dim_out, 3, padding=1)
        "w2": nrm(keys[8], (3, 3, dim_out, dim_out)),
        "b2": nrm(keys[9], (1, dim_out)),
        "g2": 1.0 + nrm(keys[10], (1, dim_out)),
        "be2": nrm(keys[11], (1, dim_out)),
        # res_conv: Conv2d(dim, dim_out, 1) since dim != dim_out
        # (for dim == dim_out pass rw = jnp.eye(dim), rb = zeros -> nn.Identity)
        "rw": nrm(keys[12], (dim, dim_out)),
        "rb": nrm(keys[13], (1, dim_out)),
    }

    fwd = jax.jit(resnet_block_forward, static_argnames=("groups",))
    out = fwd(x, temb, params, groups=groups)
    out = jax.block_until_ready(out)

    ref = _ref_forward(x, temb, params, groups)
    np.testing.assert_allclose(np.asarray(out), np.asarray(ref),
                               rtol=5e-3, atol=5e-3)
    print("KERNEL_OK")
</pallas_src>

<mosaic_0001>
module attributes {stable_mosaic.version = 11 : i64} {
  func.func @_resnet_block_kernel(%arg0: i32, %arg1: memref<1x18x18x4xbf16, #tpu.memory_space<vmem>>, %arg2: memref<1x1x8xf32, #tpu.memory_space<vmem>>, %arg3: memref<36x8xbf16, #tpu.memory_space<vmem>>, %arg4: memref<72x8xbf16, #tpu.memory_space<vmem>>, %arg5: memref<4x8xbf16, #tpu.memory_space<vmem>>, %arg6: memref<8x8xf32, #tpu.memory_space<vmem>>, %arg7: memref<1x16x16x8xf32, #tpu.memory_space<vmem>>, %arg8: memref<18x20x8xbf16, #tpu.memory_space<vmem>>) attributes {dimension_semantics = [#tpu.dimension_semantics<parallel>], iteration_bounds = array<i64: 2>, scalar_prefetch = 0 : i64, scratch_operands = 1 : i64, tpu.core_type = #tpu.core_type<tc>, window_params = [{transform_indices = @transform_0, window_bounds = array<i64: 1, 18, 18, 4>}, {transform_indices = @transform_1, window_bounds = array<i64: 1, 1, 8>}, {pipeline_mode = #tpu.pipeline_mode<synchronous>, transform_indices = @transform_2, window_bounds = array<i64: 36, 8>}, {pipeline_mode = #tpu.pipeline_mode<synchronous>, transform_indices = @transform_3, window_bounds = array<i64: 72, 8>}, {pipeline_mode = #tpu.pipeline_mode<synchronous>, transform_indices = @transform_4, window_bounds = array<i64: 4, 8>}, {pipeline_mode = #tpu.pipeline_mode<synchronous>, transform_indices = @transform_5, window_bounds = array<i64: 8, 8>}, {transform_indices = @transform_6, window_bounds = array<i64: 1, 16, 16, 8>}]} {
    %c0 = arith.constant 0 : index
    %c0_0 = arith.constant 0 : index
    %0 = vector.load %arg6[%c0, %c0_0] : memref<8x8xf32, #tpu.memory_space<vmem>>, vector<1x8xf32>
    %c1 = arith.constant 1 : index
    %c0_1 = arith.constant 0 : index
    %1 = vector.load %arg6[%c1, %c0_1] : memref<8x8xf32, #tpu.memory_space<vmem>>, vector<1x8xf32>
    %c2 = arith.constant 2 : index
    %c0_2 = arith.constant 0 : index
    %2 = vector.load %arg6[%c2, %c0_2] : memref<8x8xf32, #tpu.memory_space<vmem>>, vector<1x8xf32>
    %c3 = arith.constant 3 : index
    %c0_3 = arith.constant 0 : index
    %3 = vector.load %arg6[%c3, %c0_3] : memref<8x8xf32, #tpu.memory_space<vmem>>, vector<1x8xf32>
    %c4 = arith.constant 4 : index
    %c0_4 = arith.constant 0 : index
    %4 = vector.load %arg6[%c4, %c0_4] : memref<8x8xf32, #tpu.memory_space<vmem>>, vector<1x8xf32>
    %c5 = arith.constant 5 : index
    %c0_5 = arith.constant 0 : index
    %5 = vector.load %arg6[%c5, %c0_5] : memref<8x8xf32, #tpu.memory_space<vmem>>, vector<1x8xf32>
    %c6 = arith.constant 6 : index
    %c0_6 = arith.constant 0 : index
    %6 = vector.load %arg6[%c6, %c0_6] : memref<8x8xf32, #tpu.memory_space<vmem>>, vector<1x8xf32>
    %c0_7 = arith.constant 0 : index
    %c0_8 = arith.constant 0 : index
    %c0_9 = arith.constant 0 : index
    %c0_10 = arith.constant 0 : index
    %7 = vector.load %arg1[%c0_7, %c0_8, %c0_9, %c0_10] : memref<1x18x18x4xbf16, #tpu.memory_space<vmem>>, vector<1x18x18x4xbf16>
    %8 = vector.shape_cast %7 : vector<1x18x18x4xbf16> to vector<18x18x4xbf16>
    %9 = vector.extract_strided_slice %8 {offsets = [1, 1, 0], sizes = [16, 16, 4], strides = [1, 1, 1]} : vector<18x18x4xbf16> to vector<16x16x4xbf16>
    %10 = vector.shape_cast %9 : vector<16x16x4xbf16> to vector<256x4xbf16>
    %11 = vector.extract_strided_slice %8 {offsets = [0, 0, 0], sizes = [16, 16, 4], strides = [1, 1, 1]} : vector<18x18x4xbf16> to vector<16x16x4xbf16>
    %12 = vector.shape_cast %11 : vector<16x16x4xbf16> to vector<256x4xbf16>
    %13 = vector.extract_strided_slice %8 {offsets = [0, 1, 0], sizes = [16, 16, 4], strides = [1, 1, 1]} : vector<18x18x4xbf16> to vector<16x16x4xbf16>
    %14 = vector.shape_cast %13 : vector<16x16x4xbf16> to vector<256x4xbf16>
    %15 = vector.extract_strided_slice %8 {offsets = [0, 2, 0], sizes = [16, 16, 4], strides = [1, 1, 1]} : vector<18x18x4xbf16> to vector<16x16x4xbf16>
    %16 = vector.shape_cast %15 : vector<16x16x4xbf16> to vector<256x4xbf16>
    %17 = vector.extract_strided_slice %8 {offsets = [1, 0, 0], sizes = [16, 16, 4], strides = [1, 1, 1]} : vector<18x18x4xbf16> to vector<16x16x4xbf16>
    %18 = vector.shape_cast %17 : vector<16x16x4xbf16> to vector<256x4xbf16>
    %19 = vector.extract_strided_slice %8 {offsets = [1, 2, 0], sizes = [16, 16, 4], strides = [1, 1, 1]} : vector<18x18x4xbf16> to vector<16x16x4xbf16>
    %20 = vector.shape_cast %19 : vector<16x16x4xbf16> to vector<256x4xbf16>
    %21 = vector.extract_strided_slice %8 {offsets = [2, 0, 0], sizes = [16, 16, 4], strides = [1, 1, 1]} : vector<18x18x4xbf16> to vector<16x16x4xbf16>
    %22 = vector.shape_cast %21 : vector<16x16x4xbf16> to vector<256x4xbf16>
    %23 = vector.extract_strided_slice %8 {offsets = [2, 1, 0], sizes = [16, 16, 4], strides = [1, 1, 1]} : vector<18x18x4xbf16> to vector<16x16x4xbf16>
    %24 = vector.shape_cast %23 : vector<16x16x4xbf16> to vector<256x4xbf16>
    %25 = vector.extract_strided_slice %8 {offsets = [2, 2, 0], sizes = [16, 16, 4], strides = [1, 1, 1]} : vector<18x18x4xbf16> to vector<16x16x4xbf16>
    %26 = vector.shape_cast %25 : vector<16x16x4xbf16> to vector<256x4xbf16>
    %27 = tpu.concatenate %12, %14, %16, %18, %10, %20, %22, %24, %26 in 1 : vector<256x4xbf16>, vector<256x4xbf16>, vector<256x4xbf16>, vector<256x4xbf16>, vector<256x4xbf16>, vector<256x4xbf16>, vector<256x4xbf16>, vector<256x4xbf16>, vector<256x4xbf16> -> vector<256x36xbf16>
    %c0_11 = arith.constant 0 : index
    %c0_12 = arith.constant 0 : index
    %28 = vector.load %arg3[%c0_11, %c0_12] : memref<36x8xbf16, #tpu.memory_space<vmem>>, vector<36x8xbf16>
    %cst = arith.constant dense<0.000000e+00> : vector<256x8xf32>
    %29 = tpu.matmul %27, %28, %cst {dimension_numbers = #tpu.dot_dimension_numbers<[1], [0], [0], [1], [0, 0, 1, 1], [], []>} : vector<256x36xbf16>, vector<36x8xbf16>, vector<256x8xf32> -> vector<256x8xf32>
    %30 = vector.broadcast %0 : vector<1x8xf32> to vector<256x8xf32>
    %31 = arith.addf %29, %30 : vector<256x8xf32>
    %cst_13 = arith.constant 1.000000e+00 : f32
    %32 = vector.broadcast %cst_13 : f32 to vector<1x2xf32>
    %cst_14 = arith.constant dense<0.000000e+00> : vector<8xf32>
    %33 = vector.multi_reduction <add>, %31, %cst_14 [0] : vector<256x8xf32> to vector<8xf32>
    %34 = vector.shape_cast %33 : vector<8xf32> to vector<1x8xf32>
    %35 = vector.extract_strided_slice %34 {offsets = [0, 0], sizes = [1, 2], strides = [1, 1]} : vector<1x8xf32> to vector<1x2xf32>
    %36 = vector.shape_cast %35 : vector<1x2xf32> to vector<1x1x2xf32>
    %cst_15 = arith.constant dense<0.000000e+00> : vector<1xf32>
    %37 = vector.multi_reduction <add>, %36, %cst_15 [1, 2] : vector<1x1x2xf32> to vector<1xf32>
    %38 = vector.shape_cast %37 : vector<1xf32> to vector<1x1x1xf32>
    %39 = vector.extract %38[0, 0, 0] : f32 from vector<1x1x1xf32>
    %cst_16 = arith.constant 5.120000e+02 : f32
    %40 = arith.divf %39, %cst_16 : f32
    %41 = vector.broadcast %40 : f32 to vector<1x2xf32>
    %42 = arith.mulf %32, %41 : vector<1x2xf32>
    %43 = vector.extract_strided_slice %34 {offsets = [0, 2], sizes = [1, 2], strides = [1, 1]} : vector<1x8xf32> to vector<1x2xf32>
    %44 = vector.shape_cast %43 : vector<1x2xf32> to vector<1x1x2xf32>
    %cst_17 = arith.constant dense<0.000000e+00> : vector<1xf32>
    %45 = vector.multi_reduction <add>, %44, %cst_17 [1, 2] : vector<1x1x2xf32> to vector<1xf32>
    %46 = vector.shape_cast %45 : vector<1xf32> to vector<1x1x1xf32>
    %47 = vector.extract %46[0, 0, 0] : f32 from vector<1x1x1xf32>
    %cst_18 = arith.constant 5.120000e+02 : f32
    %48 = arith.divf %47, %cst_18 : f32
    %49 = vector.broadcast %48 : f32 to vector<1x2xf32>
    %50 = arith.mulf %32, %49 : vector<1x2xf32>
    %51 = vector.extract_strided_slice %34 {offsets = [0, 4], sizes = [1, 2], strides = [1, 1]} : vector<1x8xf32> to vector<1x2xf32>
    %52 = vector.shape_cast %51 : vector<1x2xf32> to vector<1x1x2xf32>
    %cst_19 = arith.constant dense<0.000000e+00> : vector<1xf32>
    %53 = vector.multi_reduction <add>, %52, %cst_19 [1, 2] : vector<1x1x2xf32> to vector<1xf32>
    %54 = vector.shape_cast %53 : vector<1xf32> to vector<1x1x1xf32>
    %55 = vector.extract %54[0, 0, 0] : f32 from vector<1x1x1xf32>
    %cst_20 = arith.constant 5.120000e+02 : f32
    %56 = arith.divf %55, %cst_20 : f32
    %57 = vector.broadcast %56 : f32 to vector<1x2xf32>
    %58 = arith.mulf %32, %57 : vector<1x2xf32>
    %59 = vector.extract_strided_slice %34 {offsets = [0, 6], sizes = [1, 2], strides = [1, 1]} : vector<1x8xf32> to vector<1x2xf32>
    %60 = vector.shape_cast %59 : vector<1x2xf32> to vector<1x1x2xf32>
    %cst_21 = arith.constant dense<0.000000e+00> : vector<1xf32>
    %61 = vector.multi_reduction <add>, %60, %cst_21 [1, 2] : vector<1x1x2xf32> to vector<1xf32>
    %62 = vector.shape_cast %61 : vector<1xf32> to vector<1x1x1xf32>
    %63 = vector.extract %62[0, 0, 0] : f32 from vector<1x1x1xf32>
    %cst_22 = arith.constant 5.120000e+02 : f32
    %64 = arith.divf %63, %cst_22 : f32
    %65 = vector.broadcast %64 : f32 to vector<1x2xf32>
    %66 = arith.mulf %32, %65 : vector<1x2xf32>
    %67 = tpu.concatenate %42, %50, %58, %66 in 1 : vector<1x2xf32>, vector<1x2xf32>, vector<1x2xf32>, vector<1x2xf32> -> vector<1x8xf32>
    %68 = vector.broadcast %67 : vector<1x8xf32> to vector<256x8xf32>
    %69 = arith.subf %31, %68 : vector<256x8xf32>
    %70 = arith.mulf %69, %69 : vector<256x8xf32>
    %cst_23 = arith.constant dense<0.000000e+00> : vector<8xf32>
    %71 = vector.multi_reduction <add>, %70, %cst_23 [0] : vector<256x8xf32> to vector<8xf32>
    %72 = vector.shape_cast %71 : vector<8xf32> to vector<1x8xf32>
    %73 = vector.extract_strided_slice %72 {offsets = [0, 0], sizes = [1, 2], strides = [1, 1]} : vector<1x8xf32> to vector<1x2xf32>
    %74 = vector.shape_cast %73 : vector<1x2xf32> to vector<1x1x2xf32>
    %cst_24 = arith.constant dense<0.000000e+00> : vector<1xf32>
    %75 = vector.multi_reduction <add>, %74, %cst_24 [1, 2] : vector<1x1x2xf32> to vector<1xf32>
    %76 = vector.shape_cast %75 : vector<1xf32> to vector<1x1x1xf32>
    %77 = vector.extract %76[0, 0, 0] : f32 from vector<1x1x1xf32>
    %cst_25 = arith.constant 5.120000e+02 : f32
    %78 = arith.divf %77, %cst_25 : f32
    %cst_26 = arith.constant 9.99999974E-6 : f32
    %79 = arith.addf %78, %cst_26 : f32
    %80 = math.rsqrt %79 : f32
    %81 = vector.broadcast %80 : f32 to vector<1x2xf32>
    %82 = arith.mulf %32, %81 : vector<1x2xf32>
    %83 = vector.extract_strided_slice %72 {offsets = [0, 2], sizes = [1, 2], strides = [1, 1]} : vector<1x8xf32> to vector<1x2xf32>
    %84 = vector.shape_cast %83 : vector<1x2xf32> to vector<1x1x2xf32>
    %cst_27 = arith.constant dense<0.000000e+00> : vector<1xf32>
    %85 = vector.multi_reduction <add>, %84, %cst_27 [1, 2] : vector<1x1x2xf32> to vector<1xf32>
    %86 = vector.shape_cast %85 : vector<1xf32> to vector<1x1x1xf32>
    %87 = vector.extract %86[0, 0, 0] : f32 from vector<1x1x1xf32>
    %cst_28 = arith.constant 5.120000e+02 : f32
    %88 = arith.divf %87, %cst_28 : f32
    %cst_29 = arith.constant 9.99999974E-6 : f32
    %89 = arith.addf %88, %cst_29 : f32
    %90 = math.rsqrt %89 : f32
    %91 = vector.broadcast %90 : f32 to vector<1x2xf32>
    %92 = arith.mulf %32, %91 : vector<1x2xf32>
    %93 = vector.extract_strided_slice %72 {offsets = [0, 4], sizes = [1, 2], strides = [1, 1]} : vector<1x8xf32> to vector<1x2xf32>
    %94 = vector.shape_cast %93 : vector<1x2xf32> to vector<1x1x2xf32>
    %cst_30 = arith.constant dense<0.000000e+00> : vector<1xf32>
    %95 = vector.multi_reduction <add>, %94, %cst_30 [1, 2] : vector<1x1x2xf32> to vector<1xf32>
    %96 = vector.shape_cast %95 : vector<1xf32> to vector<1x1x1xf32>
    %97 = vector.extract %96[0, 0, 0] : f32 from vector<1x1x1xf32>
    %cst_31 = arith.constant 5.120000e+02 : f32
    %98 = arith.divf %97, %cst_31 : f32
    %cst_32 = arith.constant 9.99999974E-6 : f32
    %99 = arith.addf %98, %cst_32 : f32
    %100 = math.rsqrt %99 : f32
    %101 = vector.broadcast %100 : f32 to vector<1x2xf32>
    %102 = arith.mulf %32, %101 : vector<1x2xf32>
    %103 = vector.extract_strided_slice %72 {offsets = [0, 6], sizes = [1, 2], strides = [1, 1]} : vector<1x8xf32> to vector<1x2xf32>
    %104 = vector.shape_cast %103 : vector<1x2xf32> to vector<1x1x2xf32>
    %cst_33 = arith.constant dense<0.000000e+00> : vector<1xf32>
    %105 = vector.multi_reduction <add>, %104, %cst_33 [1, 2] : vector<1x1x2xf32> to vector<1xf32>
    %106 = vector.shape_cast %105 : vector<1xf32> to vector<1x1x1xf32>
    %107 = vector.extract %106[0, 0, 0] : f32 from vector<1x1x1xf32>
    %cst_34 = arith.constant 5.120000e+02 : f32
    %108 = arith.divf %107, %cst_34 : f32
    %cst_35 = arith.constant 9.99999974E-6 : f32
    %109 = arith.addf %108, %cst_35 : f32
    %110 = math.rsqrt %109 : f32
    %111 = vector.broadcast %110 : f32 to vector<1x2xf32>
    %112 = arith.mulf %32, %111 : vector<1x2xf32>
    %113 = tpu.concatenate %82, %92, %102, %112 in 1 : vector<1x2xf32>, vector<1x2xf32>, vector<1x2xf32>, vector<1x2xf32> -> vector<1x8xf32>
    %114 = arith.mulf %113, %1 : vector<1x8xf32>
    %115 = vector.broadcast %114 : vector<1x8xf32> to vector<256x8xf32>
    %116 = arith.mulf %69, %115 : vector<256x8xf32>
    %117 = vector.broadcast %2 : vector<1x8xf32> to vector<256x8xf32>
    %118 = arith.addf %116, %117 : vector<256x8xf32>
    %119 = arith.negf %118 : vector<256x8xf32>
    %120 = math.exp %119 : vector<256x8xf32>
    %cst_36 = arith.constant 1.000000e+00 : f32
    %121 = vector.broadcast %cst_36 : f32 to vector<256x8xf32>
    %122 = arith.addf %121, %120 : vector<256x8xf32>
    %123 = arith.divf %121, %122 : vector<256x8xf32>
    %124 = arith.mulf %118, %123 : vector<256x8xf32>
    %c0_37 = arith.constant 0 : index
    %c0_38 = arith.constant 0 : index
    %125 = vector.load %arg5[%c0_37, %c0_38] : memref<4x8xbf16, #tpu.memory_space<vmem>>, vector<4x8xbf16>
    %cst_39 = arith.constant dense<0.000000e+00> : vector<256x8xf32>
    %126 = tpu.matmul %10, %125, %cst_39 {dimension_numbers = #tpu.dot_dimension_numbers<[1], [0], [0], [1], [0, 0, 1, 1], [], []>} : vector<256x4xbf16>, vector<4x8xbf16>, vector<256x8xf32> -> vector<256x8xf32>
    %127 = vector.broadcast %6 : vector<1x8xf32> to vector<256x8xf32>
    %128 = arith.addf %126, %127 : vector<256x8xf32>
    %c0_40 = arith.constant 0 : index
    %c0_41 = arith.constant 0 : index
    %c0_42 = arith.constant 0 : index
    %129 = vector.load %arg2[%c0_40, %c0_41, %c0_42] : memref<1x1x8xf32, #tpu.memory_space<vmem>>, vector<1x1x8xf32>
    %130 = vector.shape_cast %129 : vector<1x1x8xf32> to vector<1x8xf32>
    %131 = vector.broadcast %130 : vector<1x8xf32> to vector<256x8xf32>
    %132 = arith.addf %124, %131 : vector<256x8xf32>
    %133 = vector.shape_cast %132 : vector<256x8xf32> to vector<16x16x8xf32>
    %134 = arith.truncf %133 : vector<16x16x8xf32> to vector<16x16x8xbf16>
    %cst_43 = arith.constant 0.000000e+00 : bf16
    %135 = vector.broadcast %cst_43 : bf16 to vector<1x20x8xbf16>
    %cst_44 = arith.constant 0.000000e+00 : bf16
    %136 = vector.broadcast %cst_44 : bf16 to vector<16x2x8xbf16>
    %c0_45 = arith.constant 0 : index
    %c0_46 = arith.constant 0 : index
    %c0_47 = arith.constant 0 : index
    %137 = vector.load %arg8[%c0_45, %c0_46, %c0_47] : memref<18x20x8xbf16, #tpu.memory_space<vmem>>, vector<1x20x8xbf16>
    tpu.vector_store %arg8[%c0_45, %c0_46, %c0_47], %135 {strides = array<i32>} : memref<18x20x8xbf16, #tpu.memory_space<vmem>>, vector<1x20x8xbf16>,
    %c17 = arith.constant 17 : index
    %c0_48 = arith.constant 0 : index
    %c0_49 = arith.constant 0 : index
    %138 = vector.load %arg8[%c17, %c0_48, %c0_49] : memref<18x20x8xbf16, #tpu.memory_space<vmem>>, vector<1x20x8xbf16>
    tpu.vector_store %arg8[%c17, %c0_48, %c0_49], %135 {strides = array<i32>} : memref<18x20x8xbf16, #tpu.memory_space<vmem>>, vector<1x20x8xbf16>,
    %c1_50 = arith.constant 1 : index
    %c0_51 = arith.constant 0 : index
    %c0_52 = arith.constant 0 : index
    %139 = vector.load %arg8[%c1_50, %c0_51, %c0_52] : memref<18x20x8xbf16, #tpu.memory_space<vmem>>, vector<16x2x8xbf16>
    tpu.vector_store %arg8[%c1_50, %c0_51, %c0_52], %136 {strides = array<i32>} : memref<18x20x8xbf16, #tpu.memory_space<vmem>>, vector<16x2x8xbf16>,
    %c1_53 = arith.constant 1 : index
    %c18 = arith.constant 18 : index
    %c0_54 = arith.constant 0 : index
    %140 = vector.load %arg8[%c1_53, %c18, %c0_54] : memref<18x20x8xbf16, #tpu.memory_space<vmem>>, vector<16x2x8xbf16>
    tpu.vector_store %arg8[%c1_53, %c18, %c0_54], %136 {strides = array<i32>} : memref<18x20x8xbf16, #tpu.memory_space<vmem>>, vector<16x2x8xbf16>,
    %c1_55 = arith.constant 1 : index
    %c2_56 = arith.constant 2 : index
    %c0_57 = arith.constant 0 : index
    %141 = vector.load %arg8[%c1_55, %c2_56, %c0_57] : memref<18x20x8xbf16, #tpu.memory_space<vmem>>, vector<16x16x8xbf16>
    tpu.vector_store %arg8[%c1_55, %c2_56, %c0_57], %134 {strides = array<i32>} : memref<18x20x8xbf16, #tpu.memory_space<vmem>>, vector<16x16x8xbf16>,
    %c0_58 = arith.constant 0 : index
    %c0_59 = arith.constant 0 : index
    %c0_60 = arith.constant 0 : index
    %142 = vector.load %arg8[%c0_58, %c0_59, %c0_60] : memref<18x20x8xbf16, #tpu.memory_space<vmem>>, vector<18x20x8xbf16>
    %143 = vector.extract_strided_slice %142 {offsets = [1, 2, 0], sizes = [16, 16, 8], strides = [1, 1, 1]} : vector<18x20x8xbf16> to vector<16x16x8xbf16>
    %144 = vector.shape_cast %143 : vector<16x16x8xbf16> to vector<256x8xbf16>
    %145 = vector.extract_strided_slice %142 {offsets = [0, 1, 0], sizes = [16, 16, 8], strides = [1, 1, 1]} : vector<18x20x8xbf16> to vector<16x16x8xbf16>
    %146 = vector.shape_cast %145 : vector<16x16x8xbf16> to vector<256x8xbf16>
    %147 = vector.extract_strided_slice %142 {offsets = [0, 2, 0], sizes = [16, 16, 8], strides = [1, 1, 1]} : vector<18x20x8xbf16> to vector<16x16x8xbf16>
    %148 = vector.shape_cast %147 : vector<16x16x8xbf16> to vector<256x8xbf16>
    %149 = vector.extract_strided_slice %142 {offsets = [0, 3, 0], sizes = [16, 16, 8], strides = [1, 1, 1]} : vector<18x20x8xbf16> to vector<16x16x8xbf16>
    %150 = vector.shape_cast %149 : vector<16x16x8xbf16> to vector<256x8xbf16>
    %151 = vector.extract_strided_slice %142 {offsets = [1, 1, 0], sizes = [16, 16, 8], strides = [1, 1, 1]} : vector<18x20x8xbf16> to vector<16x16x8xbf16>
    %152 = vector.shape_cast %151 : vector<16x16x8xbf16> to vector<256x8xbf16>
    %153 = vector.extract_strided_slice %142 {offsets = [1, 3, 0], sizes = [16, 16, 8], strides = [1, 1, 1]} : vector<18x20x8xbf16> to vector<16x16x8xbf16>
    %154 = vector.shape_cast %153 : vector<16x16x8xbf16> to vector<256x8xbf16>
    %155 = vector.extract_strided_slice %142 {offsets = [2, 1, 0], sizes = [16, 16, 8], strides = [1, 1, 1]} : vector<18x20x8xbf16> to vector<16x16x8xbf16>
    %156 = vector.shape_cast %155 : vector<16x16x8xbf16> to vector<256x8xbf16>
    %157 = vector.extract_strided_slice %142 {offsets = [2, 2, 0], sizes = [16, 16, 8], strides = [1, 1, 1]} : vector<18x20x8xbf16> to vector<16x16x8xbf16>
    %158 = vector.shape_cast %157 : vector<16x16x8xbf16> to vector<256x8xbf16>
    %159 = vector.extract_strided_slice %142 {offsets = [2, 3, 0], sizes = [16, 16, 8], strides = [1, 1, 1]} : vector<18x20x8xbf16> to vector<16x16x8xbf16>
    %160 = vector.shape_cast %159 : vector<16x16x8xbf16> to vector<256x8xbf16>
    %161 = tpu.concatenate %146, %148, %150, %152, %144, %154, %156, %158, %160 in 1 : vector<256x8xbf16>, vector<256x8xbf16>, vector<256x8xbf16>, vector<256x8xbf16>, vector<256x8xbf16>, vector<256x8xbf16>, vector<256x8xbf16>, vector<256x8xbf16>, vector<256x8xbf16> -> vector<256x72xbf16>
    %c0_61 = arith.constant 0 : index
    %c0_62 = arith.constant 0 : index
    %162 = vector.load %arg4[%c0_61, %c0_62] : memref<72x8xbf16, #tpu.memory_space<vmem>>, vector<72x8xbf16>
    %cst_63 = arith.constant dense<0.000000e+00> : vector<256x8xf32>
    %163 = tpu.matmul %161, %162, %cst_63 {dimension_numbers = #tpu.dot_dimension_numbers<[1], [0], [0], [1], [0, 0, 1, 1], [], []>} : vector<256x72xbf16>, vector<72x8xbf16>, vector<256x8xf32> -> vector<256x8xf32>
    %164 = vector.broadcast %3 : vector<1x8xf32> to vector<256x8xf32>
    %165 = arith.addf %163, %164 : vector<256x8xf32>
    %cst_64 = arith.constant 1.000000e+00 : f32
    %166 = vector.broadcast %cst_64 : f32 to vector<1x2xf32>
    %cst_65 = arith.constant dense<0.000000e+00> : vector<8xf32>
    %167 = vector.multi_reduction <add>, %165, %cst_65 [0] : vector<256x8xf32> to vector<8xf32>
    %168 = vector.shape_cast %167 : vector<8xf32> to vector<1x8xf32>
    %169 = vector.extract_strided_slice %168 {offsets = [0, 0], sizes = [1, 2], strides = [1, 1]} : vector<1x8xf32> to vector<1x2xf32>
    %170 = vector.shape_cast %169 : vector<1x2xf32> to vector<1x1x2xf32>
    %cst_66 = arith.constant dense<0.000000e+00> : vector<1xf32>
    %171 = vector.multi_reduction <add>, %170, %cst_66 [1, 2] : vector<1x1x2xf32> to vector<1xf32>
    %172 = vector.shape_cast %171 : vector<1xf32> to vector<1x1x1xf32>
    %173 = vector.extract %172[0, 0, 0] : f32 from vector<1x1x1xf32>
    %cst_67 = arith.constant 5.120000e+02 : f32
    %174 = arith.divf %173, %cst_67 : f32
    %175 = vector.broadcast %174 : f32 to vector<1x2xf32>
    %176 = arith.mulf %166, %175 : vector<1x2xf32>
    %177 = vector.extract_strided_slice %168 {offsets = [0, 2], sizes = [1, 2], strides = [1, 1]} : vector<1x8xf32> to vector<1x2xf32>
    %178 = vector.shape_cast %177 : vector<1x2xf32> to vector<1x1x2xf32>
    %cst_68 = arith.constant dense<0.000000e+00> : vector<1xf32>
    %179 = vector.multi_reduction <add>, %178, %cst_68 [1, 2] : vector<1x1x2xf32> to vector<1xf32>
    %180 = vector.shape_cast %179 : vector<1xf32> to vector<1x1x1xf32>
    %181 = vector.extract %180[0, 0, 0] : f32 from vector<1x1x1xf32>
    %cst_69 = arith.constant 5.120000e+02 : f32
    %182 = arith.divf %181, %cst_69 : f32
    %183 = vector.broadcast %182 : f32 to vector<1x2xf32>
    %184 = arith.mulf %166, %183 : vector<1x2xf32>
    %185 = vector.extract_strided_slice %168 {offsets = [0, 4], sizes = [1, 2], strides = [1, 1]} : vector<1x8xf32> to vector<1x2xf32>
    %186 = vector.shape_cast %185 : vector<1x2xf32> to vector<1x1x2xf32>
    %cst_70 = arith.constant dense<0.000000e+00> : vector<1xf32>
    %187 = vector.multi_reduction <add>, %186, %cst_70 [1, 2] : vector<1x1x2xf32> to vector<1xf32>
    %188 = vector.shape_cast %187 : vector<1xf32> to vector<1x1x1xf32>
    %189 = vector.extract %188[0, 0, 0] : f32 from vector<1x1x1xf32>
    %cst_71 = arith.constant 5.120000e+02 : f32
    %190 = arith.divf %189, %cst_71 : f32
    %191 = vector.broadcast %190 : f32 to vector<1x2xf32>
    %192 = arith.mulf %166, %191 : vector<1x2xf32>
    %193 = vector.extract_strided_slice %168 {offsets = [0, 6], sizes = [1, 2], strides = [1, 1]} : vector<1x8xf32> to vector<1x2xf32>
    %194 = vector.shape_cast %193 : vector<1x2xf32> to vector<1x1x2xf32>
    %cst_72 = arith.constant dense<0.000000e+00> : vector<1xf32>
    %195 = vector.multi_reduction <add>, %194, %cst_72 [1, 2] : vector<1x1x2xf32> to vector<1xf32>
    %196 = vector.shape_cast %195 : vector<1xf32> to vector<1x1x1xf32>
    %197 = vector.extract %196[0, 0, 0] : f32 from vector<1x1x1xf32>
    %cst_73 = arith.constant 5.120000e+02 : f32
    %198 = arith.divf %197, %cst_73 : f32
    %199 = vector.broadcast %198 : f32 to vector<1x2xf32>
    %200 = arith.mulf %166, %199 : vector<1x2xf32>
    %201 = tpu.concatenate %176, %184, %192, %200 in 1 : vector<1x2xf32>, vector<1x2xf32>, vector<1x2xf32>, vector<1x2xf32> -> vector<1x8xf32>
    %202 = vector.broadcast %201 : vector<1x8xf32> to vector<256x8xf32>
    %203 = arith.subf %165, %202 : vector<256x8xf32>
    %204 = arith.mulf %203, %203 : vector<256x8xf32>
    %cst_74 = arith.constant dense<0.000000e+00> : vector<8xf32>
    %205 = vector.multi_reduction <add>, %204, %cst_74 [0] : vector<256x8xf32> to vector<8xf32>
    %206 = vector.shape_cast %205 : vector<8xf32> to vector<1x8xf32>
    %207 = vector.extract_strided_slice %206 {offsets = [0, 0], sizes = [1, 2], strides = [1, 1]} : vector<1x8xf32> to vector<1x2xf32>
    %208 = vector.shape_cast %207 : vector<1x2xf32> to vector<1x1x2xf32>
    %cst_75 = arith.constant dense<0.000000e+00> : vector<1xf32>
    %209 = vector.multi_reduction <add>, %208, %cst_75 [1, 2] : vector<1x1x2xf32> to vector<1xf32>
    %210 = vector.shape_cast %209 : vector<1xf32> to vector<1x1x1xf32>
    %211 = vector.extract %210[0, 0, 0] : f32 from vector<1x1x1xf32>
    %cst_76 = arith.constant 5.120000e+02 : f32
    %212 = arith.divf %211, %cst_76 : f32
    %cst_77 = arith.constant 9.99999974E-6 : f32
    %213 = arith.addf %212, %cst_77 : f32
    %214 = math.rsqrt %213 : f32
    %215 = vector.broadcast %214 : f32 to vector<1x2xf32>
    %216 = arith.mulf %166, %215 : vector<1x2xf32>
    %217 = vector.extract_strided_slice %206 {offsets = [0, 2], sizes = [1, 2], strides = [1, 1]} : vector<1x8xf32> to vector<1x2xf32>
    %218 = vector.shape_cast %217 : vector<1x2xf32> to vector<1x1x2xf32>
    %cst_78 = arith.constant dense<0.000000e+00> : vector<1xf32>
    %219 = vector.multi_reduction <add>, %218, %cst_78 [1, 2] : vector<1x1x2xf32> to vector<1xf32>
    %220 = vector.shape_cast %219 : vector<1xf32> to vector<1x1x1xf32>
    %221 = vector.extract %220[0, 0, 0] : f32 from vector<1x1x1xf32>
    %cst_79 = arith.constant 5.120000e+02 : f32
    %222 = arith.divf %221, %cst_79 : f32
    %cst_80 = arith.constant 9.99999974E-6 : f32
    %223 = arith.addf %222, %cst_80 : f32
    %224 = math.rsqrt %223 : f32
    %225 = vector.broadcast %224 : f32 to vector<1x2xf32>
    %226 = arith.mulf %166, %225 : vector<1x2xf32>
    %227 = vector.extract_strided_slice %206 {offsets = [0, 4], sizes = [1, 2], strides = [1, 1]} : vector<1x8xf32> to vector<1x2xf32>
    %228 = vector.shape_cast %227 : vector<1x2xf32> to vector<1x1x2xf32>
    %cst_81 = arith.constant dense<0.000000e+00> : vector<1xf32>
    %229 = vector.multi_reduction <add>, %228, %cst_81 [1, 2] : vector<1x1x2xf32> to vector<1xf32>
    %230 = vector.shape_cast %229 : vector<1xf32> to vector<1x1x1xf32>
    %231 = vector.extract %230[0, 0, 0] : f32 from vector<1x1x1xf32>
    %cst_82 = arith.constant 5.120000e+02 : f32
    %232 = arith.divf %231, %cst_82 : f32
    %cst_83 = arith.constant 9.99999974E-6 : f32
    %233 = arith.addf %232, %cst_83 : f32
    %234 = math.rsqrt %233 : f32
    %235 = vector.broadcast %234 : f32 to vector<1x2xf32>
    %236 = arith.mulf %166, %235 : vector<1x2xf32>
    %237 = vector.extract_strided_slice %206 {offsets = [0, 6], sizes = [1, 2], strides = [1, 1]} : vector<1x8xf32> to vector<1x2xf32>
    %238 = vector.shape_cast %237 : vector<1x2xf32> to vector<1x1x2xf32>
    %cst_84 = arith.constant dense<0.000000e+00> : vector<1xf32>
    %239 = vector.multi_reduction <add>, %238, %cst_84 [1, 2] : vector<1x1x2xf32> to vector<1xf32>
    %240 = vector.shape_cast %239 : vector<1xf32> to vector<1x1x1xf32>
    %241 = vector.extract %240[0, 0, 0] : f32 from vector<1x1x1xf32>
    %cst_85 = arith.constant 5.120000e+02 : f32
    %242 = arith.divf %241, %cst_85 : f32
    %cst_86 = arith.constant 9.99999974E-6 : f32
    %243 = arith.addf %242, %cst_86 : f32
    %244 = math.rsqrt %243 : f32
    %245 = vector.broadcast %244 : f32 to vector<1x2xf32>
    %246 = arith.mulf %166, %245 : vector<1x2xf32>
    %247 = tpu.concatenate %216, %226, %236, %246 in 1 : vector<1x2xf32>, vector<1x2xf32>, vector<1x2xf32>, vector<1x2xf32> -> vector<1x8xf32>
    %248 = arith.mulf %247, %4 : vector<1x8xf32>
    %249 = vector.broadcast %248 : vector<1x8xf32> to vector<256x8xf32>
    %250 = arith.mulf %203, %249 : vector<256x8xf32>
    %251 = vector.broadcast %5 : vector<1x8xf32> to vector<256x8xf32>
    %252 = arith.addf %250, %251 : vector<256x8xf32>
    %253 = arith.negf %252 : vector<256x8xf32>
    %254 = math.exp %253 : vector<256x8xf32>
    %cst_87 = arith.constant 1.000000e+00 : f32
    %255 = vector.broadcast %cst_87 : f32 to vector<256x8xf32>
    %256 = arith.addf %255, %254 : vector<256x8xf32>
    %257 = arith.divf %255, %256 : vector<256x8xf32>
    %258 = arith.mulf %252, %257 : vector<256x8xf32>
    %259 = arith.addf %258, %128 : vector<256x8xf32>
    %260 = vector.shape_cast %259 : vector<256x8xf32> to vector<1x16x16x8xf32>
    %c0_88 = arith.constant 0 : index
    %c0_89 = arith.constant 0 : index
    %c0_90 = arith.constant 0 : index
    %c0_91 = arith.constant 0 : index
    %261 = vector.load %arg7[%c0_88, %c0_89, %c0_90, %c0_91] : memref<1x16x16x8xf32, #tpu.memory_space<vmem>>, vector<1x16x16x8xf32>
    tpu.vector_store %arg7[%c0_88, %c0_89, %c0_90, %c0_91], %260 {strides = array<i32>} : memref<1x16x16x8xf32, #tpu.memory_space<vmem>>, vector<1x16x16x8xf32>,
    return
  }
  func.func @transform_0(%arg0: i32) -> (i32, i32, i32, i32) {
    %c0_i32 = arith.constant 0 : i32
    %c0_i32_0 = arith.constant 0 : i32
    %c0_i32_1 = arith.constant 0 : i32
    %c0_i32_2 = arith.constant 0 : i32
    return %arg0, %c0_i32, %c0_i32_0, %c0_i32_1 : i32, i32, i32, i32
  }
  func.func @transform_1(%arg0: i32) -> (i32, i32, i32) {
    %c0_i32 = arith.constant 0 : i32
    %c0_i32_0 = arith.constant 0 : i32
    %c0_i32_1 = arith.constant 0 : i32
    return %arg0, %c0_i32, %c0_i32_0 : i32, i32, i32
  }
  func.func @transform_2(%arg0: i32) -> (i32, i32) {
    %c0_i32 = arith.constant 0 : i32
    %c0_i32_0 = arith.constant 0 : i32
    %c0_i32_1 = arith.constant 0 : i32
    return %c0_i32, %c0_i32_0 : i32, i32
  }
  func.func @transform_3(%arg0: i32) -> (i32, i32) {
    %c0_i32 = arith.constant 0 : i32
    %c0_i32_0 = arith.constant 0 : i32
    %c0_i32_1 = arith.constant 0 : i32
    return %c0_i32, %c0_i32_0 : i32, i32
  }
  func.func @transform_4(%arg0: i32) -> (i32, i32) {
    %c0_i32 = arith.constant 0 : i32
    %c0_i32_0 = arith.constant 0 : i32
    %c0_i32_1 = arith.constant 0 : i32
    return %c0_i32, %c0_i32_0 : i32, i32
  }
  func.func @transform_5(%arg0: i32) -> (i32, i32) {
    %c0_i32 = arith.constant 0 : i32
    %c0_i32_0 = arith.constant 0 : i32
    %c0_i32_1 = arith.constant 0 : i32
    return %c0_i32, %c0_i32_0 : i32, i32
  }
  func.func @transform_6(%arg0: i32) -> (i32, i32, i32, i32) {
    %c0_i32 = arith.constant 0 : i32
    %c0_i32_0 = arith.constant 0 : i32
    %c0_i32_1 = arith.constant 0 : i32
    %c0_i32_2 = arith.constant 0 : i32
    return %arg0, %c0_i32, %c0_i32_0, %c0_i32_1 : i32, i32, i32, i32
  }
}

</mosaic_0001>

<bundles_post_ra>
// kernel: resnet_block_forward.1
= control target key start
LH: loop header
LB: loop body
LE: loop exit
PB: predicated region body
PF: predicated region fallthrough
CT: control target
= control target key end

     0   :  { %s6728_s21 = smov 0   ;;  %s11033_s0 = inlined_call_operand.vmem [shape: bf16[2,18,18,4], index: 0, kind: input, shape index: {}]   ;;  %s11034_s1 = inlined_call_operand.vmem [shape: f32[2,1,8], index: 1, kind: input, shape index: {}]   ;;  %s11035_s2 = inlined_call_operand.vmem [shape: bf16[36,8], index: 2, kind: input, shape index: {}]   ;;  %s11036_s3 = inlined_call_operand.vmem [shape: bf16[72,8], index: 3, kind: input, shape index: {}]   ;;  %s11037_s4 = inlined_call_operand.vmem [shape: bf16[4,8], index: 4, kind: input, shape index: {}]   ;;  %s11038_s5 = inlined_call_operand.vmem [shape: f32[8,8], index: 5, kind: input, shape index: {}]   ;;  %s11039_s6 = inlined_call_operand.vmem [shape: f32[2,16,16,8], index: 6, kind: output, shape index: {}]  }
   0x1 LB: > { %s5758_s22 = sadd.s32 4294967295, %s6675_s21   ;;  %p5762_p0 = scmp.ge.s32.totalorder %s6675_s21, 1  ;;  %s6675_s21 = sphi %s6728_s21, %s16_s21  }
   0x2   : > { %p220_p1 = scmp.lt.s32.totalorder %s6675_s21, 3 }
   0x4   : > { %p221_p2 = pnand %p5762_p0, %p220_p1 }
   0x6   : > { %224 = sbr.rel (%p221_p2) target bundleno = 3458 (0xd82), region = 44 }
   0xd   : > { %p253_p3 = scmp.lt.s32.totalorder %s5758_s22, 1  ;;  %vm787_vm0 = vcmask 1042432   ;;  %vm788_vm1 = vcmask 1046532   ;;  %vm328_vm2 = vsmask.f32 3328  ;;  %s6677_s27 = smov 12  }
   0xe   : > { %vm329_vm3 = vsmask.f32 7440  ;;  %vm6787_vm4 = vmor %vm787_vm0, %vm788_vm1  ;;  %s6678_s28 = smov 20   ;;  %v11137_v54 = vmov 0  ;;  %s6679_s29 = smov 8   ;;  %vm1364_vm6 = vcmask 31744  }
   0xf   : > { %s11405_s22 = smov (!%p253_p3, %s5758_s22), 1  ;;  %vm6816_vm5 = vmor %vm328_vm2, %vm329_vm3  ;;  %s6680_s8 = smov 4   ;;  %vm1701_vm7 = vcmask 1041408   ;;  %vm1413_vm8 = vcmask 64512   ;;  %vm1446_vm9 = vcmask 97280   ;;  %vm1479_vm10 = vcmask 130048  }
  0x10   : > { %s6280_s23 = smul.u32 216, %s11405_s22  ;;  %v11138_v54 = vsel %vm6816_vm5, 4294967295, %v11137_v54  ;;  %s6681_s11 = smov 16   ;;  %vm1512_vm11 = vcmask 162816   ;;  %vm1545_vm12 = vcmask 195584   ;;  %vm1578_vm13 = vcmask 228352  }
  0x11   : > { %11139 = vst [vmem:[#allocation3_spill] sm:$0xff] %v11138_v54  ;;  %s6682_s12 = smov 24   ;;  %s6683_s13 = smov 28   ;;  %vm1611_vm14 = vcmask 261120   ;;  %vm1668_vm15 = vcmask 293888   ;;  %vm1935_vm0 = vcmask 8192  }
  0x12   : > { %s6742_s26 = scalar_lea.vmem %s11033_s0, %s6280_s23  ;;  %s6684_s14 = smov 32   ;;  %vm11088_vm1 = vcmask 15360   ;;  %vm11087_vm2 = vcmask 48128   ;;  %vm2798_vm3 = vcmask 60416  }
  0x13   : > { %v6745_v0 = vld [vmem:[%s6742_s26 + $0x18] sm:$0xf]  ;;  %v6748_v1 = vld [vmem:[%s6742_s26 + $0x1c] sm:$0xf]  ;;  %v277_v2 = vld [vmem:[%s6742_s26 + $0xc] sm:$0xf] }
  0x14   : > { %v365_v3 = vshll.u32 %v6748_v1, 16  ;;  %v369_v4 = vshrl.u32 %v6748_v1, 16  ;;  %v6755_v5 = vcombine.low %v6745_v0, %v6748_v1  ;;  %v356_v6 = vshrl.u32 %v6745_v0, 16  ;;  %v6759_v7 = vld [vmem:[%s6742_s26 + $0x10] sm:$0xf]  ;;  %s6685_s19 = smov 124  }
  0x15   : > { %v359_v8 = vshll.u32 %v6745_v0, 16  ;;  %v341_v9 = vshll.u32 %v6759_v7, 16  ;;  %v345_v10 = vshrl.u32 %v6759_v7, 16  ;;  %v6765_v11 = vcombine.low %v277_v2, %v6759_v7  ;;  %v6768_v12 = vld [vmem:[%s6742_s26 + $0x14] sm:$0x1]  ;;  %s6686_s20 = smov 126  }
  0x16   : > { %v6770_v13 = vrot.slane %v365_v3, 5  ;;  %v6772_v14 = vrot.slane %v369_v4, 4  ;;  %1159 = vrot.lane.b32.xlu1 %v6755_v5, %s6677_s27  ;;  %v6776_v15 = vrot.slane %v356_v6, 4  ;;  %v332_v16 = vshrl.u32 %v277_v2, 16  ;;  %v6779_v17 = vld [vmem:[%s6742_s26] sm:$0xf] }
  0x17   : > { %v361_v18 = vrot.slane %v359_v8, 5  ;;  %v6781_v19 = vrot.slane %v345_v10, 4  ;;  %1157 = vrot.lane.b32.xlu0 %v6765_v11, %s6677_s27  ;;  %v335_v20 = vshll.u32 %v277_v2, 16  ;;  %v5767_v22 = vrot.slane %v277_v2, 9  ;;  %v6792_v23 = vld [vmem:[%s6742_s26 + $0x4] sm:$0xf] }
  0x18   : > { %v334_v24 = vrot.slane %v332_v16, 4  ;;  %v799_v25 = vrot.slane %v6759_v7, 5  ;;  %v802_v26 = vrot.slane %v6768_v12, 5  ;;  %v276_v27 = vld [vmem:[%s6742_s26 + $0x8] sm:$0x1]  ;;  %v5766_v28 = vrot.slane %v6779_v17, 9 }
  0x19   : > { %v337_v29 = vrot.slane %v335_v20, 5  ;;  %v792_v30 = vrot.slane %v6792_v23, 5  ;;  %v795_v31 = vrot.slane %v276_v27, 5  ;;  %v716_v32 = vshrl.u32 %v6779_v17, 16  ;;  %v282_v45 = vld [vmem:[%s6742_s26 + $0x20] sm:$0x1] }
  0x1a   : > { %v800_v33 = vsel %vm6787_vm4, %v5767_v22, %v799_v25  ;;  %v801_v34 = vrot.slane %v799_v25, 4  ;;  %v719_v35 = vshll.u32 %v6779_v17, 16  ;;  %v725_v36 = vshll.u32 %v6792_v23, 16  ;;  %v6830_v8 = vld [vmem:[%s6742_s26 + $0x24] sm:$0xf]  ;;  %s6687_s23 = smov 122  }
  0x1b   : > { %v793_v37 = vsel %vm6787_vm4, %v5766_v28, %v792_v30  ;;  %v794_v38 = vrot.slane %v792_v30, 4  ;;  %v718_v39 = vrot.slane %v716_v32, 4  ;;  %v729_v40 = vshrl.u32 %v6792_v23, 16  ;;  %v6839_v16 = vld [vmem:[%s6742_s26 + $0x28] sm:$0xf] }
  0x1c   : > { %v803_v41 = vsel %vm6787_vm4, %v801_v34, %v802_v26  ;;  %v721_v42 = vrot.slane %v719_v35, 5  ;;  %v727_v43 = vrot.slane %v725_v36, 5  ;;  %v735_v44 = vshll.u32 %v276_v27, 16  ;;  %v285_v28 = vld [vmem:[%s6742_s26 + $0x2c] sm:$0x1] }
  0x1d   : > { %v5817_v46 = vcombine.low %v800_v33, %v803_v41  ;;  %v796_v47 = vsel %vm6787_vm4, %v794_v38, %v795_v31  ;;  %v731_v48 = vrot.slane %v729_v40, 4  ;;  %v375_v49 = vshll.u32 %v282_v45, 16 }
  0x1e   : > { %v5816_v50 = vcombine.low %v793_v37, %v796_v47  ;;  %v722_v51 = vor.u32 %v721_v42, %v718_v39  ;;  %v737_v52 = vrot.slane %v735_v44, 5  ;;  %v5768_v53 = vrot.slane %v6745_v0, 9  ;;  %v6365_v39 = vld [vmem:[%s11035_s2 + $0x8] sm:$0xff]  }
  0x1f   : > { %1227 = vrot.lane.b32.xlu0 %v5817_v46, %s6678_s28  ;;  %v732_v55 = vor.u32 %v731_v48, %v727_v43  ;;  %v377_v56 = vrot.slane %v375_v49, 5  ;;  %v806_v57 = vrot.slane %v6748_v1, 5  ;;  %v809_v58 = vrot.slane %v282_v45, 5  ;;  %v6885_v48 = vld [vmem:[%s6742_s26 + $0x34] sm:$0xf] }
  0x20   : > { %1122 = vrot.lane.b32.xlu1 %v5816_v50, %s6679_s29  ;;  %v723_v59 = vrot.slane %v722_v51, 4  ;;  %v338_v60 = vor.u32 %v337_v29, %v334_v24  ;;  %v343_v61 = vrot.slane %v341_v9, 5  ;;  %v351_v62 = vshll.u32 %v6768_v12, 16  ;;  %v6363_v24 = vld [vmem:[%s11035_s2] sm:$0xff]  }
  0x21   : > { %v733_v63 = vrot.slane %v732_v55, 4  ;;  %v807_v0 = vsel %vm6787_vm4, %v5768_v53, %v806_v57  ;;  %v808_v2 = vrot.slane %v806_v57, 4  ;;  %v362_v3 = vor.u32 %v361_v18, %v6776_v15  ;;  %6160 = vmatprep.subr.bf16.mxu0 %v6363_v24 }
  0x22   : > { %v728_v1 = vsel %vm6816_vm5, %v723_v59, %v727_v43  ;;  %v339_v4 = vrot.slane %v338_v60, 4  ;;  %v348_v6 = vor.u32 %v6781_v19, %v343_v61  ;;  %v353_v7 = vrot.slane %v351_v62, 5  ;;  %6161 = vmatpush3.bf16.msra.mxu0 %v6363_v24 }
  0x23   : > { %v738_v9 = vsel %vm6816_vm5, %v733_v63, %v737_v52  ;;  %v810_v10 = vsel %vm6787_vm4, %v808_v2, %v809_v58  ;;  %v363_v12 = vrot.slane %v362_v3, 4  ;;  %v372_v15 = vor.u32 %v6772_v14, %v6770_v13  ;;  %6162 = vmatprep.subr.bf16.mxu0 %v6365_v39 }
  0x24   : > { %1124 = vrot.lane.b32.xlu1 %v5817_v46, %s6679_s29  ;;  %v5800_v18 = vcombine.low %v728_v1, %v738_v9  ;;  %v6842_v19 = vcombine.low %v807_v0, %v810_v10  ;;  %v344_v20 = vsel %vm6816_vm5, %v339_v4, %v343_v61  ;;  %v349_v22 = vrot.slane %v348_v6, 4  ;;  %v6880_v46 = vld [vmem:[%s6742_s26 + $0x30] sm:$0xf]  ;;  %v288_v0 = vld [vmem:[%s6742_s26 + $0x38] sm:$0x1] }
  0x25   : > { %v368_v25 = vsel %vm6816_vm5, %v363_v12, %v6770_v13  ;;  %v373_v14 = vrot.slane %v372_v15, 4  ;;  %v380_v26 = vshrl.u32 %v6830_v8, 16  ;;  %v383_v27 = vshll.u32 %v6830_v8, 16  ;;  %v6922_v9 = vld [vmem:[%s6742_s26 + $0x40] sm:$0xf] }
  0x26   : > { %1042 = vrot.lane.b32.xlu0 %v5800_v18, %s6680_s8  ;;  %v354_v29 = vsel %vm6816_vm5, %v349_v22, %v353_v7  ;;  %v389_v30 = vshll.u32 %v6839_v16, 16  ;;  %v393_v31 = vshrl.u32 %v6839_v16, 16  ;;  %v399_v38 = vshll.u32 %v285_v28, 16  ;;  %6163 = vmatpush3.bf16.msra.mxu0 %v6365_v39  ;;  %v6915_v7 = vld [vmem:[%s6742_s26 + $0x3c] sm:$0xf] }
  0x27   : > { %v6860_v32 = vcombine.low %v344_v20, %v354_v29  ;;  %v378_v13 = vsel %vm6816_vm5, %v373_v14, %v377_v56  ;;  %v382_v33 = vrot.slane %v380_v26, 4  ;;  %v385_v34 = vrot.slane %v383_v27, 5  ;;  %v6925_v10 = vld [vmem:[%s6742_s26 + $0x54] sm:$0xf] }
  0x28   : > { %1229 = vrot.lane.b32.xlu1 %v6842_v19, %s6678_s28  ;;  %v6866_v35 = vcombine.low %v368_v25, %v378_v13  ;;  %v391_v36 = vrot.slane %v389_v30, 5  ;;  %v395_v37 = vrot.slane %v393_v31, 4  ;;  %v401_v42 = vrot.slane %v399_v38, 5 }
  0x29   : > { %v386_v40 = vor.u32 %v385_v34, %v382_v33  ;;  %v6877_v44 = vcombine.low %v6830_v8, %v6839_v16  ;;  %v813_v50 = vrot.slane %v6839_v16, 5  ;;  %v404_v51 = vshrl.u32 %v6880_v46, 16  ;;  %v6929_v16 = vld [vmem:[%s6742_s26 + $0x58] sm:$0xf] }
  0x2a   : > { %11140 = vst [vmem:[#allocation4_spill] sm:$0xff] %v6866_v35  ;;  %1044 = vrot.lane.b32.xlu0 %v6860_v32, %s6680_s8  ;;  %v396_v41 = vor.u32 %v395_v37, %v391_v36  ;;  %v407_v52 = vshll.u32 %v6880_v46, 16  ;;  %v413_v55 = vshll.u32 %v6885_v48, 16  ;;  %v417_v56 = vshrl.u32 %v6885_v48, 16  ;;  %v6949_v37 = vld [vmem:[%s6742_s26 + $0x5c] sm:$0x1] }
  0x2b   : > { %v387_v43 = vrot.slane %v386_v40, 4  ;;  %v5769_v57 = vrot.slane %v6830_v8, 9  ;;  %v815_v58 = vrot.slane %v813_v50, 4  ;;  %v816_v59 = vrot.slane %v285_v28, 5 }
  0x2c   : > { %1194 = vrot.lane.b32.xlu1 %v6866_v35, %s6681_s11  ;;  %v397_v45 = vrot.slane %v396_v41, 4  ;;  %v406_v60 = vrot.slane %v404_v51, 4  ;;  %v409_v61 = vrot.slane %v407_v52, 5  ;;  %v415_v62 = vrot.slane %v413_v55, 5 }
  0x2d   : > { %v392_v47 = vsel %vm6816_vm5, %v387_v43, %v391_v36  ;;  %v419_v63 = vrot.slane %v417_v56, 4  ;;  %v814_v2 = vsel %vm6787_vm4, %v5769_v57, %v813_v50  ;;  %v817_v3 = vsel %vm6787_vm4, %v815_v58, %v816_v59 }
  0x2e   : > { %1192 = vrot.lane.b32.xlu0 %v6860_v32, %s6681_s11  ;;  %v402_v49 = vsel %vm6816_vm5, %v397_v45, %v401_v42  ;;  %v410_v1 = vor.u32 %v409_v61, %v406_v60  ;;  %v423_v6 = vshll.u32 %v288_v0, 16  ;;  %v6919_v8 = vcombine.low %v814_v2, %v817_v3 }
  0x2f   : > { %v6896_v53 = vcombine.low %v392_v47, %v402_v49  ;;  %v420_v4 = vor.u32 %v419_v63, %v415_v62  ;;  %v820_v15 = vrot.slane %v6885_v48, 5  ;;  %v428_v22 = vshrl.u32 %v6915_v7, 16  ;;  %v291_v47 = vld [vmem:[%s6742_s26 + $0x44] sm:$0x1] }
  0x30   : > { %1264 = vrot.lane.b32.xlu1 %v6877_v44, %s6682_s12  ;;  %v411_v12 = vrot.slane %v410_v1, 4  ;;  %v425_v20 = vrot.slane %v423_v6, 5  ;;  %v431_v24 = vshll.u32 %v6915_v7, 16  ;;  %v437_v25 = vshll.u32 %v6922_v9, 16 }
  0x31   : > { %11141 = vst [vmem:[#allocation5_spill] sm:$0xff] %v6896_v53  ;;  %v421_v18 = vrot.slane %v420_v4, 4  ;;  %v441_v14 = vshrl.u32 %v6922_v9, 16  ;;  %v476_v26 = vshrl.u32 %v6925_v10, 16  ;;  %v479_v27 = vshll.u32 %v6925_v10, 16 }
  0x32   : > { %1262 = vrot.lane.b32.xlu0 %v6755_v5, %s6682_s12  ;;  %v6943_v28 = vcombine.low %v6880_v46, %v6885_v48  ;;  %v5770_v29 = vrot.slane %v6880_v46, 9  ;;  %v823_v30 = vrot.slane %v288_v0, 5  ;;  %v485_v31 = vshll.u32 %v6929_v16, 16 }
  0x33   : > { %v822_v13 = vrot.slane %v820_v15, 4  ;;  %v478_v33 = vrot.slane %v476_v26, 4  ;;  %v481_v34 = vrot.slane %v479_v27, 5  ;;  %v489_v36 = vshrl.u32 %v6929_v16, 16 }
  0x34   : > { %1299 = vrot.lane.b32.xlu1 %v6896_v53, %s6683_s13  ;;  %v416_v38 = vsel %vm6816_vm5, %v411_v12, %v415_v62  ;;  %v430_v39 = vrot.slane %v428_v22, 4  ;;  %v433_v40 = vrot.slane %v431_v24, 5  ;;  %v487_v41 = vrot.slane %v485_v31, 5 }
  0x35   : > { %v426_v42 = vsel %vm6816_vm5, %v421_v18, %v425_v20  ;;  %v439_v43 = vrot.slane %v437_v25, 5  ;;  %v443_v45 = vrot.slane %v441_v14, 4  ;;  %v491_v46 = vrot.slane %v489_v36, 4  ;;  %v293_v18 = vld [vmem:[%s6742_s26 + $0x4c] sm:$0xf] }
  0x36   : > { %1297 = vrot.lane.b32.xlu0 %v6866_v35, %s6683_s13  ;;  %v482_v48 = vor.u32 %v481_v34, %v478_v33  ;;  %v495_v49 = vshll.u32 %v6949_v37, 16  ;;  %v6963_v51 = vcombine.low %v416_v38, %v426_v42  ;;  %v821_v52 = vsel %vm6787_vm4, %v5770_v29, %v820_v15  ;;  %v292_v15 = vld [vmem:[%s6742_s26 + $0x48] sm:$0xf]  ;;  %v294_v36 = vld [vmem:[%s6742_s26 + $0x50] sm:$0x1] }
  0x37   : > { %v492_v50 = vor.u32 %v491_v46, %v487_v41  ;;  %v824_v55 = vsel %vm6787_vm4, %v822_v13, %v823_v30  ;;  %v434_v56 = vor.u32 %v433_v40, %v430_v39  ;;  %v444_v57 = vor.u32 %v443_v45, %v439_v43  ;;  %v6366_v30 = vld [vmem:[%s11035_s2 + $0x10] ss:$0 sps:$4 sm:$0x33]  }
  0x38   : > { %1046 = vrot.lane.b32.xlu1 %v6866_v35, %s6680_s8  ;;  %11142 = vst [vmem:[#allocation6_spill] sm:$0xff] %v6963_v51  ;;  %v447_v58 = vshll.u32 %v291_v47, 16  ;;  %v497_v60 = vrot.slane %v495_v49, 5  ;;  %v5820_v61 = vcombine.low %v821_v52, %v824_v55  ;;  %v6982_v1 = vcombine.low %v6915_v7, %v6922_v9  ;;  %6276 = vmatprep.subr.msk.bf16.mxu0 %vm1701_vm7, %v6366_v30 }
  0x39   : > { %v493_v59 = vrot.slane %v492_v50, 4  ;;  %v435_v62 = vrot.slane %v434_v56, 4  ;;  %v445_v63 = vrot.slane %v444_v57, 4  ;;  %v5784_v20 = vcombine.low %v6779_v17, %v6792_v23 }
  0x3a   : > { %1332 = vrot.lane.b32.xlu0 %v6842_v19, %s6684_s14  ;;  %v449_v0 = vrot.slane %v447_v58, 5  ;;  %v827_v22 = vrot.slane %v6922_v9, 5  ;;  %v452_v25 = vshrl.u32 %v292_v15, 16  ;;  %v455_v14 = vshll.u32 %v292_v15, 16 }
  0x3b   : > { %v498_v3 = vsel %vm6816_vm5, %v493_v59, %v497_v60  ;;  %v440_v4 = vsel %vm6816_vm5, %v435_v62, %v439_v43  ;;  %v465_v26 = vshrl.u32 %v293_v18, 16  ;;  %v5771_v27 = vrot.slane %v6915_v7, 9  ;;  %v298_v62 = vld [vmem:[%s6742_s26 + $0x60] sm:$0xf] }
  0x3c   : > { %1048 = vrot.lane.b32.xlu1 %v6896_v53, %s6680_s8  ;;  %v450_v6 = vsel %vm6816_vm5, %v445_v63, %v449_v0  ;;  %v829_v29 = vrot.slane %v827_v22, 4  ;;  %v830_v9 = vrot.slane %v291_v47, 5  ;;  %v454_v31 = vrot.slane %v452_v25, 4  ;;  %v299_v63 = vld [vmem:[%s6742_s26 + $0x64] sm:$0xf] }
  0x3d   : > { %v7001_v24 = vcombine.low %v440_v4, %v450_v6  ;;  %v457_v13 = vrot.slane %v455_v14, 5  ;;  %v467_v34 = vrot.slane %v465_v26, 4  ;;  %v828_v7 = vsel %vm6787_vm4, %v5771_v27, %v827_v22  ;;  %v300_v26 = vld [vmem:[%s6742_s26 + $0x68] sm:$0x1] }
  0x3e   : > { %1334 = vrot.lane.b32.xlu0 %v6919_v8, %s6684_s14  ;;  %v831_v38 = vsel %vm6787_vm4, %v829_v29, %v830_v9  ;;  %v1703_v42 = vsel %vm1701_vm7, %v6366_v30, 0  ;;  %v7027_v49 = vcombine.low %v292_v15, %v293_v18  ;;  %v5772_v50 = vrot.slane %v292_v15, 9  ;;  %v7075_v30 = vld [vmem:[%s6742_s26 + $0x6c] sm:$0xf] }
  0x3f   : > { %11143 = vst [vmem:[#allocation7_spill] sm:$0xff] %v7001_v24  ;;  %v458_v39 = vor.u32 %v457_v13, %v454_v31  ;;  %v5821_v43 = vcombine.low %v828_v7, %v831_v38  ;;  %6165 = vmatpush3.bf16.msra.mxu0 %v1703_v42  ;;  %v837_v57 = vrot.slane %v294_v36, 5  ;;  %v841_v0 = vrot.slane %v6929_v16, 5  ;;  %v7079_v13 = vld [vmem:[%s6742_s26 + $0x70] sm:$0xf] }
  0x40   : > { %1128 = vrot.lane.b32.xlu1 %v6919_v8, %s6679_s29  ;;  %v509_v4 = vshll.u32 %v299_v63, 16  ;;  %v513_v6 = vshrl.u32 %v299_v63, 16  ;;  %v5773_v15 = vrot.slane %v6925_v10, 9  ;;  %v844_v22 = vrot.slane %v6949_v37, 5 }
  0x41   : > { %v459_v45 = vrot.slane %v458_v39, 4  ;;  %v519_v29 = vshll.u32 %v300_v26, 16  ;;  %v524_v7 = vshrl.u32 %v7075_v30, 16  ;;  %v527_v39 = vshll.u32 %v7075_v30, 16 }
  0x42   : > { %1126 = vrot.lane.b32.xlu0 %v6842_v19, %s6679_s29  ;;  %v483_v19 = vrot.slane %v482_v48, 4  ;;  %v834_v48 = vrot.slane %v293_v18, 5  ;;  %v511_v14 = vrot.slane %v509_v4, 5  ;;  %v842_v27 = vsel %vm6787_vm4, %v5773_v15, %v841_v0 }
  0x43   : > { %v7088_v42 = vcombine.low %v298_v62, %v299_v63 }
  0x44   : > { %1163 = vrot.lane.b32.xlu1 %v6943_v28, %s6677_s27  ;;  %v488_v2 = vsel %vm6816_vm5, %v483_v19, %v487_v41  ;;  %v471_v41 = vshll.u32 %v294_v36, 16  ;;  %v836_v56 = vrot.slane %v834_v48, 4  ;;  %v835_v19 = vsel %vm6787_vm4, %v5772_v50, %v834_v48 }
  0x45   : > { %v6988_v12 = vcombine.low %v488_v2, %v498_v3  ;;  %v500_v2 = vshrl.u32 %v298_v62, 16  ;;  %v503_v3 = vshll.u32 %v298_v62, 16  ;;  %v848_v36 = vrot.slane %v299_v63, 5 }
  0x46   : > { %1161 = vrot.lane.b32.xlu0 %v6877_v44, %s6677_s27  ;;  %v473_v47 = vrot.slane %v471_v41, 5  ;;  %v838_v59 = vsel %vm6787_vm4, %v836_v56, %v837_v57  ;;  %v537_v41 = vshrl.u32 %v7079_v13, 16  ;;  %v526_v48 = vrot.slane %v524_v7, 4  ;;  %v303_v57 = vld [vmem:[%s6742_s26 + $0x74] sm:$0x1] }
  0x47   : > { %6212 = vmatprep.mubr.msk.bf16.mxu1 %vm1364_vm6, %v6988_v12  ;;  %v5822_v60 = vcombine.low %v835_v19, %v838_v59  ;;  %v505_v25 = vrot.slane %v503_v3, 5 }
  0x48   : > { %1198 = vrot.lane.b32.xlu1 %v6963_v51, %s6681_s11  ;;  %v539_v56 = vrot.slane %v537_v41, 4 }
  0x4a   : > { %1196 = vrot.lane.b32.xlu0 %v6896_v53, %s6681_s11 }
  0x4c   : > { %1233 = vrot.lane.b32.xlu1 %v5820_v61, %s6678_s28 }
  0x4e   : > { %1231 = vrot.lane.b32.xlu0 %v6919_v8, %s6678_s28  ;;  %v461_v8 = vshll.u32 %v293_v18, 16  ;;  %v843_v18 = vrot.slane %v841_v0, 4 }
  0x50   : > { %1268 = vrot.lane.b32.xlu1 %v6982_v1, %s6682_s12  ;;  %v463_v33 = vrot.slane %v461_v8, 5  ;;  %v515_v8 = vrot.slane %v513_v6, 4 }
  0x52   : > { %1266 = vrot.lane.b32.xlu0 %v6943_v28, %s6682_s12  ;;  %v468_v40 = vor.u32 %v467_v34, %v463_v33  ;;  %v464_v52 = vsel %vm6816_vm5, %v459_v45, %v463_v33  ;;  %v516_v9 = vor.u32 %v515_v8, %v511_v14  ;;  %v521_v34 = vrot.slane %v519_v29, 5 }
  0x53   : > { %v855_v8 = vrot.slane %v7079_v13, 5 }
  0x54   : > { %1303 = vrot.lane.b32.xlu1 %v7001_v24, %s6683_s13  ;;  %v469_v46 = vrot.slane %v468_v40, 4  ;;  %v517_v38 = vrot.slane %v516_v9, 4  ;;  %v533_v40 = vshll.u32 %v7079_v13, 16 }
  0x56   : > { %1301 = vrot.lane.b32.xlu0 %v6963_v51, %s6683_s13  ;;  %v474_v55 = vsel %vm6816_vm5, %v469_v46, %v473_v47  ;;  %v850_v46 = vrot.slane %v848_v36, 4  ;;  %v851_v47 = vrot.slane %v300_v26, 5  ;;  %v522_v50 = vsel %vm6816_vm5, %v517_v38, %v521_v34 }
  0x57   : > { %v7036_v58 = vcombine.low %v464_v52, %v474_v55  ;;  %v529_v52 = vrot.slane %v527_v39, 5  ;;  %v535_v55 = vrot.slane %v533_v40, 5  ;;  %v858_v34 = vrot.slane %v303_v57, 5  ;;  %v306_v40 = vld [vmem:[%s6742_s26 + $0x80] sm:$0x1] }
  0x58   : > { %1050 = vrot.lane.b32.xlu1 %v6963_v51, %s6680_s8 }
  0x59   : > { %11144 = vst [vmem:[#allocation8_spill] sm:$0xff] %v7036_v58  ;;  %v530_v63 = vor.u32 %v529_v52, %v526_v48  ;;  %v540_v0 = vor.u32 %v539_v56, %v535_v55  ;;  %v567_v48 = vshll.u32 %v306_v40, 16  ;;  %v7169_v56 = vld [vmem:[%s6742_s26 + $0x88] sm:$0xf] }
  0x5a   : > { %1336 = vrot.lane.b32.xlu0 %v5820_v61, %s6684_s14 }
  0x5b   : > { %v531_v3 = vrot.slane %v530_v63, 4  ;;  %v541_v4 = vrot.slane %v540_v0, 4  ;;  %v569_v63 = vrot.slane %v567_v48, 5 }
  0x5c   : > { %1052 = vrot.lane.b32.xlu1 %v7001_v24, %s6680_s8 }
  0x5e   : > { %1338 = vrot.lane.b32.xlu0 %v5821_v43, %s6684_s14 }
  0x60   : > { %1132 = vrot.lane.b32.xlu1 %v5821_v43, %s6679_s29 }
  0x62   : > { %1130 = vrot.lane.b32.xlu0 %v5820_v61, %s6679_s29  ;;  %v7051_v61 = vcombine.low %v6925_v10, %v6929_v16  ;;  %v502_v16 = vrot.slane %v500_v2, 4  ;;  %v845_v10 = vsel %vm6787_vm4, %v843_v18, %v844_v22  ;;  %v543_v2 = vshll.u32 %v303_v57, 16 }
  0x63   : > { %v5823_v31 = vcombine.low %v842_v27, %v845_v10  ;;  %v7121_v22 = vcombine.low %v7075_v30, %v7079_v13  ;;  %v5775_v13 = vrot.slane %v7075_v30, 9 }
  0x64   : > { %1167 = vrot.lane.b32.xlu1 %v7027_v49, %s6677_s27  ;;  %v506_v37 = vor.u32 %v505_v25, %v502_v16  ;;  %v545_v6 = vrot.slane %v543_v2, 5  ;;  %v7124_v16 = vld [vmem:[%s6742_s26 + $0x78] sm:$0xf]  ;;  %v536_v25 = vsel %vm6816_vm5, %v531_v3, %v535_v55  ;;  %v7166_v55 = vld [vmem:[%s6742_s26 + $0x84] sm:$0xf] }
  0x65   : > { %v548_v26 = vshrl.u32 %v7124_v16, 16  ;;  %v551_v10 = vshll.u32 %v7124_v16, 16  ;;  %v572_v2 = vshrl.u32 %v7166_v55, 16  ;;  %v575_v3 = vshll.u32 %v7166_v55, 16 }
  0x66   : > { %1165 = vrot.lane.b32.xlu0 %v6982_v1, %s6677_s27  ;;  %v507_v33 = vrot.slane %v506_v37, 4 }
  0x67   : > { %v553_v7 = vrot.slane %v551_v10, 5 }
  0x68   : > { %1202 = vrot.lane.b32.xlu1 %v7036_v58, %s6681_s11  ;;  %v512_v45 = vsel %vm6816_vm5, %v507_v33, %v511_v14  ;;  %v546_v14 = vsel %vm6816_vm5, %v541_v4, %v545_v6  ;;  %v857_v33 = vrot.slane %v855_v8, 4  ;;  %v581_v4 = vshll.u32 %v7169_v56, 16 }
  0x69   : > { %v7099_v19 = vcombine.low %v512_v45, %v522_v50  ;;  %v7138_v27 = vcombine.low %v536_v25, %v546_v14  ;;  %v585_v6 = vshrl.u32 %v7169_v56, 16 }
  0x6a   : > { %1200 = vrot.lane.b32.xlu0 %v7001_v24, %s6681_s11  ;;  %v859_v30 = vsel %vm6787_vm4, %v857_v33, %v858_v34  ;;  %v574_v33 = vrot.slane %v572_v2, 4  ;;  %v577_v34 = vrot.slane %v575_v3, 5 }
  0x6b   : > { %11145 = vst [vmem:[#allocation9_spill] sm:$0xff] %v7099_v19  ;;  %11146 = vst [vmem:[#allocation10_spill] sm:$0xff] %v7138_v27 }
  0x6c   : > { %1237 = vrot.lane.b32.xlu1 %v5822_v60, %s6678_s28 }
  0x6e   : > { %1235 = vrot.lane.b32.xlu0 %v5821_v43, %s6678_s28  ;;  %v5774_v43 = vrot.slane %v298_v62, 9  ;;  %v852_v62 = vsel %vm6787_vm4, %v850_v46, %v851_v47 }
  0x70   : > { %1272 = vrot.lane.b32.xlu1 %v7051_v61, %s6682_s12  ;;  %v849_v59 = vsel %vm6787_vm4, %v5774_v43, %v848_v36  ;;  %v550_v36 = vrot.slane %v548_v26, 4  ;;  %v856_v43 = vsel %vm6787_vm4, %v5775_v13, %v855_v8  ;;  %v5776_v8 = vrot.slane %v7124_v16, 9 }
  0x71   : > { %v7163_v52 = vcombine.low %v856_v43, %v859_v30  ;;  %v865_v26 = vrot.slane %v306_v40, 5  ;;  %v578_v43 = vor.u32 %v577_v34, %v574_v33 }
  0x72   : > { %1270 = vrot.lane.b32.xlu0 %v7027_v49, %s6682_s12  ;;  %v554_v46 = vor.u32 %v553_v7, %v550_v36  ;;  %v587_v36 = vrot.slane %v585_v6, 4 }
  0x74   : > { %1307 = vrot.lane.b32.xlu1 %v6988_v12, %s6683_s13 }
  0x76   : > { %1305 = vrot.lane.b32.xlu0 %v7036_v58, %s6683_s13 }
  0x78   : > { %1054 = vrot.lane.b32.xlu1 %v7036_v58, %s6680_s8 }
  0x7a   : > { %1340 = vrot.lane.b32.xlu0 %v5822_v60, %s6684_s14 }
  0x7c   : > { %1056 = vrot.lane.b32.xlu1 %v6988_v12, %s6680_s8 }
  0x7e   : > { %1342 = vrot.lane.b32.xlu0 %v5823_v31, %s6684_s14 }
  0x80   : > { %1136 = vrot.lane.b32.xlu1 %v5823_v31, %s6679_s29 }
  0x82   : > { %1134 = vrot.lane.b32.xlu0 %v5822_v60, %s6679_s29  ;;  %v7109_v60 = vcombine.low %v849_v59, %v852_v62  ;;  %v555_v59 = vrot.slane %v554_v46, 4 }
  0x84   : > { %1171 = vrot.lane.b32.xlu1 %v7088_v42, %s6677_s27 }
  0x86   : > { %1169 = vrot.lane.b32.xlu0 %v7051_v61, %s6677_s27 }
  0x88   : > { %1206 = vrot.lane.b32.xlu1 %v7099_v19, %s6681_s11  ;;  %v7115_v15 = vpop.permute.xlu1 %1159 }
  0x89   : > { %v7117_v18 = vpop.permute.xlu0 %1157 }
  0x8a   : > { %1204 = vrot.lane.b32.xlu0 %v6988_v12, %s6681_s11  ;;  %v7131_v12 = vld [vmem:[%s6742_s26 + $0x7c] sm:$0xf] }
  0x8b   : > { %v557_v37 = vshll.u32 %v7131_v12, 16  ;;  %v561_v29 = vshrl.u32 %v7131_v12, 16  ;;  %v862_v0 = vrot.slane %v7131_v12, 5  ;;  %v7182_v14 = vcombine.low %v7124_v16, %v7131_v12 }
  0x8c   : > { %1241 = vrot.lane.b32.xlu1 %v7109_v60, %s6678_s28  ;;  %v583_v16 = vrot.slane %v581_v4, 5 }
  0x8d   : > { %v559_v38 = vrot.slane %v557_v37, 5  ;;  %v563_v39 = vrot.slane %v561_v29, 4  ;;  %v864_v13 = vrot.slane %v862_v0, 4  ;;  %v863_v40 = vsel %vm6787_vm4, %v5776_v8, %v862_v0 }
  0x8e   : > { %1239 = vrot.lane.b32.xlu0 %v5823_v31, %s6678_s28  ;;  %v588_v30 = vor.u32 %v587_v36, %v583_v16 }
  0x8f   : > { %v564_v47 = vor.u32 %v563_v39, %v559_v38  ;;  %v560_v29 = vsel %vm6816_vm5, %v555_v59, %v559_v38  ;;  %v579_v59 = vrot.slane %v578_v43, 4 }
  0x90   : > { %1276 = vrot.lane.b32.xlu1 %v7121_v22, %s6682_s12 }
  0x91   : > { %v7145_v9 = vpop.permute.xlu0 %1227  ;;  %v565_v62 = vrot.slane %v564_v47, 4  ;;  %v584_v8 = vsel %vm6816_vm5, %v579_v59, %v583_v16 }
  0x92   : > { %1274 = vrot.lane.b32.xlu0 %v7088_v42, %s6682_s12  ;;  %v1123_v31 = vpop.permute.xlu1 %1122 }
  0x93   : > { %v570_v12 = vsel %vm6816_vm5, %v565_v62, %v569_v63 }
  0x94   : > { %1311 = vrot.lane.b32.xlu1 %v7138_v27, %s6683_s13  ;;  %v7205_v39 = vcombine.low %v560_v29, %v570_v12  ;;  %v7255_v29 = vld [vmem:[%s6742_s26 + $0x94] sm:$0xf] }
  0x96   : > { %1309 = vrot.lane.b32.xlu0 %v7099_v19, %s6683_s13  ;;  %v1125_v41 = vpop.permute.xlu1 %1124  ;;  %11147 = vst [vmem:[#allocation11_spill] sm:$0xff] %v7205_v39 }
  0x98   : > { %v1043_v45 = vpop.permute.xlu0 %1042  ;;  %1058 = vrot.lane.b32.xlu1 %v7099_v19, %s6680_s8 }
  0x99   : > { %v1367_v10 = vsel %vm1364_vm6, %v5784_v20, %v1043_v45  ;;  %v7200_v20 = vld [vmem:[%s6742_s26 + $0x8c] sm:$0x1] }
  0x9a   : > { %1344 = vrot.lane.b32.xlu0 %v7109_v60, %s6684_s14  ;;  %v7161_v50 = vpop.permute.xlu1 %1229  ;;  %v1415_v7 = vsel %vm1413_vm8, %v1367_v10, %v1123_v31  ;;  %v591_v31 = vshll.u32 %v7200_v20, 16 }
  0x9b   : > { %v1448_v45 = vsel %vm1446_vm9, %v1415_v7, %v7117_v18  ;;  %v589_v18 = vrot.slane %v588_v30, 4  ;;  %v5777_v7 = vrot.slane %v7166_v55, 9 }
  0x9c   : > { %v1045_v57 = vpop.permute.xlu0 %1044  ;;  %1060 = vrot.lane.b32.xlu1 %v7138_v27, %s6680_s8  ;;  %v593_v62 = vrot.slane %v591_v31, 5 }
  0x9d   : > { %v1370_v17 = vsel %vm1364_vm6, %v6765_v11, %v1045_v57  ;;  %v866_v11 = vsel %vm6787_vm4, %v864_v13, %v865_v26  ;;  %v7245_v26 = vld [vmem:[%s6742_s26 + $0x90] sm:$0xf]  ;;  %v869_v13 = vrot.slane %v7169_v56, 5 }
  0x9e   : > { %1346 = vrot.lane.b32.xlu0 %v7163_v52, %s6684_s14  ;;  %v1195_v25 = vpop.permute.xlu1 %1194  ;;  %v599_v16 = vshll.u32 %v7245_v26, 16 }
  0xa0   : > { %v1193_v37 = vpop.permute.xlu0 %1192  ;;  %1140 = vrot.lane.b32.xlu1 %v7163_v52, %s6679_s29  ;;  %v601_v43 = vrot.slane %v599_v16, 5 }
  0xa1   : > { %v1481_v47 = vsel %vm1479_vm10, %v1448_v45, %v1193_v37  ;;  %v312_v45 = vld [vmem:[%s6742_s26 + $0x98] sm:$0x1] }
  0xa2   : > { %1138 = vrot.lane.b32.xlu0 %v7109_v60, %s6679_s29  ;;  %v1265_v23 = vpop.permute.xlu1 %1264  ;;  %v1417_v60 = vsel %vm1413_vm8, %v1370_v17, %v1125_v41  ;;  %v7222_v41 = vcombine.low %v863_v40, %v866_v11  ;;  %v1514_v63 = vsel %vm1512_vm11, %v1481_v47, %v7145_v9  ;;  %v7237_v9 = vcombine.low %v7166_v55, %v7169_v56 }
  0xa3   : > { %v1450_v48 = vsel %vm1446_vm9, %v1417_v60, %v7115_v15  ;;  %v605_v17 = vshll.u32 %v7255_v29, 16  ;;  %v872_v40 = vrot.slane %v7200_v20, 5  ;;  %v870_v55 = vsel %vm6787_vm4, %v5777_v7, %v869_v13 }
  0xa4   : > { %v1263_v38 = vpop.permute.xlu0 %1262  ;;  %1175 = vrot.lane.b32.xlu1 %v7182_v14, %s6677_s27  ;;  %v1483_v15 = vsel %vm1479_vm10, %v1450_v48, %v1195_v25  ;;  %v594_v25 = vsel %vm6816_vm5, %v589_v18, %v593_v62  ;;  %v7290_v18 = vld [vmem:[%s6742_s26 + $0x9c] sm:$0xf] }
  0xa5   : > { %v1547_v2 = vsel %vm1545_vm12, %v1514_v63, %v1263_v38  ;;  %v1516_v10 = vsel %vm1512_vm11, %v1483_v15, %v7161_v50  ;;  %v7262_v50 = vcombine.low %v584_v8, %v594_v25  ;;  %v871_v38 = vrot.slane %v869_v13, 4  ;;  %v7297_v15 = vld [vmem:[%s6742_s26 + $0xa0] sm:$0xf] }
  0xa6   : > { %1173 = vrot.lane.b32.xlu0 %v7121_v22, %s6677_s27  ;;  %v1300_v46 = vpop.permute.xlu1 %1299  ;;  %v1549_v12 = vsel %vm1545_vm12, %v1516_v10, %v1265_v23  ;;  %v609_v23 = vshrl.u32 %v7255_v29, 16  ;;  %v607_v30 = vrot.slane %v605_v17, 5  ;;  %v620_v8 = vshrl.u32 %v7290_v18, 16 }
  0xa7   : > { %v1582_v33 = vsel %vm1578_vm13, %v1549_v12, %v1300_v46  ;;  %11148 = vst [vmem:[#allocation12_spill] sm:$0xff] %v7262_v50  ;;  %v873_v20 = vsel %vm6787_vm4, %v871_v38, %v872_v40  ;;  %v623_v10 = vshll.u32 %v7290_v18, 16  ;;  %v629_v12 = vshll.u32 %v7297_v15, 16 }
  0xa8   : > { %v1298_v57 = vpop.permute.xlu0 %1297  ;;  %1210 = vrot.lane.b32.xlu1 %v7205_v39, %s6681_s11  ;;  %v611_v31 = vrot.slane %v609_v23, 4  ;;  %v7294_v63 = vcombine.low %v870_v55, %v873_v20  ;;  %v633_v13 = vshrl.u32 %v7297_v15, 16  ;;  %v879_v23 = vrot.slane %v312_v45, 5 }
  0xa9   : > { %v1580_v3 = vsel %vm1578_vm13, %v1547_v2, %v1298_v57  ;;  %v615_v57 = vshll.u32 %v312_v45, 16  ;;  %v622_v7 = vrot.slane %v620_v8, 4  ;;  %v625_v40 = vrot.slane %v623_v10, 5 }
  0xaa   : > { %1208 = vrot.lane.b32.xlu0 %v7138_v27, %s6681_s11  ;;  %v7228_v0 = vpop.permute.xlu1 %1046  ;;  %v612_v59 = vor.u32 %v611_v31, %v607_v30 }
  0xab   : > { %v626_v20 = vor.u32 %v625_v40, %v622_v7 }
  0xac   : > { %v1333_v4 = vpop.permute.xlu0 %1332  ;;  %1245 = vrot.lane.b32.xlu1 %v7222_v41, %s6678_s28  ;;  %v613_v25 = vrot.slane %v612_v59, 4 }
  0xad   : > { %v1613_v6 = vsel %vm1611_vm14, %v1580_v3, %v1333_v4  ;;  %v617_v4 = vrot.slane %v615_v57, 5  ;;  %v627_v10 = vrot.slane %v626_v20, 4 }
  0xae   : > { %1243 = vrot.lane.b32.xlu0 %v7163_v52, %s6678_s28  ;;  %6166 = vmatprep.mubr.msk.bf16.mxu0 %vm1668_vm15, %v1613_v6  ;;  %v7252_v37 = vpop.permute.xlu1 %1048  ;;  %v596_v52 = vshrl.u32 %v7245_v26, 16  ;;  %v876_v6 = vrot.slane %v7255_v29, 5 }
  0xaf   : > { %v618_v38 = vsel %vm6816_vm5, %v613_v25, %v617_v4 }
  0xb0   : > { %v1335_v34 = vpop.permute.xlu0 %1334  ;;  %1280 = vrot.lane.b32.xlu1 %v7237_v9, %s6682_s12  ;;  %v598_v60 = vrot.slane %v596_v52, 4  ;;  %v5778_v52 = vrot.slane %v7245_v26, 9  ;;  %v878_v17 = vrot.slane %v876_v6, 4 }
  0xb1   : > { %v1615_v36 = vsel %vm1611_vm14, %v1582_v33, %v1335_v34  ;;  %v7310_v34 = vcombine.low %v7245_v26, %v7255_v29  ;;  %v7322_v29 = vld [vmem:[%s6742_s26 + $0xa4] sm:$0x1] }
  0xb2   : > { %1278 = vrot.lane.b32.xlu0 %v7182_v14, %s6682_s12  ;;  %6167 = vmatmul.mubr.msk.bf16.vlgmr.msra.gmra.mrb[0].mxu0 %vm1668_vm15, %v1615_v36  ;;  %v7272_v56 = vpop.permute.xlu1 %1128  ;;  %v602_v48 = vor.u32 %v601_v43, %v598_v60  ;;  %v631_v60 = vrot.slane %v629_v12, 5  ;;  %v635_v43 = vrot.slane %v633_v13, 4  ;;  %v877_v45 = vsel %vm6787_vm4, %v5778_v52, %v876_v6 }
  0xb3   : > { %v880_v55 = vsel %vm6787_vm4, %v878_v17, %v879_v23  ;;  %v639_v57 = vshll.u32 %v7322_v29, 16  ;;  %v7372_v23 = vld [vmem:[%s6742_s26 + $0xa8] sm:$0xf] }
  0xb4   : > { %v1127_v11 = vpop.permute.xlu0 %1126  ;;  %1315 = vrot.lane.b32.xlu1 %v7262_v50, %s6683_s13  ;;  %v603_v3 = vrot.slane %v602_v48, 4  ;;  %v636_v48 = vor.u32 %v635_v43, %v631_v60  ;;  %v7342_v8 = vcombine.low %v877_v45, %v880_v55  ;;  %v647_v45 = vshll.u32 %v7372_v23, 16 }
  0xb5   : > { %v641_v13 = vrot.slane %v639_v57, 5 }
  0xb6   : > { %1313 = vrot.lane.b32.xlu0 %v7205_v39, %s6683_s13  ;;  %v7281_v46 = vpop.permute.xlu1 %1163  ;;  %v608_v36 = vsel %vm6816_vm5, %v603_v3, %v607_v30  ;;  %v637_v12 = vrot.slane %v636_v48, 4  ;;  %v5779_v48 = vrot.slane %v7290_v18, 9 }
  0xb7   : > { %v7326_v30 = vcombine.low %v608_v36, %v618_v38 }
  0xb8   : > { %v1162_v47 = vpop.permute.xlu0 %1161  ;;  %1062 = vrot.lane.b32.xlu1 %v7205_v39, %s6680_s8 }
  0xb9   : > { %11149 = vst [vmem:[#allocation13_spill] sm:$0xff] %v7326_v30 }
  0xba   : > { %1348 = vrot.lane.b32.xlu0 %v7222_v41, %s6684_s14  ;;  %v1199_v62 = vpop.permute.xlu1 %1198 }
  0xbc   : > { %v1197_v2 = vpop.permute.xlu0 %1196  ;;  %1064 = vrot.lane.b32.xlu1 %v7262_v50, %s6680_s8 }
  0xbe   : > { %1350 = vrot.lane.b32.xlu0 %v7294_v63, %s6684_s14  ;;  %v1234_v33 = vpop.permute.xlu1 %1233 }
  0xc0   : > { %v1232_v16 = vpop.permute.xlu0 %1231  ;;  %1144 = vrot.lane.b32.xlu1 %v7294_v63, %s6679_s29 }
  0xc2   : > { %1142 = vrot.lane.b32.xlu0 %v7222_v41, %s6679_s29  ;;  %v1269_v26 = vpop.permute.xlu1 %1268  ;;  %v1373_v41 = vsel %vm1364_vm6, %v6755_v5, %v7228_v0  ;;  %v1376_v5 = vsel %vm1364_vm6, %v6877_v44, %v7252_v37  ;;  %v7363_v44 = vcombine.low %v7290_v18, %v7297_v15 }
  0xc3   : > { %v1419_v3 = vsel %vm1413_vm8, %v1373_v41, %v1127_v11  ;;  %v886_v41 = vrot.slane %v7322_v29, 5 }
  0xc4   : > { %v1267_v31 = vpop.permute.xlu0 %1266  ;;  %1179 = vrot.lane.b32.xlu1 %v7310_v34, %s6677_s27  ;;  %v1452_v4 = vsel %vm1446_vm9, %v1419_v3, %v1162_v47  ;;  %v1421_v47 = vsel %vm1413_vm8, %v1376_v5, %v7272_v56 }
  0xc5   : > { %v1485_v25 = vsel %vm1479_vm10, %v1452_v4, %v1197_v2  ;;  %v1454_v52 = vsel %vm1446_vm9, %v1421_v47, %v7281_v46  ;;  %v642_v46 = vsel %vm6816_vm5, %v637_v12, %v641_v13  ;;  %v649_v4 = vrot.slane %v647_v45, 5 }
  0xc6   : > { %1177 = vrot.lane.b32.xlu0 %v7237_v9, %s6677_s27  ;;  %v1304_v59 = vpop.permute.xlu1 %1303  ;;  %v1518_v0 = vsel %vm1512_vm11, %v1485_v25, %v1232_v16  ;;  %v1487_v37 = vsel %vm1479_vm10, %v1454_v52, %v1199_v62  ;;  %v632_v16 = vsel %vm6816_vm5, %v627_v10, %v631_v60  ;;  %v7381_v62 = vld [vmem:[%s6742_s26 + $0xac] sm:$0xf]  ;;  %v883_v60 = vrot.slane %v7297_v15, 5 }
  0xc7   : > { %v1551_v2 = vsel %vm1545_vm12, %v1518_v0, %v1267_v31  ;;  %v1520_v7 = vsel %vm1512_vm11, %v1487_v37, %v1234_v33  ;;  %v7388_v33 = vcombine.low %v632_v16, %v642_v46  ;;  %v657_v20 = vshrl.u32 %v7381_v62, 16 }
  0xc8   : > { %v1302_v6 = vpop.permute.xlu0 %1301  ;;  %1214 = vrot.lane.b32.xlu1 %v7326_v30, %s6681_s11  ;;  %v1553_v40 = vsel %vm1545_vm12, %v1520_v7, %v1269_v26  ;;  %v653_v26 = vshll.u32 %v7381_v62, 16  ;;  %v885_v57 = vrot.slane %v883_v60, 4  ;;  %v884_v18 = vsel %vm6787_vm4, %v5779_v48, %v883_v60 }
  0xc9   : > { %v1584_v36 = vsel %vm1578_vm13, %v1551_v2, %v1302_v6  ;;  %v1586_v43 = vsel %vm1578_vm13, %v1553_v40, %v1304_v59  ;;  %11150 = vst [vmem:[#allocation14_spill] sm:$0xff] %v7388_v33  ;;  %v318_v6 = vld [vmem:[%s6742_s26 + $0xb0] sm:$0x1]  ;;  %v659_v10 = vrot.slane %v657_v20, 4  ;;  %v7416_v2 = vld [vmem:[%s6742_s26 + $0xb4] sm:$0xf]  ;;  %v7436_v45 = vcombine.low %v7372_v23, %v7381_v62 }
  0xca   : > { %1212 = vrot.lane.b32.xlu0 %v7262_v50, %s6681_s11  ;;  %v7351_v11 = vpop.permute.xlu1 %1050  ;;  %v655_v25 = vrot.slane %v653_v26, 5  ;;  %v887_v29 = vsel %vm6787_vm4, %v885_v57, %v886_v41  ;;  %v663_v0 = vshll.u32 %v318_v6, 16  ;;  %v890_v46 = vrot.slane %v7381_v62, 5  ;;  %v7448_v62 = vld [vmem:[%s6742_s26 + $0xbc] sm:$0x1] }
  0xcb   : > { %v668_v7 = vshrl.u32 %v7416_v2, 16  ;;  %v671_v60 = vshll.u32 %v7416_v2, 16  ;;  %v893_v57 = vrot.slane %v318_v6, 5 }
  0xcc   : > { %v1337_v17 = vpop.permute.xlu0 %1336  ;;  %1249 = vrot.lane.b32.xlu1 %v7342_v8, %s6678_s28  ;;  %v660_v47 = vor.u32 %v659_v10, %v655_v25  ;;  %v665_v16 = vrot.slane %v663_v0, 5  ;;  %v892_v48 = vrot.slane %v890_v46, 4 }
  0xcd   : > { %v1617_v56 = vsel %vm1611_vm14, %v1584_v36, %v1337_v17  ;;  %v7420_v36 = vcombine.low %v884_v18, %v887_v29  ;;  %v7423_v17 = vld [vmem:[%s6742_s26 + $0xb8] sm:$0xf]  ;;  %v670_v41 = vrot.slane %v668_v7, 4 }
  0xce   : > { %1247 = vrot.lane.b32.xlu0 %v7294_v63, %s6678_s28  ;;  %6170 = vmatprep.mubr.msk.bf16.mxu0 %vm1668_vm15, %v1617_v56  ;;  %v7378_v38 = vpop.permute.xlu1 %1052  ;;  %v644_v63 = vshrl.u32 %v7372_v23, 16  ;;  %v661_v40 = vrot.slane %v660_v47, 4 }
  0xd0   : > { %v1339_v31 = vpop.permute.xlu0 %1338  ;;  %1284 = vrot.lane.b32.xlu1 %v7363_v44, %s6682_s12  ;;  %v646_v3 = vrot.slane %v644_v63, 4 }
  0xd1   : > { %v1619_v55 = vsel %vm1611_vm14, %v1586_v43, %v1339_v31  ;;  %v681_v43 = vshrl.u32 %v7423_v17, 16  ;;  %v677_v31 = vshll.u32 %v7423_v17, 16 }
  0xd2   : > { %1282 = vrot.lane.b32.xlu0 %v7310_v34, %s6682_s12  ;;  %6171 = vmatmul.mubr.msk.bf16.gmra.mrb[4].mxu0 %vm1668_vm15, %v1619_v55  ;;  %v7398_v15 = vpop.permute.xlu1 %1132  ;;  %v650_v5 = vor.u32 %v649_v4, %v646_v3  ;;  %v5780_v55 = vrot.slane %v7372_v23, 9  ;;  %v666_v3 = vsel %vm6816_vm5, %v661_v40, %v665_v16  ;;  %v673_v4 = vrot.slane %v671_v60, 5 }
  0xd3   : > { %v679_v10 = vrot.slane %v677_v31, 5  ;;  %v683_v18 = vrot.slane %v681_v43, 4 }
  0xd4   : > { %v1131_v59 = vpop.permute.xlu0 %1130  ;;  %1319 = vrot.lane.b32.xlu1 %v7388_v33, %s6683_s13  ;;  %v651_v56 = vrot.slane %v650_v5, 4  ;;  %v891_v6 = vsel %vm6787_vm4, %v5780_v55, %v890_v46  ;;  %v894_v5 = vsel %vm6787_vm4, %v892_v48, %v893_v57  ;;  %v674_v0 = vor.u32 %v673_v4, %v670_v41 }
  0xd5   : > { %v684_v47 = vor.u32 %v683_v18, %v679_v10  ;;  %v7468_v60 = vcombine.low %v891_v6, %v894_v5 }
  0xd6   : > { %1317 = vrot.lane.b32.xlu0 %v7326_v30, %s6683_s13  ;;  %v7407_v12 = vpop.permute.xlu1 %1167  ;;  %v656_v26 = vsel %vm6816_vm5, %v651_v56, %v655_v25  ;;  %v687_v56 = vshll.u32 %v7448_v62, 16  ;;  %v675_v31 = vrot.slane %v674_v0, 4 }
  0xd7   : > { %v7452_v25 = vcombine.low %v656_v26, %v666_v3  ;;  %v685_v55 = vrot.slane %v684_v47, 4  ;;  %v7498_v3 = vld [vmem:[%s6742_s26 + $0xc0] sm:$0xf] }
  0xd8   : > { %v1166_v13 = vpop.permute.xlu0 %1165  ;;  %1066 = vrot.lane.b32.xlu1 %v7326_v30, %s6680_s8  ;;  %v689_v26 = vrot.slane %v687_v56, 5  ;;  %v695_v0 = vshll.u32 %v7498_v3, 16 }
  0xd9   : > { %11151 = vst [vmem:[#allocation15_spill] sm:$0xff] %v7452_v25 }
  0xda   : > { %1352 = vrot.lane.b32.xlu0 %v7342_v8, %s6684_s14  ;;  %v1203_v52 = vpop.permute.xlu1 %1202 }
  0xdc   : > { %v1201_v37 = vpop.permute.xlu0 %1200  ;;  %1068 = vrot.lane.b32.xlu1 %v7388_v33, %s6680_s8 }
  0xde   : > { %1354 = vrot.lane.b32.xlu0 %v7420_v36, %s6684_s14  ;;  %v1238_v63 = vpop.permute.xlu1 %1237 }
  0xe0   : > { %v1236_v20 = vpop.permute.xlu0 %1235  ;;  %1148 = vrot.lane.b32.xlu1 %v7420_v36, %s6679_s29 }
  0xe2   : > { %1146 = vrot.lane.b32.xlu0 %v7342_v8, %s6679_s29  ;;  %v1273_v23 = vpop.permute.xlu1 %1272  ;;  %v1379_v8 = vsel %vm1364_vm6, %v6943_v28, %v7351_v11  ;;  %v1382_v28 = vsel %vm1364_vm6, %v6982_v1, %v7378_v38  ;;  %v7489_v1 = vcombine.low %v7416_v2, %v7423_v17 }
  0xe3   : > { %v1423_v7 = vsel %vm1413_vm8, %v1379_v8, %v1131_v59  ;;  %v5781_v8 = vrot.slane %v7416_v2, 9 }
  0xe4   : > { %v1271_v29 = vpop.permute.xlu0 %1270  ;;  %1183 = vrot.lane.b32.xlu1 %v7436_v45, %s6677_s27  ;;  %v1456_v40 = vsel %vm1446_vm9, %v1423_v7, %v1166_v13  ;;  %v1425_v13 = vsel %vm1413_vm8, %v1382_v28, %v7398_v15  ;;  %v900_v7 = vrot.slane %v7448_v62, 5  ;;  %v324_v28 = vld [vmem:[%s6742_s26 + $0xc8] sm:$0x1] }
  0xe5   : > { %v1489_v43 = vsel %vm1479_vm10, %v1456_v40, %v1201_v37  ;;  %v1458_v48 = vsel %vm1446_vm9, %v1425_v13, %v7407_v12  ;;  %v690_v12 = vsel %vm6816_vm5, %v685_v55, %v689_v26 }
  0xe6   : > { %1181 = vrot.lane.b32.xlu0 %v7363_v44, %s6677_s27  ;;  %v1308_v16 = vpop.permute.xlu1 %1307  ;;  %v1522_v11 = vsel %vm1512_vm11, %v1489_v43, %v1236_v20  ;;  %v1491_v38 = vsel %vm1479_vm10, %v1458_v48, %v1203_v52  ;;  %v680_v20 = vsel %vm6816_vm5, %v675_v31, %v679_v10  ;;  %v7507_v52 = vld [vmem:[%s6742_s26 + $0xc4] sm:$0xf]  ;;  %v897_v10 = vrot.slane %v7423_v17, 5 }
  0xe7   : > { %v1555_v37 = vsel %vm1545_vm12, %v1522_v11, %v1271_v29  ;;  %v1524_v4 = vsel %vm1512_vm11, %v1491_v38, %v1238_v63  ;;  %v7514_v63 = vcombine.low %v680_v20, %v690_v12  ;;  %v705_v56 = vshrl.u32 %v7507_v52, 16 }
  0xe8   : > { %v1306_v46 = vpop.permute.xlu0 %1305  ;;  %1218 = vrot.lane.b32.xlu1 %v7452_v25, %s6681_s11  ;;  %v1557_v29 = vsel %vm1545_vm12, %v1524_v4, %v1273_v23  ;;  %v701_v23 = vshll.u32 %v7507_v52, 16  ;;  %v697_v43 = vrot.slane %v695_v0, 5  ;;  %v898_v2 = vsel %vm6787_vm4, %v5781_v8, %v897_v10 }
  0xe9   : > { %v1588_v57 = vsel %vm1578_vm13, %v1555_v37, %v1306_v46  ;;  %v1590_v6 = vsel %vm1578_vm13, %v1557_v29, %v1308_v16  ;;  %11152 = vst [vmem:[#allocation16_spill] sm:$0xff] %v7514_v63  ;;  %v899_v16 = vrot.slane %v897_v10, 4  ;;  %v707_v55 = vrot.slane %v705_v56, 4  ;;  %v7542_v37 = vld [vmem:[%s6742_s26 + $0xcc] sm:$0xf] }
  0xea   : > { %1216 = vrot.lane.b32.xlu0 %v7388_v33, %s6681_s11  ;;  %v7477_v59 = vpop.permute.xlu1 %1054  ;;  %v703_v31 = vrot.slane %v701_v23, 5  ;;  %v913_v20 = vshrl.u32 %v7542_v37, 16  ;;  %v916_v12 = vshll.u32 %v7542_v37, 16  ;;  %v907_v0 = vrot.slane %v7507_v52, 5 }
  0xeb   : > { %v901_v62 = vsel %vm6787_vm4, %v899_v16, %v900_v7  ;;  %v7566_v16 = vcombine.low %v7498_v3, %v7507_v52 }
  0xec   : > { %v1341_v41 = vpop.permute.xlu0 %1340  ;;  %1253 = vrot.lane.b32.xlu1 %v7468_v60, %s6678_s28  ;;  %v708_v48 = vor.u32 %v707_v55, %v703_v31  ;;  %v915_v56 = vrot.slane %v913_v20, 4  ;;  %v918_v23 = vrot.slane %v916_v12, 5 }
  0xed   : > { %v1621_v15 = vsel %vm1611_vm14, %v1588_v57, %v1341_v41  ;;  %v711_v57 = vshll.u32 %v324_v28, 16  ;;  %v7545_v41 = vld [vmem:[%s6742_s26 + $0xd0] sm:$0xf] }
  0xee   : > { %1251 = vrot.lane.b32.xlu0 %v7420_v36, %s6678_s28  ;;  %6174 = vmatprep.mubr.msk.bf16.mxu0 %vm1668_vm15, %v1621_v15  ;;  %v7504_v18 = vpop.permute.xlu1 %1056  ;;  %v692_v36 = vshrl.u32 %v7498_v3, 16  ;;  %v7551_v15 = vcombine.low %v898_v2, %v901_v62  ;;  %v926_v10 = vshrl.u32 %v7545_v41, 16  ;;  %v5782_v2 = vrot.slane %v7498_v3, 9 }
  0xef   : > { %v909_v62 = vrot.slane %v907_v0, 4  ;;  %v919_v20 = vor.u32 %v918_v23, %v915_v56 }
  0xf0   : > { %v1343_v5 = vpop.permute.xlu0 %1342  ;;  %1288 = vrot.lane.b32.xlu1 %v7489_v1, %s6682_s12  ;;  %v694_v46 = vrot.slane %v692_v36, 4  ;;  %v713_v36 = vrot.slane %v711_v57, 5 }
  0xf1   : > { %v1623_v47 = vsel %vm1611_vm14, %v1590_v6, %v1343_v5  ;;  %v922_v6 = vshll.u32 %v7545_v41, 16  ;;  %v709_v5 = vrot.slane %v708_v48, 4  ;;  %v327_v48 = vld [vmem:[%s6742_s26 + $0xd4] sm:$0x1] }
  0xf2   : > { %1286 = vrot.lane.b32.xlu0 %v7436_v45, %s6682_s12  ;;  %6175 = vmatmul.mubr.msk.bf16.gmra.mrb[8].mxu0 %vm1668_vm15, %v1623_v47  ;;  %v7524_v17 = vpop.permute.xlu1 %1136  ;;  %v698_v13 = vor.u32 %v697_v43, %v694_v46  ;;  %v928_v43 = vrot.slane %v926_v10, 4  ;;  %v908_v10 = vsel %vm6787_vm4, %v5782_v2, %v907_v0 }
  0xf3   : > { %v924_v46 = vrot.slane %v922_v6, 5  ;;  %v714_v55 = vsel %vm6816_vm5, %v709_v5, %v713_v36  ;;  %v920_v5 = vrot.slane %v919_v20, 4 }
  0xf4   : > { %v1135_v40 = vpop.permute.xlu0 %1134  ;;  %1323 = vrot.lane.b32.xlu1 %v7514_v63, %s6683_s13  ;;  %v699_v29 = vrot.slane %v698_v13, 4  ;;  %v910_v13 = vrot.slane %v324_v28, 5 }
  0xf5   : > { %v929_v12 = vor.u32 %v928_v43, %v924_v46 }
  0xf6   : > { %1321 = vrot.lane.b32.xlu0 %v7452_v25, %s6683_s13  ;;  %v7532_v26 = vpop.permute.xlu1 %1171  ;;  %v704_v7 = vsel %vm6816_vm5, %v699_v29, %v703_v31  ;;  %v932_v29 = vshll.u32 %v327_v48, 16  ;;  %v911_v3 = vsel %vm6787_vm4, %v909_v62, %v910_v13  ;;  %v925_v62 = vsel %vm6816_vm5, %v920_v5, %v924_v46 }
  0xf7   : > { %v7578_v31 = vcombine.low %v704_v7, %v714_v55  ;;  %v5834_v0 = vcombine.low %v908_v10, %v911_v3  ;;  %v930_v23 = vrot.slane %v929_v12, 4  ;;  %v944_v46 = vrot.slane %v327_v48, 5 }
  0xf8   : > { %v1170_v11 = vpop.permute.xlu0 %1169  ;;  %1070 = vrot.lane.b32.xlu1 %v7452_v25, %s6680_s8  ;;  %v934_v7 = vrot.slane %v932_v29, 5 }
  0xf9   : > { %11153 = vst [vmem:[#allocation17_spill] sm:$0xff] %v7578_v31 }
  0xfa   : > { %1356 = vrot.lane.b32.xlu0 %v7468_v60, %s6684_s14  ;;  %v7549_v38 = vpop.permute.xlu1 %1206  ;;  %v935_v13 = vsel %vm6816_vm5, %v930_v23, %v934_v7 }
  0xfc   : > { %v1205_v4 = vpop.permute.xlu0 %1204  ;;  %1072 = vrot.lane.b32.xlu1 %v7514_v63, %s6680_s8 }
  0xfe   : > { %1358 = vrot.lane.b32.xlu0 %v7551_v15, %s6684_s14  ;;  %v1242_v47 = vpop.permute.xlu1 %1241 }
 0x100   : > { %v1240_v8 = vpop.permute.xlu0 %1239  ;;  %1152 = vrot.lane.b32.xlu1 %v7551_v15, %s6679_s29 }
 0x102   : > { %1150 = vrot.lane.b32.xlu0 %v7468_v60, %s6679_s29  ;;  %v1277_v57 = vpop.permute.xlu1 %1276  ;;  %v1385_v60 = vsel %vm1364_vm6, %v7027_v49, %v7477_v59  ;;  %v941_v49 = vrot.slane %v7545_v41, 5  ;;  %v1388_v59 = vsel %vm1364_vm6, %v7051_v61, %v7504_v18 }
 0x103   : > { %v1427_v6 = vsel %vm1413_vm8, %v1385_v60, %v1135_v40  ;;  %v1429_v55 = vsel %vm1413_vm8, %v1388_v59, %v7524_v17  ;;  %v5783_v17 = vrot.slane %v7542_v37, 9 }
 0x104   : > { %v1275_v52 = vpop.permute.xlu0 %1274  ;;  %1187 = vrot.lane.b32.xlu1 %v7566_v16, %s6677_s27  ;;  %v1460_v36 = vsel %vm1446_vm9, %v1427_v6, %v1170_v11  ;;  %v1462_v61 = vsel %vm1446_vm9, %v1429_v55, %v7532_v26 }
 0x105   : > { %v1493_v43 = vsel %vm1479_vm10, %v1460_v36, %v1205_v4  ;;  %v5835_v4 = vcombine.low %v7542_v37, %v7545_v41  ;;  %v1495_v20 = vsel %vm1479_vm10, %v1462_v61, %v7549_v38  ;;  %v5836_v38 = vcombine.low %v925_v62, %v935_v13 }
 0x106   : > { %1185 = vrot.lane.b32.xlu0 %v7489_v1, %s6677_s27  ;;  %v1312_v28 = vpop.permute.xlu1 %1311  ;;  %v1526_v40 = vsel %vm1512_vm11, %v1493_v43, %v1240_v8  ;;  %v1528_v12 = vsel %vm1512_vm11, %v1495_v20, %v1242_v47  ;;  %v942_v48 = vsel %vm6787_vm4, %v5783_v17, %v941_v49 }
 0x107   : > { %v1559_v2 = vsel %vm1545_vm12, %v1526_v40, %v1275_v52  ;;  %v943_v52 = vrot.slane %v941_v49, 4  ;;  %v1561_v29 = vsel %vm1545_vm12, %v1528_v12, %v1277_v57 }
 0x108   : > { %v1310_v56 = vpop.permute.xlu0 %1309  ;;  %1222 = vrot.lane.b32.xlu1 %v7578_v31, %s6681_s11  ;;  %v1594_v10 = vsel %vm1578_vm13, %v1561_v29, %v1312_v28 }
 0x109   : > { %v1592_v18 = vsel %vm1578_vm13, %v1559_v2, %v1310_v56  ;;  %v945_v47 = vsel %vm6787_vm4, %v943_v52, %v944_v46 }
 0x10a   : > { %1220 = vrot.lane.b32.xlu0 %v7514_v63, %s6681_s11  ;;  %v1059_v11 = vpop.permute.xlu1 %1058  ;;  %v5837_v60 = vcombine.low %v942_v48, %v945_v47 }
 0x10b   : > { %v1391_v43 = vsel %vm1364_vm6, %v7088_v42, %v1059_v11 }
 0x10c   : > { %v1345_v8 = vpop.permute.xlu0 %1344  ;;  %1257 = vrot.lane.b32.xlu1 %v5834_v0, %s6678_s28 }
 0x10d   : > { %v1625_v41 = vsel %vm1611_vm14, %v1592_v18, %v1345_v8 }
 0x10e   : > { %1255 = vrot.lane.b32.xlu0 %v7551_v15, %s6678_s28  ;;  %6178 = vmatprep.mubr.msk.bf16.mxu0 %vm1668_vm15, %v1625_v41  ;;  %v1061_v26 = vpop.permute.xlu1 %1060 }
 0x110   : > { %v1347_v37 = vpop.permute.xlu0 %1346  ;;  %1292 = vrot.lane.b32.xlu1 %v5835_v4, %s6682_s12 }
 0x111   : > { %v1627_v3 = vsel %vm1611_vm14, %v1594_v10, %v1347_v37 }
 0x112   : > { %1290 = vrot.lane.b32.xlu0 %v7566_v16, %s6682_s12  ;;  %6179 = vmatmul.mubr.msk.bf16.gmra.mrb[12].mxu0 %vm1668_vm15, %v1627_v3  ;;  %v1141_v15 = vpop.permute.xlu1 %1140 }
 0x114   : > { %v1139_v57 = vpop.permute.xlu0 %1138  ;;  %1327 = vrot.lane.b32.xlu1 %v5836_v38, %s6683_s13 }
 0x115   : > { %v1431_v59 = vsel %vm1413_vm8, %v1391_v43, %v1139_v57 }
 0x116   : > { %1325 = vrot.lane.b32.xlu0 %v7578_v31, %s6683_s13  ;;  %v1176_v28 = vpop.permute.xlu1 %1175 }
 0x118   : > { %v1174_v6 = vpop.permute.xlu0 %1173  ;;  %1362 = vrot.lane.b32.xlu1 %v5837_v60, %s6684_s14 }
 0x119   : > { %v1464_v40 = vsel %vm1446_vm9, %v1431_v59, %v1174_v6 }
 0x11a   : > { %1360 = vrot.lane.b32.xlu0 %v5834_v0, %s6684_s14  ;;  %v1211_v5 = vpop.permute.xlu1 %1210  ;;  %v1394_v0 = vsel %vm1364_vm6, %v7121_v22, %v1061_v26 }
 0x11b   : > { %v1433_v61 = vsel %vm1413_vm8, %v1394_v0, %v1141_v15 }
 0x11c   : > { %v1209_v36 = vpop.permute.xlu0 %1208  ;;  %v1466_v42 = vsel %vm1446_vm9, %v1433_v61, %v1176_v28 }
 0x11d   : > { %v1497_v2 = vsel %vm1479_vm10, %v1464_v40, %v1209_v36  ;;  %v1499_v13 = vsel %vm1479_vm10, %v1466_v42, %v1211_v5 }
 0x11e   : > { %v1246_v56 = vpop.permute.xlu1 %1245 }
 0x11f   : > { %v1532_v20 = vsel %vm1512_vm11, %v1499_v13, %v1246_v56 }
 0x120   : > { %v1244_v16 = vpop.permute.xlu0 %1243 }
 0x121   : > { %v1530_v4 = vsel %vm1512_vm11, %v1497_v2, %v1244_v16 }
 0x122   : > { %v1281_v23 = vpop.permute.xlu1 %1280 }
 0x123   : > { %v1565_v41 = vsel %vm1545_vm12, %v1532_v20, %v1281_v23 }
 0x124   : > { %v1279_v7 = vpop.permute.xlu0 %1278 }
 0x125   : > { %v1563_v18 = vsel %vm1545_vm12, %v1530_v4, %v1279_v7 }
 0x126   : > { %v1316_v49 = vpop.permute.xlu1 %1315 }
 0x127   : > { %v1598_v52 = vsel %vm1578_vm13, %v1565_v41, %v1316_v49 }
 0x128   : > { %v1314_v55 = vpop.permute.xlu0 %1313 }
 0x129   : > { %v1596_v11 = vsel %vm1578_vm13, %v1563_v18, %v1314_v55 }
 0x12a   : > { %v1063_v62 = vpop.permute.xlu1 %1062 }
 0x12b   : > { %v1397_v60 = vsel %vm1364_vm6, %v7182_v14, %v1063_v62 }
 0x12c   : > { %v1349_v8 = vpop.permute.xlu0 %1348 }
 0x12d   : > { %v1629_v17 = vsel %vm1611_vm14, %v1596_v11, %v1349_v8 }
 0x12e   : > { %6182 = vmatprep.mubr.msk.bf16.mxu0 %vm1668_vm15, %v1629_v17  ;;  %v1065_v22 = vpop.permute.xlu1 %1064 }
 0x12f   : > { %v1400_v16 = vsel %vm1364_vm6, %v7237_v9, %v1065_v22 }
 0x130   : > { %v1351_v46 = vpop.permute.xlu0 %1350 }
 0x131   : > { %v1631_v12 = vsel %vm1611_vm14, %v1598_v52, %v1351_v46 }
 0x132   : > { %6183 = vmatmul.mubr.msk.bf16.gmra.mrb[16].mxu0 %vm1668_vm15, %v1631_v12  ;;  %v1145_v26 = vpop.permute.xlu1 %1144 }
 0x133   : > { %v1437_v43 = vsel %vm1413_vm8, %v1400_v16, %v1145_v26 }
 0x134   : > { %v1143_v29 = vpop.permute.xlu0 %1142 }
 0x135   : > { %v1435_v6 = vsel %vm1413_vm8, %v1397_v60, %v1143_v29 }
 0x136   : > { %v1180_v10 = vpop.permute.xlu1 %1179 }
 0x137   : > { %v1470_v14 = vsel %vm1446_vm9, %v1437_v43, %v1180_v10 }
 0x138   : > { %v1178_v37 = vpop.permute.xlu0 %1177 }
 0x139   : > { %v1468_v5 = vsel %vm1446_vm9, %v1435_v6, %v1178_v37 }
 0x13a   : > { %v1215_v38 = vpop.permute.xlu1 %1214 }
 0x13b   : > { %v1503_v55 = vsel %vm1479_vm10, %v1470_v14, %v1215_v38 }
 0x13c   : > { %v1213_v3 = vpop.permute.xlu0 %1212 }
 0x13d   : > { %v1501_v56 = vsel %vm1479_vm10, %v1468_v5, %v1213_v3 }
 0x13e   : > { %v1250_v48 = vpop.permute.xlu1 %1249 }
 0x13f   : > { %v1536_v0 = vsel %vm1512_vm11, %v1503_v55, %v1250_v48 }
 0x140   : > { %v1248_v47 = vpop.permute.xlu0 %1247 }
 0x141   : > { %v1534_v23 = vsel %vm1512_vm11, %v1501_v56, %v1248_v47 }
 0x142   : > { %v1285_v15 = vpop.permute.xlu1 %1284 }
 0x143   : > { %v1569_v4 = vsel %vm1545_vm12, %v1536_v0, %v1285_v15 }
 0x144   : > { %v1283_v57 = vpop.permute.xlu0 %1282 }
 0x145   : > { %v1567_v49 = vsel %vm1545_vm12, %v1534_v23, %v1283_v57 }
 0x146   : > { %v1320_v28 = vpop.permute.xlu1 %1319 }
 0x147   : > { %v1602_v62 = vsel %vm1578_vm13, %v1569_v4, %v1320_v28 }
 0x148   : > { %v1318_v36 = vpop.permute.xlu0 %1317 }
 0x149   : > { %v1600_v59 = vsel %vm1578_vm13, %v1567_v49, %v1318_v36 }
 0x14a   : > { %v1067_v7 = vpop.permute.xlu1 %1066 }
 0x14b   : > { %v1403_v12 = vsel %vm1364_vm6, %v7310_v34, %v1067_v7 }
 0x14c   : > { %v1353_v40 = vpop.permute.xlu0 %1352 }
 0x14d   : > { %v1633_v2 = vsel %vm1611_vm14, %v1600_v59, %v1353_v40 }
 0x14e   : > { %6186 = vmatprep.mubr.msk.bf16.mxu0 %vm1668_vm15, %v1633_v2  ;;  %v1069_v9 = vpop.permute.xlu1 %1068 }
 0x14f   : > { %v1406_v3 = vsel %vm1364_vm6, %v7363_v44, %v1069_v9 }
 0x150   : > { %v1355_v61 = vpop.permute.xlu0 %1354 }
 0x151   : > { %v1635_v18 = vsel %vm1611_vm14, %v1602_v62, %v1355_v61 }
 0x152   : > { %6187 = vmatmul.mubr.msk.bf16.gmra.mrb[20].mxu0 %vm1668_vm15, %v1635_v18  ;;  %v1149_v42 = vpop.permute.xlu1 %1148 }
 0x153   : > { %v1441_v15 = vsel %vm1413_vm8, %v1406_v3, %v1149_v42 }
 0x154   : > { %v1147_v11 = vpop.permute.xlu0 %1146 }
 0x155   : > { %v1439_v29 = vsel %vm1413_vm8, %v1403_v12, %v1147_v11 }
 0x156   : > { %v1184_v8 = vpop.permute.xlu1 %1183 }
 0x157   : > { %v1474_v34 = vsel %vm1446_vm9, %v1441_v15, %v1184_v8 }
 0x158   : > { %v1182_v13 = vpop.permute.xlu0 %1181 }
 0x159   : > { %v1472_v10 = vsel %vm1446_vm9, %v1439_v29, %v1182_v13 }
 0x15a   : > { %v1219_v17 = vpop.permute.xlu1 %1218 }
 0x15b   : > { %v1507_v6 = vsel %vm1479_vm10, %v1474_v34, %v1219_v17 }
 0x15c   : > { %v1217_v20 = vpop.permute.xlu0 %1216 }
 0x15d   : > { %v1505_v38 = vsel %vm1479_vm10, %v1472_v10, %v1217_v20 }
 0x15e   : > { %v1254_v22 = vpop.permute.xlu1 %1253 }
 0x15f   : > { %v1540_v36 = vsel %vm1512_vm11, %v1507_v6, %v1254_v22 }
 0x160   : > { %v1252_v41 = vpop.permute.xlu0 %1251 }
 0x161   : > { %v1538_v48 = vsel %vm1512_vm11, %v1505_v38, %v1252_v41 }
 0x162   : > { %v1289_v52 = vpop.permute.xlu1 %1288 }
 0x163   : > { %v1573_v56 = vsel %vm1545_vm12, %v1540_v36, %v1289_v52 }
 0x164   : > { %v1287_v46 = vpop.permute.xlu0 %1286 }
 0x165   : > { %v1571_v57 = vsel %vm1545_vm12, %v1538_v48, %v1287_v46 }
 0x166   : > { %v1324_v26 = vpop.permute.xlu1 %1323 }
 0x167   : > { %v1606_v16 = vsel %vm1578_vm13, %v1573_v56, %v1324_v26 }
 0x168   : > { %v1322_v37 = vpop.permute.xlu0 %1321 }
 0x169   : > { %v1604_v60 = vsel %vm1578_vm13, %v1571_v57, %v1322_v37 }
 0x16a   : > { %v1071_v47 = vpop.permute.xlu1 %1070 }
 0x16b   : > { %v1409_v18 = vsel %vm1364_vm6, %v7436_v45, %v1071_v47 }
 0x16c   : > { %v1357_v28 = vpop.permute.xlu0 %1356 }
 0x16d   : > { %v1637_v5 = vsel %vm1611_vm14, %v1604_v60, %v1357_v28 }
 0x16e   : > { %6190 = vmatprep.mubr.msk.bf16.mxu0 %vm1668_vm15, %v1637_v5  ;;  %v1073_v44 = vpop.permute.xlu1 %1072 }
 0x16f   : > { %v1412_v62 = vsel %vm1364_vm6, %v7489_v1, %v1073_v44 }
 0x170   : > { %v1359_v23 = vpop.permute.xlu0 %1358 }
 0x171   : > { %v1639_v7 = vsel %vm1611_vm14, %v1606_v16, %v1359_v23 }
 0x172   : > { %6191 = vmatmul.mubr.msk.bf16.gmra.mrb[24].mxu0 %vm1668_vm15, %v1639_v7  ;;  %v1153_v43 = vpop.permute.xlu1 %1152  ;;  %v7723_v7 = vld [vmem:[%s11038_s5] ss:$0 sm:$0xff] }
 0x173   : > { %v1445_v42 = vsel %vm1413_vm8, %v1412_v62, %v1153_v43 }
 0x174   : > { %v1151_v49 = vpop.permute.xlu0 %1150 }
 0x175   : > { %v1443_v13 = vsel %vm1413_vm8, %v1409_v18, %v1151_v49 }
 0x176   : > { %v1188_v14 = vpop.permute.xlu1 %1187 }
 0x177   : > { %v1478_v17 = vsel %vm1446_vm9, %v1445_v42, %v1188_v14 }
 0x178   : > { %v1186_v59 = vpop.permute.xlu0 %1185 }
 0x179   : > { %v1476_v22 = vsel %vm1446_vm9, %v1443_v13, %v1186_v59  ;;  %vm2808_vm9 = vcmask 57344  }
 0x17a   : > { %v1223_v40 = vpop.permute.xlu1 %1222 }
 0x17b   : > { %v1511_v41 = vsel %vm1479_vm10, %v1478_v17, %v1223_v40 }
 0x17c   : > { %v1221_v55 = vpop.permute.xlu0 %1220 }
 0x17d   : > { %v1509_v1 = vsel %vm1479_vm10, %v1476_v22, %v1221_v55 }
 0x17e   : > { %v1258_v2 = vpop.permute.xlu1 %1257 }
 0x17f   : > { %v1544_v12 = vsel %vm1512_vm11, %v1511_v41, %v1258_v2 }
 0x180   : > { %v1256_v0 = vpop.permute.xlu0 %1255 }
 0x181   : > { %v1542_v45 = vsel %vm1512_vm11, %v1509_v1, %v1256_v0  ;;  %vm2801_vm11 = vcmask 58368  }
 0x182   : > { %v1293_v9 = vpop.permute.xlu1 %1292 }
 0x183   : > { %v1577_v26 = vsel %vm1545_vm12, %v1544_v12, %v1293_v9 }
 0x184   : > { %v1291_v4 = vpop.permute.xlu0 %1290 }
 0x185   : > { %v6168_v61 = vpop.f32.mrb[0].mxu0  ;;  %v1575_v10 = vsel %vm1545_vm12, %v1542_v45, %v1291_v4 }
 0x186   : > { %v1739_v11 = vpop.f32.mrb[1].mxu0  ;;  %v1328_v8 = vpop.permute.xlu1 %1327  ;;  %v7734_v55 = vadd.f32 %v6168_v61, %v7723_v7 }
 0x187   : > { %v6169_v20 = vpop.f32.mrb[2].mxu0  ;;  %v1610_v37 = vsel %vm1578_vm13, %v1577_v26, %v1328_v8 }
 0x188   : > { %v1742_v52 = vpop.f32.mrb[3].mxu0  ;;  %v1326_v46 = vpop.permute.xlu0 %1325  ;;  %v1869_v4 = vsel %vm1413_vm8, %v7734_v55, 0.0  ;;  %v7741_v62 = vadd.f32 %v6169_v20, %v7723_v7 }
 0x189   : > { %v1608_v38 = vsel %vm1578_vm13, %v1575_v10, %v1326_v46  ;;  %v7726_v43 = vadd.f32 %v7723_v7, %v1742_v52  ;;  %vm3710_vm13 = vsmask.f32 2304 }
 0x18a   : > { %v1363_v29 = vpop.permute.xlu1 %1362 }
 0x18b   : > { %v1643_v3 = vsel %vm1611_vm14, %v1610_v37, %v1363_v29  ;;  %v1867_v14 = vsel %vm1413_vm8, %v7726_v43, 0.0 }
 0x18c   : > { %v1361_v48 = vpop.permute.xlu0 %1360 }
 0x18d   : > { %v1641_v47 = vsel %vm1611_vm14, %v1608_v38, %v1361_v48 }
 0x18e   : > { %6194 = vmatprep.mubr.msk.bf16.mxu0 %vm1668_vm15, %v1641_v47 }
 0x18f   : > { %6195 = vmatmul.mubr.msk.bf16.gmra.mrb[28].mxu0 %vm1668_vm15, %v1643_v3  ;;  %vm3711_vm15 = vsmask.f32 6416 }
 0x190   : > { %6200 = vmatprep.mubr.msk.bf16.mxu0 %vm1364_vm6, %v6860_v32  ;;  %v7729_v32 = vadd.f32 %v7723_v7, %v1739_v11  ;;  %v1871_v11 = vsel %vm1413_vm8, %v7741_v62, 0.0 }
 0x192   : > { %v1866_v2 = vsel %vm1413_vm8, %v7729_v32, 0.0 }
 0x193   : > { %v1868_v9 = vadd.f32 %v1867_v14, %v1866_v2 }
 0x195   : > { %v1870_v42 = vadd.f32 %v1869_v4, %v1868_v9 }
 0x197   : > { %v1872_v13 = vadd.f32 %v1871_v11, %v1870_v42 }
 0x1a5   : > { %v6172_v15 = vpop.f32.mrb[4].mxu0 }
 0x1a6   : > { %v1755_v57 = vpop.f32.mrb[5].mxu0  ;;  %v7756_v20 = vadd.f32 %v6172_v15, %v7723_v7 }
 0x1a7   : > { %v6173_v34 = vpop.f32.mrb[6].mxu0  ;;  %v7744_v18 = vadd.f32 %v7723_v7, %v1755_v57 }
 0x1a8   : > { %v1758_v60 = vpop.f32.mrb[7].mxu0  ;;  %v1877_v52 = vsel %vm1413_vm8, %v7756_v20, 0.0  ;;  %v7761_v46 = vadd.f32 %v6173_v34, %v7723_v7 }
 0x1a9   : > { %v1873_v61 = vsel %vm1413_vm8, %v7744_v18, 0.0  ;;  %v7751_v8 = vadd.f32 %v7723_v7, %v1758_v60 }
 0x1aa   : > { %v1874_v17 = vadd.f32 %v1873_v61, %v1872_v13  ;;  %v1879_v45 = vsel %vm1413_vm8, %v7761_v46, 0.0 }
 0x1ab   : > { %v1875_v22 = vsel %vm1413_vm8, %v7751_v8, 0.0 }
 0x1ac   : > { %v1876_v41 = vadd.f32 %v1875_v22, %v1874_v17 }
 0x1ae   : > { %v1878_v12 = vadd.f32 %v1877_v52, %v1876_v41 }
 0x1b0   : > { %v1880_v10 = vadd.f32 %v1879_v45, %v1878_v12 }
 0x1c5   : > { %v6176_v28 = vpop.f32.mrb[8].mxu0 }
 0x1c6   : > { %v1771_v6 = vpop.f32.mrb[9].mxu0  ;;  %v7776_v3 = vadd.f32 %v6176_v28, %v7723_v7 }
 0x1c7   : > { %v6177_v5 = vpop.f32.mrb[10].mxu0  ;;  %v7764_v1 = vadd.f32 %v7723_v7, %v1771_v6 }
 0x1c8   : > { %v1774_v36 = vpop.f32.mrb[11].mxu0  ;;  %v1885_v34 = vsel %vm1413_vm8, %v7776_v3, 0.0  ;;  %v7781_v60 = vadd.f32 %v6177_v5, %v7723_v7 }
 0x1c9   : > { %v1881_v26 = vsel %vm1413_vm8, %v7764_v1, 0.0  ;;  %v7771_v29 = vadd.f32 %v7723_v7, %v1774_v36 }
 0x1ca   : > { %v1882_v37 = vadd.f32 %v1881_v26, %v1880_v10  ;;  %v1887_v2 = vsel %vm1413_vm8, %v7781_v60, 0.0 }
 0x1cb   : > { %v1883_v38 = vsel %vm1413_vm8, %v7771_v29, 0.0 }
 0x1cc   : > { %v1884_v48 = vadd.f32 %v1883_v38, %v1882_v37 }
 0x1ce   : > { %v1886_v14 = vadd.f32 %v1885_v34, %v1884_v48 }
 0x1d0   : > { %v1888_v4 = vadd.f32 %v1887_v2, %v1886_v14 }
 0x1e5   : > { %v6180_v44 = vpop.f32.mrb[12].mxu0 }
 0x1e6   : > { %v1787_v56 = vpop.f32.mrb[13].mxu0  ;;  %v7796_v11 = vadd.f32 %v6180_v44, %v7723_v7 }
 0x1e7   : > { %v6181_v16 = vpop.f32.mrb[14].mxu0  ;;  %v7784_v6 = vadd.f32 %v7723_v7, %v1787_v56 }
 0x1e8   : > { %v1790_v23 = vpop.f32.mrb[15].mxu0  ;;  %v1893_v61 = vsel %vm1413_vm8, %v7796_v11, 0.0  ;;  %v7801_v13 = vadd.f32 %v6181_v16, %v7723_v7 }
 0x1e9   : > { %v1889_v28 = vsel %vm1413_vm8, %v7784_v6, 0.0  ;;  %v7791_v9 = vadd.f32 %v7723_v7, %v1790_v23 }
 0x1ea   : > { %v1890_v42 = vadd.f32 %v1889_v28, %v1888_v4  ;;  %v1895_v22 = vsel %vm1413_vm8, %v7801_v13, 0.0 }
 0x1eb   : > { %v1891_v5 = vsel %vm1413_vm8, %v7791_v9, 0.0 }
 0x1ec   : > { %v1892_v56 = vadd.f32 %v1891_v5, %v1890_v42 }
 0x1ee   : > { %v1894_v23 = vadd.f32 %v1893_v61, %v1892_v56 }
 0x1f0   : > { %v1896_v52 = vadd.f32 %v1895_v22, %v1894_v23 }
 0x205   : > { %v6184_v49 = vpop.f32.mrb[16].mxu0 }
 0x206   : > { %v1803_v59 = vpop.f32.mrb[17].mxu0  ;;  %v7816_v16 = vadd.f32 %v6184_v49, %v7723_v7 }
 0x207   : > { %v6185_v40 = vpop.f32.mrb[18].mxu0  ;;  %v7804_v17 = vadd.f32 %v7723_v7, %v1803_v59 }
 0x208   : > { %v1806_v0 = vpop.f32.mrb[19].mxu0  ;;  %v1901_v26 = vsel %vm1413_vm8, %v7816_v16, 0.0  ;;  %v7821_v10 = vadd.f32 %v6185_v40, %v7723_v7 }
 0x209   : > { %v1897_v41 = vsel %vm1413_vm8, %v7804_v17, 0.0  ;;  %v7811_v44 = vadd.f32 %v7723_v7, %v1806_v0 }
 0x20a   : > { %v1898_v12 = vadd.f32 %v1897_v41, %v1896_v52  ;;  %v1903_v14 = vsel %vm1413_vm8, %v7821_v10, 0.0 }
 0x20b   : > { %v1899_v45 = vsel %vm1413_vm8, %v7811_v44, 0.0 }
 0x20c   : > { %v1900_v59 = vadd.f32 %v1899_v45, %v1898_v12 }
 0x20e   : > { %v1902_v0 = vadd.f32 %v1901_v26, %v1900_v59 }
 0x210   : > { %v1904_v4 = vadd.f32 %v1903_v14, %v1902_v0 }
 0x225   : > { %v6188_v47 = vpop.f32.mrb[20].mxu0 }
 0x226   : > { %v1819_v15 = vpop.f32.mrb[21].mxu0  ;;  %v7836_v42 = vadd.f32 %v6188_v47, %v7723_v7 }
 0x227   : > { %v6189_v57 = vpop.f32.mrb[22].mxu0  ;;  %v7824_v37 = vadd.f32 %v7723_v7, %v1819_v15 }
 0x228   : > { %v1822_v36 = vpop.f32.mrb[23].mxu0  ;;  %v1909_v56 = vsel %vm1413_vm8, %v7836_v42, 0.0  ;;  %v7841_v61 = vadd.f32 %v6189_v57, %v7723_v7 }
 0x229   : > { %v1905_v49 = vsel %vm1413_vm8, %v7824_v37, 0.0  ;;  %v7831_v2 = vadd.f32 %v7723_v7, %v1822_v36 }
 0x22a   : > { %v1906_v40 = vadd.f32 %v1905_v49, %v1904_v4  ;;  %v1911_v22 = vsel %vm1413_vm8, %v7841_v61, 0.0 }
 0x22b   : > { %v1907_v15 = vsel %vm1413_vm8, %v7831_v2, 0.0 }
 0x22c   : > { %v1908_v5 = vadd.f32 %v1907_v15, %v1906_v40 }
 0x22e   : > { %v1910_v36 = vadd.f32 %v1909_v56, %v1908_v5 }
 0x230   : > { %v1912_v52 = vadd.f32 %v1911_v22, %v1910_v36 }
 0x245   : > { %v6192_v38 = vpop.f32.mrb[24].mxu0 }
 0x246   : > { %v1835_v48 = vpop.f32.mrb[25].mxu0  ;;  %v7856_v57 = vadd.f32 %v6192_v38, %v7723_v7 }
 0x247   : > { %v6193_v34 = vpop.f32.mrb[26].mxu0  ;;  %v7844_v23 = vadd.f32 %v7723_v7, %v1835_v48 }
 0x248   : > { %v1838_v28 = vpop.f32.mrb[27].mxu0  ;;  %v1917_v26 = vsel %vm1413_vm8, %v7856_v57, 0.0  ;;  %v7861_v0 = vadd.f32 %v6193_v34, %v7723_v7 }
 0x249   : > { %v1913_v41 = vsel %vm1413_vm8, %v7844_v23, 0.0  ;;  %v7851_v47 = vadd.f32 %v7723_v7, %v1838_v28 }
 0x24a   : > { %v1914_v12 = vadd.f32 %v1913_v41, %v1912_v52  ;;  %v1919_v28 = vsel %vm1413_vm8, %v7861_v0, 0.0 }
 0x24b   : > { %v1915_v45 = vsel %vm1413_vm8, %v7851_v47, 0.0 }
 0x24c   : > { %v1916_v59 = vadd.f32 %v1915_v45, %v1914_v12 }
 0x24e   : > { %v1918_v48 = vadd.f32 %v1917_v26, %v1916_v59 }
 0x250   : > { %v1920_v15 = vadd.f32 %v1919_v28, %v1918_v48 }
 0x262   : > { %v6196_v14 = vpop.f32.mrb[28].mxu0 }
 0x263   : > { %v1851_v49 = vpop.f32.mrb[29].mxu0  ;;  %v7869_v5 = vadd.f32 %v6196_v14, %v7723_v7 }
 0x264   : > { %v7866_v4 = vadd.f32 %v7723_v7, %v1851_v49  ;;  %v6197_v40 = vpop.f32.mrb[30].mxu0 }
 0x265   : > { %v1854_v38 = vpop.f32.mrb[31].mxu0  ;;  %v7877_v22 = vadd.f32 %v6197_v40, %v7723_v7  ;;  %v1925_v12 = vsel %vm1413_vm8, %v7869_v5, 0.0 }
 0x266   : > { %v1921_v56 = vsel %vm1413_vm8, %v7866_v4, 0.0  ;;  %v7874_v34 = vadd.f32 %v7723_v7, %v1854_v38 }
 0x267   : > { %v1922_v36 = vadd.f32 %v1921_v56, %v1920_v15  ;;  %v1927_v59 = vsel %vm1413_vm8, %v7877_v22, 0.0 }
 0x268   : > { %v1923_v41 = vsel %vm1413_vm8, %v7874_v34, 0.0 }
 0x269   : > { %v1924_v52 = vadd.f32 %v1923_v41, %v1922_v36 }
 0x26b   : > { %v1926_v45 = vadd.f32 %v1925_v12, %v1924_v52 }
 0x26d   : > { %v1928_v26 = vadd.f32 %v1927_v59, %v1926_v45 }
 0x26f   : > { %v1929_v48 = vrot.slane %v1928_v26, 4 }
 0x271   : > { %v1930_v14 = vadd.f32 %v1929_v48, %v1928_v26 }
 0x273   : > { %v1931_v49 = vrot.slane %v1930_v14, 2 }
 0x275   : > { %v1932_v28 = vadd.f32 %v1931_v49, %v1930_v14 }
 0x277   : > { %v1933_v15 = vrot.slane %v1932_v28, 1 }
 0x279   : > { %v1934_v38 = vadd.f32 %v1933_v15, %v1932_v28 }
 0x27b   : > { %1968 = vrot.lane.b32.xlu1 %v1934_v38, %s6685_s19  ;;  %1951 = vrot.lane.b32.xlu0 %v1934_v38, %s6686_s20  ;;  %v1936_v7 = vsel %vm1935_vm0, %v1934_v38, 0.0 }
 0x27f   : > { %1985 = vrot.lane.b32.xlu0 %v1934_v38, %s6687_s23 }
 0x29f   : > { %1937 = vadd.xlane.f32.xlu1 %v1936_v7 }
 0x2ed   : > { %v1952_v40 = vpop.permute.xlu0 %1951  ;;  %v1969_v36 = vpop.permute.xlu1 %1968 }
 0x2ee   : > { %v1954_v56 = vsel %vm1935_vm0, %v1952_v40, 0.0  ;;  %v1971_v52 = vsel %vm1935_vm0, %v1969_v36, 0.0 }
 0x2ef   : > { %1955 = vadd.xlane.f32.xlu0 %v1954_v56 }
 0x2f1   : > { %v1986_v41 = vpop.permute.xlu0 %1985 }
 0x2f2   : > { %v1988_v12 = vsel %vm1935_vm0, %v1986_v41, 0.0 }
 0x2f3   : > { %1972 = vadd.xlane.f32.xlu0 %v1971_v52  ;;  %1989 = vadd.xlane.f32.xlu1 %v1988_v12 }
 0x32c   : > { %v1938_v45 = vpop.xlane.xlu1 %1937 }
 0x32d   : > { %v1939_v59 = vrot.slane %v1938_v45, 4 }
 0x32f   : > { %v1940_v26 = vadd.f32 %v1939_v59, %v1938_v45 }
 0x331   : > { %v1941_v48 = vrot.slane %v1940_v26, 2 }
 0x333   : > { %v1942_v14 = vadd.f32 %v1941_v48, %v1940_v26 }
 0x335   : > { %v1943_v49 = vrot.slane %v1942_v14, 1 }
 0x337   : > { %v1944_v28 = vadd.f32 %v1943_v49, %v1942_v14 }
 0x339   : > { %6281 = vpush %v1944_v28 }
 0x36a   : > { %s6282_s24 = spop %6281 }
 0x36b   : > { %s1948_s27 = smul.f32 0.001953125, %s6282_s24 }
 0x37c   : > { %v1956_v15 = vpop.xlane.xlu0 %1955 }
 0x37d   : > { %v1957_v38 = vrot.slane %v1956_v15, 4 }
 0x37f   : > { %v1958_v7 = vadd.f32 %v1957_v38, %v1956_v15 }
 0x380   : > { %v1973_v40 = vpop.xlane.xlu0 %1972  ;;  %v1990_v56 = vpop.xlane.xlu1 %1989 }
 0x381   : > { %v1974_v31 = vrot.slane %v1973_v40, 4  ;;  %v1991_v63 = vrot.slane %v1990_v56, 4  ;;  %v1959_v36 = vrot.slane %v1958_v7, 2 }
 0x383   : > { %v1975_v25 = vadd.f32 %v1974_v31, %v1973_v40  ;;  %v1992_v41 = vadd.f32 %v1991_v63, %v1990_v56  ;;  %v1960_v52 = vadd.f32 %v1959_v36, %v1958_v7  ;;  %v2007_v63 = vlaneseq }
 0x385   : > { %v1961_v12 = vrot.slane %v1960_v52, 1  ;;  %v1976_v33 = vrot.slane %v1975_v25, 2  ;;  %v1993_v58 = vrot.slane %v1992_v41, 2 }
 0x387   : > { %v1962_v45 = vadd.f32 %v1961_v12, %v1960_v52  ;;  %v1977_v59 = vadd.f32 %v1976_v33, %v1975_v25  ;;  %v1994_v26 = vadd.f32 %v1993_v58, %v1992_v41  ;;  %v1949_v58 = vstv %s1948_s27 }
 0x388   : > { %v2008_v25 = vshrl.u32 %v2007_v63, 7 }
 0x389   : > { %6283 = vpush %v1962_v45  ;;  %v1978_v48 = vrot.slane %v1977_v59, 1  ;;  %v1995_v14 = vrot.slane %v1994_v26, 1 }
 0x38a   : > { %v7894_v40 = vsub.s32 0, %v2008_v25 }
 0x38b   : > { %v1979_v49 = vadd.f32 %v1978_v48, %v1977_v59  ;;  %v1996_v28 = vadd.f32 %v1995_v14, %v1994_v26 }
 0x38c   : > { %11154 = vst [vmem:[#allocation18_spill] sm:$0xff] %v7894_v40 }
 0x38d   : > { %6285 = vpush %v1979_v49 }
 0x38e   : > { %6287 = vpush %v1996_v28 }
 0x3ba   : > { %s6284_s25 = spop %6283 }
 0x3bb   : > { %s1966_s26 = smul.f32 0.001953125, %s6284_s25 }
 0x3bd   : > { %v1967_v31 = vstv %s1966_s26 }
 0x3be   : > { %s6286_s28 = spop %6285  ;;  %v2003_v15 = vsel %vm11088_vm1, %v1949_v58, %v1967_v31 }
 0x3bf   : > { %s1983_s30 = smul.f32 0.001953125, %s6286_s28  ;;  %s6288_s7 = spop %6287 }
 0x3c0   : > { %s2000_s8 = smul.f32 0.001953125, %s6288_s7  ;;  %s6689_s28 = smov 48  }
 0x3c1   : > { %v1984_v33 = vstv %s1983_s30 }
 0x3c2   : > { %v2004_v38 = vsel %vm1364_vm6, %v2003_v15, %v1984_v33  ;;  %v2001_v7 = vstv %s2000_s8 }
 0x3c3   : > { %v2006_v56 = vsel %vm11087_vm2, %v2004_v38, %v2001_v7 }
 0x3c4   : > { %v7898_v36 = vrot.slane %v2006_v56, %v7894_v40 }
 0x3c6   : > { %v7902_v41 = vsub.f32 %v7729_v32, %v7898_v36  ;;  %v7906_v52 = vsub.f32 %v7726_v43, %v7898_v36  ;;  %v7910_v12 = vsub.f32 %v7734_v55, %v7898_v36  ;;  %v7914_v45 = vsub.f32 %v7741_v62, %v7898_v36 }
 0x3c7   : > { %v7922_v32 = vsub.f32 %v7744_v18, %v7898_v36  ;;  %v7928_v55 = vsub.f32 %v7751_v8, %v7898_v36  ;;  %v7936_v28 = vsub.f32 %v7756_v20, %v7898_v36  ;;  %v7943_v8 = vsub.f32 %v7761_v46, %v7898_v36 }
 0x3c8   : > { %v2043_v59 = vmul.f32 %v7902_v41, %v7902_v41  ;;  %v2044_v26 = vmul.f32 %v7906_v52, %v7906_v52  ;;  %v2045_v43 = vmul.f32 %v7910_v12, %v7910_v12  ;;  %v2046_v62 = vmul.f32 %v7914_v45, %v7914_v45 }
 0x3c9   : > { %v2047_v18 = vmul.f32 %v7922_v32, %v7922_v32  ;;  %v2048_v33 = vmul.f32 %v7928_v55, %v7928_v55  ;;  %v7950_v20 = vsub.f32 %v7764_v1, %v7898_v36  ;;  %v2049_v15 = vmul.f32 %v7936_v28, %v7936_v28 }
 0x3ca   : > { %v2075_v48 = vsel %vm1413_vm8, %v2043_v59, 0.0  ;;  %v2076_v14 = vsel %vm1413_vm8, %v2044_v26, 0.0  ;;  %v2078_v63 = vsel %vm1413_vm8, %v2045_v43, 0.0  ;;  %v2080_v58 = vsel %vm1413_vm8, %v2046_v62, 0.0 }
 0x3cb   : > { %v2077_v49 = vadd.f32 %v2076_v14, %v2075_v48  ;;  %v2082_v38 = vsel %vm1413_vm8, %v2047_v18, 0.0  ;;  %v7957_v46 = vsub.f32 %v7771_v29, %v7898_v36  ;;  %v2050_v56 = vmul.f32 %v7943_v8, %v7943_v8 }
 0x3cc   : > { %v2084_v59 = vsel %vm1413_vm8, %v2048_v33, 0.0  ;;  %v7964_v1 = vsub.f32 %v7776_v3, %v7898_v36  ;;  %v2051_v43 = vmul.f32 %v7950_v20, %v7950_v20  ;;  %v2086_v62 = vsel %vm1413_vm8, %v2049_v15, 0.0 }
 0x3cd   : > { %v2079_v31 = vadd.f32 %v2078_v63, %v2077_v49  ;;  %v7971_v29 = vsub.f32 %v7781_v60, %v7898_v36  ;;  %v2052_v14 = vmul.f32 %v7957_v46, %v7957_v46  ;;  %v2088_v49 = vsel %vm1413_vm8, %v2050_v56, 0.0 }
 0x3ce   : > { %v7978_v3 = vsub.f32 %v7784_v6, %v7898_v36  ;;  %v2053_v63 = vmul.f32 %v7964_v1, %v7964_v1  ;;  %v7985_v60 = vsub.f32 %v7791_v9, %v7898_v36  ;;  %v7992_v6 = vsub.f32 %v7796_v11, %v7898_v36 }
 0x3cf   : > { %v2081_v25 = vadd.f32 %v2080_v58, %v2079_v31  ;;  %v2090_v31 = vsel %vm1413_vm8, %v2051_v43, 0.0  ;;  %v2054_v58 = vmul.f32 %v7971_v29, %v7971_v29  ;;  %v7999_v9 = vsub.f32 %v7801_v13, %v7898_v36 }
 0x3d0   : > { %v8006_v11 = vsub.f32 %v7804_v17, %v7898_v36  ;;  %v8013_v13 = vsub.f32 %v7811_v44, %v7898_v36  ;;  %v8020_v17 = vsub.f32 %v7816_v16, %v7898_v36  ;;  %v8027_v44 = vsub.f32 %v7821_v10, %v7898_v36 }
 0x3d1   : > { %v2083_v7 = vadd.f32 %v2082_v38, %v2081_v25  ;;  %v2092_v25 = vsel %vm1413_vm8, %v2052_v14, 0.0  ;;  %v2055_v38 = vmul.f32 %v7978_v3, %v7978_v3  ;;  %v8034_v16 = vsub.f32 %v7824_v37, %v7898_v36 }
 0x3d2   : > { %v8041_v10 = vsub.f32 %v7831_v2, %v7898_v36  ;;  %v8048_v37 = vsub.f32 %v7836_v42, %v7898_v36  ;;  %v8055_v2 = vsub.f32 %v7841_v61, %v7898_v36  ;;  %v8062_v42 = vsub.f32 %v7844_v23, %v7898_v36 }
 0x3d3   : > { %v2085_v26 = vadd.f32 %v2084_v59, %v2083_v7  ;;  %v2094_v7 = vsel %vm1413_vm8, %v2053_v63, 0.0  ;;  %v2056_v59 = vmul.f32 %v7985_v60, %v7985_v60  ;;  %v8069_v61 = vsub.f32 %v7851_v47, %v7898_v36 }
 0x3d4   : > { %v8076_v23 = vsub.f32 %v7856_v57, %v7898_v36  ;;  %v8083_v47 = vsub.f32 %v7861_v0, %v7898_v36  ;;  %v8090_v57 = vsub.f32 %v7866_v4, %v7898_v36  ;;  %v8097_v0 = vsub.f32 %v7874_v34, %v7898_v36 }
 0x3d5   : > { %v2087_v48 = vadd.f32 %v2086_v62, %v2085_v26  ;;  %v2096_v26 = vsel %vm1413_vm8, %v2054_v58, 0.0  ;;  %v2057_v62 = vmul.f32 %v7992_v6, %v7992_v6  ;;  %v8104_v4 = vsub.f32 %v7869_v5, %v7898_v36 }
 0x3d6   : > { %v8111_v34 = vsub.f32 %v7877_v22, %v7898_v36 }
 0x3d7   : > { %v2089_v18 = vadd.f32 %v2088_v49, %v2087_v48  ;;  %v2098_v48 = vsel %vm1413_vm8, %v2055_v38, 0.0  ;;  %v2058_v49 = vmul.f32 %v7999_v9, %v7999_v9  ;;  %v2073_v5 = vmul.f32 %v8104_v4, %v8104_v4 }
 0x3d9   : > { %v2091_v33 = vadd.f32 %v2090_v31, %v2089_v18  ;;  %v2100_v18 = vsel %vm1413_vm8, %v2056_v59, 0.0  ;;  %v2059_v31 = vmul.f32 %v8006_v11, %v8006_v11  ;;  %v2134_v22 = vsel %vm1413_vm8, %v2073_v5, 0.0 }
 0x3db   : > { %v2093_v15 = vadd.f32 %v2092_v25, %v2091_v33  ;;  %v2102_v33 = vsel %vm1413_vm8, %v2057_v62, 0.0  ;;  %v2060_v25 = vmul.f32 %v8013_v13, %v8013_v13 }
 0x3dd   : > { %v2095_v56 = vadd.f32 %v2094_v7, %v2093_v15  ;;  %v2104_v15 = vsel %vm1413_vm8, %v2058_v49, 0.0  ;;  %v2061_v7 = vmul.f32 %v8020_v17, %v8020_v17 }
 0x3df   : > { %v2097_v43 = vadd.f32 %v2096_v26, %v2095_v56  ;;  %v2106_v56 = vsel %vm1413_vm8, %v2059_v31, 0.0  ;;  %v2062_v26 = vmul.f32 %v8027_v44, %v8027_v44 }
 0x3e1   : > { %v2099_v14 = vadd.f32 %v2098_v48, %v2097_v43  ;;  %v2108_v43 = vsel %vm1413_vm8, %v2060_v25, 0.0  ;;  %v2063_v48 = vmul.f32 %v8034_v16, %v8034_v16 }
 0x3e3   : > { %v2101_v63 = vadd.f32 %v2100_v18, %v2099_v14  ;;  %v2110_v14 = vsel %vm1413_vm8, %v2061_v7, 0.0  ;;  %v2064_v18 = vmul.f32 %v8041_v10, %v8041_v10 }
 0x3e5   : > { %v2103_v58 = vadd.f32 %v2102_v33, %v2101_v63  ;;  %v2112_v63 = vsel %vm1413_vm8, %v2062_v26, 0.0  ;;  %v2065_v33 = vmul.f32 %v8048_v37, %v8048_v37 }
 0x3e7   : > { %v2105_v38 = vadd.f32 %v2104_v15, %v2103_v58  ;;  %v2114_v58 = vsel %vm1413_vm8, %v2063_v48, 0.0  ;;  %v2066_v15 = vmul.f32 %v8055_v2, %v8055_v2 }
 0x3e9   : > { %v2107_v59 = vadd.f32 %v2106_v56, %v2105_v38  ;;  %v2116_v38 = vsel %vm1413_vm8, %v2064_v18, 0.0  ;;  %v2067_v56 = vmul.f32 %v8062_v42, %v8062_v42 }
 0x3eb   : > { %v2109_v62 = vadd.f32 %v2108_v43, %v2107_v59  ;;  %v2118_v59 = vsel %vm1413_vm8, %v2065_v33, 0.0  ;;  %v2068_v43 = vmul.f32 %v8069_v61, %v8069_v61 }
 0x3ed   : > { %v2111_v49 = vadd.f32 %v2110_v14, %v2109_v62  ;;  %v2120_v62 = vsel %vm1413_vm8, %v2066_v15, 0.0  ;;  %v2069_v14 = vmul.f32 %v8076_v23, %v8076_v23 }
 0x3ef   : > { %v2113_v31 = vadd.f32 %v2112_v63, %v2111_v49  ;;  %v2122_v49 = vsel %vm1413_vm8, %v2067_v56, 0.0  ;;  %v2070_v63 = vmul.f32 %v8083_v47, %v8083_v47 }
 0x3f1   : > { %v2115_v25 = vadd.f32 %v2114_v58, %v2113_v31  ;;  %v2124_v31 = vsel %vm1413_vm8, %v2068_v43, 0.0  ;;  %v2071_v58 = vmul.f32 %v8090_v57, %v8090_v57  ;;  %v2074_v43 = vmul.f32 %v8111_v34, %v8111_v34 }
 0x3f3   : > { %v2117_v7 = vadd.f32 %v2116_v38, %v2115_v25  ;;  %v2126_v25 = vsel %vm1413_vm8, %v2069_v14, 0.0  ;;  %v2072_v38 = vmul.f32 %v8097_v0, %v8097_v0  ;;  %v2136_v14 = vsel %vm1413_vm8, %v2074_v43, 0.0 }
 0x3f5   : > { %v2119_v26 = vadd.f32 %v2118_v59, %v2117_v7  ;;  %v2128_v7 = vsel %vm1413_vm8, %v2070_v63, 0.0  ;;  %v2130_v59 = vsel %vm1413_vm8, %v2071_v58, 0.0 }
 0x3f7   : > { %v2121_v48 = vadd.f32 %v2120_v62, %v2119_v26  ;;  %v2132_v62 = vsel %vm1413_vm8, %v2072_v38, 0.0 }
 0x3f9   : > { %v2123_v18 = vadd.f32 %v2122_v49, %v2121_v48 }
 0x3fb   : > { %v2125_v33 = vadd.f32 %v2124_v31, %v2123_v18 }
 0x3fd   : > { %v2127_v15 = vadd.f32 %v2126_v25, %v2125_v33 }
 0x3ff   : > { %v2129_v56 = vadd.f32 %v2128_v7, %v2127_v15 }
 0x401   : > { %v2131_v26 = vadd.f32 %v2130_v59, %v2129_v56 }
 0x403   : > { %v2133_v48 = vadd.f32 %v2132_v62, %v2131_v26 }
 0x405   : > { %v2135_v36 = vadd.f32 %v2134_v22, %v2133_v48 }
 0x407   : > { %v2137_v49 = vadd.f32 %v2136_v14, %v2135_v36 }
 0x409   : > { %v2138_v18 = vrot.slane %v2137_v49, 4 }
 0x40b   : > { %v2139_v63 = vadd.f32 %v2138_v18, %v2137_v49 }
 0x40d   : > { %v2140_v31 = vrot.slane %v2139_v63, 2 }
 0x40f   : > { %v2141_v33 = vadd.f32 %v2140_v31, %v2139_v63 }
 0x411   : > { %v2142_v25 = vrot.slane %v2141_v33, 1 }
 0x413   : > { %v2143_v15 = vadd.f32 %v2142_v25, %v2141_v33 }
 0x415   : > { %2163 = vrot.lane.b32.xlu1 %v2143_v15, %s6686_s20  ;;  %v2144_v58 = vsel %vm1935_vm0, %v2143_v15, 0.0 }
 0x416   : > { %2145 = vadd.xlane.f32.xlu0 %v2144_v58 }
 0x487   : > { %v2164_v7 = vpop.permute.xlu1 %2163 }
 0x488   : > { %v2166_v38 = vsel %vm1935_vm0, %v2164_v7, 0.0 }
 0x489   : > { %2167 = vadd.xlane.f32.xlu0 %v2166_v38 }
 0x49f   : > { %2184 = vrot.lane.b32.xlu0 %v2143_v15, %s6685_s19 }
 0x4a3   : > { %2205 = vrot.lane.b32.xlu0 %v2143_v15, %s6687_s23  ;;  %v2146_v56 = vpop.xlane.xlu0 %2145 }
 0x4a4   : > { %v2147_v5 = vrot.slane %v2146_v56, 4 }
 0x4a6   : > { %v2148_v59 = vadd.f32 %v2147_v5, %v2146_v56 }
 0x4a8   : > { %v2149_v26 = vrot.slane %v2148_v59, 2 }
 0x4aa   : > { %v2150_v43 = vadd.f32 %v2149_v26, %v2148_v59 }
 0x4ac   : > { %v2151_v62 = vrot.slane %v2150_v43, 1 }
 0x4ae   : > { %v2152_v48 = vadd.f32 %v2151_v62, %v2150_v43 }
 0x4b0   : > { %6289 = vpush %v2152_v48 }
 0x4e1   : > { %s6290_s9 = spop %6289 }
 0x4e2   : > { %s2156_s10 = smul.f32 0.001953125, %s6290_s9  ;;  %s6690_s9 = smov 56  }
 0x4e4   : > { %s2157_s13 = sadd.f32 1e-05, %s2156_s10 }
 0x4e6   : > { %v2158_v22 = vstv %s2157_s13 }
 0x4e7   : > { %6379 = vrsqrt.f32 %v2158_v22 }
 0x4f1   : > { %v6380_v36 = vpop.eup %6379 }
 0x4f2   : > { %6291 = vpush %v6380_v36 }
 0x516   : > { %v2168_v14 = vpop.xlane.xlu0 %2167 }
 0x517   : > { %v2169_v49 = vrot.slane %v2168_v14, 4 }
 0x519   : > { %v2170_v18 = vadd.f32 %v2169_v49, %v2168_v14 }
 0x51a   : > { %v2185_v63 = vpop.permute.xlu0 %2184 }
 0x51b   : > { %v2187_v31 = vsel %vm1935_vm0, %v2185_v63, 0.0  ;;  %v2171_v33 = vrot.slane %v2170_v18, 2 }
 0x51c   : > { %2188 = vadd.xlane.f32.xlu1 %v2187_v31 }
 0x51d   : > { %v2172_v25 = vadd.f32 %v2171_v33, %v2170_v18 }
 0x51e   : > { %v2206_v15 = vpop.permute.xlu0 %2205 }
 0x51f   : > { %v2208_v58 = vsel %vm1935_vm0, %v2206_v15, 0.0  ;;  %v2173_v7 = vrot.slane %v2172_v25, 1 }
 0x520   : > { %2209 = vadd.xlane.f32.xlu0 %v2208_v58 }
 0x521   : > { %v2174_v38 = vadd.f32 %v2173_v7, %v2172_v25  ;;  %v11045_v7 = vmov 0  }
 0x522   : > { %2799 = vst.msk [vmem:[#allocation2] sm:$0xf] %vm2798_vm3, %v11045_v7  ;;  %2800 = vst.msk [vmem:[#allocation2 + $0x4] sm:$0xf] %vm2798_vm3, %v11045_v7 }
 0x523   : > { %6293 = vpush %v2174_v38  ;;  %s8131_s15 = spop %6291 }
 0x524   : > { %2802 = vst.msk [vmem:[#allocation2 + $0x8] sm:$0x3] %vm2801_vm11, %v11045_v7  ;;  %2806 = vst.msk [vmem:[#allocation2 + $0xd4] sm:$0x3] %vm2801_vm11, %v11045_v7 }
 0x525   : > { %2804 = vst.msk [vmem:[#allocation2 + $0xcc] sm:$0xf] %vm2798_vm3, %v11045_v7  ;;  %2805 = vst.msk [vmem:[#allocation2 + $0xd0] sm:$0xf] %vm2798_vm3, %v11045_v7 }
 0x526   : > { %2809 = vst.msk [vmem:[#allocation2 + $0xc] sm:$0x1] %vm2808_vm9, %v11045_v7  ;;  %2810 = vst.msk [vmem:[#allocation2 + $0x18] sm:$0x1] %vm2808_vm9, %v11045_v7 }
 0x527   : > { %2811 = vst.msk [vmem:[#allocation2 + $0x24] sm:$0x1] %vm2808_vm9, %v11045_v7  ;;  %2812 = vst.msk [vmem:[#allocation2 + $0x30] sm:$0x1] %vm2808_vm9, %v11045_v7 }
 0x528   : > { %2813 = vst.msk [vmem:[#allocation2 + $0x3c] sm:$0x1] %vm2808_vm9, %v11045_v7  ;;  %2814 = vst.msk [vmem:[#allocation2 + $0x48] sm:$0x1] %vm2808_vm9, %v11045_v7 }
 0x529   : > { %2815 = vst.msk [vmem:[#allocation2 + $0x54] sm:$0x1] %vm2808_vm9, %v11045_v7  ;;  %2816 = vst.msk [vmem:[#allocation2 + $0x60] sm:$0x1] %vm2808_vm9, %v11045_v7  ;;  %v8177_v38 = vld [vmem:[#allocation2] sm:$0xf] }
 0x52a   : > { %2817 = vst.msk [vmem:[#allocation2 + $0x6c] sm:$0x1] %vm2808_vm9, %v11045_v7  ;;  %2818 = vst.msk [vmem:[#allocation2 + $0x78] sm:$0x1] %vm2808_vm9, %v11045_v7 }
 0x52b   : > { %2819 = vst.msk [vmem:[#allocation2 + $0x84] sm:$0x1] %vm2808_vm9, %v11045_v7  ;;  %2820 = vst.msk [vmem:[#allocation2 + $0x90] sm:$0x1] %vm2808_vm9, %v11045_v7 }
 0x52c   : > { %2821 = vst.msk [vmem:[#allocation2 + $0x9c] sm:$0x1] %vm2808_vm9, %v11045_v7  ;;  %2822 = vst.msk [vmem:[#allocation2 + $0xa8] sm:$0x1] %vm2808_vm9, %v11045_v7 }
 0x52d   : > { %2823 = vst.msk [vmem:[#allocation2 + $0xb4] sm:$0x1] %vm2808_vm9, %v11045_v7  ;;  %2824 = vst.msk [vmem:[#allocation2 + $0xc0] sm:$0x1] %vm2808_vm9, %v11045_v7 }
 0x52e   : > { %11155 = vst [vmem:[#allocation19_spill] sm:$0xff] %v8177_v38  ;;  %vm8206_vm11 = vmor %vm3710_vm13, %vm3711_vm15  ;;  %vm2825_vm13 = vcmask 58369   ;;  %vm2922_vm15 = vcmask 1040384  }
 0x554   : > { %s6294_s16 = spop %6293 }
 0x555   : > { %s2178_s17 = smul.f32 0.001953125, %s6294_s16 }
 0x557   : > { %s2179_s18 = sadd.f32 1e-05, %s2178_s17 }
 0x559   : > { %v2180_v56 = vstv %s2179_s18 }
 0x55a   : > { %6381 = vrsqrt.f32 %v2180_v56  ;;  %v8179_v56 = vld [vmem:[#allocation2 + $0x4] sm:$0xf] }
 0x55b   : > { %11156 = vst [vmem:[#allocation20_spill] sm:$0xff] %v8179_v56 }
 0x564   : > { %v6382_v5 = vpop.eup %6381 }
 0x565   : > { %6295 = vpush %v6382_v5  ;;  %v8181_v5 = vld [vmem:[#allocation2 + $0x8] sm:$0x3] }
 0x566   : > { %11157 = vst [vmem:[#allocation21_spill] sm:$0xff] %v8181_v5 }
 0x596   : > { %s8133_s24 = spop %6295 }
 0x5a9   : > { %v2189_v59 = vpop.xlane.xlu1 %2188 }
 0x5aa   : > { %v2190_v26 = vrot.slane %v2189_v59, 4 }
 0x5ac   : > { %v2191_v43 = vadd.f32 %v2190_v26, %v2189_v59  ;;  %v5957_v59 = vrot.slane %v8177_v38, 9  ;;  %v3705_v26 = vrot.slane %v8179_v56, 5 }
 0x5ad   : > { %v2210_v14 = vpop.xlane.xlu0 %2209 }
 0x5ae   : > { %v2192_v62 = vrot.slane %v2191_v43, 2  ;;  %v2211_v49 = vrot.slane %v2210_v14, 4 }
 0x5b0   : > { %v2193_v48 = vadd.f32 %v2192_v62, %v2191_v43  ;;  %v2212_v18 = vadd.f32 %v2211_v49, %v2210_v14  ;;  %v3708_v43 = vrot.slane %v8181_v5, 5  ;;  %v11047_v62 = vshrl.u32 %v8177_v38, 16 }
 0x5b1   : > { %v11055_v14 = vshll.u32 %v8181_v5, 16  ;;  %v3706_v49 = vsel %vm6787_vm4, %v5957_v59, %v3705_v26 }
 0x5b2   : > { %v2194_v22 = vrot.slane %v2193_v48, 1  ;;  %v2213_v63 = vrot.slane %v2212_v18, 2 }
 0x5b3   : > { %v3725_v59 = vrot.slane %v11055_v14, 6  ;;  %v8215_v14 = vld [vmem:[#allocation2 + $0xcc] sm:$0xf] }
 0x5b4   : > { %v2195_v36 = vadd.f32 %v2194_v22, %v2193_v48  ;;  %v2214_v33 = vadd.f32 %v2213_v63, %v2212_v18  ;;  %v11050_v48 = vshll.u32 %v8177_v38, 16  ;;  %v11052_v22 = vshll.u32 %v8179_v56, 16  ;;  %11161 = vst [vmem:[#allocation23_spill] sm:$0xff] %v8215_v14 }
 0x5b5   : > { %v3707_v18 = vrot.slane %v3705_v26, 4  ;;  %v3713_v63 = vrot.slane %v11047_v62, 5  ;;  %v11158_v38 = vmov 0 }
 0x5b6   : > { %6297 = vpush %v2195_v36  ;;  %v2215_v25 = vrot.slane %v2214_v33, 1  ;;  %v11051_v36 = vshrl.u32 %v8179_v56, 16  ;;  %v11159_v38 = vsel %vm8206_vm11, 4294967295, %v11158_v38 }
 0x5b7   : > { %11160 = vst [vmem:[#allocation22_spill] sm:$0xff] %v11159_v38 }
 0x5b8   : > { %v2216_v58 = vadd.f32 %v2215_v25, %v2214_v33  ;;  %v3717_v33 = vrot.slane %v11051_v36, 5  ;;  %v3718_v25 = vrot.slane %v11052_v22, 6 }
 0x5ba   : > { %v3719_v62 = vor.u32 %v3718_v25, %v3717_v33  ;;  %v11057_v33 = vshrl.u32 %v8215_v14, 16  ;;  %v11056_v25 = vshll.u32 %v8215_v14, 16 }
 0x5bc   : > { %v3721_v22 = vrot.slane %v3719_v62, 4 }
 0x5e7   : > { %s6298_s25 = spop %6297 }
 0x5e8   : > { %s2199_s26 = smul.f32 0.001953125, %s6298_s25 }
 0x5ea   : > { %s2200_s27 = sadd.f32 1e-05, %s2199_s26  ;;  %s260_s26 = scalar_lea.vmem %s11034_s1, %s11405_s22 }
 0x5ec   : > { %v2201_v31 = vstv %s2200_s27  ;;  %s6691_s27 = smov 40  }
 0x5ed   : > { %6383 = vrsqrt.f32 %v2201_v31  ;;  %v3714_v31 = vrot.slane %v11050_v48, 6 }
 0x5ef   : > { %v3715_v7 = vor.u32 %v3714_v31, %v3713_v63  ;;  %v8219_v63 = vld [vmem:[#allocation2 + $0xd4] sm:$0x3] }
 0x5f0   : > { %11163 = vst [vmem:[#allocation25_spill] sm:$0xff] %v8219_v63 }
 0x5f1   : > { %v3716_v36 = vrot.slane %v3715_v7, 4 }
 0x5f7   : > { %v6384_v15 = vpop.eup %6383 }
 0x5f8   : > { %6299 = vpush %v6384_v15  ;;  %v3709_v15 = vsel %vm6787_vm4, %v3707_v18, %v3708_v43  ;;  %v3720_v43 = vsel %vm8206_vm11, %v3716_v36, %v3719_v62  ;;  %v11059_v62 = vshll.u32 %v8219_v63, 16 }
 0x5f9   : > { %6301 = vpush %v2216_v58  ;;  %v3722_v58 = vshrl.u32 %v8181_v5, 16  ;;  %v5975_v26 = vcombine.low %v3706_v49, %v3709_v15  ;;  %v8217_v49 = vld [vmem:[#allocation2 + $0xd0] sm:$0xf] }
 0x5fa   : > { %11162 = vst [vmem:[#allocation24_spill] sm:$0xff] %v8217_v49  ;;  %v11058_v7 = vshll.u32 %v8217_v49, 16 }
 0x5fb   : > { %v3724_v48 = vrot.slane %v3722_v58, 5  ;;  %4137 = vrot.lane.b32.xlu1 %v5975_v26, %s6679_s29  ;;  %v4014_v26 = vrot.slane %v11059_v62, 5 }
 0x5fc   : > { %v4004_v36 = vrot.slane %v11058_v7, 5  ;;  %v5958_v7 = vrot.slane %v8215_v14, 9 }
 0x5fd   : > { %v3726_v56 = vor.u32 %v3725_v59, %v3724_v48  ;;  %v11060_v48 = vshrl.u32 %v8217_v49, 16 }
 0x5ff   : > { %v3727_v18 = vsel %vm8206_vm11, %v3721_v22, %v3726_v56  ;;  %v3995_v56 = vrot.slane %v11057_v33, 4  ;;  %v3998_v22 = vrot.slane %v11056_v25, 5  ;;  %v4008_v15 = vrot.slane %v11060_v48, 4 }
 0x600   : > { %v5991_v31 = vcombine.low %v3720_v43, %v3727_v18 }
 0x601   : > { %v3999_v58 = vor.u32 %v3998_v22, %v3995_v56  ;;  %v4009_v59 = vor.u32 %v4008_v15, %v4004_v36  ;;  %v4021_v56 = vrot.slane %v8217_v49, 5  ;;  %v4024_v22 = vrot.slane %v8219_v63, 5 }
 0x602   : > { %4217 = vrot.lane.b32.xlu1 %v5991_v31, %s6681_s11 }
 0x603   : > { %v4000_v43 = vrot.slane %v3999_v58, 4  ;;  %v4010_v18 = vrot.slane %v4009_v59, 4  ;;  %v4022_v15 = vsel %vm6787_vm4, %v5958_v7, %v4021_v56  ;;  %v4023_v58 = vrot.slane %v4021_v56, 4 }
 0x604   : > { %v2183_v59 = vstv %s8133_s24 }
 0x605   : > { %v4005_v31 = vsel %vm6816_vm5, %v4000_v43, %v4004_v36  ;;  %v4015_v25 = vsel %vm6816_vm5, %v4010_v18, %v4014_v26  ;;  %v4025_v36 = vsel %vm6787_vm4, %v4023_v58, %v4024_v22  ;;  %v2161_v43 = vstv %s8131_s15 }
 0x606   : > { %v6010_v33 = vcombine.low %v4005_v31, %v4015_v25  ;;  %v6011_v25 = vcombine.low %v4022_v15, %v4025_v36  ;;  %v2226_v26 = vsel %vm11088_vm1, %v2161_v43, %v2183_v59  ;;  %v11164_v31 = vmov 0   ;;  %v268_v15 = vld [vmem:[%s11038_s5 + $0x1] sm:$0x1] }
 0x607   : > { %2827 = vst.msk [vmem:[#allocation2 + $0x20] sm:$0x2] %vm2825_vm13, %v11164_v31  ;;  %2826 = vst.msk [vmem:[#allocation2 + $0x14] sm:$0x2] %vm2825_vm13, %v11164_v31 }
 0x608   : > { %4387 = vrot.lane.b32.xlu1 %v6010_v33, %s6689_s28  ;;  %2828 = vst.msk [vmem:[#allocation2 + $0x2c] sm:$0x2] %vm2825_vm13, %v11164_v31  ;;  %2829 = vst.msk [vmem:[#allocation2 + $0x38] sm:$0x2] %vm2825_vm13, %v11164_v31 }
 0x609   : > { %2830 = vst.msk [vmem:[#allocation2 + $0x44] sm:$0x2] %vm2825_vm13, %v11164_v31  ;;  %2831 = vst.msk [vmem:[#allocation2 + $0x50] sm:$0x2] %vm2825_vm13, %v11164_v31 }
 0x60a   : > { %2832 = vst.msk [vmem:[#allocation2 + $0x5c] sm:$0x2] %vm2825_vm13, %v11164_v31  ;;  %2833 = vst.msk [vmem:[#allocation2 + $0x68] sm:$0x2] %vm2825_vm13, %v11164_v31 }
 0x60b   : > { %2834 = vst.msk [vmem:[#allocation2 + $0x74] sm:$0x2] %vm2825_vm13, %v11164_v31  ;;  %2835 = vst.msk [vmem:[#allocation2 + $0x80] sm:$0x2] %vm2825_vm13, %v11164_v31 }
 0x60c   : > { %4422 = vrot.lane.b32.xlu1 %v6011_v25, %s6690_s9  ;;  %2836 = vst.msk [vmem:[#allocation2 + $0x8c] sm:$0x2] %vm2825_vm13, %v11164_v31  ;;  %2837 = vst.msk [vmem:[#allocation2 + $0x98] sm:$0x2] %vm2825_vm13, %v11164_v31 }
 0x60d   : > { %2838 = vst.msk [vmem:[#allocation2 + $0xa4] sm:$0x2] %vm2825_vm13, %v11164_v31  ;;  %2839 = vst.msk [vmem:[#allocation2 + $0xb0] sm:$0x2] %vm2825_vm13, %v11164_v31 }
 0x60e   : > { %2840 = vst.msk [vmem:[#allocation2 + $0xbc] sm:$0x2] %vm2825_vm13, %v11164_v31  ;;  %2841 = vst.msk [vmem:[#allocation2 + $0xc8] sm:$0x2] %vm2825_vm13, %v11164_v31  ;;  %vm2923_vm13 = vcmask 1044484  }
 0x60f   : > { %vm8555_vm1 = vmor %vm2922_vm15, %vm2923_vm13 }
 0x629   : > { %s6300_s30 = spop %6299 }
 0x62a   : > { %v2204_v33 = vstv %s6300_s30  ;;  %s6302_s7 = spop %6301 }
 0x62b   : > { %v2227_v18 = vsel %vm1364_vm6, %v2226_v26, %v2204_v33  ;;  %s2220_s8 = smul.f32 0.001953125, %s6302_s7  ;;  %v8302_v33 = vld [vmem:[%s11038_s5 + $0x2] ss:$0 sm:$0xff] }
 0x62d   : > { %s2221_s10 = sadd.f32 1e-05, %s2220_s8  ;;  %s6692_s8 = smov 64  }
 0x62f   : > { %v2222_v7 = vstv %s2221_s10 }
 0x630   : > { %6385 = vrsqrt.f32 %v2222_v7 }
 0x63a   : > { %v6386_v56 = vpop.eup %6385 }
 0x63b   : > { %6303 = vpush %v6386_v56 }
 0x66c   : > { %s6304_s13 = spop %6303 }
 0x66d   : > { %v2225_v22 = vstv %s6304_s13 }
 0x66e   : > { %v2228_v58 = vsel %vm11087_vm2, %v2227_v18, %v2225_v22  ;;  %vm3053_vm2 = vcmask 60417  }
 0x66f   : > { %v2229_v59 = vmul.f32 %v2228_v58, %v268_v15 }
 0x671   : > { %v8291_v36 = vrot.slane %v2229_v59, %v7894_v40 }
 0x673   : > { %v2234_v43 = vmul.f32 %v8291_v36, %v7902_v41  ;;  %v2235_v25 = vmul.f32 %v8291_v36, %v7906_v52  ;;  %v2236_v26 = vmul.f32 %v8291_v36, %v7910_v12  ;;  %v2237_v18 = vmul.f32 %v8291_v36, %v7914_v45 }
 0x674   : > { %v2238_v7 = vmul.f32 %v8291_v36, %v7922_v32  ;;  %v2239_v41 = vmul.f32 %v8291_v36, %v7928_v55  ;;  %v2240_v52 = vmul.f32 %v8291_v36, %v7936_v28  ;;  %v2241_v45 = vmul.f32 %v8291_v36, %v7943_v8 }
 0x675   : > { %v8313_v31 = vadd.f32 %v8302_v33, %v2234_v43  ;;  %v8316_v12 = vadd.f32 %v8302_v33, %v2235_v25  ;;  %v8319_v56 = vadd.f32 %v8302_v33, %v2236_v26  ;;  %v8324_v32 = vadd.f32 %v8302_v33, %v2237_v18 }
 0x676   : > { %v2242_v55 = vmul.f32 %v8291_v36, %v7950_v20  ;;  %v8329_v28 = vadd.f32 %v8302_v33, %v2238_v7  ;;  %v2243_v22 = vmul.f32 %v8291_v36, %v7957_v46  ;;  %v2244_v15 = vmul.f32 %v8291_v36, %v7964_v1 }
 0x677   : > { %v8336_v58 = vadd.f32 %v8302_v33, %v2239_v41  ;;  %v8339_v8 = vadd.f32 %v8302_v33, %v2240_v52  ;;  %v5859_v59 = vmul.f32 -1.442695, %v8313_v31  ;;  %v5860_v43 = vmul.f32 -1.442695, %v8316_v12 }
 0x678   : > { %v5861_v20 = vmul.f32 -1.442695, %v8319_v56  ;;  %v2245_v25 = vmul.f32 %v8291_v36, %v7971_v29  ;;  %v8347_v46 = vadd.f32 %v8302_v33, %v2241_v45  ;;  %v5862_v1 = vmul.f32 -1.442695, %v8324_v32 }
 0x679   : > { %v2246_v26 = vmul.f32 %v8291_v36, %v7978_v3  ;;  %v8353_v18 = vadd.f32 %v8302_v33, %v2242_v55  ;;  %v5863_v7 = vmul.f32 -1.442695, %v8329_v28  ;;  %6387 = vpow2.f32 %v5859_v59 }
 0x67a   : > { %v2247_v41 = vmul.f32 %v8291_v36, %v7985_v60  ;;  %v8359_v52 = vadd.f32 %v8302_v33, %v2243_v22  ;;  %v5864_v29 = vmul.f32 -1.442695, %v8336_v58  ;;  %6389 = vpow2.f32 %v5860_v43 }
 0x67b   : > { %v2248_v45 = vmul.f32 %v8291_v36, %v7992_v6  ;;  %v8365_v3 = vadd.f32 %v8302_v33, %v2244_v15  ;;  %v5865_v55 = vmul.f32 -1.442695, %v8339_v8  ;;  %6391 = vpow2.f32 %v5861_v20 }
 0x67c   : > { %v2249_v59 = vmul.f32 %v8291_v36, %v7999_v9  ;;  %v8371_v60 = vadd.f32 %v8302_v33, %v2245_v25  ;;  %v5866_v22 = vmul.f32 -1.442695, %v8347_v46  ;;  %6393 = vpow2.f32 %v5862_v1 }
 0x67d   : > { %v2250_v43 = vmul.f32 %v8291_v36, %v8006_v11  ;;  %v8377_v6 = vadd.f32 %v8302_v33, %v2246_v26  ;;  %v5867_v15 = vmul.f32 -1.442695, %v8353_v18  ;;  %6395 = vpow2.f32 %v5863_v7 }
 0x67e   : > { %v2251_v20 = vmul.f32 %v8291_v36, %v8013_v13  ;;  %v8383_v9 = vadd.f32 %v8302_v33, %v2247_v41  ;;  %v5868_v25 = vmul.f32 -1.442695, %v8359_v52  ;;  %6397 = vpow2.f32 %v5864_v29 }
 0x67f   : > { %v2252_v1 = vmul.f32 %v8291_v36, %v8020_v17  ;;  %v8389_v11 = vadd.f32 %v8302_v33, %v2248_v45  ;;  %v5869_v26 = vmul.f32 -1.442695, %v8365_v3  ;;  %6399 = vpow2.f32 %v5865_v55 }
 0x680   : > { %v2253_v7 = vmul.f32 %v8291_v36, %v8027_v44  ;;  %v8395_v13 = vadd.f32 %v8302_v33, %v2249_v59  ;;  %v5870_v41 = vmul.f32 -1.442695, %v8371_v60  ;;  %6401 = vpow2.f32 %v5866_v22 }
 0x681   : > { %v2254_v29 = vmul.f32 %v8291_v36, %v8034_v16  ;;  %v8401_v17 = vadd.f32 %v8302_v33, %v2250_v43  ;;  %v5871_v45 = vmul.f32 -1.442695, %v8377_v6  ;;  %6403 = vpow2.f32 %v5867_v15 }
 0x682   : > { %v2255_v55 = vmul.f32 %v8291_v36, %v8041_v10  ;;  %v8407_v44 = vadd.f32 %v8302_v33, %v2251_v20  ;;  %v5872_v59 = vmul.f32 -1.442695, %v8383_v9  ;;  %6405 = vpow2.f32 %v5868_v25 }
 0x683   : > { %v8410_v62 = vpop.eup %6387  ;;  %v2256_v16 = vmul.f32 %v8291_v36, %v8048_v37  ;;  %v8415_v22 = vadd.f32 %v8302_v33, %v2252_v1  ;;  %v5873_v43 = vmul.f32 -1.442695, %v8389_v11  ;;  %6407 = vpow2.f32 %v5869_v26 }
 0x684   : > { %v8418_v15 = vpop.eup %6389  ;;  %v2257_v10 = vmul.f32 %v8291_v36, %v8055_v2  ;;  %v8423_v20 = vadd.f32 %v8302_v33, %v2253_v7  ;;  %v5874_v25 = vmul.f32 -1.442695, %v8395_v13  ;;  %6409 = vpow2.f32 %v5870_v41 }
 0x685   : > { %v8426_v48 = vpop.eup %6391  ;;  %v2258_v37 = vmul.f32 %v8291_v36, %v8062_v42  ;;  %v8431_v1 = vadd.f32 %v8302_v33, %v2254_v29  ;;  %v5875_v26 = vmul.f32 -1.442695, %v8401_v17  ;;  %6411 = vpow2.f32 %v5871_v45 }
 0x686   : > { %v8434_v40 = vpop.eup %6393  ;;  %v2259_v2 = vmul.f32 %v8291_v36, %v8069_v61  ;;  %v8439_v7 = vadd.f32 %v8302_v33, %v2255_v55  ;;  %v5876_v41 = vmul.f32 -1.442695, %v8407_v44  ;;  %6413 = vpow2.f32 %v5872_v59 }
 0x687   : > { %v8442_v63 = vpop.eup %6395  ;;  %v2260_v42 = vmul.f32 %v8291_v36, %v8076_v23  ;;  %v8447_v29 = vadd.f32 %v8302_v33, %v2256_v16  ;;  %v5877_v45 = vmul.f32 -1.442695, %v8415_v22  ;;  %6415 = vpow2.f32 %v5873_v43 }
 0x688   : > { %v8450_v49 = vpop.eup %6397  ;;  %v2261_v61 = vmul.f32 %v8291_v36, %v8083_v47  ;;  %v8455_v55 = vadd.f32 %v8302_v33, %v2257_v10  ;;  %v5878_v59 = vmul.f32 -1.442695, %v8423_v20  ;;  %6417 = vpow2.f32 %v5874_v25 }
 0x689   : > { %v8458_v14 = vpop.eup %6399  ;;  %v2262_v23 = vmul.f32 %v8291_v36, %v8090_v57  ;;  %v8463_v16 = vadd.f32 %v8302_v33, %v2258_v37  ;;  %v5879_v43 = vmul.f32 -1.442695, %v8431_v1  ;;  %6419 = vpow2.f32 %v5875_v26 }
 0x68a   : > { %v8466_v5 = vpop.eup %6401  ;;  %v2263_v47 = vmul.f32 %v8291_v36, %v8097_v0  ;;  %v8471_v10 = vadd.f32 %v8302_v33, %v2259_v2  ;;  %v5880_v25 = vmul.f32 -1.442695, %v8439_v7  ;;  %6421 = vpow2.f32 %v5876_v41 }
 0x68b   : > { %v6404_v30 = vpop.eup %6403  ;;  %v2264_v57 = vmul.f32 %v8291_v36, %v8104_v4  ;;  %v8477_v37 = vadd.f32 %v8302_v33, %v2260_v42  ;;  %v5881_v26 = vmul.f32 -1.442695, %v8447_v29  ;;  %6423 = vpow2.f32 %v5877_v45 }
 0x68c   : > { %v6406_v24 = vpop.eup %6405  ;;  %v2265_v0 = vmul.f32 %v8291_v36, %v8111_v34  ;;  %v8483_v2 = vadd.f32 %v8302_v33, %v2261_v61  ;;  %v5882_v50 = vmul.f32 -1.442695, %v8455_v55  ;;  %6425 = vpow2.f32 %v5878_v59 }
 0x68d   : > { %v6408_v41 = vpop.eup %6407  ;;  %v8487_v51 = vadd.f32 %v8302_v33, %v2262_v23  ;;  %v5883_v4 = vmul.f32 -1.442695, %v8463_v16  ;;  %6427 = vpow2.f32 %v5879_v43  ;;  %v8491_v45 = vadd.f32 %v8302_v33, %v2263_v47 }
 0x68e   : > { %11165 = vst [vmem:[#allocation26_spill] sm:$0xff] %v8483_v2  ;;  %v6410_v42 = vpop.eup %6409  ;;  %v5884_v39 = vmul.f32 -1.442695, %v8471_v10  ;;  %6429 = vpow2.f32 %v5880_v25  ;;  %v8495_v36 = vadd.f32 %v8302_v33, %v2264_v57  ;;  %v5885_v61 = vmul.f32 -1.442695, %v8477_v37 }
 0x68f   : > { %11166 = vst [vmem:[#allocation27_spill] sm:$0xff] %v8487_v51  ;;  %11167 = vst [vmem:[#allocation28_spill] sm:$0xff] %v8491_v45  ;;  %v6412_v34 = vpop.eup %6411  ;;  %6431 = vpow2.f32 %v5881_v26  ;;  %v8499_v23 = vadd.f32 %v8302_v33, %v2265_v0  ;;  %v5886_v43 = vmul.f32 -1.442695, %v8483_v2  ;;  %v5887_v47 = vmul.f32 -1.442695, %v8487_v51 }
 0x690   : > { %11168 = vst [vmem:[#allocation29_spill] sm:$0xff] %v8495_v36  ;;  %v6414_v59 = vpop.eup %6413  ;;  %6433 = vpow2.f32 %v5882_v50  ;;  %v5888_v25 = vmul.f32 -1.442695, %v8491_v45  ;;  %v5889_v35 = vmul.f32 -1.442695, %v8495_v36  ;;  %v2400_v50 = vadd.f32 1.0, %v8426_v48 }
 0x691   : > { %11169 = vst [vmem:[#allocation30_spill] sm:$0xff] %v8499_v23  ;;  %v6416_v53 = vpop.eup %6415  ;;  %6435 = vpow2.f32 %v5883_v4  ;;  %v5890_v19 = vmul.f32 -1.442695, %v8499_v23  ;;  %v2401_v4 = vadd.f32 1.0, %v8434_v40  ;;  %v2402_v23 = vadd.f32 1.0, %v8442_v63 }
 0x692   : > { %v6418_v27 = vpop.eup %6417  ;;  %6437 = vpow2.f32 %v5884_v39  ;;  %v2398_v39 = vadd.f32 1.0, %v8410_v62  ;;  %v2406_v62 = vadd.f32 1.0, %v6404_v30  ;;  %v2407_v45 = vadd.f32 1.0, %v6406_v24 }
 0x693   : > { %v6420_v57 = vpop.eup %6419  ;;  %6439 = vpow2.f32 %v5885_v61  ;;  %v2399_v61 = vadd.f32 1.0, %v8418_v15  ;;  %v2408_v63 = vadd.f32 1.0, %v6408_v41  ;;  %v2409_v51 = vadd.f32 1.0, %v6410_v42 }
 0x694   : > { %v6422_v26 = vpop.eup %6421  ;;  %6441 = vpow2.f32 %v5886_v43  ;;  %v2414_v30 = vadd.f32 1.0, %v6420_v57 }
 0x695   : > { %v6424_v33 = vpop.eup %6423  ;;  %6443 = vpow2.f32 %v5887_v47  ;;  %v2403_v47 = vadd.f32 1.0, %v8450_v49  ;;  %v2410_v49 = vadd.f32 1.0, %v6412_v34  ;;  %v2415_v24 = vadd.f32 1.0, %v6422_v26 }
 0x696   : > { %v6426_v0 = vpop.eup %6425  ;;  %6445 = vpow2.f32 %v5888_v25  ;;  %v2404_v25 = vadd.f32 1.0, %v8458_v14  ;;  %v2413_v14 = vadd.f32 1.0, %v6418_v27  ;;  %v2416_v41 = vadd.f32 1.0, %v6424_v33 }
 0x697   : > { %v6428_v54 = vpop.eup %6427  ;;  %6447 = vpow2.f32 %v5889_v35  ;;  %v2405_v35 = vadd.f32 1.0, %v8466_v5  ;;  %v2412_v5 = vadd.f32 1.0, %v6416_v53 }
 0x698   : > { %v6430_v38 = vpop.eup %6429  ;;  %6449 = vpow2.f32 %v5890_v19  ;;  %v2418_v34 = vadd.f32 1.0, %v6428_v54 }
 0x699   : > { %v6432_v36 = vpop.eup %6431  ;;  %6451 = vrcp.f32 %v2400_v50 }
 0x69a   : > { %v6434_v43 = vpop.eup %6433  ;;  %6453 = vrcp.f32 %v2401_v4  ;;  %v2411_v4 = vadd.f32 1.0, %v6414_v59  ;;  %v8518_v59 = vadd.f32 1.0, %v6430_v38 }
 0x69b   : > { %v6436_v48 = vpop.eup %6435  ;;  %6455 = vrcp.f32 %v2398_v39  ;;  %v2417_v39 = vadd.f32 1.0, %v6426_v0  ;;  %v8524_v53 = vadd.f32 1.0, %v6434_v43 }
 0x69c   : > { %v6438_v40 = vpop.eup %6437  ;;  %6457 = vrcp.f32 %v2399_v61  ;;  %v8520_v61 = vadd.f32 1.0, %v6432_v36  ;;  %v8526_v27 = vadd.f32 1.0, %v6436_v48 }
 0x69d   : > { %v6440_v19 = vpop.eup %6439  ;;  %6459 = vrcp.f32 %v2402_v23  ;;  %v8528_v57 = vadd.f32 1.0, %v6438_v40 }
 0x69e   : > { %v6442_v15 = vpop.eup %6441  ;;  %6461 = vrcp.f32 %v2403_v47  ;;  %v8530_v33 = vadd.f32 1.0, %v6440_v19 }
 0x69f   : > { %v6444_v50 = vpop.eup %6443  ;;  %6463 = vrcp.f32 %v2404_v25  ;;  %v8522_v25 = vld [vmem:[%s260_s26] ss:$0 sm:$0xff]  ;;  %v8532_v0 = vadd.f32 1.0, %v6442_v15 }
 0x6a0   : > { %v6446_v2 = vpop.eup %6445  ;;  %6465 = vrcp.f32 %v2405_v35 }
 0x6a1   : > { %v6448_v23 = vpop.eup %6447  ;;  %6467 = vrcp.f32 %v2406_v62  ;;  %v8537_v36 = vadd.f32 1.0, %v6446_v2 }
 0x6a2   : > { %v6450_v42 = vpop.eup %6449  ;;  %6469 = vrcp.f32 %v2407_v45  ;;  %v8535_v45 = vadd.f32 1.0, %v6444_v50  ;;  %v8540_v40 = vadd.f32 1.0, %v6448_v23 }
 0x6a3   : > { %v6452_v47 = vpop.eup %6451  ;;  %6471 = vrcp.f32 %v2408_v63  ;;  %v8544_v15 = vadd.f32 1.0, %v6450_v42 }
 0x6a4   : > { %v6454_v26 = vpop.eup %6453  ;;  %v2496_v54 = vmul.f32 %v6452_v47, %v8319_v56  ;;  %6473 = vrcp.f32 %v2409_v51 }
 0x6a5   : > { %v6456_v38 = vpop.eup %6455  ;;  %v2497_v43 = vmul.f32 %v6454_v26, %v8324_v32  ;;  %6475 = vrcp.f32 %v2410_v49 }
 0x6a6   : > { %v6458_v48 = vpop.eup %6457  ;;  %v2752_v35 = vadd.f32 %v8522_v25, %v2496_v54  ;;  %6477 = vrcp.f32 %v2411_v4  ;;  %v2494_v19 = vmul.f32 %v6456_v38, %v8313_v31 }
 0x6a7   : > { %v6460_v62 = vpop.eup %6459  ;;  %v2753_v51 = vadd.f32 %v8522_v25, %v2497_v43  ;;  %6479 = vrcp.f32 %v2412_v5  ;;  %v2495_v56 = vmul.f32 %v6458_v48, %v8316_v12 }
 0x6a8   : > { %v6462_v2 = vpop.eup %6461  ;;  %v6073_v63 = vpack.c.bf16 %v2752_v35, %v2752_v35  ;;  %6481 = vrcp.f32 %v2413_v14  ;;  %v2750_v32 = vadd.f32 %v8522_v25, %v2494_v19  ;;  %v2498_v50 = vmul.f32 %v6460_v62, %v8329_v28 }
 0x6a9   : > { %v6464_v49 = vpop.eup %6463  ;;  %v6074_v23 = vpack.c.bf16 %v2753_v51, %v2753_v51  ;;  %6483 = vrcp.f32 %v2414_v30  ;;  %v2751_v31 = vadd.f32 %v8522_v25, %v2495_v56  ;;  %v2499_v4 = vmul.f32 %v6462_v2, %v8336_v58 }
 0x6aa   : > { %v6466_v42 = vpop.eup %6465  ;;  %v2930_v47 = vrot.slane %v6073_v63, 7  ;;  %6485 = vrcp.f32 %v2415_v24  ;;  %v6071_v5 = vpack.c.bf16 %v2750_v32, %v2750_v32  ;;  %v2500_v12 = vmul.f32 %v6464_v49, %v8339_v8 }
 0x6ab   : > { %v6468_v26 = vpop.eup %6467  ;;  %v2932_v28 = vrot.slane %v6074_v23, 7  ;;  %6487 = vrcp.f32 %v2416_v41  ;;  %v6072_v30 = vpack.c.bf16 %v2751_v31, %v2751_v31  ;;  %v2501_v54 = vmul.f32 %v6466_v42, %v8347_v46 }
 0x6ac   : > { %v6470_v38 = vpop.eup %6469  ;;  %v2931_v58 = vrot.slane %v2930_v47, 4  ;;  %3057 = vst.msk [vmem:[#allocation2 + $0x18] sm:$0xe] %vm3053_vm2, %v2930_v47  ;;  %6489 = vrcp.f32 %v2417_v39  ;;  %v2925_v24 = vrot.slane %v6071_v5, 7  ;;  %v2502_v8 = vmul.f32 %v6468_v26, %v8353_v18 }
 0x6ad   : > { %v6472_v43 = vpop.eup %6471  ;;  %v2934_v48 = vrot.slane %v2932_v28, 4  ;;  %6491 = vrcp.f32 %v2418_v34  ;;  %v2927_v35 = vrot.slane %v6072_v30, 7  ;;  %v2503_v19 = vmul.f32 %v6470_v38, %v8359_v52 }
 0x6ae   : > { %v6474_v62 = vpop.eup %6473  ;;  %v2933_v41 = vsel %vm8555_vm1, %v2931_v58, %v2932_v28  ;;  %6493 = vrcp.f32 %v8518_v59  ;;  %v2926_v46 = vrot.slane %v2925_v24, 4  ;;  %3054 = vst.msk [vmem:[#allocation2 + $0xc] sm:$0xe] %vm3053_vm2, %v2925_v24  ;;  %v2504_v39 = vmul.f32 %v6472_v43, %v8365_v3 }
 0x6af   : > { %v6476_v51 = vpop.eup %6475  ;;  %3058 = vst.msk [vmem:[#allocation2 + $0x1c] sm:$0xf] %vm2798_vm3, %v2933_v41  ;;  %6495 = vrcp.f32 %v8520_v61  ;;  %v2929_v18 = vrot.slane %v2927_v35, 4  ;;  %v8572_v52 = vmul.f32 %v6474_v62, %v8371_v60  ;;  %v2754_v34 = vadd.f32 %v8522_v25, %v2498_v50 }
 0x6b0   : > { %3059 = vst.msk [vmem:[#allocation2 + $0x20] sm:$0x1] %vm2808_vm9, %v2934_v48  ;;  %v6478_v56 = vpop.eup %6477  ;;  %6497 = vrcp.f32 %v8524_v53  ;;  %v2928_v59 = vsel %vm8555_vm1, %v2926_v46, %v2927_v35  ;;  %v2506_v3 = vmul.f32 %v6476_v51, %v8377_v6  ;;  %v2755_v2 = vadd.f32 %v8522_v25, %v2499_v4 }
 0x6b1   : > { %v6480_v63 = vpop.eup %6479  ;;  %6499 = vrcp.f32 %v8526_v27  ;;  %3055 = vst.msk [vmem:[#allocation2 + $0x10] sm:$0xf] %vm2798_vm3, %v2928_v59  ;;  %v8584_v60 = vmul.f32 %v6478_v56, %v8383_v9  ;;  %v6075_v61 = vpack.c.bf16 %v2754_v34, %v2754_v34  ;;  %v8587_v53 = vadd.f32 %v8522_v25, %v2500_v12 }
 0x6b2   : > { %3056 = vst.msk [vmem:[#allocation2 + $0x14] sm:$0x1] %vm2808_vm9, %v2929_v18  ;;  %v6482_v32 = vpop.eup %6481  ;;  %6501 = vrcp.f32 %v8528_v57  ;;  %v2508_v6 = vmul.f32 %v6480_v63, %v8389_v11  ;;  %v6076_v50 = vpack.c.bf16 %v2755_v2, %v2755_v2  ;;  %v8592_v49 = vadd.f32 %v8522_v25, %v2501_v54 }
 0x6b3   : > { %v6484_v27 = vpop.eup %6483  ;;  %v8594_v23 = vld [vmem:[#allocation2 + $0x18] sm:$0xf]  ;;  %6503 = vrcp.f32 %v8530_v33  ;;  %v2509_v9 = vmul.f32 %v6482_v32, %v8395_v13  ;;  %v2935_v31 = vrot.slane %v6075_v61, 7  ;;  %v8599_v4 = vadd.f32 %v8522_v25, %v2502_v8 }
 0x6b4   : > { %v6486_v42 = vpop.eup %6485  ;;  %v5942_v57 = vrot.slane %v8594_v23, 9  ;;  %6505 = vrcp.f32 %v8532_v0  ;;  %v2510_v11 = vmul.f32 %v6484_v27, %v8401_v17  ;;  %v2937_v47 = vrot.slane %v6076_v50, 7 }
 0x6b5   : > { %v6488_v5 = vpop.eup %6487  ;;  %6507 = vrcp.f32 %v8535_v45  ;;  %v8605_v12 = vld [vmem:[#allocation2 + $0xc] sm:$0xf]  ;;  %v2511_v33 = vmul.f32 %v6486_v42, %v8407_v44  ;;  %v2936_v13 = vrot.slane %v2935_v31, 4  ;;  %3060 = vst.msk [vmem:[#allocation2 + $0x24] sm:$0xe] %vm3053_vm2, %v2935_v31  ;;  %v8610_v26 = vadd.f32 %v8522_v25, %v2503_v19 }
 0x6b6   : > { %v6490_v28 = vpop.eup %6489  ;;  %v8612_v30 = vld [vmem:[#allocation2 + $0x1c] sm:$0xf]  ;;  %6509 = vrcp.f32 %v8537_v36  ;;  %v5941_v17 = vrot.slane %v8605_v12, 9  ;;  %v2512_v45 = vmul.f32 %v6488_v5, %v8415_v22  ;;  %v2939_v54 = vrot.slane %v2937_v47, 4 }
 0x6b7   : > { %v8614_v0 = vld [vmem:[#allocation2 + $0x20] sm:$0x3]  ;;  %v6492_v38 = vpop.eup %6491  ;;  %v3213_v44 = vrot.slane %v8612_v30, 5  ;;  %6511 = vrcp.f32 %v8540_v40  ;;  %v2513_v24 = vmul.f32 %v6490_v28, %v8423_v20  ;;  %v2938_v22 = vsel %vm8555_vm1, %v2936_v13, %v2937_v47 }
 0x6b8   : > { %v3216_v58 = vrot.slane %v8614_v0, 5  ;;  %v6494_v8 = vpop.eup %6493  ;;  %6513 = vrcp.f32 %v8544_v15  ;;  %v8624_v43 = vld [vmem:[#allocation2 + $0x10] sm:$0xf]  ;;  %v2514_v48 = vmul.f32 %v6492_v38, %v8431_v1  ;;  %3062 = vst.msk [vmem:[#allocation2 + $0x2c] sm:$0x1] %vm2808_vm9, %v2939_v54  ;;  %v8633_v35 = vadd.f32 %v8522_v25, %v2504_v39 }
 0x6b9   : > { %v8626_v36 = vld [vmem:[#allocation2 + $0x14] sm:$0x3]  ;;  %v6496_v40 = vpop.eup %6495  ;;  %v3214_v20 = vsel %vm6787_vm4, %v5942_v57, %v3213_v44  ;;  %v3215_v19 = vrot.slane %v3213_v44, 4  ;;  %v3206_v15 = vrot.slane %v8624_v43, 5  ;;  %3061 = vst.msk [vmem:[#allocation2 + $0x28] sm:$0xf] %vm2798_vm3, %v2938_v22  ;;  %v2515_v41 = vmul.f32 %v6494_v8, %v8439_v7 }
 0x6ba   : > { %v3209_v62 = vrot.slane %v8626_v36, 5  ;;  %v6498_v1 = vpop.eup %6497  ;;  %v2516_v46 = vmul.f32 %v6496_v40, %v8447_v29  ;;  %v8644_v39 = vadd.f32 %v8522_v25, %v8572_v52  ;;  %v8647_v51 = vadd.f32 %v8522_v25, %v2506_v3 }
 0x6bb   : > { %v6500_v18 = vpop.eup %6499  ;;  %v3217_v34 = vsel %vm6787_vm4, %v3215_v19, %v3216_v58  ;;  %v3207_v56 = vsel %vm6787_vm4, %v5941_v17, %v3206_v15  ;;  %v3208_v59 = vrot.slane %v3206_v15, 4  ;;  %v2517_v2 = vmul.f32 %v6498_v1, %v8455_v55  ;;  %v11175_v19 = vld [vmem:[#allocation29_spill] sm:$0xff] }
 0x6bc   : > { %v6502_v7 = vpop.eup %6501  ;;  %v8654_v63 = vcombine.low %v3214_v20, %v3217_v34  ;;  %v2518_v29 = vmul.f32 %v6500_v18, %v8463_v16  ;;  %v8657_v52 = vld [vmem:[#allocation2 + $0x24] sm:$0xf]  ;;  %v8661_v3 = vadd.f32 %v8522_v25, %v8584_v60  ;;  %v8664_v61 = vadd.f32 %v8522_v25, %v2508_v6 }
 0x6bd   : > { %v6504_v32 = vpop.eup %6503  ;;  %v3210_v50 = vsel %vm6787_vm4, %v3208_v59, %v3209_v62  ;;  %v2519_v55 = vmul.f32 %v6502_v7, %v8471_v10  ;;  %v5943_v27 = vrot.slane %v8657_v52, 9  ;;  %v8671_v31 = vadd.f32 %v8522_v25, %v2509_v9  ;;  %v11172_v10 = vld [vmem:[#allocation26_spill] sm:$0xff] }
 0x6be   : > { %v6506_v16 = vpop.eup %6505  ;;  %4289 = vrot.lane.b32.xlu1 %v8654_v63, %s6684_s14  ;;  %v5976_v60 = vcombine.low %v3207_v56, %v3210_v50  ;;  %v2520_v42 = vmul.f32 %v6504_v32, %v8477_v37  ;;  %v8677_v6 = vadd.f32 %v8522_v25, %v2510_v11  ;;  %v8680_v57 = vadd.f32 %v8522_v25, %v2511_v33  ;;  %v11173_v11 = vld [vmem:[#allocation27_spill] sm:$0xff] }
 0x6bf   : > { %v6508_v47 = vpop.eup %6507  ;;  %v2521_v5 = vmul.f32 %v6506_v16, %v11172_v10  ;;  %v8683_v13 = vld [vmem:[#allocation2 + $0x2c] sm:$0x3]  ;;  %v8686_v9 = vadd.f32 %v8522_v25, %v2512_v45  ;;  %v8689_v28 = vadd.f32 %v8522_v25, %v2513_v24  ;;  %v8692_v17 = vadd.f32 %v8522_v25, %v2514_v48  ;;  %v11174_v24 = vld [vmem:[#allocation28_spill] sm:$0xff] }
 0x6c0   : > { %v6510_v37 = vpop.eup %6509  ;;  %4139 = vrot.lane.b32.xlu0 %v5976_v60, %s6679_s29  ;;  %v2522_v33 = vmul.f32 %v6508_v47, %v11173_v11  ;;  %v8696_v54 = vld [vmem:[#allocation2 + $0x28] sm:$0xf]  ;;  %v3223_v38 = vrot.slane %v8683_v13, 5  ;;  %v8700_v44 = vadd.f32 %v8522_v25, %v2515_v41  ;;  %v8703_v45 = vadd.f32 %v8522_v25, %v2516_v46  ;;  %v11176_v46 = vld [vmem:[#allocation30_spill] sm:$0xff] }
 0x6c1   : > { %v6512_v58 = vpop.eup %6511  ;;  %v2523_v8 = vmul.f32 %v6510_v37, %v11174_v24  ;;  %v3220_v48 = vrot.slane %v8696_v54, 5  ;;  %v8708_v22 = vadd.f32 %v8522_v25, %v2517_v2  ;;  %v8711_v40 = vadd.f32 %v8522_v25, %v2518_v29 }
 0x6c2   : > { %v6514_v20 = vpop.eup %6513  ;;  %v2524_v15 = vmul.f32 %v6512_v58, %v11175_v19  ;;  %v8715_v62 = vadd.f32 %v8522_v25, %v2519_v55  ;;  %v8718_v1 = vadd.f32 %v8522_v25, %v2520_v42  ;;  %v8721_v41 = vadd.f32 %v8522_v25, %v2521_v5 }
 0x6c3   : > { %v2525_v18 = vmul.f32 %v6514_v20, %v11176_v46  ;;  %v3221_v34 = vsel %vm6787_vm4, %v5943_v27, %v3220_v48  ;;  %v3222_v56 = vrot.slane %v3220_v48, 4  ;;  %v8727_v59 = vadd.f32 %v8522_v25, %v2522_v33 }
 0x6c4   : > { %v8730_v2 = vadd.f32 %v8522_v25, %v2523_v8  ;;  %v8733_v7 = vadd.f32 %v8522_v25, %v2524_v15  ;;  %4287 = vrot.lane.b32.xlu0 %v5976_v60, %s6684_s14  ;;  %v6077_v29 = vpack.c.bf16 %v8587_v53, %v8587_v53  ;;  %v6078_v32 = vpack.c.bf16 %v8592_v49, %v8592_v49 }
 0x6c5   : > { %v3224_v50 = vsel %vm6787_vm4, %v3222_v56, %v3223_v38  ;;  %v8743_v55 = vadd.f32 %v8522_v25, %v2525_v18  ;;  %v6079_v27 = vpack.c.bf16 %v8599_v4, %v8599_v4  ;;  %v6080_v16 = vpack.c.bf16 %v8610_v26, %v8610_v26 }
 0x6c6   : > { %v5978_v42 = vcombine.low %v3221_v34, %v3224_v50  ;;  %v6081_v60 = vpack.c.bf16 %v8633_v35, %v8633_v35  ;;  %v6082_v53 = vpack.c.bf16 %v8644_v39, %v8644_v39  ;;  %v6083_v49 = vpack.c.bf16 %v8647_v51, %v8647_v51 }
 0x6c7   : > { %v6084_v25 = vpack.c.bf16 %v8661_v3, %v8661_v3  ;;  %v6085_v47 = vpack.c.bf16 %v8664_v61, %v8664_v61  ;;  %v6086_v4 = vpack.c.bf16 %v8671_v31, %v8671_v31  ;;  %v6087_v26 = vpack.c.bf16 %v8677_v6, %v8677_v6 }
 0x6c8   : > { %4394 = vrot.lane.b32.xlu1 %v5978_v42, %s6690_s9  ;;  %v6088_v35 = vpack.c.bf16 %v8680_v57, %v8680_v57  ;;  %v6089_v39 = vpack.c.bf16 %v8686_v9, %v8686_v9  ;;  %v6090_v51 = vpack.c.bf16 %v8689_v28, %v8689_v28  ;;  %v6091_v3 = vpack.c.bf16 %v8692_v17, %v8692_v17 }
 0x6c9   : > { %v6092_v61 = vpack.c.bf16 %v8700_v44, %v8700_v44  ;;  %v6093_v31 = vpack.c.bf16 %v8703_v45, %v8703_v45  ;;  %v6094_v6 = vpack.c.bf16 %v8708_v22, %v8708_v22  ;;  %v6095_v57 = vpack.c.bf16 %v8711_v40, %v8711_v40  ;;  %4392 = vrot.lane.b32.xlu0 %v8654_v63, %s6690_s9 }
 0x6ca   : > { %v6096_v10 = vpack.c.bf16 %v8715_v62, %v8715_v62  ;;  %v6097_v5 = vpack.c.bf16 %v8718_v1, %v8718_v1  ;;  %v6098_v9 = vpack.c.bf16 %v8721_v41, %v8721_v41  ;;  %v6099_v28 = vpack.c.bf16 %v8727_v59, %v8727_v59 }
 0x6cb   : > { %v6100_v17 = vpack.c.bf16 %v8730_v2, %v8730_v2  ;;  %v6101_v37 = vpack.c.bf16 %v8733_v7, %v8733_v7  ;;  %v6102_v11 = vpack.c.bf16 %v8743_v55, %v8743_v55  ;;  %v8796_v33 = vrot.slane %v6077_v29, 7 }
 0x6cc   : > { %4141 = vrot.lane.b32.xlu1 %v8654_v63, %s6679_s29  ;;  %v8800_v38 = vrot.slane %v6078_v32, 7  ;;  %v8802_v44 = vrot.slane %v6079_v27, 7  ;;  %v8804_v45 = vrot.slane %v6080_v16, 7  ;;  %v8806_v58 = vrot.slane %v6081_v60, 7 }
 0x6cd   : > { %v8808_v24 = vrot.slane %v6082_v53, 7  ;;  %v8810_v8 = vrot.slane %v6083_v49, 7  ;;  %v8812_v48 = vrot.slane %v6084_v25, 7  ;;  %v8814_v22 = vrot.slane %v6085_v47, 7  ;;  %3063 = vst.msk [vmem:[#allocation2 + $0x30] sm:$0xe] %vm3053_vm2, %v8796_v33  ;;  %4291 = vrot.lane.b32.xlu0 %v5978_v42, %s6684_s14 }
 0x6ce   : > { %v8819_v63 = vrot.slane %v6086_v4, 7  ;;  %v8821_v40 = vrot.slane %v6087_v26, 7  ;;  %v8823_v20 = vrot.slane %v6088_v35, 7  ;;  %v8825_v19 = vrot.slane %v6089_v39, 7  ;;  %3066 = vst.msk [vmem:[#allocation2 + $0x3c] sm:$0xe] %vm3053_vm2, %v8802_v44 }
 0x6cf   : > { %3069 = vst.msk [vmem:[#allocation2 + $0x48] sm:$0xe] %vm3053_vm2, %v8806_v58  ;;  %v8831_v15 = vrot.slane %v6090_v51, 7  ;;  %v8833_v62 = vrot.slane %v6091_v3, 7  ;;  %v8835_v1 = vrot.slane %v6092_v61, 7  ;;  %v8837_v41 = vrot.slane %v6093_v31, 7 }
 0x6d0   : > { %3072 = vst.msk [vmem:[#allocation2 + $0x54] sm:$0xe] %vm3053_vm2, %v8810_v8  ;;  %3075 = vst.msk [vmem:[#allocation2 + $0x60] sm:$0xe] %vm3053_vm2, %v8814_v22  ;;  %v8843_v46 = vrot.slane %v6094_v6, 7  ;;  %v8845_v18 = vrot.slane %v6095_v57, 7  ;;  %4143 = vrot.lane.b32.xlu1 %v5978_v42, %s6679_s29 }
 0x6d1   : > { %v8847_v34 = vrot.slane %v6096_v10, 7  ;;  %v8849_v56 = vrot.slane %v6097_v5, 7  ;;  %3078 = vst.msk [vmem:[#allocation2 + $0x6c] sm:$0xe] %vm3053_vm2, %v8821_v40  ;;  %3081 = vst.msk [vmem:[#allocation2 + $0x78] sm:$0xe] %vm3053_vm2, %v8825_v19 }
 0x6d2   : > { %v8856_v59 = vrot.slane %v6098_v9, 7  ;;  %v8858_v2 = vrot.slane %v6099_v28, 7  ;;  %v8860_v7 = vrot.slane %v6100_v17, 7  ;;  %v8862_v29 = vrot.slane %v6101_v37, 7  ;;  %3084 = vst.msk [vmem:[#allocation2 + $0x84] sm:$0xe] %vm3053_vm2, %v8833_v62 }
 0x6d3   : > { %3087 = vst.msk [vmem:[#allocation2 + $0x90] sm:$0xe] %vm3053_vm2, %v8837_v41  ;;  %v3002_v32 = vrot.slane %v6102_v11, 7  ;;  %v2941_v50 = vrot.slane %v8796_v33, 4  ;;  %v2944_v55 = vrot.slane %v8800_v38, 4  ;;  %v2946_v27 = vrot.slane %v8802_v44, 4 }
 0x6d4   : > { %3090 = vst.msk [vmem:[#allocation2 + $0x9c] sm:$0xe] %vm3053_vm2, %v8845_v18  ;;  %3093 = vst.msk [vmem:[#allocation2 + $0xa8] sm:$0xe] %vm3053_vm2, %v8849_v56  ;;  %v2949_v16 = vrot.slane %v8804_v45, 4  ;;  %v2951_v42 = vrot.slane %v8806_v58, 4 }
 0x6d5   : > { %v2954_v60 = vrot.slane %v8808_v24, 4  ;;  %v2956_v53 = vrot.slane %v8810_v8, 4  ;;  %3096 = vst.msk [vmem:[#allocation2 + $0xb4] sm:$0xe] %vm3053_vm2, %v8858_v2  ;;  %3099 = vst.msk [vmem:[#allocation2 + $0xc0] sm:$0xe] %vm3053_vm2, %v8862_v29  ;;  %v2943_v11 = vsel %vm8555_vm1, %v2941_v50, %v8800_v38  ;;  %v2948_v33 = vsel %vm8555_vm1, %v2946_v27, %v8804_v45 }
 0x6d6   : > { %v2959_v49 = vrot.slane %v8812_v48, 4  ;;  %v2961_v25 = vrot.slane %v8814_v22, 4  ;;  %v2964_v47 = vrot.slane %v8819_v63, 4  ;;  %v2966_v4 = vrot.slane %v8821_v40, 4  ;;  %3065 = vst.msk [vmem:[#allocation2 + $0x38] sm:$0x1] %vm2808_vm9, %v2944_v55 }
 0x6d7   : > { %v2969_v26 = vrot.slane %v8823_v20, 4  ;;  %v2971_v35 = vrot.slane %v8825_v19, 4  ;;  %v2974_v39 = vrot.slane %v8831_v15, 4  ;;  %v2976_v51 = vrot.slane %v8833_v62, 4  ;;  %3068 = vst.msk [vmem:[#allocation2 + $0x44] sm:$0x1] %vm2808_vm9, %v2949_v16 }
 0x6d8   : > { %3071 = vst.msk [vmem:[#allocation2 + $0x50] sm:$0x1] %vm2808_vm9, %v2954_v60  ;;  %v2979_v3 = vrot.slane %v8835_v1, 4  ;;  %v2981_v61 = vrot.slane %v8837_v41, 4  ;;  %v2984_v31 = vrot.slane %v8843_v46, 4  ;;  %v2986_v6 = vrot.slane %v8845_v18, 4 }
 0x6d9   : > { %3074 = vst.msk [vmem:[#allocation2 + $0x5c] sm:$0x1] %vm2808_vm9, %v2959_v49  ;;  %3077 = vst.msk [vmem:[#allocation2 + $0x68] sm:$0x1] %vm2808_vm9, %v2964_v47  ;;  %v2989_v57 = vrot.slane %v8847_v34, 4  ;;  %v2991_v10 = vrot.slane %v8849_v56, 4  ;;  %v2953_v44 = vsel %vm8555_vm1, %v2951_v42, %v8808_v24  ;;  %v2958_v58 = vsel %vm8555_vm1, %v2956_v53, %v8812_v48 }
 0x6da   : > { %v2994_v5 = vrot.slane %v8856_v59, 4  ;;  %v2996_v9 = vrot.slane %v8858_v2, 4  ;;  %3080 = vst.msk [vmem:[#allocation2 + $0x74] sm:$0x1] %vm2808_vm9, %v2969_v26  ;;  %3083 = vst.msk [vmem:[#allocation2 + $0x80] sm:$0x1] %vm2808_vm9, %v2974_v39  ;;  %v2963_v38 = vsel %vm8555_vm1, %v2961_v25, %v8819_v63  ;;  %v2968_v45 = vsel %vm8555_vm1, %v2966_v4, %v8823_v20 }
 0x6db   : > { %v2999_v28 = vrot.slane %v8860_v7, 4  ;;  %v3001_v17 = vrot.slane %v8862_v29, 4  ;;  %v3004_v37 = vrot.slane %v3002_v32, 4  ;;  %3086 = vst.msk [vmem:[#allocation2 + $0x8c] sm:$0x1] %vm2808_vm9, %v2979_v3  ;;  %v2973_v24 = vsel %vm8555_vm1, %v2971_v35, %v8831_v15 }
 0x6dc   : > { %3089 = vst.msk [vmem:[#allocation2 + $0x98] sm:$0x1] %vm2808_vm9, %v2984_v31  ;;  %3092 = vst.msk [vmem:[#allocation2 + $0xa4] sm:$0x1] %vm2808_vm9, %v2989_v57  ;;  %v2978_v8 = vsel %vm8555_vm1, %v2976_v51, %v8835_v1  ;;  %v2983_v48 = vsel %vm8555_vm1, %v2981_v61, %v8843_v46  ;;  %v2988_v22 = vsel %vm8555_vm1, %v2986_v6, %v8847_v34  ;;  %v8965_v19 = vld [vmem:[#allocation2 + $0x30] sm:$0xf] }
 0x6dd   : > { %3095 = vst.msk [vmem:[#allocation2 + $0xb0] sm:$0x1] %vm2808_vm9, %v2994_v5  ;;  %3098 = vst.msk [vmem:[#allocation2 + $0xbc] sm:$0x1] %vm2808_vm9, %v2999_v28  ;;  %v2993_v63 = vsel %vm8555_vm1, %v2991_v10, %v8856_v59  ;;  %v2998_v40 = vsel %vm8555_vm1, %v2996_v9, %v8860_v7  ;;  %v3003_v20 = vsel %vm8555_vm1, %v3001_v17, %v3002_v32  ;;  %v8969_v15 = vld [vmem:[#allocation2 + $0x38] sm:$0x3] }
 0x6de   : > { %3064 = vst.msk [vmem:[#allocation2 + $0x34] sm:$0xf] %vm2798_vm3, %v2943_v11  ;;  %3067 = vst.msk [vmem:[#allocation2 + $0x40] sm:$0xf] %vm2798_vm3, %v2948_v33  ;;  %v8976_v46 = vld [vmem:[#allocation2 + $0x44] sm:$0x3] }
 0x6df   : > { %3101 = vst.msk [vmem:[#allocation2 + $0xc8] sm:$0x1] %vm2808_vm9, %v3004_v37  ;;  %v5944_v34 = vrot.slane %v8965_v19, 9  ;;  %v3230_v59 = vrot.slane %v8969_v15, 5  ;;  %v8984_v29 = vld [vmem:[#allocation2 + $0x3c] sm:$0xf] }
 0x6e0   : > { %3070 = vst.msk [vmem:[#allocation2 + $0x4c] sm:$0xf] %vm2798_vm3, %v2953_v44  ;;  %3073 = vst.msk [vmem:[#allocation2 + $0x58] sm:$0xf] %vm2798_vm3, %v2958_v58  ;;  %v3237_v16 = vrot.slane %v8976_v46, 5  ;;  %v5945_v25 = vrot.slane %v8984_v29, 9 }
 0x6e1   : > { %3076 = vst.msk [vmem:[#allocation2 + $0x64] sm:$0xf] %vm2798_vm3, %v2963_v38  ;;  %3079 = vst.msk [vmem:[#allocation2 + $0x70] sm:$0xf] %vm2798_vm3, %v2968_v45  ;;  %v8993_v60 = vld [vmem:[#allocation2 + $0x50] sm:$0x3] }
 0x6e2   : > { %3082 = vst.msk [vmem:[#allocation2 + $0x7c] sm:$0xf] %vm2798_vm3, %v2973_v24  ;;  %3085 = vst.msk [vmem:[#allocation2 + $0x88] sm:$0xf] %vm2798_vm3, %v2978_v8  ;;  %v9004_v35 = vld [vmem:[#allocation2 + $0x48] sm:$0xf] }
 0x6e3   : > { %3088 = vst.msk [vmem:[#allocation2 + $0x94] sm:$0xf] %vm2798_vm3, %v2983_v48  ;;  %3091 = vst.msk [vmem:[#allocation2 + $0xa0] sm:$0xf] %vm2798_vm3, %v2988_v22  ;;  %v3244_v51 = vrot.slane %v8993_v60, 5  ;;  %v5946_v9 = vrot.slane %v9004_v35, 9 }
 0x6e4   : > { %3094 = vst.msk [vmem:[#allocation2 + $0xac] sm:$0xf] %vm2798_vm3, %v2993_v63  ;;  %3097 = vst.msk [vmem:[#allocation2 + $0xb8] sm:$0xf] %vm2798_vm3, %v2998_v40  ;;  %v9009_v3 = vld [vmem:[#allocation2 + $0x5c] sm:$0x3] }
 0x6e5   : > { %3100 = vst.msk [vmem:[#allocation2 + $0xc4] sm:$0xf] %vm2798_vm3, %v3003_v20  ;;  %v8967_v14 = vld [vmem:[#allocation2 + $0x34] sm:$0xf]  ;;  %v8972_v1 = vld [vmem:[#allocation2 + $0x40] sm:$0xf] }
 0x6e6   : > { %v3227_v62 = vrot.slane %v8967_v14, 5  ;;  %v3234_v18 = vrot.slane %v8972_v1, 5  ;;  %v9014_v57 = vld [vmem:[#allocation2 + $0x54] sm:$0xf]  ;;  %v9016_v5 = vld [vmem:[#allocation2 + $0x68] sm:$0x3] }
 0x6e7   : > { %v8974_v41 = vld [vmem:[#allocation2 + $0x4c] sm:$0xf]  ;;  %v8982_v7 = vld [vmem:[#allocation2 + $0x58] sm:$0xf]  ;;  %11180 = vst [vmem:[#allocation29_spill] sm:$0xff] %v9016_v5  ;;  %v3251_v33 = vrot.slane %v9009_v3, 5 }
 0x6e8   : > { %v3229_v56 = vrot.slane %v3227_v62, 4  ;;  %v3241_v2 = vrot.slane %v8974_v41, 5  ;;  %v3236_v32 = vrot.slane %v3234_v18, 4  ;;  %v8986_v50 = vld [vmem:[#allocation2 + $0x64] sm:$0xf]  ;;  %v3228_v55 = vsel %vm6787_vm4, %v5944_v34, %v3227_v62 }
 0x6e9   : > { %11177 = vst [vmem:[#allocation26_spill] sm:$0xff] %v8986_v50  ;;  %v3248_v53 = vrot.slane %v8982_v7, 5  ;;  %v8996_v49 = vld [vmem:[#allocation2 + $0x70] sm:$0xf]  ;;  %v3255_v26 = vrot.slane %v8986_v50, 5  ;;  %v3235_v39 = vsel %vm6787_vm4, %v5945_v25, %v3234_v18  ;;  %v3258_v24 = vrot.slane %v9016_v5, 5 }
 0x6ea   : > { %v3231_v27 = vsel %vm6787_vm4, %v3229_v56, %v3230_v59  ;;  %11178 = vst [vmem:[#allocation27_spill] sm:$0xff] %v8996_v49  ;;  %v3238_v47 = vsel %vm6787_vm4, %v3236_v32, %v3237_v16  ;;  %v3243_v4 = vrot.slane %v3241_v2, 4  ;;  %v3262_v61 = vrot.slane %v8996_v49, 5  ;;  %v9012_v31 = vld [vmem:[#allocation2 + $0x7c] sm:$0xf] }
 0x6eb   : > { %v5979_v42 = vcombine.low %v3228_v55, %v3231_v27  ;;  %11179 = vst [vmem:[#allocation28_spill] sm:$0xff] %v9012_v31  ;;  %v5980_v6 = vcombine.low %v3235_v39, %v3238_v47  ;;  %v3250_v10 = vrot.slane %v3248_v53, 4  ;;  %v9021_v17 = vld [vmem:[#allocation2 + $0x60] sm:$0xf]  ;;  %v3257_v37 = vrot.slane %v3255_v26, 4 }
 0x6ec   : > { %v3245_v28 = vsel %vm6787_vm4, %v3243_v4, %v3244_v51  ;;  %11181 = vst [vmem:[#allocation30_spill] sm:$0xff] %v9021_v17  ;;  %v3136_v11 = vld [vmem:[#allocation2 + $0x88] sm:$0xf]  ;;  %v9026_v44 = vld [vmem:[#allocation2 + $0x6c] sm:$0xf]  ;;  %v3269_v38 = vrot.slane %v9012_v31, 5  ;;  %v3242_v45 = vsel %vm6787_vm4, %v5946_v9, %v3241_v2 }
 0x6ed   : > { %4293 = vrot.lane.b32.xlu1 %v5979_v42, %s6684_s14  ;;  %4396 = vrot.lane.b32.xlu0 %v5979_v42, %s6690_s9  ;;  %11182 = vst [vmem:[#allocation31_spill] sm:$0xff] %v9026_v44  ;;  %v9028_v58 = vld [vmem:[#allocation2 + $0x74] sm:$0x3]  ;;  %v3264_v8 = vrot.slane %v3262_v61, 4  ;;  %v9034_v48 = vld [vmem:[#allocation2 + $0x78] sm:$0xf]  ;;  %v9038_v63 = vcombine.low %v3242_v45, %v3245_v28  ;;  %v3252_v20 = vsel %vm6787_vm4, %v3250_v10, %v3251_v33 }
 0x6ee   : > { %11183 = vst [vmem:[#allocation32_spill] sm:$0xff] %v9028_v58  ;;  %11184 = vst [vmem:[#allocation33_spill] sm:$0xff] %v9034_v48  ;;  %v9036_v22 = vld [vmem:[#allocation2 + $0x80] sm:$0x3]  ;;  %v5947_v40 = vrot.slane %v9014_v57, 9  ;;  %v3276_v18 = vrot.slane %v3136_v11, 5  ;;  %v3259_v56 = vsel %vm6787_vm4, %v3257_v37, %v3258_v24 }
 0x6ef   : > { %11185 = vst [vmem:[#allocation34_spill] sm:$0xff] %v9036_v22  ;;  %v9043_v62 = vld [vmem:[#allocation2 + $0x84] sm:$0xf]  ;;  %v5948_v34 = vrot.slane %v9021_v17, 9  ;;  %v5949_v59 = vrot.slane %v9026_v44, 9  ;;  %v3265_v2 = vrot.slane %v9028_v58, 5 }
 0x6f0   : > { %11186 = vst [vmem:[#allocation35_spill] sm:$0xff] %v9043_v62  ;;  %v3137_v32 = vld [vmem:[#allocation2 + $0x8c] sm:$0x3]  ;;  %v3249_v55 = vsel %vm6787_vm4, %v5947_v40, %v3248_v53  ;;  %v5950_v27 = vrot.slane %v9034_v48, 9  ;;  %v3271_v16 = vrot.slane %v3269_v38, 4  ;;  %v3272_v25 = vrot.slane %v9036_v22, 5 }
 0x6f1   : > { %4398 = vrot.lane.b32.xlu1 %v5980_v6, %s6690_s9  ;;  %4295 = vrot.lane.b32.xlu0 %v5980_v6, %s6684_s14  ;;  %v3138_v47 = vld [vmem:[#allocation2 + $0x90] sm:$0xf]  ;;  %v9057_v4 = vcombine.low %v3249_v55, %v3252_v20  ;;  %v3256_v39 = vsel %vm6787_vm4, %v5948_v34, %v3255_v26  ;;  %v5951_v51 = vrot.slane %v9043_v62, 9  ;;  %v3139_v10 = vld [vmem:[#allocation2 + $0x94] sm:$0xf]  ;;  %v3263_v28 = vsel %vm6787_vm4, %v5949_v59, %v3262_v61 }
 0x6f2   : > { %v9064_v9 = vld [vmem:[#allocation2 + $0x98] sm:$0x3]  ;;  %v9066_v53 = vcombine.low %v3256_v39, %v3259_v56  ;;  %v3278_v37 = vrot.slane %v3276_v18, 4  ;;  %v3279_v11 = vrot.slane %v3137_v32, 5  ;;  %v3270_v33 = vsel %vm6787_vm4, %v5950_v27, %v3269_v38  ;;  %v9074_v24 = vld [vmem:[#allocation2 + $0x9c] sm:$0xf] }
 0x6f3   : > { %v3277_v26 = vsel %vm6787_vm4, %v5951_v51, %v3276_v18  ;;  %v5952_v45 = vrot.slane %v3138_v47, 9  ;;  %v3273_v61 = vsel %vm6787_vm4, %v3271_v16, %v3272_v25  ;;  %v3283_v20 = vrot.slane %v3139_v10, 5  ;;  %v3142_v16 = vld [vmem:[#allocation2 + $0xa0] sm:$0xf]  ;;  %v9115_v62 = vld [vmem:[#allocation2 + $0xc4] sm:$0xf] }
 0x6f4   : > { %v3286_v38 = vrot.slane %v9064_v9, 5  ;;  %v11091_v18 = vshll.u32 %v8605_v12, 16  ;;  %v11090_v34 = vshll.u32 %v8624_v43, 16  ;;  %v11089_v56 = vshrl.u32 %v8624_v43, 16  ;;  %v3150_v50 = vld [vmem:[#allocation2 + $0xc0] sm:$0xf] }
 0x6f5   : > { %4145 = vrot.lane.b32.xlu1 %v5979_v42, %s6679_s29  ;;  %4400 = vrot.lane.b32.xlu0 %v9038_v63, %s6690_s9  ;;  %v3266_v42 = vsel %vm6787_vm4, %v3264_v8, %v3265_v2  ;;  %v11092_v8 = vshrl.u32 %v8605_v12, 16  ;;  %v11095_v59 = vshll.u32 %v8626_v36, 16  ;;  %v3737_v55 = vshrl.u32 %v8626_v36, 16 }
 0x6f6   : > { %v9080_v40 = vcombine.low %v3263_v28, %v3266_v42  ;;  %v9095_v27 = vcombine.low %v3270_v33, %v3273_v61  ;;  %v3729_v25 = vrot.slane %v11091_v18, 6  ;;  %v3732_v47 = vrot.slane %v11089_v56, 5  ;;  %v3143_v42 = vld [vmem:[#allocation2 + $0xa4] sm:$0x3] }
 0x6f7   : > { %v3728_v32 = vrot.slane %v11092_v8, 5  ;;  %v3733_v39 = vrot.slane %v11090_v34, 6  ;;  %v3739_v51 = vrot.slane %v3737_v55, 5  ;;  %v3740_v10 = vrot.slane %v11095_v59, 6 }
 0x6f8   : > { %v3365_v9 = vshrl.u32 %v8594_v23, 16  ;;  %v3368_v28 = vshll.u32 %v8594_v23, 16  ;;  %v3374_v56 = vshll.u32 %v8612_v30, 16  ;;  %v3378_v34 = vshrl.u32 %v8612_v30, 16 }
 0x6f9   : > { %4147 = vrot.lane.b32.xlu1 %v5980_v6, %s6679_s29  ;;  %4299 = vrot.lane.b32.xlu0 %v9057_v4, %s6684_s14  ;;  %v3280_v6 = vsel %vm6787_vm4, %v3278_v37, %v3279_v11  ;;  %v3145_v37 = vld [vmem:[#allocation2 + $0xac] sm:$0xf]  ;;  %v3148_v11 = vld [vmem:[#allocation2 + $0xb8] sm:$0xf]  ;;  %v3730_v33 = vor.u32 %v3729_v25, %v3728_v32  ;;  %v3734_v61 = vor.u32 %v3733_v39, %v3732_v47  ;;  %v3285_v8 = vrot.slane %v3283_v20, 4 }
 0x6fa   : > { %v9113_v18 = vcombine.low %v3277_v26, %v3280_v6  ;;  %v3290_v2 = vrot.slane %v3142_v16, 5  ;;  %v3741_v55 = vor.u32 %v3740_v10, %v3739_v51  ;;  %v9117_v31 = vrot.slane %v3374_v56, 5  ;;  %v3144_v6 = vld [vmem:[#allocation2 + $0xa8] sm:$0xf]  ;;  %v3146_v25 = vld [vmem:[#allocation2 + $0xb0] sm:$0x3] }
 0x6fb   : > { %v3731_v59 = vrot.slane %v3730_v33, 4  ;;  %v3736_v22 = vrot.slane %v3734_v61, 4  ;;  %v3380_v23 = vrot.slane %v3378_v34, 4  ;;  %v3284_v30 = vsel %vm6787_vm4, %v5952_v45, %v3283_v20  ;;  %v3147_v47 = vld [vmem:[#allocation2 + $0xb4] sm:$0xf] }
 0x6fc   : > { %v3293_v26 = vrot.slane %v3143_v42, 5  ;;  %v3297_v32 = vrot.slane %v3145_v37, 5  ;;  %v3304_v16 = vrot.slane %v3148_v11, 5  ;;  %v3367_v33 = vrot.slane %v3365_v9, 4 }
 0x6fd   : > { %4297 = vrot.lane.b32.xlu1 %v9038_v63, %s6684_s14  ;;  %4404 = vrot.lane.b32.xlu0 %v9066_v53, %s6690_s9  ;;  %v3735_v51 = vsel %vm8206_vm11, %v3731_v59, %v3734_v61  ;;  %v3742_v10 = vsel %vm8206_vm11, %v3736_v22, %v3741_v55  ;;  %v3370_v48 = vrot.slane %v3368_v28, 5  ;;  %v3311_v58 = vrot.slane %v9115_v62, 5  ;;  %v3149_v62 = vld [vmem:[#allocation2 + $0xbc] sm:$0x3] }
 0x6fe   : > { %v9130_v44 = vcombine.low %v3735_v51, %v3742_v10  ;;  %v3743_v49 = vrot.slane %v3365_v9, 5  ;;  %v3744_v45 = vrot.slane %v3368_v28, 6  ;;  %v3287_v20 = vsel %vm6787_vm4, %v3285_v8, %v3286_v38  ;;  %v3152_v9 = vld [vmem:[#allocation2 + $0xc8] sm:$0x3] }
 0x6ff   : > { %v3292_v42 = vrot.slane %v3290_v2, 4  ;;  %v5954_v37 = vrot.slane %v3144_v6, 9  ;;  %v3381_v11 = vor.u32 %v3380_v23, %v9117_v31  ;;  %v3299_v22 = vrot.slane %v3297_v32, 4 }
 0x700   : > { %v3300_v59 = vrot.slane %v3146_v25, 5  ;;  %v5955_v61 = vrot.slane %v3147_v47, 9  ;;  %v3306_v55 = vrot.slane %v3304_v16, 4  ;;  %v3371_v28 = vor.u32 %v3370_v48, %v3367_v33 }
 0x701   : > { %4402 = vrot.lane.b32.xlu1 %v9057_v4, %s6690_s9  ;;  %4303 = vrot.lane.b32.xlu0 %v9080_v40, %s6684_s14  ;;  %v3384_v51 = vshll.u32 %v8614_v0, 16  ;;  %v3747_v8 = vrot.slane %v3378_v34, 5  ;;  %v3748_v38 = vrot.slane %v3374_v56, 6  ;;  %v9140_v6 = vcombine.low %v3284_v30, %v3287_v20 }
 0x702   : > { %v11188_v23 = vrot.slane %v9074_v24, 9  ;;  %v3313_v10 = vrot.slane %v3311_v58, 4  ;;  %v3745_v5 = vor.u32 %v3744_v45, %v3743_v49  ;;  %v3294_v25 = vsel %vm6787_vm4, %v3292_v42, %v3293_v26 }
 0x703   : > { %v3307_v47 = vrot.slane %v3149_v62, 5  ;;  %v3382_v17 = vrot.slane %v3381_v11, 4  ;;  %v3752_v48 = vshrl.u32 %v8614_v0, 16  ;;  %v3298_v24 = vsel %vm6787_vm4, %v5954_v37, %v3297_v32 }
 0x704   : > { %v3301_v49 = vsel %vm6787_vm4, %v3299_v22, %v3300_v59  ;;  %v3305_v34 = vsel %vm6787_vm4, %v5955_v61, %v3304_v16  ;;  %v3314_v56 = vrot.slane %v3152_v9, 5  ;;  %v3372_v0 = vrot.slane %v3371_v28, 4 }
 0x705   : > { %4149 = vrot.lane.b32.xlu1 %v9038_v63, %s6679_s29  ;;  %4408 = vrot.lane.b32.xlu0 %v9095_v27, %s6690_s9  ;;  %v3291_v63 = vsel %vm6787_vm4, %v11188_v23, %v3290_v2  ;;  %v3308_v2 = vsel %vm6787_vm4, %v3306_v55, %v3307_v47  ;;  %v3386_v30 = vrot.slane %v3384_v51, 5  ;;  %v9161_v26 = vor.u32 %v3748_v38, %v3747_v8 }
 0x706   : > { %v5956_v33 = vrot.slane %v3150_v50, 9  ;;  %v3315_v32 = vsel %vm6787_vm4, %v3313_v10, %v3314_v56  ;;  %v9167_v45 = vrot.slane %v3745_v5, 4  ;;  %v3754_v16 = vrot.slane %v3752_v48, 5 }
 0x707   : > { %v3387_v42 = vsel %vm6816_vm5, %v3382_v17, %v3386_v30  ;;  %v3755_v37 = vrot.slane %v3384_v51, 6  ;;  %v3389_v11 = vshrl.u32 %v8657_v52, 16  ;;  %v9176_v22 = vcombine.low %v3298_v24, %v3301_v49 }
 0x708   : > { %v9178_v50 = vcombine.low %v3305_v34, %v3308_v2  ;;  %v11115_v5 = vshll.u32 %v8657_v52, 16  ;;  %v11116_v59 = vshrl.u32 %v8696_v54, 16  ;;  %v3312_v17 = vsel %vm6787_vm4, %v5956_v33, %v3311_v58 }
 0x709   : > { %4151 = vrot.lane.b32.xlu1 %v9057_v4, %s6679_s29  ;;  %4307 = vrot.lane.b32.xlu0 %v9113_v18, %s6684_s14  ;;  %v9163_v4 = vcombine.low %v3291_v63, %v3294_v25  ;;  %v3377_v62 = vsel %vm6816_vm5, %v3372_v0, %v9117_v31  ;;  %v3751_v61 = vrot.slane %v9161_v26, 4  ;;  %v11117_v55 = vshll.u32 %v8696_v54, 16 }
 0x70a   : > { %v9189_v9 = vcombine.low %v3312_v17, %v3315_v32  ;;  %v9191_v28 = vcombine.low %v3377_v62, %v3387_v42  ;;  %v3413_v21 = vshrl.u32 %v8965_v19, 16  ;;  %v3756_v58 = vor.u32 %v3755_v37, %v3754_v16 }
 0x70b   : > { %v11114_v8 = vshll.u32 %v8683_v13, 16  ;;  %v9199_v38 = vrot.slane %v3389_v11, 5  ;;  %v3416_v31 = vshll.u32 %v8965_v19, 16  ;;  %v9208_v23 = vrot.slane %v11115_v5, 6 }
 0x70c   : > { %v3762_v63 = vrot.slane %v11116_v59, 5  ;;  %v3415_v10 = vrot.slane %v3413_v21, 4  ;;  %v3422_v25 = vshll.u32 %v8967_v14, 16  ;;  %v9215_v47 = vsel %vm8206_vm11, %v3751_v61, %v3756_v58 }
 0x70d   : > { %4301 = vrot.lane.b32.xlu1 %v9066_v53, %s6684_s14  ;;  %4412 = vrot.lane.b32.xlu0 %v9140_v6, %s6690_s9  ;;  %v3763_v19 = vrot.slane %v11117_v55, 6  ;;  %v3418_v48 = vrot.slane %v3416_v31, 5  ;;  %v3426_v24 = vshrl.u32 %v8967_v14, 16  ;;  %v3767_v49 = vshrl.u32 %v8683_v13, 16 }
 0x70e   : > { %v3424_v34 = vrot.slane %v3422_v25, 5  ;;  %v3432_v56 = vshll.u32 %v8969_v15, 16  ;;  %v3773_v2 = vrot.slane %v3413_v21, 5  ;;  %v9224_v0 = vrot.slane %v11114_v8, 6 }
 0x70f   : > { %v3419_v30 = vor.u32 %v3418_v48, %v3415_v10  ;;  %v3428_v33 = vrot.slane %v3426_v24, 4  ;;  %v3774_v32 = vrot.slane %v3416_v31, 6  ;;  %v9232_v42 = vrot.slane %v3389_v11, 4 }
 0x710   : > { %v3777_v16 = vrot.slane %v3426_v24, 5  ;;  %v3778_v37 = vrot.slane %v3422_v25, 6  ;;  %v3782_v21 = vshrl.u32 %v8969_v15, 16  ;;  %v9235_v58 = vor.u32 %v3763_v19, %v3762_v63 }
 0x711   : > { %4406 = vrot.lane.b32.xlu1 %v9080_v40, %s6690_s9  ;;  %4311 = vrot.lane.b32.xlu0 %v9163_v4, %s6684_s14  ;;  %v3420_v17 = vrot.slane %v3419_v30, 4  ;;  %v3429_v62 = vor.u32 %v3428_v33, %v3424_v34  ;;  %v3775_v61 = vor.u32 %v3774_v32, %v3773_v2  ;;  %v3785_v10 = vrot.slane %v3432_v56, 6 }
 0x712   : > { %v3779_v31 = vor.u32 %v3778_v37, %v3777_v16  ;;  %v3434_v51 = vrot.slane %v3432_v56, 5  ;;  %v3784_v15 = vrot.slane %v3782_v21, 5  ;;  %v3440_v63 = vshll.u32 %v8984_v29, 16 }
 0x713   : > { %v3425_v48 = vsel %vm6816_vm5, %v3420_v17, %v3424_v34  ;;  %v3430_v8 = vrot.slane %v3429_v62, 4  ;;  %v3776_v11 = vrot.slane %v3775_v61, 4  ;;  %v3446_v19 = vshll.u32 %v8972_v1, 16 }
 0x714   : > { %v3781_v25 = vrot.slane %v3779_v31, 4  ;;  %v3450_v56 = vshrl.u32 %v8972_v1, 16  ;;  %v3456_v2 = vshll.u32 %v8976_v46, 16  ;;  %v3786_v30 = vor.u32 %v3785_v10, %v3784_v15 }
 0x715   : > { %4153 = vrot.lane.b32.xlu1 %v9066_v53, %s6679_s29  ;;  %4416 = vrot.lane.b32.xlu0 %v9176_v22, %s6690_s9  ;;  %v3437_v53 = vshrl.u32 %v8984_v29, 16  ;;  %v3435_v24 = vsel %vm6816_vm5, %v3430_v8, %v3434_v51  ;;  %v3780_v34 = vsel %vm8206_vm11, %v3776_v11, %v3779_v31  ;;  %v3789_v32 = vrot.slane %v3440_v63, 6 }
 0x716   : > { %v3792_v16 = vrot.slane %v3450_v56, 5  ;;  %v3793_v37 = vrot.slane %v3446_v19, 6  ;;  %v3797_v29 = vshrl.u32 %v8976_v46, 16  ;;  %v3800_v17 = vrot.slane %v3456_v2, 6 }
 0x717   : > { %v3788_v33 = vrot.slane %v3437_v53, 5  ;;  %v3787_v1 = vsel %vm8206_vm11, %v3781_v25, %v3786_v30  ;;  %v3439_v8 = vrot.slane %v3437_v53, 4  ;;  %v3442_v62 = vrot.slane %v3440_v63, 5 }
 0x718   : > { %v9261_v61 = vcombine.low %v3780_v34, %v3787_v1  ;;  %v3794_v21 = vor.u32 %v3793_v37, %v3792_v16  ;;  %v3799_v31 = vrot.slane %v3797_v29, 5  ;;  %v3448_v10 = vrot.slane %v3446_v19, 5 }
 0x719   : > { %4155 = vrot.lane.b32.xlu1 %v9080_v40, %s6679_s29  ;;  %4315 = vrot.lane.b32.xlu0 %v9178_v50, %s6684_s14  ;;  %v9252_v40 = vcombine.low %v3425_v48, %v3435_v24  ;;  %v3790_v51 = vor.u32 %v3789_v32, %v3788_v33  ;;  %v3769_v48 = vrot.slane %v3767_v49, 5  ;;  %v3443_v11 = vor.u32 %v3442_v62, %v3439_v8 }
 0x71a   : > { %v3452_v15 = vrot.slane %v3450_v56, 4  ;;  %v3796_v24 = vrot.slane %v3794_v21, 4  ;;  %v3801_v5 = vor.u32 %v3800_v17, %v3799_v31  ;;  %v11190_v14 = vshrl.u32 %v8605_v12, 16 }
 0x71b   : > { %v3791_v46 = vrot.slane %v3790_v51, 4  ;;  %v11191_v55 = vshll.u32 %v8605_v12, 16  ;;  %v3444_v53 = vrot.slane %v3443_v11, 4  ;;  %v11192_v19 = vshll.u32 %v8624_v43, 16 }
 0x71c   : > { %v3343_v59 = vrot.slane %v11190_v14, 4  ;;  %v3453_v63 = vor.u32 %v3452_v15, %v3448_v10  ;;  %v11193_v14 = vshll.u32 %v8696_v54, 16  ;;  %v3802_v12 = vsel %vm8206_vm11, %v3796_v24, %v3801_v5 }
 0x71d   : > { %4305 = vrot.lane.b32.xlu1 %v9095_v27, %s6684_s14  ;;  %4420 = vrot.lane.b32.xlu0 %v9189_v9, %s6690_s9  ;;  %v3346_v25 = vrot.slane %v11191_v55, 5  ;;  %v3795_v49 = vsel %vm8206_vm11, %v3791_v46, %v3794_v21  ;;  %v3352_v34 = vrot.slane %v11192_v19, 5  ;;  %v11194_v30 = vshrl.u32 %v8624_v43, 16 }
 0x71e   : > { %v3400_v56 = vrot.slane %v11193_v14, 5  ;;  %v9281_v32 = vcombine.low %v3795_v49, %v3802_v12  ;;  %v3449_v16 = vsel %vm6816_vm5, %v3444_v53, %v3448_v10  ;;  %v3454_v37 = vrot.slane %v3453_v63, 4  ;;  %v9351_v49 = vpop.permute.xlu1 %4137 }
 0x71f   : > { %v3347_v55 = vor.u32 %v3346_v25, %v3343_v59  ;;  %v3356_v33 = vrot.slane %v11194_v30, 4  ;;  %v3458_v29 = vrot.slane %v3456_v2, 5  ;;  %v3766_v17 = vrot.slane %v9235_v58, 4 }
 0x720   : > { %v11195_v1 = vshrl.u32 %v8696_v54, 16  ;;  %v11196_v43 = vor.u32 %v9208_v23, %v9199_v38  ;;  %v3771_v59 = vor.u32 %v9224_v0, %v3769_v48  ;;  %v11197_v2 = vshll.u32 %v8657_v52, 16 }
 0x721   : > { %4410 = vrot.lane.b32.xlu1 %v9113_v18, %s6690_s9  ;;  %4322 = vrot.lane.b32.xlu0 %v9130_v44, %s6691_s27  ;;  %v3348_v8 = vrot.slane %v3347_v55, 4  ;;  %v3357_v62 = vor.u32 %v3356_v33, %v3352_v34  ;;  %v3459_v54 = vsel %vm6816_vm5, %v3454_v37, %v3458_v29  ;;  %v11199_v46 = vshll.u32 %v8626_v36, 16  ;;  %v9321_v36 = vld [vmem:[%s11037_s4] sm:$0x3] }
 0x722   : > { %v3404_v51 = vrot.slane %v11195_v1, 4  ;;  %v3761_v5 = vrot.slane %v11196_v43, 4  ;;  %v3394_v21 = vrot.slane %v11197_v2, 5  ;;  %v9300_v31 = vcombine.low %v3449_v16, %v3459_v54  ;;  %6278 = vmatprep.subr.msk.bf16.mxu1 %vm1701_vm7, %v9321_v36  ;;  %6277 = vmatprep.subr.msk.bf16.mxu0 %vm1701_vm7, %v9321_v36 }
 0x723   : > { %v3358_v10 = vrot.slane %v3357_v62, 4  ;;  %v3362_v11 = vrot.slane %v11199_v46, 5  ;;  %v11200_v38 = vsel %vm8206_vm11, %v9167_v45, %v9161_v26  ;;  %v3772_v23 = vsel %vm8206_vm11, %v3766_v17, %v3771_v59 }
 0x724   : > { %11198 = vst [vmem:[#allocation22_spill] sm:$0xff] %v9300_v31  ;;  %v9312_v52 = vcombine.low %v11200_v38, %v9215_v47  ;;  %v3405_v0 = vor.u32 %v3404_v51, %v3400_v56  ;;  %v3765_v45 = vsel %vm8206_vm11, %v3761_v5, %v9235_v58  ;;  %v3395_v47 = vor.u32 %v3394_v21, %v9232_v42 }
 0x725   : > { %4157 = vrot.lane.b32.xlu1 %v9095_v27, %s6679_s29  ;;  %4357 = vrot.lane.b32.xlu0 %v9191_v28, %s6689_s28  ;;  %v3353_v27 = vsel %vm6816_vm5, %v3348_v8, %v3352_v34  ;;  %v3363_v48 = vsel %vm6816_vm5, %v3358_v10, %v3362_v11  ;;  %v9337_v15 = vcombine.low %v3765_v45, %v3772_v23  ;;  %v11201_v58 = vshll.u32 %v8683_v13, 16  ;;  %v9361_v13 = vpop.permute.xlu1 %4217 }
 0x726   : > { %v9327_v26 = vcombine.low %v3353_v27, %v3363_v48  ;;  %v3396_v24 = vrot.slane %v3395_v47, 4  ;;  %v3474_v34 = vshrl.u32 %v8974_v41, 16  ;;  %v3461_v14 = vshrl.u32 %v9004_v35, 16 }
 0x727   : > { %v3410_v25 = vrot.slane %v11201_v58, 5  ;;  %v3480_v37 = vshll.u32 %v8993_v60, 16  ;;  %v3498_v51 = vshrl.u32 %v8982_v7, 16  ;;  %v3812_v43 = vshrl.u32 %v8993_v60, 16 }
 0x728   : > { %v3401_v53 = vsel %vm6816_vm5, %v3396_v24, %v3400_v56  ;;  %v3464_v56 = vshll.u32 %v9004_v35, 16  ;;  %v3476_v55 = vrot.slane %v3474_v34, 4  ;;  %v3807_v29 = vrot.slane %v3474_v34, 5 }
 0x729   : > { %4159 = vrot.lane.b32.xlu1 %v9113_v18, %s6679_s29  ;;  %4427 = vrot.lane.b32.xlu0 %v9312_v52, %s6692_s8  ;;  %v3406_v18 = vrot.slane %v3405_v0, 4  ;;  %v9367_v19 = vpop.permute.xlu1 %4387  ;;  %v3494_v35 = vshll.u32 %v8982_v7, 16  ;;  %v3803_v8 = vrot.slane %v3461_v14, 5  ;;  %v3485_v5 = vshrl.u32 %v9014_v57, 16 }
 0x72a   : > { %11202 = vst [vmem:[#allocation3_spill] sm:$0xff] %v9367_v19  ;;  %v3466_v30 = vrot.slane %v3464_v56, 5  ;;  %v3804_v62 = vrot.slane %v3464_v56, 6  ;;  %v3488_v59 = vshll.u32 %v9014_v57, 16  ;;  %v3482_v2 = vrot.slane %v3480_v37, 5 }
 0x72b   : > { %v3411_v42 = vsel %vm6816_vm5, %v3406_v18, %v3410_v25  ;;  %v3822_v27 = vrot.slane %v3498_v51, 5  ;;  %v3823_v7 = vrot.slane %v3494_v35, 6  ;;  %v3814_v11 = vrot.slane %v3812_v43, 5 }
 0x72c   : > { %v9355_v63 = vcombine.low %v3401_v53, %v3411_v42  ;;  %v3805_v46 = vor.u32 %v3804_v62, %v3803_v8  ;;  %v3815_v38 = vrot.slane %v3480_v37, 6  ;;  %v3504_v57 = vshll.u32 %v9009_v3, 16  ;;  %v11206_v8 = vld [vmem:[#allocation26_spill] sm:$0xff] }
 0x72d   : > { %4309 = vrot.lane.b32.xlu1 %v9140_v6, %s6684_s14  ;;  %4429 = vrot.lane.b32.xlu0 %v9337_v15, %s6692_s8  ;;  %v3818_v23 = vrot.slane %v3485_v5, 5  ;;  %v3819_v0 = vrot.slane %v3488_v59, 6  ;;  %v3827_v48 = vshrl.u32 %v9009_v3, 16  ;;  %v3824_v47 = vor.u32 %v3823_v7, %v3822_v27 }
 0x72e   : > { %v3806_v24 = vrot.slane %v3805_v46, 4  ;;  %v3816_v58 = vor.u32 %v3815_v38, %v3814_v11  ;;  %v3830_v53 = vrot.slane %v3504_v57, 6  ;;  %v3500_v56 = vrot.slane %v3498_v51, 4 }
 0x72f   : > { %v3820_v25 = vor.u32 %v3819_v0, %v3818_v23  ;;  %v3829_v42 = vrot.slane %v3827_v48, 5  ;;  %v3518_v62 = vshll.u32 %v11206_v8, 16  ;;  %v3522_v43 = vshrl.u32 %v11206_v8, 16 }
 0x730   : > { %v3506_v23 = vrot.slane %v3504_v57, 5  ;;  %v11209_v57 = vld [vmem:[#allocation27_spill] sm:$0xff]  ;;  %vm4808_vm4 = vcmask 1043456   ;;  %vm4636_vm1 = vcmask 392192   ;;  %vm4775_vm2 = vcmask 588800  }
 0x731   : > { %4414 = vrot.lane.b32.xlu1 %v9163_v4, %s6690_s9  ;;  %4221 = vrot.lane.b32.xlu0 %v9312_v52, %s6681_s11  ;;  %v3821_v37 = vrot.slane %v3820_v25, 4  ;;  %v9453_v11 = vrot.slane %v3518_v62, 5  ;;  %v3524_v38 = vrot.slane %v3522_v43, 4  ;;  %v3837_v25 = vrot.slane %v3522_v43, 5 }
 0x732   : > { %v9389_v16 = vpop.permute.xlu0 %4139  ;;  %vm4702_vm3 = vcmask 523264  }
 0x735   : > { %4161 = vrot.lane.b32.xlu1 %v9140_v6, %s6679_s29  ;;  %4256 = vrot.lane.b32.xlu0 %v9355_v63, %s6682_s12  ;;  %v3470_v6 = vshll.u32 %v8974_v41, 16  ;;  %v3463_v41 = vrot.slane %v3461_v14, 4  ;;  %v3496_v14 = vrot.slane %v3494_v35, 5 }
 0x736   : > { %v9407_v10 = vpop.permute.xlu0 %4287 }
 0x737   : > { %v3472_v12 = vrot.slane %v3470_v6, 5  ;;  %v3808_v1 = vrot.slane %v3470_v6, 6 }
 0x739   : > { %4163 = vrot.lane.b32.xlu1 %v9163_v4, %s6679_s29  ;;  %4326 = vrot.lane.b32.xlu0 %v9337_v15, %s6691_s27  ;;  %v9379_v4 = vpop.permute.xlu1 %4422  ;;  %v3477_v17 = vor.u32 %v3476_v55, %v3472_v12  ;;  %v3809_v54 = vor.u32 %v3808_v1, %v3807_v29  ;;  %v3826_v55 = vrot.slane %v3824_v47, 4  ;;  %v3831_v29 = vor.u32 %v3830_v53, %v3829_v42 }
 0x73a   : > { %11203 = vst [vmem:[#allocation36_spill] sm:$0xff] %v9379_v4  ;;  %v3838_v42 = vrot.slane %v3518_v62, 6  ;;  %v3542_v53 = vshll.u32 %v11209_v57, 16 }
 0x73b   : > { %v3478_v21 = vrot.slane %v3477_v17, 4  ;;  %v3811_v45 = vrot.slane %v3809_v54, 4  ;;  %v9423_v34 = vpop.permute.xlu0 %4392  ;;  %v11205_v17 = vld [vmem:[#allocation30_spill] sm:$0xff] }
 0x73c   : > { %v3509_v1 = vshrl.u32 %v11205_v17, 16  ;;  %v3512_v35 = vshll.u32 %v11205_v17, 16  ;;  %v3839_v43 = vor.u32 %v3838_v42, %v3837_v25 }
 0x73d   : > { %4313 = vrot.lane.b32.xlu1 %v9176_v22, %s6684_s14  ;;  %4361 = vrot.lane.b32.xlu0 %v9252_v40, %s6689_s28  ;;  %v9387_v33 = vpop.permute.xlu1 %4289 }
 0x73e   : > { %v3511_v27 = vrot.slane %v3509_v1, 4  ;;  %v3514_v7 = vrot.slane %v3512_v35, 5  ;;  %v3841_v42 = vrot.slane %v3839_v43, 4 }
 0x741   : > { %4418 = vrot.lane.b32.xlu1 %v9178_v50, %s6690_s9  ;;  %4431 = vrot.lane.b32.xlu0 %v9261_v61, %s6692_s8 }
 0x745   : > { %4165 = vrot.lane.b32.xlu1 %v9176_v22, %s6679_s29  ;;  %4433 = vrot.lane.b32.xlu0 %v9281_v32, %s6692_s8  ;;  %v3467_v22 = vor.u32 %v3466_v30, %v3463_v41  ;;  %v3487_v41 = vrot.slane %v3485_v5, 4  ;;  %v3490_v30 = vrot.slane %v3488_v59, 5  ;;  %v9447_v59 = vpop.permute.xlu0 %4291 }
 0x747   : > { %v3468_v60 = vrot.slane %v3467_v22, 4  ;;  %v3501_v22 = vor.u32 %v3500_v56, %v3496_v14  ;;  %v3546_v56 = vshrl.u32 %v11209_v57, 16 }
 0x749   : > { %4167 = vrot.lane.b32.xlu1 %v9178_v50, %s6679_s29  ;;  %4225 = vrot.lane.b32.xlu0 %v9261_v61, %s6681_s11  ;;  %v9405_v50 = vpop.permute.xlu1 %4394  ;;  %v3473_v18 = vsel %vm6816_vm5, %v3468_v60, %v3472_v12  ;;  %v3810_v12 = vsel %vm8206_vm11, %v3806_v24, %v3809_v54  ;;  %v3491_v54 = vor.u32 %v3490_v30, %v3487_v41  ;;  %v3502_v46 = vrot.slane %v3501_v22, 4  ;;  %v11208_v24 = vld [vmem:[#allocation29_spill] sm:$0xff] }
 0x74a   : > { %v2580_v41 = vsel %vm1701_vm7, %v9321_v36, 0  ;;  %v3852_v36 = vrot.slane %v3546_v56, 5  ;;  %vm4603_vm7 = vcmask 326656  }
 0x74b   : > { %v3492_v0 = vrot.slane %v3491_v54, 4  ;;  %6275 = vmatpush3.bf16.msra.mxu1 %v2580_v41  ;;  %6199 = vmatpush3.bf16.msra.mxu0 %v2580_v41 }
 0x74d   : > { %4317 = vrot.lane.b32.xlu1 %v9189_v9, %s6684_s14  ;;  %4260 = vrot.lane.b32.xlu0 %v9300_v31, %s6682_s12  ;;  %v3483_v9 = vsel %vm6816_vm5, %v3478_v21, %v3482_v2  ;;  %v9421_v6 = vpop.permute.xlu1 %4141  ;;  %v3832_v2 = vsel %vm8206_vm11, %v3826_v55, %v3831_v29  ;;  %v3825_v21 = vsel %vm8206_vm11, %v3821_v37, %v3824_v47  ;;  %v3834_v55 = vrot.slane %v3512_v35, 6  ;;  %v11210_v37 = vld [vmem:[#allocation31_spill] sm:$0xff] }
 0x74e   : > { %v9419_v3 = vcombine.low %v3473_v18, %v3483_v9  ;;  %v9451_v60 = vcombine.low %v3825_v21, %v3832_v2  ;;  %v3515_v47 = vor.u32 %v3514_v7, %v3511_v27  ;;  %v3525_v18 = vor.u32 %v3524_v38, %v9453_v11 }
 0x74f   : > { %v3497_v30 = vsel %vm6816_vm5, %v3492_v0, %v3496_v14  ;;  %v3533_v29 = vshrl.u32 %v11210_v37, 16  ;;  %v3536_v17 = vshll.u32 %v11210_v37, 16  ;;  %v3853_v2 = vrot.slane %v3542_v53, 6  ;;  %v6375_v14 = vld [vmem:[%s11036_s3 + $0x8] sm:$0xff]  }
 0x750   : > { %11204 = vst [vmem:[#allocation37_spill] sm:$0xff] %v9419_v3  ;;  %v3526_v62 = vrot.slane %v3525_v18, 4  ;;  %v3516_v21 = vrot.slane %v3515_v47, 4  ;;  %v11215_v18 = vld [vmem:[#allocation9_spill] sm:$0xff]  ;;  %v11218_v47 = vld [vmem:[#allocation10_spill] sm:$0xff] }
 0x751   : > { %4219 = vrot.lane.b32.xlu1 %v9130_v44, %s6681_s11  ;;  %4330 = vrot.lane.b32.xlu0 %v9281_v32, %s6691_s27  ;;  %v3817_v44 = vsel %vm8206_vm11, %v3811_v45, %v3816_v58  ;;  %v9445_v5 = vpop.permute.xlu1 %4143  ;;  %v3507_v45 = vsel %vm6816_vm5, %v3502_v46, %v3506_v23  ;;  %v3528_v58 = vshll.u32 %v11208_v24, 16  ;;  %v11214_v46 = vld [vmem:[#allocation32_spill] sm:$0xff]  ;;  %v3848_v23 = vrot.slane %v3533_v29, 5 }
 0x752   : > { %v9435_v51 = vcombine.low %v3810_v12, %v3817_v44  ;;  %v3833_v44 = vrot.slane %v3509_v1, 5  ;;  %v3842_v12 = vshrl.u32 %v11208_v24, 16  ;;  %v9487_v1 = vcombine.low %v3497_v30, %v3507_v45  ;;  %6213 = vmatmul.mubr.msk.bf16.vlgmr.msra.gmra.mrb[0].mxu1 %vm1364_vm6, %v11215_v18  ;;  %v11216_v24 = vld [vmem:[#allocation4_spill] sm:$0xff] }
 0x753   : > { %v3530_v35 = vrot.slane %v3528_v58, 5  ;;  %v3845_v7 = vrot.slane %v3528_v58, 6  ;;  %v3552_v38 = vshll.u32 %v11214_v46, 16  ;;  %v3849_v0 = vrot.slane %v3536_v17, 6  ;;  %6201 = vmatmul.mubr.msk.bf16.vlgmr.msra.gmra.mrb[32].mxu0 %vm1364_vm6, %v11216_v24  ;;  %6216 = vmatprep.mubr.msk.bf16.mxu1 %vm1364_vm6, %v11218_v47 }
 0x754   : > { %11213 = vst [vmem:[#allocation27_spill] sm:$0xff] %v9487_v1  ;;  %v3835_v54 = vor.u32 %v3834_v55, %v3833_v44  ;;  %v3844_v27 = vrot.slane %v3842_v12, 5  ;;  %v3857_v45 = vshrl.u32 %v11214_v46, 16  ;;  %v3854_v57 = vor.u32 %v3853_v2, %v3852_v36  ;;  %v6376_v44 = vld [vmem:[%s11036_s3 + $0x10] sm:$0xff]   ;;  %v11219_v55 = vld [vmem:[#allocation5_spill] sm:$0xff] }
 0x755   : > { %4252 = vrot.lane.b32.xlu1 %v9327_v26, %s6682_s12  ;;  %4365 = vrot.lane.b32.xlu0 %v9419_v3, %s6689_s28  ;;  %v3531_v58 = vsel %vm6816_vm5, %v3526_v62, %v3530_v35  ;;  %v3850_v30 = vor.u32 %v3849_v0, %v3848_v23  ;;  %v3860_v35 = vrot.slane %v3552_v38, 6  ;;  %v9530_v18 = vrot.slane %v3542_v53, 5  ;;  %v11223_v23 = vld [vmem:[#allocation11_spill] sm:$0xff]  ;;  %v11224_v0 = vld [vmem:[#allocation6_spill] sm:$0xff] }
 0x756   : > { %6204 = vmatprep.mubr.msk.bf16.mxu0 %vm1364_vm6, %v11219_v55  ;;  %v3836_v12 = vrot.slane %v3835_v54, 4  ;;  %v3846_v41 = vor.u32 %v3845_v7, %v3844_v27  ;;  %v3859_v37 = vrot.slane %v3857_v45, 5  ;;  %v3548_v24 = vrot.slane %v3546_v56, 4  ;;  %v6377_v54 = vld [vmem:[%s11036_s3 + $0x18] sm:$0xff]  }
 0x757   : > { %v3851_v56 = vrot.slane %v3850_v30, 4  ;;  %v3535_v27 = vrot.slane %v3533_v29, 4  ;;  %v3538_v7 = vrot.slane %v3536_v17, 5  ;;  %v11228_v29 = vld [vmem:[#allocation12_spill] sm:$0xff]  ;;  %v11230_v30 = vld [vmem:[#allocation7_spill] sm:$0xff] }
 0x758   : > { %v3840_v53 = vsel %vm8206_vm11, %v3836_v12, %v3839_v43 }
 0x759   : > { %4254 = vrot.lane.b32.xlu1 %v9191_v28, %s6682_s12  ;;  %4435 = vrot.lane.b32.xlu0 %v9435_v51, %s6692_s8 }
 0x75a   : > { %6217 = vmatmul.mubr.msk.bf16.gmra.mrb[4].mxu1 %vm1364_vm6, %v11223_v23 }
 0x75b   : > { %6205 = vmatmul.mubr.msk.bf16.gmra.mrb[36].mxu0 %vm1364_vm6, %v11224_v0  ;;  %6220 = vmatprep.mubr.msk.bf16.mxu1 %vm1364_vm6, %v11228_v29 }
 0x75c   : > { %6208 = vmatprep.mubr.msk.bf16.mxu0 %vm1364_vm6, %v11230_v30  ;;  %v11238_v30 = vld [vmem:[#allocation14_spill] sm:$0xff] }
 0x75d   : > { %4324 = vrot.lane.b32.xlu1 %v9312_v52, %s6691_s27  ;;  %4437 = vrot.lane.b32.xlu0 %v9451_v60, %s6692_s8  ;;  %v6374_v52 = vld [vmem:[%s11036_s3] sm:$0xff]  }
 0x75e   : > { %6232 = vmatprep.subr.bf16.mxu1 %v6374_v52 }
 0x75f   : > { %v9459_v48 = vpop.permute.xlu1 %4293  ;;  %v9461_v9 = vpop.permute.xlu0 %4396  ;;  %6233 = vmatpush3.bf16.msra.mxu1 %v6374_v52  ;;  %v3521_v52 = vsel %vm6816_vm5, %v3516_v21, %v9453_v11  ;;  %v3847_v11 = vsel %vm8206_vm11, %v3841_v42, %v3846_v41  ;;  %v3856_v21 = vrot.slane %v3854_v57, 4  ;;  %v11227_v42 = vld [vmem:[#allocation33_spill] sm:$0xff] }
 0x760   : > { %11207 = vst [vmem:[#allocation30_spill] sm:$0xff] %v9459_v48  ;;  %6234 = vmatprep.subr.bf16.mxu1 %v6375_v14  ;;  %v9528_v2 = vcombine.low %v3521_v52, %v3531_v58  ;;  %v3549_v58 = vor.u32 %v3548_v24, %v9530_v18  ;;  %v3557_v43 = vshrl.u32 %v11227_v42, 16  ;;  %v3560_v55 = vshll.u32 %v11227_v42, 16  ;;  %v11229_v52 = vld [vmem:[#allocation28_spill] sm:$0xff] }
 0x761   : > { %4359 = vrot.lane.b32.xlu1 %v9355_v63, %s6689_s28  ;;  %4229 = vrot.lane.b32.xlu0 %v9435_v51, %s6681_s11  ;;  %v3566_v12 = vshll.u32 %v11229_v52, 16  ;;  %v3570_v41 = vshrl.u32 %v11229_v52, 16 }
 0x762   : > { %11222 = vst [vmem:[#allocation4_spill] sm:$0xff] %v9528_v2  ;;  %v3863_v42 = vrot.slane %v3557_v43, 5  ;;  %v3864_v46 = vrot.slane %v3560_v55, 6 }
 0x763   : > { %v9483_v22 = vpop.permute.xlu1 %4398  ;;  %v9485_v8 = vpop.permute.xlu0 %4295  ;;  %6235 = vmatpush3.bf16.msra.mxu1 %v6375_v14  ;;  %v3861_v14 = vor.u32 %v3860_v35, %v3859_v37  ;;  %v3539_v37 = vor.u32 %v3538_v7, %v3535_v27  ;;  %v9576_v23 = vrot.slane %v3566_v12, 5  ;;  %v3572_v0 = vrot.slane %v3570_v41, 4  ;;  %v11233_v27 = vld [vmem:[#allocation34_spill] sm:$0xff] }
 0x764   : > { %11211 = vst [vmem:[#allocation26_spill] sm:$0xff] %v9483_v22  ;;  %11212 = vst [vmem:[#allocation29_spill] sm:$0xff] %v9485_v8  ;;  %6236 = vmatprep.subr.bf16.mxu1 %v6376_v44  ;;  %v3576_v7 = vshll.u32 %v11233_v27, 16 }
 0x765   : > { %4223 = vrot.lane.b32.xlu1 %v9337_v15, %s6681_s11  ;;  %4264 = vrot.lane.b32.xlu0 %v9487_v1, %s6682_s12  ;;  %v3862_v17 = vsel %vm8206_vm11, %v3856_v21, %v3861_v14  ;;  %v3550_v21 = vrot.slane %v3549_v58, 4  ;;  %v3562_v14 = vrot.slane %v3560_v55, 5  ;;  %v11234_v58 = vld [vmem:[#allocation13_spill] sm:$0xff] }
 0x766   : > { %6221 = vmatmul.mubr.msk.bf16.gmra.mrb[8].mxu1 %vm1364_vm6, %v11234_v58 }
 0x767   : > { %v9502_v15 = vpop.permute.xlu1 %4145  ;;  %v9504_v25 = vpop.permute.xlu0 %4400  ;;  %6237 = vmatpush3.bf16.msra.mxu1 %v6376_v44  ;;  %v3855_v44 = vsel %vm8206_vm11, %v3851_v56, %v3854_v57  ;;  %v3554_v57 = vrot.slane %v3552_v38, 5  ;;  %v3540_v56 = vrot.slane %v3539_v37, 4  ;;  %v3867_v38 = vrot.slane %v3570_v41, 5  ;;  %6224 = vmatprep.mubr.msk.bf16.mxu1 %vm1364_vm6, %v11238_v30  ;;  %v6651_v37 = vld [vmem:[#allocation2 + $0x88] sm:$0xf] }
 0x768   : > { %11217 = vst [vmem:[#allocation31_spill] sm:$0xff] %v9504_v25  ;;  %6238 = vmatprep.subr.bf16.mxu1 %v6377_v54  ;;  %v3590_v58 = vshll.u32 %v6651_v37, 16  ;;  %v3594_v4 = vshrl.u32 %v6651_v37, 16  ;;  %v3865_v30 = vor.u32 %v3864_v46, %v3863_v42  ;;  %v3875_v37 = vrot.slane %v3576_v7, 6  ;;  %v11243_v46 = vld [vmem:[#allocation15_spill] sm:$0xff] }
 0x769   : > { %4258 = vrot.lane.b32.xlu1 %v9252_v40, %s6682_s12  ;;  %4334 = vrot.lane.b32.xlu0 %v9451_v60, %s6691_s27 }
 0x76b   : > { %v9524_v62 = vpop.permute.xlu1 %4147  ;;  %v9526_v36 = vpop.permute.xlu0 %4299  ;;  %6239 = vmatpush3.bf16.msra.mxu1 %v6377_v54  ;;  %v11235_v54 = vld [vmem:[#allocation8_spill] sm:$0xff] }
 0x76c   : > { %11220 = vst [vmem:[#allocation32_spill] sm:$0xff] %v9524_v62  ;;  %11221 = vst [vmem:[#allocation9_spill] sm:$0xff] %v9526_v36  ;;  %6209 = vmatmul.mubr.msk.bf16.gmra.mrb[40].mxu0 %vm1364_vm6, %v11235_v54 }
 0x76d   : > { %4328 = vrot.lane.b32.xlu1 %v9261_v61, %s6691_s27  ;;  %4369 = vrot.lane.b32.xlu0 %v9528_v2, %s6689_s28  ;;  %v9551_v61 = vcombine.low %v3840_v53, %v3847_v11  ;;  %v9574_v11 = vcombine.low %v3855_v44, %v3862_v17  ;;  %v3559_v53 = vrot.slane %v3557_v43, 4  ;;  %v3573_v43 = vor.u32 %v3572_v0, %v9576_v23 }
 0x76e   : > { %v3868_v44 = vrot.slane %v3566_v12, 6  ;;  %6225 = vmatmul.mubr.msk.bf16.gmra.mrb[12].mxu1 %vm1364_vm6, %v11243_v46 }
 0x76f   : > { %v9547_v45 = vpop.permute.xlu1 %4297  ;;  %v9549_v47 = vpop.permute.xlu0 %4404  ;;  %v3563_v52 = vor.u32 %v3562_v14, %v3559_v53  ;;  %v11239_v53 = vld [vmem:[#allocation35_spill] sm:$0xff]  ;;  %v3545_v14 = vsel %vm6816_vm5, %v3540_v56, %v9530_v18  ;;  %v3574_v19 = vrot.slane %v3573_v43, 4  ;;  %v9618_v56 = vld [vmem:[#allocation2 + $0x8c] sm:$0x3] }
 0x770   : > { %11225 = vst [vmem:[#allocation10_spill] sm:$0xff] %v9547_v45  ;;  %11226 = vst [vmem:[#allocation5_spill] sm:$0xff] %v9549_v47  ;;  %v3581_v55 = vshrl.u32 %v11239_v53, 16  ;;  %v3584_v41 = vshll.u32 %v11239_v53, 16  ;;  %v3600_v53 = vshll.u32 %v9618_v56, 16  ;;  %v3887_v42 = vshrl.u32 %v9618_v56, 16 }
 0x771   : > { %4363 = vrot.lane.b32.xlu1 %v9300_v31, %s6689_s28  ;;  %4439 = vrot.lane.b32.xlu0 %v9551_v61, %s6692_s8  ;;  %v3564_v54 = vrot.slane %v3563_v52, 4  ;;  %v3578_v52 = vrot.slane %v3576_v7, 5  ;;  %v9642_v47 = vrot.slane %v3590_v58, 5 }
 0x773   : > { %v9570_v35 = vpop.permute.xlu1 %4402  ;;  %v9572_v24 = vpop.permute.xlu0 %4303  ;;  %v3569_v7 = vsel %vm6816_vm5, %v3564_v54, %v9576_v23 }
 0x774   : > { %11231 = vst [vmem:[#allocation11_spill] sm:$0xff] %v9570_v35  ;;  %11232 = vst [vmem:[#allocation6_spill] sm:$0xff] %v9572_v24  ;;  %v3883_v24 = vrot.slane %v3590_v58, 6  ;;  %v3596_v35 = vrot.slane %v3594_v4, 4  ;;  %v3583_v58 = vrot.slane %v3581_v55, 4 }
 0x775   : > { %4227 = vrot.lane.b32.xlu1 %v9281_v32, %s6681_s11  ;;  %4441 = vrot.lane.b32.xlu0 %v9574_v11, %s6692_s8  ;;  %v3555_v32 = vsel %vm6816_vm5, %v3550_v21, %v3554_v57  ;;  %v3872_v21 = vshrl.u32 %v11233_v27, 16  ;;  %v3882_v27 = vrot.slane %v3594_v4, 5 }
 0x776   : > { %v9612_v57 = vcombine.low %v3545_v14, %v3555_v32  ;;  %v3878_v32 = vrot.slane %v3581_v55, 5  ;;  %v3879_v14 = vrot.slane %v3584_v41, 6 }
 0x777   : > { %v9589_v29 = vpop.permute.xlu1 %4149  ;;  %v9591_v17 = vpop.permute.xlu0 %4408  ;;  %v3874_v18 = vrot.slane %v3872_v21, 5  ;;  %v3579_v21 = vsel %vm6816_vm5, %v3574_v19, %v3578_v52  ;;  %v3884_v46 = vor.u32 %v3883_v24, %v3882_v27  ;;  %v6653_v52 = vld [vmem:[#allocation2 + $0x90] sm:$0xf] }
 0x778   : > { %11236 = vst [vmem:[#allocation33_spill] sm:$0xff] %v9589_v29  ;;  %11237 = vst [vmem:[#allocation12_spill] sm:$0xff] %v9591_v17  ;;  %v3869_v17 = vor.u32 %v3868_v44, %v3867_v38  ;;  %v6378_v44 = vld [vmem:[%s11036_s3 + $0x20] ss:$0 sps:$4 sm:$0xff]   ;;  %v9648_v24 = vcombine.low %v3569_v7, %v3579_v21  ;;  %v3608_v21 = vshll.u32 %v6653_v52, 16 }
 0x779   : > { %4262 = vrot.lane.b32.xlu1 %v9419_v3, %s6682_s12  ;;  %4233 = vrot.lane.b32.xlu0 %v9551_v61, %s6681_s11  ;;  %11242 = vst [vmem:[#allocation34_spill] sm:$0xff] %v9612_v57  ;;  %v4810_v54 = vsel %vm4808_vm4, %v6378_v44, 0 }
 0x77a   : > { %v3871_v56 = vrot.slane %v3869_v17, 4  ;;  %6279 = vmatprep.subr.msk.bf16.mxu1 %vm4808_vm4, %v6378_v44 }
 0x77b   : > { %v9608_v12 = vpop.permute.xlu1 %4151  ;;  %v9610_v0 = vpop.permute.xlu0 %4307  ;;  %6241 = vmatpush3.bf16.msra.mxu1 %v4810_v54 }
 0x77c   : > { %11240 = vst [vmem:[#allocation28_spill] sm:$0xff] %v9608_v12  ;;  %11241 = vst [vmem:[#allocation7_spill] sm:$0xff] %v9610_v0  ;;  %v3880_v0 = vor.u32 %v3879_v14, %v3878_v32  ;;  %v3889_v12 = vrot.slane %v3887_v42, 5  ;;  %v3597_v14 = vor.u32 %v3596_v35, %v9642_v47  ;;  %v3605_v42 = vshrl.u32 %v6653_v52, 16 }
 0x77d   : > { %4332 = vrot.lane.b32.xlu1 %v9435_v51, %s6691_s27  ;;  %4268 = vrot.lane.b32.xlu0 %v9612_v57, %s6682_s12  ;;  %v11246_v51 = vld [vmem:[#allocation16_spill] sm:$0xff]  ;;  %v3602_v52 = vrot.slane %v3600_v53, 5 }
 0x77e   : > { %6228 = vmatprep.mubr.msk.bf16.mxu1 %vm1364_vm6, %v11246_v51  ;;  %v3866_v51 = vrot.slane %v3865_v30, 4  ;;  %v3886_v30 = vrot.slane %v3884_v46, 4 }
 0x77f   : > { %v9624_v38 = vpop.permute.xlu1 %4301  ;;  %v9626_v43 = vpop.permute.xlu0 %4412 }
 0x780   : > { %11244 = vst [vmem:[#allocation13_spill] sm:$0xff] %v9624_v38  ;;  %11245 = vst [vmem:[#allocation8_spill] sm:$0xff] %v9626_v43  ;;  %v3876_v43 = vor.u32 %v3875_v37, %v3874_v18  ;;  %v3890_v38 = vrot.slane %v3600_v53, 6  ;;  %v3870_v4 = vsel %vm8206_vm11, %v3866_v51, %v3869_v17  ;;  %v3586_v37 = vrot.slane %v3584_v41, 5 }
 0x781   : > { %4367 = vrot.lane.b32.xlu1 %v9487_v1, %s6689_s28  ;;  %4338 = vrot.lane.b32.xlu0 %v9574_v11, %s6691_s27  ;;  %v3881_v18 = vrot.slane %v3880_v0, 4  ;;  %v3598_v0 = vrot.slane %v3597_v14, 4 }
 0x782   : > { %v3877_v27 = vsel %vm8206_vm11, %v3871_v56, %v3876_v43  ;;  %v3891_v32 = vor.u32 %v3890_v38, %v3889_v12  ;;  %v11249_v43 = vld [vmem:[#allocation17_spill] sm:$0xff]  ;;  %v6654_v56 = vld [vmem:[#allocation2 + $0x94] sm:$0xf]  ;;  %v3587_v12 = vor.u32 %v3586_v37, %v3583_v58  ;;  %v3607_v38 = vrot.slane %v3605_v42, 4 }
 0x783   : > { %v9644_v23 = vpop.permute.xlu1 %4406  ;;  %v9646_v19 = vpop.permute.xlu0 %4311  ;;  %6229 = vmatmul.mubr.msk.bf16.gmra.mrb[16].mxu1 %vm1364_vm6, %v11249_v43  ;;  %v9665_v7 = vcombine.low %v3870_v4, %v3877_v27  ;;  %v3614_v17 = vshll.u32 %v6654_v56, 16  ;;  %v3618_v55 = vshrl.u32 %v6654_v56, 16  ;;  %v3885_v35 = vsel %vm8206_vm11, %v3881_v18, %v3884_v46 }
 0x784   : > { %11247 = vst [vmem:[#allocation14_spill] sm:$0xff] %v9644_v23  ;;  %11248 = vst [vmem:[#allocation35_spill] sm:$0xff] %v9646_v19  ;;  %v3892_v41 = vsel %vm8206_vm11, %v3886_v30, %v3891_v32  ;;  %v3610_v4 = vrot.slane %v3608_v21, 5  ;;  %v3588_v46 = vrot.slane %v3587_v12, 4  ;;  %v3603_v58 = vsel %vm6816_vm5, %v3598_v0, %v3602_v52  ;;  %v6656_v12 = vld [vmem:[#allocation2 + $0x98] sm:$0x3] }
 0x785   : > { %4231 = vrot.lane.b32.xlu1 %v9451_v60, %s6681_s11  ;;  %4373 = vrot.lane.b32.xlu0 %v9648_v24, %s6689_s28  ;;  %v9679_v27 = vcombine.low %v3885_v35, %v3892_v41  ;;  %v9681_v30 = vrot.slane %v3614_v17, 5  ;;  %v3620_v32 = vrot.slane %v3618_v55, 4  ;;  %v3893_v56 = vrot.slane %v3605_v42, 5 }
 0x786   : > { %v3611_v14 = vor.u32 %v3610_v4, %v3607_v38  ;;  %v3894_v41 = vrot.slane %v3608_v21, 6  ;;  %v3897_v53 = vrot.slane %v3618_v55, 5  ;;  %v3898_v35 = vrot.slane %v3614_v17, 6 }
 0x787   : > { %v9661_v44 = vpop.permute.xlu1 %4153  ;;  %v9663_v60 = vpop.permute.xlu0 %4416  ;;  %v3621_v43 = vor.u32 %v3620_v32, %v9681_v30  ;;  %v3624_v0 = vshll.u32 %v6656_v12, 16  ;;  %v3902_v52 = vshrl.u32 %v6656_v12, 16  ;;  %v3593_v42 = vsel %vm6816_vm5, %v3588_v46, %v9642_v47 }
 0x788   : > { %11250 = vst [vmem:[#allocation15_spill] sm:$0xff] %v9661_v44  ;;  %11251 = vst [vmem:[#allocation16_spill] sm:$0xff] %v9663_v60  ;;  %v5970_v55 = vcombine.low %v3593_v42, %v3603_v58  ;;  %v3895_v19 = vor.u32 %v3894_v41, %v3893_v56 }
 0x789   : > { %4266 = vrot.lane.b32.xlu1 %v9528_v2, %s6682_s12  ;;  %4443 = vrot.lane.b32.xlu0 %v9665_v7, %s6692_s8  ;;  %v3622_v32 = vrot.slane %v3621_v43, 4  ;;  %v3905_v12 = vrot.slane %v3624_v0, 6  ;;  %v3626_v46 = vrot.slane %v3624_v0, 5 }
 0x78b   : > { %v9675_v51 = vpop.permute.xlu1 %4155  ;;  %v9677_v54 = vpop.permute.xlu0 %4315 }
 0x78c   : > { %11252 = vst [vmem:[#allocation17_spill] sm:$0xff] %v9675_v51  ;;  %11253 = vst [vmem:[#allocation38_spill] sm:$0xff] %v9677_v54  ;;  %v6655_v54 = vld [vmem:[#allocation2 + $0xa0] sm:$0xf] }
 0x78d   : > { %4336 = vrot.lane.b32.xlu1 %v9551_v61, %s6691_s27  ;;  %4445 = vrot.lane.b32.xlu0 %v9679_v27, %s6692_s8  ;;  %v3638_v61 = vshll.u32 %v6655_v54, 16  ;;  %v3642_v60 = vshrl.u32 %v6655_v54, 16  ;;  %v3612_v54 = vrot.slane %v3611_v14, 4 }
 0x78f   : > { %v9689_v37 = vpop.permute.xlu1 %4305  ;;  %v9691_v18 = vpop.permute.xlu0 %4420  ;;  %v3913_v51 = vrot.slane %v3638_v61, 6 }
 0x790   : > { %11254 = vst [vmem:[#allocation39_spill] sm:$0xff] %v9689_v37  ;;  %11255 = vst [vmem:[#allocation40_spill] sm:$0xff] %v9691_v18  ;;  %v6657_v18 = vld [vmem:[#allocation2 + $0x9c] sm:$0xf]  ;;  %v3899_v37 = vor.u32 %v3898_v35, %v3897_v53  ;;  %v3617_v53 = vsel %vm6816_vm5, %v3612_v54, %v9681_v30  ;;  %v3896_v35 = vrot.slane %v3895_v19, 4 }
 0x791   : > { %4371 = vrot.lane.b32.xlu1 %v9612_v57, %s6689_s28  ;;  %4237 = vrot.lane.b32.xlu0 %v9665_v7, %s6681_s11  ;;  %v3629_v38 = vshrl.u32 %v6657_v18, 16  ;;  %v3632_v4 = vshll.u32 %v6657_v18, 16  ;;  %v3912_v57 = vrot.slane %v3642_v60, 5  ;;  %v3904_v18 = vrot.slane %v3902_v52, 5  ;;  %v6659_v54 = vld [vmem:[#allocation2 + $0xa8] sm:$0xf] }
 0x792   : > { %v3901_v56 = vrot.slane %v3899_v37, 4 }
 0x793   : > { %v9701_v21 = vpop.permute.xlu1 %4410  ;;  %v9703_v17 = vpop.permute.xlu0 %4322  ;;  %v3908_v23 = vrot.slane %v3629_v38, 5  ;;  %v3909_v47 = vrot.slane %v3632_v4, 6  ;;  %v3914_v41 = vor.u32 %v3913_v51, %v3912_v57  ;;  %v3906_v0 = vor.u32 %v3905_v12, %v3904_v18 }
 0x794   : > { %11256 = vst [vmem:[#allocation41_spill] sm:$0xff] %v9701_v21  ;;  %v6658_v21 = vld [vmem:[#allocation2 + $0xa4] sm:$0x3]  ;;  %v3631_v19 = vrot.slane %v3629_v38, 4  ;;  %v3653_v18 = vshrl.u32 %v6659_v54, 16  ;;  %v3656_v12 = vshll.u32 %v6659_v54, 16 }
 0x795   : > { %4235 = vrot.lane.b32.xlu1 %v9574_v11, %s6681_s11  ;;  %4272 = vrot.lane.b32.xlu0 %v5970_v55, %s6682_s12  ;;  %v3648_v1 = vshll.u32 %v6658_v21, 16  ;;  %v3917_v2 = vshrl.u32 %v6658_v21, 16  ;;  %v3627_v11 = vsel %vm6816_vm5, %v3622_v32, %v3626_v46  ;;  %v3910_v52 = vor.u32 %v3909_v47, %v3908_v23 }
 0x796   : > { %v3644_v32 = vrot.slane %v3642_v60, 4  ;;  %v5971_v51 = vcombine.low %v3617_v53, %v3627_v11  ;;  %v3916_v44 = vrot.slane %v3914_v41, 4  ;;  %v3634_v60 = vrot.slane %v3632_v4, 5 }
 0x797   : > { %v4158_v58 = vpop.permute.xlu1 %4157  ;;  %v9708_v14 = vpop.permute.xlu0 %4357  ;;  %v3919_v42 = vrot.slane %v3917_v2, 5  ;;  %v3920_v21 = vrot.slane %v3648_v1, 6  ;;  %v3900_v2 = vsel %vm8206_vm11, %v3896_v35, %v3899_v37  ;;  %v3911_v23 = vrot.slane %v3910_v52, 4 }
 0x798   : > { %v9712_v43 = vsel %vm1413_vm8, %v9648_v24, %v4158_v58  ;;  %v9723_v58 = vrot.slane %v3638_v61, 5  ;;  %v3635_v38 = vor.u32 %v3634_v60, %v3631_v19  ;;  %v3655_v52 = vrot.slane %v3653_v18, 4 }
 0x799   : > { %11257 = vst [vmem:[#allocation42_spill] sm:$0xff] %v9712_v43  ;;  %4270 = vrot.lane.b32.xlu1 %v9648_v24, %s6682_s12  ;;  %4342 = vrot.lane.b32.xlu0 %v9679_v27, %s6691_s27  ;;  %v3907_v43 = vsel %vm8206_vm11, %v3901_v56, %v3906_v0  ;;  %v3921_v30 = vor.u32 %v3920_v21, %v3919_v42  ;;  %v3658_v42 = vrot.slane %v3656_v12, 5 }
 0x79a   : > { %v3645_v61 = vor.u32 %v3644_v32, %v9723_v58  ;;  %v6003_v56 = vcombine.low %v3900_v2, %v3907_v43  ;;  %v3915_v4 = vsel %vm8206_vm11, %v3911_v23, %v3914_v41  ;;  %v3650_v2 = vrot.slane %v3648_v1, 5  ;;  %v6661_v1 = vld [vmem:[#allocation2 + $0xb0] sm:$0x3] }
 0x79b   : > { %v4160_v46 = vpop.permute.xlu1 %4159  ;;  %v9725_v57 = vpop.permute.xlu0 %4427  ;;  %v3922_v37 = vsel %vm8206_vm11, %v3916_v44, %v3921_v30  ;;  %v3636_v23 = vrot.slane %v3635_v38, 4 }
 0x79c   : > { %v9728_v24 = vsel %vm1413_vm8, %v5970_v55, %v4160_v46  ;;  %v3646_v35 = vrot.slane %v3645_v61, 4  ;;  %v9752_v32 = vcombine.low %v3915_v4, %v3922_v37  ;;  %v3659_v61 = vor.u32 %v3658_v42, %v3655_v52  ;;  %v6663_v42 = vld [vmem:[#allocation2 + $0xb4] sm:$0xf] }
 0x79d   : > { %11258 = vst [vmem:[#allocation43_spill] sm:$0xff] %v9728_v24  ;;  %4340 = vrot.lane.b32.xlu1 %v9665_v7, %s6691_s27  ;;  %4377 = vrot.lane.b32.xlu0 %v5971_v51, %s6689_s28  ;;  %v6660_v7 = vld [vmem:[#allocation2 + $0xac] sm:$0xf]  ;;  %v3923_v37 = vrot.slane %v3653_v18, 5  ;;  %v11264_v24 = vld [vmem:[#allocation20_spill] sm:$0xff]  ;;  %v3641_v18 = vsel %vm6816_vm5, %v3636_v23, %v9723_v58 }
 0x79e   : > { %v3662_v53 = vshll.u32 %v6660_v7, 16  ;;  %v3666_v0 = vshrl.u32 %v6660_v7, 16  ;;  %v3651_v60 = vsel %vm6816_vm5, %v3646_v35, %v3650_v2  ;;  %v3672_v7 = vshll.u32 %v6661_v1, 16 }
 0x79f   : > { %v9738_v47 = vpop.permute.xlu1 %4309  ;;  %v9740_v11 = vpop.permute.xlu0 %4429  ;;  %v11265_v45 = vshll.u32 %v11264_v24, 16  ;;  %v5972_v31 = vcombine.low %v3641_v18, %v3651_v60 }
 0x7a0   : > { %11259 = vst [vmem:[#allocation44_spill] sm:$0xff] %v9738_v47  ;;  %v9754_v46 = vrot.slane %v3662_v53, 5  ;;  %v3668_v44 = vrot.slane %v3666_v0, 4  ;;  %v3927_v35 = vrot.slane %v3666_v0, 5  ;;  %v3928_v52 = vrot.slane %v3662_v53, 6 }
 0x7a1   : > { %4375 = vrot.lane.b32.xlu1 %v5970_v55, %s6689_s28  ;;  %4447 = vrot.lane.b32.xlu0 %v6003_v56, %s6692_s8  ;;  %v11261_v55 = vld [vmem:[#allocation19_spill] sm:$0xff]  ;;  %v9775_v36 = vrot.slane %v11265_v45, 5  ;;  %v11267_v45 = vshrl.u32 %v11264_v24, 16  ;;  %v3935_v60 = vrot.slane %v3672_v7, 6 }
 0x7a2   : > { %v11262_v30 = vshrl.u32 %v11261_v55, 16  ;;  %v11263_v19 = vshll.u32 %v11261_v55, 16  ;;  %v3669_v55 = vor.u32 %v3668_v44, %v9754_v46  ;;  %v3680_v44 = vshll.u32 %v6663_v42, 16 }
 0x7a3   : > { %v9748_v21 = vpop.permute.xlu1 %4414  ;;  %v9750_v43 = vpop.permute.xlu0 %4221  ;;  %v3332_v2 = vrot.slane %v11267_v45, 4  ;;  %v3929_v23 = vor.u32 %v3928_v52, %v3927_v35  ;;  %v6664_v45 = vld [vmem:[#allocation2 + $0xbc] sm:$0x3] }
 0x7a4   : > { %11260 = vst [vmem:[#allocation45_spill] sm:$0xff] %v9748_v21  ;;  %v9758_v54 = vrot.slane %v11262_v30, 4  ;;  %v9762_v41 = vrot.slane %v11263_v19, 5  ;;  %v3924_v19 = vrot.slane %v3656_v12, 6  ;;  %v6662_v21 = vld [vmem:[#allocation2 + $0xb8] sm:$0xf] }
 0x7a5   : > { %4239 = vrot.lane.b32.xlu1 %v9679_v27, %s6681_s11  ;;  %4449 = vrot.lane.b32.xlu0 %v9752_v32, %s6692_s8  ;;  %v3686_v47 = vshll.u32 %v6662_v21, 16  ;;  %v3690_v27 = vshrl.u32 %v6662_v21, 16  ;;  %v3932_v12 = vshrl.u32 %v6661_v1, 16  ;;  %v3677_v21 = vshrl.u32 %v6663_v42, 16 }
 0x7a6   : > { %v3925_v62 = vor.u32 %v3924_v19, %v3923_v37  ;;  %v3682_v18 = vrot.slane %v3680_v44, 5  ;;  %v3939_v19 = vrot.slane %v3680_v44, 6  ;;  %v3947_v25 = vshrl.u32 %v6664_v45, 16 }
 0x7a7   : > { %v4162_v4 = vpop.permute.xlu1 %4161  ;;  %v9770_v30 = vpop.permute.xlu0 %4256  ;;  %v9789_v3 = vrot.slane %v3686_v47, 5  ;;  %v3692_v29 = vrot.slane %v3690_v27, 4  ;;  %v3942_v1 = vrot.slane %v3690_v27, 5  ;;  %v3943_v42 = vrot.slane %v3686_v47, 6 }
 0x7a8   : > { %v9778_v38 = vsel %vm1413_vm8, %v5971_v51, %v4162_v4  ;;  %v3660_v4 = vrot.slane %v3659_v61, 4  ;;  %v3934_v24 = vrot.slane %v3932_v12, 5  ;;  %v3679_v61 = vrot.slane %v3677_v21, 4 }
 0x7a9   : > { %11266 = vst [vmem:[#allocation19_spill] sm:$0xff] %v9778_v38  ;;  %4274 = vrot.lane.b32.xlu1 %v5971_v51, %s6682_s12  ;;  %4241 = vrot.lane.b32.xlu0 %v6003_v56, %s6681_s11  ;;  %v3674_v38 = vrot.slane %v3672_v7, 5  ;;  %v3670_v51 = vrot.slane %v3669_v55, 4  ;;  %v3696_v55 = vshll.u32 %v6664_v45, 16  ;;  %v3938_v37 = vrot.slane %v3677_v21, 5 }
 0x7aa   : > { %v3693_v27 = vor.u32 %v3692_v29, %v9789_v3  ;;  %v3323_v47 = vor.u32 %v9762_v41, %v9758_v54  ;;  %v3931_v7 = vrot.slane %v3929_v23, 4  ;;  %v3944_v35 = vor.u32 %v3943_v42, %v3942_v1 }
 0x7ab   : > { %v4164_v0 = vpop.permute.xlu1 %4163  ;;  %v9787_v53 = vpop.permute.xlu0 %4326  ;;  %v3333_v52 = vor.u32 %v3332_v2, %v9775_v36  ;;  %v3665_v12 = vsel %vm6816_vm5, %v3660_v4, %v9754_v46  ;;  %v3926_v29 = vrot.slane %v3925_v62, 4  ;;  %v3683_v21 = vor.u32 %v3682_v18, %v3679_v61  ;;  %v6666_v46 = vld [vmem:[#allocation2 + $0xc4] sm:$0xf] }
 0x7ac   : > { %v9792_v58 = vsel %vm1413_vm8, %v5972_v31, %v4164_v0  ;;  %v3936_v44 = vor.u32 %v3935_v60, %v3934_v24  ;;  %v3940_v54 = vor.u32 %v3939_v19, %v3938_v37  ;;  %v3949_v41 = vrot.slane %v3947_v25, 5  ;;  %v11271_v60 = vld [vmem:[#allocation21_spill] sm:$0xff] }
 0x7ad   : > { %11268 = vst [vmem:[#allocation20_spill] sm:$0xff] %v9792_v58  ;;  %4344 = vrot.lane.b32.xlu1 %v6003_v56, %s6691_s27  ;;  %4276 = vrot.lane.b32.xlu0 %v5972_v31, %s6682_s12  ;;  %v3675_v56 = vsel %vm6816_vm5, %v3670_v51, %v3674_v38  ;;  %v3950_v45 = vrot.slane %v3696_v55, 6  ;;  %v3694_v1 = vrot.slane %v3693_v27, 4  ;;  %v3946_v48 = vrot.slane %v3944_v35, 4 }
 0x7ae   : > { %v5973_v2 = vcombine.low %v3665_v12, %v3675_v56  ;;  %v3937_v58 = vsel %vm8206_vm11, %v3931_v7, %v3936_v44  ;;  %v3963_v62 = vshll.u32 %v6666_v46, 16  ;;  %v3967_v4 = vshrl.u32 %v6666_v46, 16 }
 0x7af   : > { %v9796_v22 = vpop.permute.xlu1 %4313  ;;  %v9798_v0 = vpop.permute.xlu0 %4361  ;;  %v3324_v24 = vrot.slane %v3323_v47, 4  ;;  %v11272_v25 = vshll.u32 %v11271_v60, 16  ;;  %v3684_v18 = vrot.slane %v3683_v21, 4  ;;  %v3698_v37 = vrot.slane %v3696_v55, 5 }
 0x7b0   : > { %11269 = vst [vmem:[#allocation46_spill] sm:$0xff] %v9796_v22  ;;  %v3334_v19 = vrot.slane %v3333_v52, 4  ;;  %v3930_v27 = vsel %vm8206_vm11, %v3926_v29, %v3929_v23  ;;  %v3941_v56 = vrot.slane %v3940_v54, 4  ;;  %v3951_v7 = vor.u32 %v3950_v45, %v3949_v41 }
 0x7b1   : > { %4379 = vrot.lane.b32.xlu1 %v5972_v31, %s6689_s28  ;;  %4346 = vrot.lane.b32.xlu0 %v9752_v32, %s6691_s27  ;;  %v6665_v31 = vld [vmem:[#allocation2 + $0xc0] sm:$0xf]  ;;  %v3338_v61 = vrot.slane %v11272_v25, 5  ;;  %v6005_v47 = vcombine.low %v3930_v27, %v3937_v58  ;;  %v9834_v52 = vrot.slane %v3963_v62, 5  ;;  %v3969_v23 = vrot.slane %v3967_v4, 4  ;;  %v11276_v27 = vld [vmem:[#allocation23_spill] sm:$0xff] }
 0x7b2   : > { %v3954_v42 = vshrl.u32 %v6665_v31, 16  ;;  %v3957_v22 = vshll.u32 %v6665_v31, 16  ;;  %v3699_v31 = vsel %vm6816_vm5, %v3694_v1, %v3698_v37  ;;  %v3952_v55 = vsel %vm8206_vm11, %v3946_v48, %v3951_v7  ;;  %v6667_v25 = vld [vmem:[#allocation2 + $0xc8] sm:$0x3] }
 0x7b3   : > { %v9812_v38 = vpop.permute.xlu1 %4418  ;;  %v9814_v51 = vpop.permute.xlu0 %4431  ;;  %v3689_v58 = vsel %vm6816_vm5, %v3684_v18, %v9789_v3  ;;  %v3329_v29 = vsel %vm6816_vm5, %v3324_v24, %v9775_v36  ;;  %v3945_v54 = vsel %vm8206_vm11, %v3941_v56, %v3944_v35  ;;  %v3339_v48 = vsel %vm6816_vm5, %v3334_v19, %v3338_v61 }
 0x7b4   : > { %11270 = vst [vmem:[#allocation47_spill] sm:$0xff] %v9812_v38  ;;  %v3956_v46 = vrot.slane %v3954_v42, 4  ;;  %v3959_v60 = vrot.slane %v3957_v22, 5  ;;  %v5974_v21 = vcombine.low %v3689_v58, %v3699_v31  ;;  %v3973_v37 = vshll.u32 %v6667_v25, 16 }
 0x7b5   : > { %4243 = vrot.lane.b32.xlu1 %v9752_v32, %s6681_s11  ;;  %4381 = vrot.lane.b32.xlu0 %v5973_v2, %s6689_s28  ;;  %v3970_v18 = vor.u32 %v3969_v23, %v9834_v52  ;;  %v3981_v36 = vrot.slane %v3967_v4, 5  ;;  %v3982_v24 = vrot.slane %v3963_v62, 6  ;;  %v3977_v35 = vrot.slane %v3954_v42, 5  ;;  %v6668_v62 = vld [vmem:[#allocation2 + $0xd4] sm:$0x3] }
 0x7b6   : > { %v3960_v1 = vor.u32 %v3959_v60, %v3956_v46  ;;  %v3978_v61 = vrot.slane %v3957_v22, 6  ;;  %v3986_v19 = vshrl.u32 %v6667_v25, 16  ;;  %v11277_v56 = vshrl.u32 %v11276_v27, 16  ;;  %v11279_v46 = vld [vmem:[#allocation24_spill] sm:$0xff] }
 0x7b7   : > { %v4166_v12 = vpop.permute.xlu1 %4165  ;;  %v9825_v44 = vpop.permute.xlu0 %4433  ;;  %v11280_v60 = vshrl.u32 %v11279_v46, 16  ;;  %v11281_v23 = vshll.u32 %v11279_v46, 16  ;;  %v4035_v58 = vshrl.u32 %v6668_v62, 16  ;;  %v5959_v22 = vcombine.low %v3329_v29, %v3339_v48  ;;  %v11283_v62 = vld [vmem:[#allocation25_spill] sm:$0xff] }
 0x7b8   : > { %11273 = vst [vmem:[#allocation21_spill] sm:$0xff] %v9825_v44  ;;  %v9830_v32 = vsel %vm1413_vm8, %v5973_v2, %v4166_v12  ;;  %v4026_v7 = vrot.slane %v11277_v56, 5  ;;  %v11278_v12 = vshll.u32 %v11276_v27, 16  ;;  %v3961_v42 = vrot.slane %v3960_v1, 4 }
 0x7b9   : > { %11274 = vst [vmem:[#allocation48_spill] sm:$0xff] %v9830_v32  ;;  %4278 = vrot.lane.b32.xlu1 %v5973_v2, %s6682_s12  ;;  %4451 = vrot.lane.b32.xlu0 %v6005_v47, %s6692_s8  ;;  %v6006_v2 = vcombine.low %v3945_v54, %v3952_v55  ;;  %v4030_v55 = vrot.slane %v11280_v60, 5  ;;  %v4031_v4 = vrot.slane %v11281_v23, 6  ;;  %v3971_v25 = vrot.slane %v3970_v18, 4 }
 0x7ba   : > { %v4027_v31 = vrot.slane %v11278_v12, 6  ;;  %v3975_v27 = vrot.slane %v3973_v37, 5  ;;  %v3979_v56 = vor.u32 %v3978_v61, %v3977_v35  ;;  %v3988_v12 = vrot.slane %v3986_v19, 5 }
 0x7bb   : > { %v4168_v41 = vpop.permute.xlu1 %4167  ;;  %v9848_v45 = vpop.permute.xlu0 %4225  ;;  %v3989_v60 = vrot.slane %v3973_v37, 6  ;;  %v4032_v23 = vor.u32 %v4031_v4, %v4030_v55  ;;  %v4037_v32 = vrot.slane %v4035_v58, 5  ;;  %v11284_v38 = vshll.u32 %v11283_v62, 16 }
 0x7bc   : > { %v9851_v3 = vsel %vm1413_vm8, %v5974_v21, %v4168_v41  ;;  %v4028_v46 = vor.u32 %v4027_v31, %v4026_v7  ;;  %v4461_v29 = vsel %vm1413_vm8, %v5959_v22, %v9351_v49  ;;  %v3976_v48 = vsel %vm6816_vm5, %v3971_v25, %v3975_v27 }
 0x7bd   : > { %11275 = vst [vmem:[#allocation49_spill] sm:$0xff] %v9851_v3  ;;  %4348 = vrot.lane.b32.xlu1 %v6005_v47, %s6691_s27  ;;  %4453 = vrot.lane.b32.xlu0 %v6006_v2, %s6692_s8  ;;  %v3983_v3 = vor.u32 %v3982_v24, %v3981_v36  ;;  %v3966_v1 = vsel %vm6816_vm5, %v3961_v42, %v9834_v52  ;;  %v3980_v37 = vrot.slane %v3979_v56, 4  ;;  %v4034_v36 = vrot.slane %v4032_v23, 4 }
 0x7be   : > { %v4029_v18 = vrot.slane %v4028_v46, 4  ;;  %v4508_v49 = vsel %vm1479_vm10, %v4461_v29, %v9361_v13  ;;  %v6007_v19 = vcombine.low %v3966_v1, %v3976_v48  ;;  %vm4669_vm5 = vcmask 457728  }
 0x7bf   : > { %v9864_v54 = vpop.permute.xlu1 %4317  ;;  %v9866_v41 = vpop.permute.xlu0 %4260 }
 0x7c0   : > { %11282 = vst [vmem:[#allocation23_spill] sm:$0xff] %v9864_v54  ;;  %v4038_v54 = vrot.slane %v11284_v38, 6  ;;  %v3990_v38 = vor.u32 %v3989_v60, %v3988_v12  ;;  %v4033_v52 = vsel %vm8206_vm11, %v4029_v18, %v4032_v23  ;;  %v11287_v18 = vld [vmem:[#allocation26_spill] sm:$0xff] }
 0x7c1   : > { %4383 = vrot.lane.b32.xlu1 %v5974_v21, %s6689_s28  ;;  %4245 = vrot.lane.b32.xlu0 %v6005_v47, %s6681_s11  ;;  %v3985_v47 = vrot.slane %v3983_v3, 4 }
 0x7c2   : > { %v4039_v24 = vor.u32 %v4038_v54, %v4037_v32  ;;  %v3984_v32 = vsel %vm8206_vm11, %v3980_v37, %v3983_v3 }
 0x7c3   : > { %v4220_v44 = vpop.permute.xlu1 %4219  ;;  %v9872_v8 = vpop.permute.xlu0 %4330 }
 0x7c4   : > { %v4040_v31 = vsel %vm8206_vm11, %v4034_v36, %v4039_v24  ;;  %v11288_v24 = vld [vmem:[#allocation31_spill] sm:$0xff] }
 0x7c5   : > { %4247 = vrot.lane.b32.xlu1 %v6006_v2, %s6681_s11  ;;  %4280 = vrot.lane.b32.xlu0 %v5974_v21, %s6682_s12  ;;  %v3991_v21 = vsel %vm8206_vm11, %v3985_v47, %v3990_v38  ;;  %v6012_v54 = vcombine.low %v4033_v52, %v4040_v31  ;;  %v11285_v47 = vld [vmem:[#allocation29_spill] sm:$0xff]  ;;  %v11292_v31 = vld [vmem:[#allocation32_spill] sm:$0xff] }
 0x7c7   : > { %v4253_v35 = vpop.permute.xlu1 %4252  ;;  %v9885_v61 = vpop.permute.xlu0 %4365 }
 0x7c8   : > { %v4540_v7 = vsel %vm1545_vm12, %v4508_v49, %v4253_v35  ;;  %v11289_v35 = vld [vmem:[#allocation21_spill] sm:$0xff] }
 0x7c9   : > { %v4572_v20 = vsel %vm1611_vm14, %v4540_v7, %v9407_v10  ;;  %4282 = vrot.lane.b32.xlu1 %v6007_v19, %s6682_s12  ;;  %4350 = vrot.lane.b32.xlu0 %v6006_v2, %s6691_s27  ;;  %v6009_v10 = vcombine.low %v3984_v32, %v3991_v21  ;;  %v4467_v2 = vsel %vm1413_vm8, %v9191_v28, %v9421_v6  ;;  %v11291_v32 = vld [vmem:[#allocation37_spill] sm:$0xff] }
 0x7ca   : > { %v4605_v13 = vsel %vm4603_vm7, %v4572_v20, %v9703_v17  ;;  %v4464_v17 = vsel %vm1413_vm8, %v9327_v26, %v9389_v16  ;;  %v4512_v3 = vsel %vm1479_vm10, %v4467_v2, %v9750_v43 }
 0x7cb   : > { %v4255_v55 = vpop.permute.xlu1 %4254  ;;  %v4436_v4 = vpop.permute.xlu0 %4435  ;;  %v4638_v58 = vsel %vm4636_vm1, %v4605_v13, %v9708_v14  ;;  %v4544_v26 = vsel %vm1545_vm12, %v4512_v3, %v9770_v30  ;;  %v4510_v28 = vsel %vm1479_vm10, %v4464_v17, %v4220_v44  ;;  %v11290_v13 = vld [vmem:[#allocation33_spill] sm:$0xff] }
 0x7cc   : > { %v4671_v39 = vsel %vm4669_vm5, %v4638_v58, %v9423_v34  ;;  %v4542_v16 = vsel %vm1545_vm12, %v4510_v28, %v4255_v55  ;;  %v4576_v43 = vsel %vm1611_vm14, %v4544_v26, %v9447_v59  ;;  %v4479_v52 = vsel %vm1413_vm8, %v11291_v32, %v11290_v13  ;;  %v11293_v55 = vld [vmem:[#allocation22_spill] sm:$0xff]  ;;  %v11306_v32 = vld [vmem:[#allocation17_spill] sm:$0xff] }
 0x7cd   : > { %4352 = vrot.lane.b32.xlu1 %v6009_v10, %s6691_s27  ;;  %4385 = vrot.lane.b32.xlu0 %v6007_v19, %s6689_s28  ;;  %v4704_v14 = vsel %vm4702_vm3, %v4671_v39, %v9725_v57  ;;  %v4609_v57 = vsel %vm4603_vm7, %v4576_v43, %v9787_v53  ;;  %v4574_v30 = vsel %vm1611_vm14, %v4542_v16, %v9387_v33  ;;  %v11295_v28 = vld [vmem:[#allocation10_spill] sm:$0xff] }
 0x7ce   : > { %6242 = vmatprep.mubr.msk.bf16.mxu1 %vm4775_vm2, %v4704_v14  ;;  %v4642_v44 = vsel %vm4636_vm1, %v4609_v57, %v9798_v0  ;;  %v11294_v14 = vld [vmem:[#allocation9_spill] sm:$0xff] }
 0x7cf   : > { %v4325_v6 = vpop.permute.xlu1 %4324  ;;  %v9923_v34 = vpop.permute.xlu0 %4437  ;;  %v4675_v56 = vsel %vm4669_vm5, %v4642_v44, %v9461_v9  ;;  %v4470_v9 = vsel %vm1413_vm8, %v9355_v63, %v9445_v5 }
 0x7d0   : > { %v4607_v22 = vsel %vm4603_vm7, %v4574_v30, %v4325_v6  ;;  %v4708_v33 = vsel %vm4702_vm3, %v4675_v56, %v9814_v51 }
 0x7d1   : > { %4457 = vrot.lane.b32.xlu1 %v6012_v54, %s6692_s8  ;;  %4455 = vrot.lane.b32.xlu0 %v6009_v10, %s6692_s8  ;;  %v4476_v10 = vsel %vm1413_vm8, %v11293_v55, %v11292_v31  ;;  %v11308_v55 = vld [vmem:[#allocation42_spill] sm:$0xff] }
 0x7d3   : > { %v4360_v42 = vpop.permute.xlu1 %4359  ;;  %v4230_v25 = vpop.permute.xlu0 %4229 }
 0x7d4   : > { %v4640_v27 = vsel %vm4636_vm1, %v4607_v22, %v4360_v42  ;;  %v4520_v58 = vsel %vm1479_vm10, %v4479_v52, %v4230_v25  ;;  %v11296_v22 = vld [vmem:[#allocation11_spill] sm:$0xff]  ;;  %v11297_v25 = vld [vmem:[#allocation5_spill] sm:$0xff]  ;;  %v11307_v52 = vld [vmem:[#allocation34_spill] sm:$0xff] }
 0x7d5   : > { %v4673_v59 = vsel %vm4669_vm5, %v4640_v27, %v9405_v50  ;;  %v4473_v50 = vsel %vm1413_vm8, %v9252_v40, %v9502_v15  ;;  %v11286_v15 = vld [vmem:[#allocation30_spill] sm:$0xff]  ;;  %v4488_v31 = vsel %vm1413_vm8, %v11307_v52, %v11306_v32 }
 0x7d6   : > { %v4706_v53 = vsel %vm4702_vm3, %v4673_v59, %v9740_v11  ;;  %v4516_v11 = vsel %vm1479_vm10, %v4473_v50, %v9848_v45 }
 0x7d7   : > { %v4224_v12 = vpop.permute.xlu1 %4223  ;;  %6243 = vmatmul.mubr.msk.bf16.vlgmr.msra.gmra.mrb[20].mxu1 %vm4775_vm2, %v4706_v53  ;;  %v4265_v0 = vpop.permute.xlu0 %4264  ;;  %v4548_v51 = vsel %vm1545_vm12, %v4516_v11, %v9866_v41  ;;  %v11301_v11 = vld [vmem:[#allocation27_spill] sm:$0xff] }
 0x7d8   : > { %6246 = vmatprep.mubr.msk.bf16.mxu1 %vm4775_vm2, %v4708_v33  ;;  %v4514_v23 = vsel %vm1479_vm10, %v4470_v9, %v4224_v12  ;;  %v4580_v1 = vsel %vm1611_vm14, %v4548_v51, %v11285_v47  ;;  %v11300_v9 = vld [vmem:[#allocation28_spill] sm:$0xff] }
 0x7d9   : > { %v4613_v40 = vsel %vm4603_vm7, %v4580_v1, %v9872_v8  ;;  %v4482_v51 = vsel %vm1413_vm8, %v11301_v11, %v11300_v9  ;;  %v11302_v1 = vld [vmem:[#allocation6_spill] sm:$0xff]  ;;  %v11314_v9 = vld [vmem:[#allocation19_spill] sm:$0xff] }
 0x7da   : > { %v4646_v5 = vsel %vm4636_vm1, %v4613_v40, %v9885_v61 }
 0x7db   : > { %v4259_v60 = vpop.permute.xlu1 %4258  ;;  %v4335_v46 = vpop.permute.xlu0 %4334  ;;  %v4679_v49 = vsel %vm4669_vm5, %v4646_v5, %v11288_v24 }
 0x7dc   : > { %v4546_v62 = vsel %vm1545_vm12, %v4514_v23, %v4259_v60  ;;  %v4712_v19 = vsel %vm4702_vm3, %v4679_v49, %v4436_v4  ;;  %v4552_v4 = vsel %vm1545_vm12, %v4520_v58, %v4265_v0  ;;  %v11298_v60 = vld [vmem:[#allocation15_spill] sm:$0xff]  ;;  %v11305_v49 = vld [vmem:[#allocation12_spill] sm:$0xff] }
 0x7dd   : > { %v4578_v63 = vsel %vm1611_vm14, %v4546_v62, %v11286_v15  ;;  %v4584_v54 = vsel %vm1611_vm14, %v4552_v4, %v11294_v14 }
 0x7de   : > { %v4617_v26 = vsel %vm4603_vm7, %v4584_v54, %v4335_v46  ;;  %v11299_v46 = vld [vmem:[#allocation4_spill] sm:$0xff]  ;;  %v11310_v54 = vld [vmem:[#allocation39_spill] sm:$0xff] }
 0x7df   : > { %v4329_v29 = vpop.permute.xlu1 %4328  ;;  %v4370_v48 = vpop.permute.xlu0 %4369  ;;  %v4485_v50 = vsel %vm1413_vm8, %v11299_v46, %v11298_v60 }
 0x7e0   : > { %v4611_v45 = vsel %vm4603_vm7, %v4578_v63, %v4329_v29  ;;  %v4650_v6 = vsel %vm4636_vm1, %v4617_v26, %v4370_v48  ;;  %v11303_v63 = vld [vmem:[#allocation13_spill] sm:$0xff] }
 0x7e1   : > { %v4683_v27 = vsel %vm4669_vm5, %v4650_v6, %v11297_v25 }
 0x7e3   : > { %v4364_v41 = vpop.permute.xlu1 %4363  ;;  %v4440_v37 = vpop.permute.xlu0 %4439 }
 0x7e4   : > { %v4644_v38 = vsel %vm4636_vm1, %v4611_v45, %v4364_v41  ;;  %v4716_v56 = vsel %vm4702_vm3, %v4683_v27, %v4440_v37 }
 0x7e5   : > { %v4677_v36 = vsel %vm4669_vm5, %v4644_v38, %v11287_v18 }
 0x7e6   : > { %v4710_v8 = vsel %vm4702_vm3, %v4677_v36, %v11289_v35  ;;  %v11304_v36 = vld [vmem:[#allocation14_spill] sm:$0xff] }
 0x7e7   : > { %v4228_v7 = vpop.permute.xlu1 %4227  ;;  %6247 = vmatmul.mubr.msk.bf16.gmra.mrb[24].mxu1 %vm4775_vm2, %v4710_v8  ;;  %v4442_v61 = vpop.permute.xlu0 %4441 }
 0x7e8   : > { %6250 = vmatprep.mubr.msk.bf16.mxu1 %vm4775_vm2, %v4712_v19  ;;  %v4518_v17 = vsel %vm1479_vm10, %v4476_v10, %v4228_v7 }
 0x7eb   : > { %v4263_v21 = vpop.permute.xlu1 %4262  ;;  %v4234_v20 = vpop.permute.xlu0 %4233 }
 0x7ec   : > { %v4550_v2 = vsel %vm1545_vm12, %v4518_v17, %v4263_v21 }
 0x7ed   : > { %v4582_v16 = vsel %vm1611_vm14, %v4550_v2, %v11295_v28 }
 0x7ef   : > { %v4333_v39 = vpop.permute.xlu1 %4332  ;;  %v4269_v3 = vpop.permute.xlu0 %4268 }
 0x7f0   : > { %v4615_v43 = vsel %vm4603_vm7, %v4582_v16, %v4333_v39  ;;  %v11309_v39 = vld [vmem:[#allocation7_spill] sm:$0xff] }
 0x7f3   : > { %v4368_v57 = vpop.permute.xlu1 %4367  ;;  %v4339_v30 = vpop.permute.xlu0 %4338 }
 0x7f4   : > { %v4648_v44 = vsel %vm4636_vm1, %v4615_v43, %v4368_v57 }
 0x7f5   : > { %v4681_v42 = vsel %vm4669_vm5, %v4648_v44, %v11296_v22  ;;  %v11312_v22 = vld [vmem:[#allocation8_spill] sm:$0xff] }
 0x7f6   : > { %v4714_v59 = vsel %vm4702_vm3, %v4681_v42, %v9923_v34  ;;  %v4524_v34 = vsel %vm1479_vm10, %v4485_v50, %v4234_v20 }
 0x7f7   : > { %v4232_v53 = vpop.permute.xlu1 %4231  ;;  %6251 = vmatmul.mubr.msk.bf16.gmra.mrb[28].mxu1 %vm4775_vm2, %v4714_v59  ;;  %v4374_v33 = vpop.permute.xlu0 %4373  ;;  %v4556_v23 = vsel %vm1545_vm12, %v4524_v34, %v4269_v3 }
 0x7f8   : > { %6254 = vmatprep.mubr.msk.bf16.mxu1 %vm4775_vm2, %v4716_v56  ;;  %v4522_v62 = vsel %vm1479_vm10, %v4482_v51, %v4232_v53  ;;  %v4588_v40 = vsel %vm1611_vm14, %v4556_v23, %v11302_v1  ;;  %v11315_v51 = vld [vmem:[#allocation44_spill] sm:$0xff]  ;;  %v11316_v1 = vld [vmem:[#allocation45_spill] sm:$0xff] }
 0x7f9   : > { %v4621_v15 = vsel %vm4603_vm7, %v4588_v40, %v4339_v30  ;;  %v11311_v30 = vld [vmem:[#allocation41_spill] sm:$0xff] }
 0x7fa   : > { %v4654_v45 = vsel %vm4636_vm1, %v4621_v15, %v4374_v33  ;;  %v11317_v15 = vld [vmem:[#allocation35_spill] sm:$0xff] }
 0x7fb   : > { %v4267_v12 = vpop.permute.xlu1 %4266  ;;  %v4444_v0 = vpop.permute.xlu0 %4443  ;;  %v4687_v35 = vsel %vm4669_vm5, %v4654_v45, %v11305_v49 }
 0x7fc   : > { %v4554_v29 = vsel %vm1545_vm12, %v4522_v62, %v4267_v12  ;;  %v4720_v19 = vsel %vm4702_vm3, %v4687_v35, %v4444_v0  ;;  %v11313_v12 = vld [vmem:[#allocation43_spill] sm:$0xff] }
 0x7fd   : > { %v4586_v5 = vsel %vm1611_vm14, %v4554_v29, %v11303_v63 }
 0x7ff   : > { %v4337_v48 = vpop.permute.xlu1 %4336  ;;  %v4446_v47 = vpop.permute.xlu0 %4445 }
 0x800   : > { %v4619_v41 = vsel %vm4603_vm7, %v4586_v5, %v4337_v48 }
 0x803   : > { %v4372_v37 = vpop.permute.xlu1 %4371  ;;  %v4238_v38 = vpop.permute.xlu0 %4237 }
 0x804   : > { %v4652_v18 = vsel %vm4636_vm1, %v4619_v41, %v4372_v37  ;;  %v4528_v10 = vsel %vm1479_vm10, %v11308_v55, %v4238_v38 }
 0x805   : > { %v4685_v24 = vsel %vm4669_vm5, %v4652_v18, %v11304_v36  ;;  %v11318_v36 = vld [vmem:[#allocation16_spill] sm:$0xff] }
 0x806   : > { %v4718_v8 = vsel %vm4702_vm3, %v4685_v24, %v4442_v61 }
 0x807   : > { %v4236_v7 = vpop.permute.xlu1 %4235  ;;  %6255 = vmatmul.mubr.msk.bf16.gmra.mrb[32].mxu1 %vm4775_vm2, %v4718_v8  ;;  %v4273_v21 = vpop.permute.xlu0 %4272  ;;  %v11319_v8 = vld [vmem:[#allocation20_spill] sm:$0xff] }
 0x808   : > { %6258 = vmatprep.mubr.msk.bf16.mxu1 %vm4775_vm2, %v4720_v19  ;;  %v4526_v58 = vsel %vm1479_vm10, %v4488_v31, %v4236_v7  ;;  %v4560_v61 = vsel %vm1545_vm12, %v4528_v10, %v4273_v21 }
 0x809   : > { %v4592_v3 = vsel %vm1611_vm14, %v4560_v61, %v11309_v39 }
 0x80b   : > { %v4271_v20 = vpop.permute.xlu1 %4270  ;;  %v4343_v13 = vpop.permute.xlu0 %4342 }
 0x80c   : > { %v4558_v4 = vsel %vm1545_vm12, %v4526_v58, %v4271_v20  ;;  %v4625_v14 = vsel %vm4603_vm7, %v4592_v3, %v4343_v13  ;;  %v11320_v13 = vld [vmem:[#allocation46_spill] sm:$0xff]  ;;  %v11321_v58 = vld [vmem:[#allocation47_spill] sm:$0xff]  ;;  %v11322_v3 = vld [vmem:[#allocation48_spill] sm:$0xff] }
 0x80d   : > { %v4590_v26 = vsel %vm1611_vm14, %v4558_v4, %v11310_v54 }
 0x80f   : > { %v4341_v17 = vpop.permute.xlu1 %4340  ;;  %v4378_v2 = vpop.permute.xlu0 %4377 }
 0x810   : > { %v4623_v28 = vsel %vm4603_vm7, %v4590_v26, %v4341_v17  ;;  %v4658_v16 = vsel %vm4636_vm1, %v4625_v14, %v4378_v2  ;;  %v11323_v26 = vld [vmem:[#allocation49_spill] sm:$0xff] }
 0x811   : > { %v4691_v42 = vsel %vm4669_vm5, %v4658_v16, %v11312_v22  ;;  %v11324_v22 = vld [vmem:[#allocation38_spill] sm:$0xff] }
 0x813   : > { %v4376_v6 = vpop.permute.xlu1 %4375  ;;  %v4448_v43 = vpop.permute.xlu0 %4447 }
 0x814   : > { %v4656_v57 = vsel %vm4636_vm1, %v4623_v28, %v4376_v6  ;;  %v4724_v27 = vsel %vm4702_vm3, %v4691_v42, %v4448_v43 }
 0x815   : > { %v4689_v44 = vsel %vm4669_vm5, %v4656_v57, %v11311_v30 }
 0x816   : > { %v4722_v25 = vsel %vm4702_vm3, %v4689_v44, %v4446_v47 }
 0x817   : > { %v4240_v59 = vpop.permute.xlu1 %4239  ;;  %6259 = vmatmul.mubr.msk.bf16.gmra.mrb[36].mxu1 %vm4775_vm2, %v4722_v25  ;;  %v4450_v56 = vpop.permute.xlu0 %4449 }
 0x818   : > { %6262 = vmatprep.mubr.msk.bf16.mxu1 %vm4775_vm2, %v4724_v27  ;;  %v4530_v0 = vsel %vm1479_vm10, %v11313_v12, %v4240_v59  ;;  %v11325_v27 = vld [vmem:[#allocation23_spill] sm:$0xff] }
 0x81b   : > { %v4275_v53 = vpop.permute.xlu1 %4274  ;;  %v4242_v33 = vpop.permute.xlu0 %4241 }
 0x81c   : > { %v4562_v60 = vsel %vm1545_vm12, %v4530_v0, %v4275_v53  ;;  %v4532_v11 = vsel %vm1479_vm10, %v11314_v9, %v4242_v33  ;;  %v11326_v0 = vld [vmem:[#allocation3_spill] sm:$0xff] }
 0x81d   : > { %v4594_v34 = vsel %vm1611_vm14, %v4562_v60, %v11315_v51 }
 0x81f   : > { %v4345_v46 = vpop.permute.xlu1 %4344  ;;  %v4277_v50 = vpop.permute.xlu0 %4276 }
 0x820   : > { %v4627_v23 = vsel %vm4603_vm7, %v4594_v34, %v4345_v46  ;;  %v4564_v62 = vsel %vm1545_vm12, %v4532_v11, %v4277_v50  ;;  %v11327_v50 = vld [vmem:[#allocation36_spill] sm:$0xff] }
 0x821   : > { %v4596_v63 = vsel %vm1611_vm14, %v4564_v62, %v11317_v15  ;;  %v11328_v34 = vld [vmem:[#allocation40_spill] sm:$0xff] }
 0x823   : > { %v4380_v29 = vpop.permute.xlu1 %4379  ;;  %v4347_v48 = vpop.permute.xlu0 %4346 }
 0x824   : > { %v4660_v47 = vsel %vm4636_vm1, %v4627_v23, %v4380_v29  ;;  %v4629_v45 = vsel %vm4603_vm7, %v4596_v63, %v4347_v48 }
 0x825   : > { %v4693_v40 = vsel %vm4669_vm5, %v4660_v47, %v11316_v1  ;;  %v10088_v39 = vpop.f32.mrb[0].mxu1 }
 0x826   : > { %v4726_v5 = vsel %vm4702_vm3, %v4693_v40, %v4450_v56  ;;  %v10092_v54 = vpop.f32.mrb[1].mxu1 }
 0x827   : > { %v4244_v41 = vpop.permute.xlu1 %4243  ;;  %6263 = vmatmul.mubr.msk.bf16.gmra.mrb[40].mxu1 %vm4775_vm2, %v4726_v5  ;;  %v4382_v37 = vpop.permute.xlu0 %4381 }
 0x828   : > { %v4662_v38 = vsel %vm4636_vm1, %v4629_v45, %v4382_v37  ;;  %v4534_v19 = vsel %vm1479_vm10, %v11319_v8, %v4244_v41  ;;  %v10098_v30 = vpop.f32.mrb[2].mxu1 }
 0x829   : > { %v4695_v24 = vsel %vm4669_vm5, %v4662_v38, %v11318_v36  ;;  %v10100_v44 = vpop.f32.mrb[3].mxu1 }
 0x82b   : > { %v4279_v18 = vpop.permute.xlu1 %4278  ;;  %v4452_v49 = vpop.permute.xlu0 %4451 }
 0x82c   : > { %v4728_v35 = vsel %vm4702_vm3, %v4695_v24, %v4452_v49  ;;  %v4566_v7 = vsel %vm1545_vm12, %v4534_v19, %v4279_v18 }
 0x82d   : > { %6266 = vmatprep.mubr.msk.bf16.mxu1 %vm4775_vm2, %v4728_v35  ;;  %v4598_v32 = vsel %vm1611_vm14, %v4566_v7, %v11320_v13  ;;  %v10111_v46 = vpop.f32.mrb[4].mxu1 }
 0x82e   : > { %v10115_v11 = vpop.f32.mrb[5].mxu1 }
 0x82f   : > { %v4349_v21 = vpop.permute.xlu1 %4348  ;;  %v4454_v20 = vpop.permute.xlu0 %4453 }
 0x830   : > { %v4631_v52 = vsel %vm4603_vm7, %v4598_v32, %v4349_v21  ;;  %v10121_v47 = vpop.f32.mrb[6].mxu1  ;;  %v10154_v21 = vld [vmem:[%s11038_s5 + $0x3] ss:$0 sm:$0xff] }
 0x831   : > { %v10124_v1 = vpop.f32.mrb[7].mxu1 }
 0x833   : > { %v4384_v31 = vpop.permute.xlu1 %4383  ;;  %v4246_v55 = vpop.permute.xlu0 %4245 }
 0x834   : > { %v4664_v10 = vsel %vm4636_vm1, %v4631_v52, %v4384_v31  ;;  %v4536_v14 = vsel %vm1479_vm10, %v11322_v3, %v4246_v55 }
 0x835   : > { %v4697_v61 = vsel %vm4669_vm5, %v4664_v10, %v11321_v58 }
 0x836   : > { %v4730_v4 = vsel %vm4702_vm3, %v4697_v61, %v4454_v20 }
 0x837   : > { %v4248_v17 = vpop.permute.xlu1 %4247  ;;  %6267 = vmatmul.mubr.msk.bf16.gmra.mrb[44].mxu1 %vm4775_vm2, %v4730_v4  ;;  %v4281_v2 = vpop.permute.xlu0 %4280 }
 0x838   : > { %v4538_v28 = vsel %vm1479_vm10, %v11323_v26, %v4248_v17  ;;  %v4568_v16 = vsel %vm1545_vm12, %v4536_v14, %v4281_v2  ;;  %vm11338_vm10 = vcmask 15360  }
 0x839   : > { %v4600_v42 = vsel %vm1611_vm14, %v4568_v16, %v11324_v22  ;;  %v10127_v40 = vpop.f32.mrb[8].mxu1 }
 0x83a   : > { %v10129_v15 = vpop.f32.mrb[9].mxu1 }
 0x83b   : > { %v4283_v6 = vpop.permute.xlu1 %4282  ;;  %v4351_v43 = vpop.permute.xlu0 %4350 }
 0x83c   : > { %v4570_v57 = vsel %vm1545_vm12, %v4538_v28, %v4283_v6  ;;  %v4633_v25 = vsel %vm4603_vm7, %v4600_v42, %v4351_v43  ;;  %v10131_v63 = vpop.f32.mrb[10].mxu1  ;;  %vm11339_vm12 = vcmask 48128  }
 0x83d   : > { %v4602_v59 = vsel %vm1611_vm14, %v4570_v57, %v11325_v27  ;;  %v10133_v5 = vpop.f32.mrb[11].mxu1  ;;  %vm11341_vm14 = vmmov %vm11338_vm10 }
 0x83e   : > { %11329 = vst [vmem:[#allocation24_spill] sm:$0xff] %v10133_v5 }
 0x83f   : > { %v4353_v56 = vpop.permute.xlu1 %4352  ;;  %v4386_v53 = vpop.permute.xlu0 %4385 }
 0x840   : > { %v4635_v33 = vsel %vm4603_vm7, %v4602_v59, %v4353_v56  ;;  %v4666_v12 = vsel %vm4636_vm1, %v4633_v25, %v4386_v53 }
 0x841   : > { %v4668_v60 = vsel %vm4636_vm1, %v4635_v33, %v11326_v0  ;;  %v4699_v23 = vsel %vm4669_vm5, %v4666_v12, %v11328_v34  ;;  %v10135_v45 = vpop.f32.mrb[12].mxu1 }
 0x842   : > { %v4701_v9 = vsel %vm4669_vm5, %v4668_v60, %v11327_v50  ;;  %11330 = vst [vmem:[#allocation25_spill] sm:$0xff] %v10135_v45  ;;  %v10137_v41 = vpop.f32.mrb[13].mxu1 }
 0x843   : > { %v4458_v51 = vpop.permute.xlu1 %4457  ;;  %v4456_v62 = vpop.permute.xlu0 %4455  ;;  %11331 = vst [vmem:[#allocation29_spill] sm:$0xff] %v10137_v41 }
 0x844   : > { %v4734_v29 = vsel %vm4702_vm3, %v4701_v9, %v4458_v51  ;;  %v4732_v48 = vsel %vm4702_vm3, %v4699_v23, %v4456_v62  ;;  %v10139_v37 = vpop.f32.mrb[14].mxu1 }
 0x845   : > { %6270 = vmatprep.mubr.msk.bf16.mxu1 %vm4775_vm2, %v4732_v48  ;;  %11332 = vst [vmem:[#allocation30_spill] sm:$0xff] %v10139_v37  ;;  %v10141_v38 = vpop.f32.mrb[15].mxu1 }
 0x846   : > { %6271 = vmatmul.mubr.msk.bf16.gmra.mrb[48].mxu1 %vm4775_vm2, %v4734_v29  ;;  %11333 = vst [vmem:[#allocation26_spill] sm:$0xff] %v10141_v38 }
 0x856   : > { %v10143_v18 = vpop.f32.mrb[16].mxu1 }
 0x857   : > { %11334 = vst [vmem:[#allocation31_spill] sm:$0xff] %v10143_v18  ;;  %v10145_v36 = vpop.f32.mrb[17].mxu1 }
 0x858   : > { %11335 = vst [vmem:[#allocation21_spill] sm:$0xff] %v10145_v36  ;;  %v10147_v24 = vpop.f32.mrb[18].mxu1 }
 0x859   : > { %11336 = vst [vmem:[#allocation33_spill] sm:$0xff] %v10147_v24  ;;  %v10149_v49 = vpop.f32.mrb[19].mxu1 }
 0x85a   : > { %11337 = vst [vmem:[#allocation37_spill] sm:$0xff] %v10149_v49 }
 0x8aa   : > { %v6244_v35 = vpop.f32.mrb[20].mxu1 }
 0x8ab   : > { %v4846_v8 = vpop.f32.mrb[21].mxu1  ;;  %v10165_v58 = vadd.f32 %v6244_v35, %v10154_v21 }
 0x8ac   : > { %v6245_v19 = vpop.f32.mrb[22].mxu1  ;;  %v10160_v32 = vadd.f32 %v10154_v21, %v4846_v8 }
 0x8ad   : > { %v4849_v7 = vpop.f32.mrb[23].mxu1  ;;  %v4976_v17 = vsel %vm1413_vm8, %v10165_v58, 0.0  ;;  %v10172_v2 = vadd.f32 %v6245_v19, %v10154_v21 }
 0x8ae   : > { %v10157_v20 = vadd.f32 %v10154_v21, %v4849_v7  ;;  %v4973_v61 = vsel %vm1413_vm8, %v10160_v32, 0.0 }
 0x8af   : > { %v4978_v26 = vsel %vm1413_vm8, %v10172_v2, 0.0 }
 0x8b0   : > { %v4974_v55 = vsel %vm1413_vm8, %v10157_v20, 0.0 }
 0x8b1   : > { %v4975_v4 = vadd.f32 %v4974_v55, %v4973_v61 }
 0x8b3   : > { %v4977_v14 = vadd.f32 %v4976_v17, %v4975_v4 }
 0x8b5   : > { %v4979_v6 = vadd.f32 %v4978_v26, %v4977_v14 }
 0x8ba   : > { %v6248_v13 = vpop.f32.mrb[24].mxu1 }
 0x8bb   : > { %v4862_v52 = vpop.f32.mrb[25].mxu1  ;;  %v10187_v27 = vadd.f32 %v6248_v13, %v10154_v21 }
 0x8bc   : > { %v6249_v31 = vpop.f32.mrb[26].mxu1  ;;  %v10175_v3 = vadd.f32 %v10154_v21, %v4862_v52 }
 0x8bd   : > { %v4865_v10 = vpop.f32.mrb[27].mxu1  ;;  %v4984_v53 = vsel %vm1413_vm8, %v10187_v27, 0.0  ;;  %v10192_v33 = vadd.f32 %v6249_v31, %v10154_v21 }
 0x8be   : > { %v4980_v28 = vsel %vm1413_vm8, %v10175_v3, 0.0  ;;  %v10182_v16 = vadd.f32 %v10154_v21, %v4865_v10 }
 0x8bf   : > { %v4981_v43 = vadd.f32 %v4980_v28, %v4979_v6  ;;  %v4986_v60 = vsel %vm1413_vm8, %v10192_v33, 0.0 }
 0x8c0   : > { %v4982_v22 = vsel %vm1413_vm8, %v10182_v16, 0.0 }
 0x8c1   : > { %v4983_v56 = vadd.f32 %v4982_v22, %v4981_v43 }
 0x8c3   : > { %v4985_v0 = vadd.f32 %v4984_v53, %v4983_v56 }
 0x8c5   : > { %v4987_v51 = vadd.f32 %v4986_v60, %v4985_v0 }
 0x8ca   : > { %v6252_v57 = vpop.f32.mrb[28].mxu1 }
 0x8cb   : > { %v4878_v42 = vpop.f32.mrb[29].mxu1  ;;  %v10207_v29 = vadd.f32 %v6252_v57, %v10154_v21 }
 0x8cc   : > { %v6253_v25 = vpop.f32.mrb[30].mxu1  ;;  %v10195_v12 = vadd.f32 %v10154_v21, %v4878_v42 }
 0x8cd   : > { %v4881_v59 = vpop.f32.mrb[31].mxu1  ;;  %v4992_v7 = vsel %vm1413_vm8, %v10207_v29, 0.0  ;;  %v10212_v13 = vadd.f32 %v6253_v25, %v10154_v21 }
 0x8ce   : > { %v4988_v50 = vsel %vm1413_vm8, %v10195_v12, 0.0  ;;  %v10202_v9 = vadd.f32 %v10154_v21, %v4881_v59 }
 0x8cf   : > { %v4989_v34 = vadd.f32 %v4988_v50, %v4987_v51  ;;  %v4994_v55 = vsel %vm1413_vm8, %v10212_v13, 0.0 }
 0x8d0   : > { %v4990_v23 = vsel %vm1413_vm8, %v10202_v9, 0.0 }
 0x8d1   : > { %v4991_v35 = vadd.f32 %v4990_v23, %v4989_v34 }
 0x8d3   : > { %v4993_v31 = vadd.f32 %v4992_v7, %v4991_v35 }
 0x8d5   : > { %v4995_v4 = vadd.f32 %v4994_v55, %v4993_v31 }
 0x8da   : > { %v6256_v62 = vpop.f32.mrb[32].mxu1 }
 0x8db   : > { %v4894_v48 = vpop.f32.mrb[33].mxu1  ;;  %v10227_v26 = vadd.f32 %v6256_v62, %v10154_v21 }
 0x8dc   : > { %v6257_v8 = vpop.f32.mrb[34].mxu1  ;;  %v10215_v52 = vadd.f32 %v10154_v21, %v4894_v48 }
 0x8dd   : > { %v4897_v19 = vpop.f32.mrb[35].mxu1  ;;  %v5000_v22 = vsel %vm1413_vm8, %v10227_v26, 0.0  ;;  %v10232_v42 = vadd.f32 %v6257_v8, %v10154_v21 }
 0x8de   : > { %v4996_v10 = vsel %vm1413_vm8, %v10215_v52, 0.0  ;;  %v10222_v61 = vadd.f32 %v10154_v21, %v4897_v19 }
 0x8df   : > { %v4997_v17 = vadd.f32 %v4996_v10, %v4995_v4  ;;  %v5002_v53 = vsel %vm1413_vm8, %v10232_v42, 0.0 }
 0x8e0   : > { %v4998_v14 = vsel %vm1413_vm8, %v10222_v61, 0.0 }
 0x8e1   : > { %v4999_v28 = vadd.f32 %v4998_v14, %v4997_v17 }
 0x8e3   : > { %v5001_v56 = vadd.f32 %v5000_v22, %v4999_v28 }
 0x8e5   : > { %v5003_v50 = vadd.f32 %v5002_v53, %v5001_v56 }
 0x8ea   : > { %v6260_v6 = vpop.f32.mrb[36].mxu1 }
 0x8eb   : > { %v4910_v43 = vpop.f32.mrb[37].mxu1  ;;  %v10247_v23 = vadd.f32 %v6260_v6, %v10154_v21 }
 0x8ec   : > { %v6261_v57 = vpop.f32.mrb[38].mxu1  ;;  %v10235_v25 = vadd.f32 %v10154_v21, %v4910_v43 }
 0x8ed   : > { %v4913_v59 = vpop.f32.mrb[39].mxu1  ;;  %v5008_v35 = vsel %vm1413_vm8, %v10247_v23, 0.0  ;;  %v10252_v8 = vadd.f32 %v6261_v57, %v10154_v21 }
 0x8ee   : > { %v5004_v0 = vsel %vm1413_vm8, %v10235_v25, 0.0  ;;  %v10242_v60 = vadd.f32 %v10154_v21, %v4913_v59 }
 0x8ef   : > { %v5005_v51 = vadd.f32 %v5004_v0, %v5003_v50  ;;  %v5010_v4 = vsel %vm1413_vm8, %v10252_v8, 0.0 }
 0x8f0   : > { %v5006_v34 = vsel %vm1413_vm8, %v10242_v60, 0.0 }
 0x8f1   : > { %v5007_v62 = vadd.f32 %v5006_v34, %v5005_v51 }
 0x8f3   : > { %v5009_v7 = vadd.f32 %v5008_v35, %v5007_v62 }
 0x8f5   : > { %v5011_v28 = vadd.f32 %v5010_v4, %v5009_v7 }
 0x8fa   : > { %v6264_v48 = vpop.f32.mrb[40].mxu1 }
 0x8fb   : > { %v4926_v19 = vpop.f32.mrb[41].mxu1  ;;  %v10267_v57 = vadd.f32 %v6264_v48, %v10154_v21 }
 0x8fc   : > { %v10255_v31 = vadd.f32 %v10154_v21, %v4926_v19  ;;  %v6265_v55 = vpop.f32.mrb[42].mxu1 }
 0x8fd   : > { %v4929_v10 = vpop.f32.mrb[43].mxu1  ;;  %v5016_v59 = vsel %vm1413_vm8, %v10267_v57, 0.0  ;;  %v10272_v56 = vadd.f32 %v6265_v55, %v10154_v21 }
 0x8fe   : > { %v5012_v17 = vsel %vm1413_vm8, %v10255_v31, 0.0  ;;  %v10262_v14 = vadd.f32 %v10154_v21, %v4929_v10 }
 0x8ff   : > { %v5013_v6 = vadd.f32 %v5012_v17, %v5011_v28  ;;  %v5018_v62 = vsel %vm1413_vm8, %v10272_v56, 0.0 }
 0x900   : > { %v5014_v43 = vsel %vm1413_vm8, %v10262_v14, 0.0 }
 0x901   : > { %v5015_v22 = vadd.f32 %v5014_v43, %v5013_v6 }
 0x903   : > { %v5017_v53 = vadd.f32 %v5016_v59, %v5015_v22 }
 0x905   : > { %v5019_v48 = vadd.f32 %v5018_v62, %v5017_v53 }
 0x90a   : > { %v6268_v0 = vpop.f32.mrb[44].mxu1 }
 0x90b   : > { %v4942_v50 = vpop.f32.mrb[45].mxu1  ;;  %v10287_v4 = vadd.f32 %v6268_v0, %v10154_v21 }
 0x90c   : > { %v10275_v51 = vadd.f32 %v10154_v21, %v4942_v50  ;;  %v6269_v34 = vpop.f32.mrb[46].mxu1 }
 0x90d   : > { %v4945_v35 = vpop.f32.mrb[47].mxu1  ;;  %v5024_v28 = vsel %vm1413_vm8, %v10287_v4, 0.0  ;;  %v10292_v6 = vadd.f32 %v6269_v34, %v10154_v21 }
 0x90e   : > { %v5020_v19 = vsel %vm1413_vm8, %v10275_v51, 0.0  ;;  %v10282_v7 = vadd.f32 %v10154_v21, %v4945_v35 }
 0x90f   : > { %v5021_v55 = vadd.f32 %v5020_v19, %v5019_v48  ;;  %v5026_v53 = vsel %vm1413_vm8, %v10292_v6, 0.0 }
 0x910   : > { %v5022_v10 = vsel %vm1413_vm8, %v10282_v7, 0.0 }
 0x911   : > { %v5023_v17 = vadd.f32 %v5022_v10, %v5021_v55 }
 0x913   : > { %v5025_v43 = vadd.f32 %v5024_v28, %v5023_v17 }
 0x915   : > { %v5027_v35 = vadd.f32 %v5026_v53, %v5025_v43 }
 0x919   : > { %v6272_v22 = vpop.f32.mrb[48].mxu1 }
 0x91a   : > { %v4958_v59 = vpop.f32.mrb[49].mxu1  ;;  %v10300_v48 = vadd.f32 %v6272_v22, %v10154_v21 }
 0x91b   : > { %v10297_v50 = vadd.f32 %v10154_v21, %v4958_v59  ;;  %v6273_v62 = vpop.f32.mrb[50].mxu1 }
 0x91c   : > { %v4961_v0 = vpop.f32.mrb[51].mxu1  ;;  %v10308_v10 = vadd.f32 %v6273_v62, %v10154_v21  ;;  %v5032_v43 = vsel %vm1413_vm8, %v10300_v48, 0.0 }
 0x91d   : > { %v5028_v19 = vsel %vm1413_vm8, %v10297_v50, 0.0  ;;  %v10305_v34 = vadd.f32 %v10154_v21, %v4961_v0 }
 0x91e   : > { %v5029_v55 = vadd.f32 %v5028_v19, %v5027_v35  ;;  %v5034_v22 = vsel %vm1413_vm8, %v10308_v10, 0.0 }
 0x91f   : > { %v5030_v17 = vsel %vm1413_vm8, %v10305_v34, 0.0 }
 0x920   : > { %v5031_v28 = vadd.f32 %v5030_v17, %v5029_v55 }
 0x922   : > { %v5033_v59 = vadd.f32 %v5032_v43, %v5031_v28 }
 0x924   : > { %v5035_v53 = vadd.f32 %v5034_v22, %v5033_v59 }
 0x926   : > { %v5036_v24 = vrot.slane %v5035_v53, 4 }
 0x928   : > { %v5037_v18 = vadd.f32 %v5036_v24, %v5035_v53 }
 0x92a   : > { %v5038_v0 = vrot.slane %v5037_v18, 2 }
 0x92c   : > { %v5039_v49 = vadd.f32 %v5038_v0, %v5037_v18 }
 0x92e   : > { %v5040_v35 = vrot.slane %v5039_v49, 1 }
 0x930   : > { %v5041_v19 = vadd.f32 %v5040_v35, %v5039_v49 }
 0x932   : > { %5074 = vrot.lane.b32.xlu1 %v5041_v19, %s6685_s19  ;;  %5057 = vrot.lane.b32.xlu0 %v5041_v19, %s6686_s20  ;;  %v5042_v21 = vsel %vm1935_vm0, %v5041_v19, 0.0 }
 0x936   : > { %5091 = vrot.lane.b32.xlu0 %v5041_v19, %s6687_s23 }
 0x956   : > { %5043 = vadd.xlane.f32.xlu1 %v5042_v21 }
 0x9a4   : > { %v5058_v62 = vpop.permute.xlu0 %5057  ;;  %v5075_v17 = vpop.permute.xlu1 %5074 }
 0x9a5   : > { %v5060_v55 = vsel %vm1935_vm0, %v5058_v62, 0.0  ;;  %v5077_v24 = vsel %vm1935_vm0, %v5075_v17, 0.0 }
 0x9a6   : > { %5061 = vadd.xlane.f32.xlu0 %v5060_v55 }
 0x9a8   : > { %v5092_v28 = vpop.permute.xlu0 %5091 }
 0x9a9   : > { %v5094_v18 = vsel %vm1935_vm0, %v5092_v28, 0.0 }
 0x9aa   : > { %5078 = vadd.xlane.f32.xlu0 %v5077_v24  ;;  %5095 = vadd.xlane.f32.xlu1 %v5094_v18 }
 0x9e3   : > { %v5044_v49 = vpop.xlane.xlu1 %5043 }
 0x9e4   : > { %v5045_v43 = vrot.slane %v5044_v49, 4 }
 0x9e6   : > { %v5046_v59 = vadd.f32 %v5045_v43, %v5044_v49 }
 0x9e8   : > { %v5047_v22 = vrot.slane %v5046_v59, 2 }
 0x9ea   : > { %v5048_v53 = vadd.f32 %v5047_v22, %v5046_v59 }
 0x9ec   : > { %v5049_v0 = vrot.slane %v5048_v53, 1 }
 0x9ee   : > { %v5050_v35 = vadd.f32 %v5049_v0, %v5048_v53 }
 0x9f0   : > { %6305 = vpush %v5050_v35 }
 0xa21   : > { %s6306_s28 = spop %6305 }
 0xa22   : > { %s5054_s27 = smul.f32 0.001953125, %s6306_s28 }
 0xa33   : > { %v5062_v19 = vpop.xlane.xlu0 %5061 }
 0xa34   : > { %v5063_v21 = vrot.slane %v5062_v19, 4 }
 0xa36   : > { %v5064_v62 = vadd.f32 %v5063_v21, %v5062_v19  ;;  %v11340_v21 = vld [vmem:[#allocation18_spill] sm:$0xff] }
 0xa37   : > { %v5079_v36 = vpop.xlane.xlu0 %5078  ;;  %v5096_v55 = vpop.xlane.xlu1 %5095 }
 0xa38   : > { %v5065_v38 = vrot.slane %v5064_v62, 2  ;;  %v5080_v37 = vrot.slane %v5079_v36, 4  ;;  %v5097_v17 = vrot.slane %v5096_v55, 4 }
 0xa3a   : > { %v5081_v41 = vadd.f32 %v5080_v37, %v5079_v36  ;;  %v5098_v28 = vadd.f32 %v5097_v17, %v5096_v55  ;;  %v5066_v24 = vadd.f32 %v5065_v38, %v5064_v62 }
 0xa3c   : > { %v5082_v18 = vrot.slane %v5081_v41, 2  ;;  %v5099_v45 = vrot.slane %v5098_v28, 2  ;;  %v5067_v5 = vrot.slane %v5066_v24, 1 }
 0xa3e   : > { %v5068_v49 = vadd.f32 %v5067_v5, %v5066_v24  ;;  %v5083_v43 = vadd.f32 %v5082_v18, %v5081_v41  ;;  %v5100_v59 = vadd.f32 %v5099_v45, %v5098_v28  ;;  %v5055_v5 = vstv %s5054_s27 }
 0xa40   : > { %6307 = vpush %v5068_v49  ;;  %v5084_v22 = vrot.slane %v5083_v43, 1  ;;  %v5101_v53 = vrot.slane %v5100_v59, 1 }
 0xa42   : > { %v5085_v0 = vadd.f32 %v5084_v22, %v5083_v43  ;;  %v5102_v35 = vadd.f32 %v5101_v53, %v5100_v59 }
 0xa44   : > { %6309 = vpush %v5085_v0 }
 0xa45   : > { %6311 = vpush %v5102_v35 }
 0xa71   : > { %s6308_s25 = spop %6307 }
 0xa72   : > { %s5072_s26 = smul.f32 0.001953125, %s6308_s25 }
 0xa74   : > { %v5073_v37 = vstv %s5072_s26 }
 0xa75   : > { %s6310_s30 = spop %6309  ;;  %v5108_v45 = vsel %vm11338_vm10, %v5055_v5, %v5073_v37 }
 0xa76   : > { %s5089_s7 = smul.f32 0.001953125, %s6310_s30  ;;  %s6312_s8 = spop %6311 }
 0xa77   : > { %s5106_s29 = smul.f32 0.001953125, %s6312_s8 }
 0xa78   : > { %v5090_v38 = vstv %s5089_s7 }
 0xa79   : > { %v5109_v41 = vsel %vm1364_vm6, %v5108_v45, %v5090_v38  ;;  %v5107_v36 = vstv %s5106_s29 }
 0xa7a   : > { %v5110_v19 = vsel %vm11339_vm12, %v5109_v41, %v5107_v36 }
 0xa7b   : > { %v10327_v62 = vrot.slane %v5110_v19, %v11340_v21 }
 0xa7d   : > { %v10331_v55 = vsub.f32 %v10160_v32, %v10327_v62  ;;  %v10335_v17 = vsub.f32 %v10157_v20, %v10327_v62  ;;  %v10339_v28 = vsub.f32 %v10165_v58, %v10327_v62  ;;  %v10343_v24 = vsub.f32 %v10172_v2, %v10327_v62 }
 0xa7e   : > { %v10351_v32 = vsub.f32 %v10175_v3, %v10327_v62  ;;  %v10357_v58 = vsub.f32 %v10182_v16, %v10327_v62  ;;  %v10365_v53 = vsub.f32 %v10187_v27, %v10327_v62  ;;  %v10372_v16 = vsub.f32 %v10192_v33, %v10327_v62 }
 0xa7f   : > { %v5147_v18 = vmul.f32 %v10331_v55, %v10331_v55  ;;  %v5148_v49 = vmul.f32 %v10335_v17, %v10335_v17  ;;  %v5149_v20 = vmul.f32 %v10339_v28, %v10339_v28  ;;  %v5150_v2 = vmul.f32 %v10343_v24, %v10343_v24 }
 0xa80   : > { %v5151_v3 = vmul.f32 %v10351_v32, %v10351_v32  ;;  %v5152_v37 = vmul.f32 %v10357_v58, %v10357_v58  ;;  %v10379_v27 = vsub.f32 %v10195_v12, %v10327_v62  ;;  %v5153_v45 = vmul.f32 %v10365_v53, %v10365_v53 }
 0xa81   : > { %v5179_v43 = vsel %vm1413_vm8, %v5147_v18, 0.0  ;;  %v5180_v59 = vsel %vm1413_vm8, %v5148_v49, 0.0  ;;  %v5182_v0 = vsel %vm1413_vm8, %v5149_v20, 0.0  ;;  %v5184_v38 = vsel %vm1413_vm8, %v5150_v2, 0.0 }
 0xa82   : > { %v5181_v22 = vadd.f32 %v5180_v59, %v5179_v43  ;;  %v5186_v41 = vsel %vm1413_vm8, %v5151_v3, 0.0  ;;  %v10386_v33 = vsub.f32 %v10202_v9, %v10327_v62  ;;  %v5154_v19 = vmul.f32 %v10372_v16, %v10372_v16 }
 0xa83   : > { %v5188_v18 = vsel %vm1413_vm8, %v5152_v37, 0.0  ;;  %v10393_v12 = vsub.f32 %v10207_v29, %v10327_v62  ;;  %v5155_v20 = vmul.f32 %v10379_v27, %v10379_v27  ;;  %v5190_v2 = vsel %vm1413_vm8, %v5153_v45, 0.0 }
 0xa84   : > { %v5183_v35 = vadd.f32 %v5182_v0, %v5181_v22  ;;  %v10400_v9 = vsub.f32 %v10212_v13, %v10327_v62  ;;  %v5156_v59 = vmul.f32 %v10386_v33, %v10386_v33  ;;  %v5192_v22 = vsel %vm1413_vm8, %v5154_v19, 0.0 }
 0xa85   : > { %v10407_v29 = vsub.f32 %v10215_v52, %v10327_v62  ;;  %v5157_v0 = vmul.f32 %v10393_v12, %v10393_v12  ;;  %v10414_v13 = vsub.f32 %v10222_v61, %v10327_v62  ;;  %v10421_v52 = vsub.f32 %v10227_v26, %v10327_v62 }
 0xa86   : > { %v5185_v5 = vadd.f32 %v5184_v38, %v5183_v35  ;;  %v5194_v35 = vsel %vm1413_vm8, %v5155_v20, 0.0  ;;  %v5158_v38 = vmul.f32 %v10400_v9, %v10400_v9  ;;  %v10428_v61 = vsub.f32 %v10232_v42, %v10327_v62 }
 0xa87   : > { %v10435_v26 = vsub.f32 %v10235_v25, %v10327_v62  ;;  %v10442_v42 = vsub.f32 %v10242_v60, %v10327_v62  ;;  %v10449_v25 = vsub.f32 %v10247_v23, %v10327_v62  ;;  %v10456_v60 = vsub.f32 %v10252_v8, %v10327_v62 }
 0xa88   : > { %v5187_v36 = vadd.f32 %v5186_v41, %v5185_v5  ;;  %v5196_v5 = vsel %vm1413_vm8, %v5156_v59, 0.0  ;;  %v5159_v41 = vmul.f32 %v10407_v29, %v10407_v29  ;;  %v10463_v23 = vsub.f32 %v10255_v31, %v10327_v62 }
 0xa89   : > { %v10470_v8 = vsub.f32 %v10262_v14, %v10327_v62  ;;  %v10477_v31 = vsub.f32 %v10267_v57, %v10327_v62  ;;  %v10484_v14 = vsub.f32 %v10272_v56, %v10327_v62  ;;  %v10491_v57 = vsub.f32 %v10275_v51, %v10327_v62 }
 0xa8a   : > { %v5189_v49 = vadd.f32 %v5188_v18, %v5187_v36  ;;  %v5198_v36 = vsel %vm1413_vm8, %v5157_v0, 0.0  ;;  %v5160_v18 = vmul.f32 %v10414_v13, %v10414_v13  ;;  %v10498_v56 = vsub.f32 %v10282_v7, %v10327_v62 }
 0xa8b   : > { %v10505_v51 = vsub.f32 %v10287_v4, %v10327_v62  ;;  %v10512_v7 = vsub.f32 %v10292_v6, %v10327_v62  ;;  %v10519_v4 = vsub.f32 %v10297_v50, %v10327_v62  ;;  %v10526_v6 = vsub.f32 %v10305_v34, %v10327_v62 }
 0xa8c   : > { %v5191_v43 = vadd.f32 %v5190_v2, %v5189_v49  ;;  %v5200_v49 = vsel %vm1413_vm8, %v5158_v38, 0.0  ;;  %v5161_v2 = vmul.f32 %v10421_v52, %v10421_v52  ;;  %v10533_v50 = vsub.f32 %v10300_v48, %v10327_v62 }
 0xa8d   : > { %v10540_v34 = vsub.f32 %v10308_v10, %v10327_v62 }
 0xa8e   : > { %v5193_v3 = vadd.f32 %v5192_v22, %v5191_v43  ;;  %v5202_v43 = vsel %vm1413_vm8, %v5159_v41, 0.0  ;;  %v5162_v22 = vmul.f32 %v10428_v61, %v10428_v61  ;;  %v5177_v48 = vmul.f32 %v10533_v50, %v10533_v50 }
 0xa90   : > { %v5195_v37 = vadd.f32 %v5194_v35, %v5193_v3  ;;  %v5204_v3 = vsel %vm1413_vm8, %v5160_v18, 0.0  ;;  %v5163_v35 = vmul.f32 %v10435_v26, %v10435_v26  ;;  %v5238_v10 = vsel %vm1413_vm8, %v5177_v48, 0.0 }
 0xa92   : > { %v5197_v45 = vadd.f32 %v5196_v5, %v5195_v37  ;;  %v5206_v37 = vsel %vm1413_vm8, %v5161_v2, 0.0  ;;  %v5164_v5 = vmul.f32 %v10442_v42, %v10442_v42 }
 0xa94   : > { %v5199_v19 = vadd.f32 %v5198_v36, %v5197_v45  ;;  %v5208_v45 = vsel %vm1413_vm8, %v5162_v22, 0.0  ;;  %v5165_v36 = vmul.f32 %v10449_v25, %v10449_v25 }
 0xa96   : > { %v5201_v20 = vadd.f32 %v5200_v49, %v5199_v19  ;;  %v5210_v19 = vsel %vm1413_vm8, %v5163_v35, 0.0  ;;  %v5166_v49 = vmul.f32 %v10456_v60, %v10456_v60 }
 0xa98   : > { %v5203_v59 = vadd.f32 %v5202_v43, %v5201_v20  ;;  %v5212_v20 = vsel %vm1413_vm8, %v5164_v5, 0.0  ;;  %v5167_v43 = vmul.f32 %v10463_v23, %v10463_v23 }
 0xa9a   : > { %v5205_v0 = vadd.f32 %v5204_v3, %v5203_v59  ;;  %v5214_v59 = vsel %vm1413_vm8, %v5165_v36, 0.0  ;;  %v5168_v3 = vmul.f32 %v10470_v8, %v10470_v8 }
 0xa9c   : > { %v5207_v38 = vadd.f32 %v5206_v37, %v5205_v0  ;;  %v5216_v0 = vsel %vm1413_vm8, %v5166_v49, 0.0  ;;  %v5169_v37 = vmul.f32 %v10477_v31, %v10477_v31 }
 0xa9e   : > { %v5209_v41 = vadd.f32 %v5208_v45, %v5207_v38  ;;  %v5218_v38 = vsel %vm1413_vm8, %v5167_v43, 0.0  ;;  %v5170_v45 = vmul.f32 %v10484_v14, %v10484_v14 }
 0xaa0   : > { %v5211_v18 = vadd.f32 %v5210_v19, %v5209_v41  ;;  %v5220_v41 = vsel %vm1413_vm8, %v5168_v3, 0.0  ;;  %v5171_v19 = vmul.f32 %v10491_v57, %v10491_v57 }
 0xaa2   : > { %v5213_v2 = vadd.f32 %v5212_v20, %v5211_v18  ;;  %v5222_v18 = vsel %vm1413_vm8, %v5169_v37, 0.0  ;;  %v5172_v20 = vmul.f32 %v10498_v56, %v10498_v56 }
 0xaa4   : > { %v5215_v22 = vadd.f32 %v5214_v59, %v5213_v2  ;;  %v5224_v2 = vsel %vm1413_vm8, %v5170_v45, 0.0  ;;  %v5173_v59 = vmul.f32 %v10505_v51, %v10505_v51 }
 0xaa6   : > { %v5217_v35 = vadd.f32 %v5216_v0, %v5215_v22  ;;  %v5226_v22 = vsel %vm1413_vm8, %v5171_v19, 0.0  ;;  %v5174_v0 = vmul.f32 %v10512_v7, %v10512_v7 }
 0xaa8   : > { %v5219_v5 = vadd.f32 %v5218_v38, %v5217_v35  ;;  %v5228_v35 = vsel %vm1413_vm8, %v5172_v20, 0.0  ;;  %v5175_v38 = vmul.f32 %v10519_v4, %v10519_v4  ;;  %v5178_v20 = vmul.f32 %v10540_v34, %v10540_v34 }
 0xaaa   : > { %v5221_v36 = vadd.f32 %v5220_v41, %v5219_v5  ;;  %v5230_v5 = vsel %vm1413_vm8, %v5173_v59, 0.0  ;;  %v5176_v41 = vmul.f32 %v10526_v6, %v10526_v6  ;;  %v5240_v59 = vsel %vm1413_vm8, %v5178_v20, 0.0 }
 0xaac   : > { %v5223_v49 = vadd.f32 %v5222_v18, %v5221_v36  ;;  %v5232_v36 = vsel %vm1413_vm8, %v5174_v0, 0.0  ;;  %v5234_v18 = vsel %vm1413_vm8, %v5175_v38, 0.0 }
 0xaae   : > { %v5225_v43 = vadd.f32 %v5224_v2, %v5223_v49  ;;  %v5236_v2 = vsel %vm1413_vm8, %v5176_v41, 0.0 }
 0xab0   : > { %v5227_v3 = vadd.f32 %v5226_v22, %v5225_v43 }
 0xab2   : > { %v5229_v37 = vadd.f32 %v5228_v35, %v5227_v3 }
 0xab4   : > { %v5231_v45 = vadd.f32 %v5230_v5, %v5229_v37 }
 0xab6   : > { %v5233_v19 = vadd.f32 %v5232_v36, %v5231_v45 }
 0xab8   : > { %v5235_v49 = vadd.f32 %v5234_v18, %v5233_v19 }
 0xaba   : > { %v5237_v43 = vadd.f32 %v5236_v2, %v5235_v49 }
 0xabc   : > { %v5239_v62 = vadd.f32 %v5238_v10, %v5237_v43 }
 0xabe   : > { %v5241_v22 = vadd.f32 %v5240_v59, %v5239_v62 }
 0xac0   : > { %v5242_v3 = vrot.slane %v5241_v22, 4 }
 0xac2   : > { %v5243_v0 = vadd.f32 %v5242_v3, %v5241_v22 }
 0xac4   : > { %v5244_v35 = vrot.slane %v5243_v0, 2 }
 0xac6   : > { %v5245_v37 = vadd.f32 %v5244_v35, %v5243_v0 }
 0xac8   : > { %v5246_v5 = vrot.slane %v5245_v37, 1 }
 0xaca   : > { %v5247_v45 = vadd.f32 %v5246_v5, %v5245_v37 }
 0xacc   : > { %5267 = vrot.lane.b32.xlu1 %v5247_v45, %s6686_s20  ;;  %v5248_v38 = vsel %vm1935_vm0, %v5247_v45, 0.0 }
 0xacd   : > { %5249 = vadd.xlane.f32.xlu0 %v5248_v38 }
 0xb3e   : > { %v5268_v36 = vpop.permute.xlu1 %5267 }
 0xb3f   : > { %v5270_v41 = vsel %vm1935_vm0, %v5268_v36, 0.0 }
 0xb40   : > { %5271 = vadd.xlane.f32.xlu0 %v5270_v41 }
 0xb56   : > { %5288 = vrot.lane.b32.xlu0 %v5247_v45, %s6685_s19 }
 0xb5a   : > { %5309 = vrot.lane.b32.xlu0 %v5247_v45, %s6687_s23  ;;  %v5250_v19 = vpop.xlane.xlu0 %5249 }
 0xb5b   : > { %v5251_v48 = vrot.slane %v5250_v19, 4 }
 0xb5d   : > { %v5252_v18 = vadd.f32 %v5251_v48, %v5250_v19 }
 0xb5f   : > { %v5253_v49 = vrot.slane %v5252_v18, 2 }
 0xb61   : > { %v5254_v20 = vadd.f32 %v5253_v49, %v5252_v18 }
 0xb63   : > { %v5255_v2 = vrot.slane %v5254_v20, 1 }
 0xb65   : > { %v5256_v43 = vadd.f32 %v5255_v2, %v5254_v20 }
 0xb67   : > { %6313 = vpush %v5256_v43 }
 0xb98   : > { %s6314_s20 = spop %6313 }
 0xb99   : > { %s5260_s14 = smul.f32 0.001953125, %s6314_s20  ;;  %s6070_s20 = sshll.u32 %s11405_s22, 8 }
 0xb9b   : > { %s5261_s9 = sadd.f32 1e-05, %s5260_s14 }
 0xb9d   : > { %v5262_v10 = vstv %s5261_s9  ;;  %s10858_s9 = scalar_lea.vmem %s11039_s6, %s6070_s20 }
 0xb9e   : > { %6515 = vrsqrt.f32 %v5262_v10 }
 0xba8   : > { %v6516_v62 = vpop.eup %6515 }
 0xba9   : > { %6315 = vpush %v6516_v62 }
 0xbcd   : > { %v5272_v59 = vpop.xlane.xlu0 %5271 }
 0xbce   : > { %v5273_v22 = vrot.slane %v5272_v59, 4 }
 0xbd0   : > { %v5274_v3 = vadd.f32 %v5273_v22, %v5272_v59 }
 0xbd1   : > { %v5289_v0 = vpop.permute.xlu0 %5288 }
 0xbd2   : > { %v5275_v35 = vrot.slane %v5274_v3, 2  ;;  %v5291_v37 = vsel %vm1935_vm0, %v5289_v0, 0.0 }
 0xbd3   : > { %5292 = vadd.xlane.f32.xlu1 %v5291_v37 }
 0xbd4   : > { %v5276_v5 = vadd.f32 %v5275_v35, %v5274_v3 }
 0xbd5   : > { %v5310_v45 = vpop.permute.xlu0 %5309 }
 0xbd6   : > { %v5312_v38 = vsel %vm1935_vm0, %v5310_v45, 0.0  ;;  %v5277_v36 = vrot.slane %v5276_v5, 1 }
 0xbd7   : > { %5313 = vadd.xlane.f32.xlu0 %v5312_v38 }
 0xbd8   : > { %v5278_v41 = vadd.f32 %v5277_v36, %v5276_v5  ;;  %v10562_v36 = vpop.f32.mrb[32].mxu0 }
 0xbda   : > { %6317 = vpush %v5278_v41  ;;  %s10560_s19 = spop %6315 }
 0xc0b   : > { %s6318_s23 = spop %6317 }
 0xc0c   : > { %s5282_s10 = smul.f32 0.001953125, %s6318_s23 }
 0xc0e   : > { %s5283_s13 = sadd.f32 1e-05, %s5282_s10 }
 0xc10   : > { %v5284_v19 = vstv %s5283_s13 }
 0xc11   : > { %6517 = vrsqrt.f32 %v5284_v19  ;;  %v5265_v19 = vstv %s10560_s19 }
 0xc1b   : > { %v6518_v48 = vpop.eup %6517 }
 0xc1c   : > { %6319 = vpush %v6518_v48 }
 0xc4d   : > { %s6320_s15 = spop %6319 }
 0xc4e   : > { %v5287_v41 = vstv %s6320_s15 }
 0xc4f   : > { %v5330_v48 = vsel %vm11341_vm14, %v5265_v19, %v5287_v41 }
 0xc60   : > { %v5293_v18 = vpop.xlane.xlu1 %5292 }
 0xc61   : > { %v5294_v49 = vrot.slane %v5293_v18, 4 }
 0xc63   : > { %v5295_v20 = vadd.f32 %v5294_v49, %v5293_v18 }
 0xc64   : > { %v5314_v59 = vpop.xlane.xlu0 %5313 }
 0xc65   : > { %v5296_v2 = vrot.slane %v5295_v20, 2  ;;  %v5315_v22 = vrot.slane %v5314_v59, 4 }
 0xc67   : > { %v5297_v43 = vadd.f32 %v5296_v2, %v5295_v20  ;;  %v5316_v3 = vadd.f32 %v5315_v22, %v5314_v59  ;;  %v10567_v2 = vpop.f32.mrb[33].mxu0 }
 0xc68   : > { %11342 = vst [vmem:[#allocation32_spill] sm:$0xff] %v10567_v2 }
 0xc69   : > { %v5298_v10 = vrot.slane %v5297_v43, 1  ;;  %v5317_v0 = vrot.slane %v5316_v3, 2 }
 0xc6b   : > { %v5299_v62 = vadd.f32 %v5298_v10, %v5297_v43  ;;  %v5318_v37 = vadd.f32 %v5317_v0, %v5316_v3  ;;  %v10569_v10 = vpop.f32.mrb[34].mxu0 }
 0xc6c   : > { %11343 = vst [vmem:[#allocation22_spill] sm:$0xff] %v10569_v10 }
 0xc6d   : > { %6321 = vpush %v5299_v62  ;;  %v5319_v5 = vrot.slane %v5318_v37, 1  ;;  %v10571_v62 = vpop.f32.mrb[35].mxu0 }
 0xc6e   : > { %11344 = vst [vmem:[#allocation9_spill] sm:$0xff] %v10571_v62  ;;  %v10573_v59 = vpop.f32.mrb[36].mxu0 }
 0xc6f   : > { %v5320_v38 = vadd.f32 %v5319_v5, %v5318_v37  ;;  %11345 = vst [vmem:[#allocation10_spill] sm:$0xff] %v10573_v59  ;;  %v10575_v22 = vpop.f32.mrb[37].mxu0 }
 0xc70   : > { %11346 = vst [vmem:[#allocation11_spill] sm:$0xff] %v10575_v22  ;;  %v10577_v3 = vpop.f32.mrb[38].mxu0 }
 0xc71   : > { %11347 = vst [vmem:[#allocation5_spill] sm:$0xff] %v10577_v3  ;;  %v10579_v0 = vpop.f32.mrb[39].mxu0 }
 0xc72   : > { %11348 = vst [vmem:[#allocation15_spill] sm:$0xff] %v10579_v0 }
 0xc9e   : > { %s6322_s16 = spop %6321 }
 0xc9f   : > { %s5303_s17 = smul.f32 0.001953125, %s6322_s16 }
 0xca1   : > { %s5304_s18 = sadd.f32 1e-05, %s5303_s17 }
 0xca3   : > { %v5305_v35 = vstv %s5304_s18 }
 0xca4   : > { %6519 = vrsqrt.f32 %v5305_v35  ;;  %v10581_v35 = vpop.f32.mrb[40].mxu0 }
 0xca5   : > { %11349 = vst [vmem:[#allocation4_spill] sm:$0xff] %v10581_v35  ;;  %v10583_v37 = vpop.f32.mrb[41].mxu0 }
 0xca6   : > { %11350 = vst [vmem:[#allocation28_spill] sm:$0xff] %v10583_v37  ;;  %v10585_v5 = vpop.f32.mrb[42].mxu0 }
 0xca7   : > { %11351 = vst [vmem:[#allocation27_spill] sm:$0xff] %v10585_v5  ;;  %v10605_v5 = vld [vmem:[%s11038_s5 + $0x5] ss:$0 sm:$0xff] }
 0xcae   : > { %v6520_v45 = vpop.eup %6519 }
 0xcaf   : > { %6323 = vpush %v6520_v45  ;;  %v10587_v45 = vpop.f32.mrb[43].mxu0 }
 0xcb0   : > { %6325 = vpush %v5320_v38  ;;  %11352 = vst [vmem:[#allocation6_spill] sm:$0xff] %v10587_v45  ;;  %v271_v38 = vld [vmem:[%s11038_s5 + $0x4] sm:$0x1] }
 0xce0   : > { %s6324_s24 = spop %6323 }
 0xce1   : > { %v5308_v18 = vstv %s6324_s24  ;;  %s6326_s11 = spop %6325 }
 0xce2   : > { %v5331_v49 = vsel %vm1364_vm6, %v5330_v48, %v5308_v18  ;;  %s5324_s12 = smul.f32 0.001953125, %s6326_s11  ;;  %vm11353_vm6 = vmmov %vm11339_vm12 }
 0xce4   : > { %s5325_s28 = sadd.f32 1e-05, %s5324_s12 }
 0xce6   : > { %v5326_v20 = vstv %s5325_s28 }
 0xce7   : > { %6521 = vrsqrt.f32 %v5326_v20 }
 0xcf1   : > { %v6522_v43 = vpop.eup %6521 }
 0xcf2   : > { %6327 = vpush %v6522_v43 }
 0xd23   : > { %s6328_s27 = spop %6327 }
 0xd24   : > { %v5329_v41 = vstv %s6328_s27 }
 0xd25   : > { %v5332_v19 = vsel %vm11353_vm6, %v5331_v49, %v5329_v41 }
 0xd26   : > { %v5333_v48 = vmul.f32 %v5332_v19, %v271_v38 }
 0xd28   : > { %v10594_v18 = vrot.slane %v5333_v48, %v11340_v21 }
 0xd2a   : > { %v5350_v20 = vmul.f32 %v10594_v18, %v10407_v29  ;;  %v5351_v43 = vmul.f32 %v10594_v18, %v10414_v13  ;;  %v5352_v45 = vmul.f32 %v10594_v18, %v10421_v52  ;;  %v5353_v49 = vmul.f32 %v10594_v18, %v10428_v61 }
 0xd2b   : > { %v5354_v21 = vmul.f32 %v10594_v18, %v10435_v26  ;;  %v5340_v29 = vmul.f32 %v10594_v18, %v10339_v28  ;;  %v5355_v13 = vmul.f32 %v10594_v18, %v10442_v42  ;;  %v5356_v52 = vmul.f32 %v10594_v18, %v10449_v25 }
 0xd2c   : > { %v10616_v38 = vadd.f32 %v10605_v5, %v5350_v20  ;;  %v10624_v61 = vadd.f32 %v10605_v5, %v5351_v43  ;;  %v10627_v26 = vadd.f32 %v10605_v5, %v5352_v45  ;;  %v5357_v28 = vmul.f32 %v10594_v18, %v10456_v60 }
 0xd2d   : > { %v10621_v41 = vadd.f32 %v10605_v5, %v5340_v29  ;;  %v10632_v42 = vadd.f32 %v10605_v5, %v5353_v49  ;;  %v5358_v19 = vmul.f32 %v10594_v18, %v10463_v23  ;;  %v10637_v25 = vadd.f32 %v10605_v5, %v5354_v21 }
 0xd2e   : > { %v5359_v48 = vmul.f32 %v10594_v18, %v10470_v8  ;;  %v10642_v20 = vadd.f32 %v10605_v5, %v5355_v13  ;;  %v6048_v43 = vmul.f32 -1.442695, %v10616_v38  ;;  %v5360_v60 = vmul.f32 %v10594_v18, %v10477_v31 }
 0xd2f   : > { %v6038_v45 = vmul.f32 -1.442695, %v10621_v41  ;;  %v10649_v49 = vadd.f32 %v10605_v5, %v5356_v52  ;;  %v6049_v23 = vmul.f32 -1.442695, %v10624_v61  ;;  %v6050_v21 = vmul.f32 -1.442695, %v10627_v26 }
 0xd30   : > { %v5361_v8 = vmul.f32 %v10594_v18, %v10484_v14  ;;  %v10656_v29 = vadd.f32 %v10605_v5, %v5357_v28  ;;  %v6051_v13 = vmul.f32 -1.442695, %v10632_v42  ;;  %v5362_v37 = vmul.f32 %v10594_v18, %v10491_v57 }
 0xd31   : > { %6523 = vpow2.f32 %v6038_v45  ;;  %v10662_v31 = vadd.f32 %v10605_v5, %v5358_v19  ;;  %v6052_v52 = vmul.f32 -1.442695, %v10637_v25  ;;  %v5363_v35 = vmul.f32 %v10594_v18, %v10498_v56 }
 0xd32   : > { %6525 = vpow2.f32 %v6048_v43  ;;  %v10668_v14 = vadd.f32 %v10605_v5, %v5359_v48  ;;  %v6053_v28 = vmul.f32 -1.442695, %v10642_v20  ;;  %v5364_v45 = vmul.f32 %v10594_v18, %v10505_v51 }
 0xd33   : > { %6527 = vpow2.f32 %v6049_v23  ;;  %v10674_v57 = vadd.f32 %v10605_v5, %v5360_v60  ;;  %v6054_v19 = vmul.f32 -1.442695, %v10649_v49  ;;  %v5365_v43 = vmul.f32 %v10594_v18, %v10512_v7 }
 0xd34   : > { %6529 = vpow2.f32 %v6050_v21  ;;  %v10680_v56 = vadd.f32 %v10605_v5, %v5361_v8  ;;  %v6055_v48 = vmul.f32 -1.442695, %v10656_v29  ;;  %v5366_v23 = vmul.f32 %v10594_v18, %v10519_v4 }
 0xd35   : > { %6531 = vpow2.f32 %v6051_v13  ;;  %v10686_v51 = vadd.f32 %v10605_v5, %v5362_v37  ;;  %v6056_v60 = vmul.f32 -1.442695, %v10662_v31  ;;  %v5367_v21 = vmul.f32 %v10594_v18, %v10526_v6 }
 0xd36   : > { %6533 = vpow2.f32 %v6052_v52  ;;  %v10692_v7 = vadd.f32 %v10605_v5, %v5363_v35  ;;  %v6057_v8 = vmul.f32 -1.442695, %v10668_v14  ;;  %v5368_v13 = vmul.f32 %v10594_v18, %v10533_v50 }
 0xd37   : > { %6535 = vpow2.f32 %v6053_v28  ;;  %v10698_v4 = vadd.f32 %v10605_v5, %v5364_v45  ;;  %v6058_v37 = vmul.f32 -1.442695, %v10674_v57  ;;  %v5369_v52 = vmul.f32 %v10594_v18, %v10540_v34 }
 0xd38   : > { %6537 = vpow2.f32 %v6054_v19  ;;  %v10704_v6 = vadd.f32 %v10605_v5, %v5365_v43  ;;  %v6059_v35 = vmul.f32 -1.442695, %v10680_v56  ;;  %v10708_v28 = vadd.f32 %v10605_v5, %v5366_v23  ;;  %v10714_v19 = vld [vmem:[%s11038_s5 + $0x6] ss:$0 sm:$0xff] }
 0xd39   : > { %11354 = vst [vmem:[#allocation13_spill] sm:$0xff] %v10698_v4  ;;  %6539 = vpow2.f32 %v6055_v48  ;;  %v6060_v50 = vmul.f32 -1.442695, %v10686_v51  ;;  %v10717_v34 = vadd.f32 %v10605_v5, %v5367_v21  ;;  %v6061_v43 = vmul.f32 -1.442695, %v10692_v7 }
 0xd3a   : > { %11355 = vst [vmem:[#allocation14_spill] sm:$0xff] %v10704_v6  ;;  %11356 = vst [vmem:[#allocation12_spill] sm:$0xff] %v10708_v28  ;;  %6541 = vpow2.f32 %v6056_v60  ;;  %v10721_v0 = vadd.f32 %v10605_v5, %v5368_v13  ;;  %v6062_v23 = vmul.f32 -1.442695, %v10698_v4  ;;  %v10725_v3 = vadd.f32 %v10605_v5, %v5369_v52 }
 0xd3b   : > { %v6524_v45 = vpop.eup %6523  ;;  %11357 = vst [vmem:[#allocation17_spill] sm:$0xff] %v10717_v34  ;;  %6543 = vpow2.f32 %v6057_v8  ;;  %v6063_v22 = vmul.f32 -1.442695, %v10704_v6  ;;  %v10730_v21 = vadd.f32 %v10088_v39, %v10714_v19  ;;  %v6064_v8 = vmul.f32 -1.442695, %v10708_v28 }
 0xd3c   : > { %v6526_v48 = vpop.eup %6525  ;;  %11358 = vst [vmem:[#allocation34_spill] sm:$0xff] %v10721_v0  ;;  %6545 = vpow2.f32 %v6058_v37  ;;  %11359 = vst [vmem:[#allocation42_spill] sm:$0xff] %v10725_v3  ;;  %v10735_v37 = vadd.f32 %v10714_v19, %v10092_v54  ;;  %v10739_v52 = vadd.f32 %v10098_v30, %v10714_v19  ;;  %v10744_v39 = vadd.f32 %v10714_v19, %v10100_v44 }
 0xd3d   : > { %v6528_v60 = vpop.eup %6527  ;;  %6547 = vpow2.f32 %v6059_v35  ;;  %v6065_v35 = vmul.f32 -1.442695, %v10717_v34  ;;  %v6066_v54 = vmul.f32 -1.442695, %v10721_v0  ;;  %v10753_v30 = vadd.f32 %v10714_v19, %v10115_v11 }
 0xd3e   : > { %v6530_v59 = vpop.eup %6529  ;;  %6549 = vpow2.f32 %v6060_v50  ;;  %v10748_v50 = vadd.f32 %v10111_v46, %v10714_v19  ;;  %v6067_v44 = vmul.f32 -1.442695, %v10725_v3  ;;  %v10762_v46 = vadd.f32 %v10714_v19, %v10124_v1  ;;  %v11361_v1 = vld [vmem:[#allocation24_spill] sm:$0xff] }
 0xd3f   : > { %v6532_v13 = vpop.eup %6531  ;;  %6551 = vpow2.f32 %v6061_v43  ;;  %v10757_v43 = vadd.f32 %v10121_v47, %v10714_v19  ;;  %v5504_v0 = vadd.f32 1.0, %v6524_v45  ;;  %v10770_v34 = vadd.f32 %v10714_v19, %v10129_v15  ;;  %v11364_v15 = vld [vmem:[#allocation29_spill] sm:$0xff] }
 0xd40   : > { %v6534_v62 = vpop.eup %6533  ;;  %6553 = vpow2.f32 %v6062_v23  ;;  %v10766_v23 = vadd.f32 %v10127_v40, %v10714_v19  ;;  %v10774_v47 = vadd.f32 %v10131_v63, %v10714_v19  ;;  %v10778_v28 = vadd.f32 %v10714_v19, %v11361_v1  ;;  %v11362_v40 = vld [vmem:[#allocation25_spill] sm:$0xff] }
 0xd41   : > { %v6536_v10 = vpop.eup %6535  ;;  %6555 = vpow2.f32 %v6063_v22  ;;  %v5514_v22 = vadd.f32 1.0, %v6526_v48  ;;  %v5515_v45 = vadd.f32 1.0, %v6528_v60  ;;  %v10786_v4 = vadd.f32 %v10714_v19, %v11364_v15 }
 0xd42   : > { %v6538_v2 = vpop.eup %6537  ;;  %6557 = vpow2.f32 %v6064_v8  ;;  %11360 = vst [vmem:[#allocation7_spill] sm:$0xff] %v10774_v47  ;;  %v10782_v8 = vadd.f32 %v11362_v40, %v10714_v19  ;;  %v5516_v63 = vadd.f32 1.0, %v6530_v59  ;;  %v5338_v48 = vmul.f32 %v10594_v18, %v10331_v55  ;;  %v11366_v55 = vld [vmem:[#allocation30_spill] sm:$0xff] }
 0xd43   : > { %v6540_v11 = vpop.eup %6539  ;;  %6559 = vpow2.f32 %v6065_v35  ;;  %11365 = vst [vmem:[#allocation41_spill] sm:$0xff] %v10786_v4  ;;  %v5517_v47 = vadd.f32 1.0, %v6532_v13  ;;  %v5341_v1 = vmul.f32 %v10594_v18, %v10343_v24  ;;  %v5518_v40 = vadd.f32 1.0, %v6534_v62 }
 0xd44   : > { %v6542_v3 = vpop.eup %6541  ;;  %11363 = vst [vmem:[#allocation39_spill] sm:$0xff] %v10782_v8  ;;  %6561 = vpow2.f32 %v6066_v54  ;;  %v5339_v54 = vmul.f32 %v10594_v18, %v10335_v17  ;;  %v5344_v15 = vmul.f32 %v10594_v18, %v10365_v53  ;;  %v5342_v59 = vmul.f32 %v10594_v18, %v10351_v32  ;;  %v11367_v8 = vld [vmem:[#allocation26_spill] sm:$0xff] }
 0xd45   : > { %v6544_v6 = vpop.eup %6543  ;;  %6563 = vpow2.f32 %v6067_v44  ;;  %v10800_v13 = vadd.f32 %v11366_v55, %v10714_v19  ;;  %v5345_v24 = vmul.f32 %v10594_v18, %v10372_v16  ;;  %v10806_v62 = vadd.f32 %v10714_v19, %v11367_v8 }
 0xd46   : > { %v6546_v35 = vpop.eup %6545  ;;  %6565 = vrcp.f32 %v5504_v0  ;;  %v5519_v0 = vadd.f32 1.0, %v6536_v10  ;;  %v10809_v53 = vadd.f32 %v10605_v5, %v5338_v48  ;;  %v5521_v4 = vadd.f32 1.0, %v6540_v11 }
 0xd47   : > { %v6548_v60 = vpop.eup %6547  ;;  %6567 = vrcp.f32 %v5514_v22  ;;  %v5520_v22 = vadd.f32 1.0, %v6538_v2  ;;  %v10812_v55 = vadd.f32 %v10605_v5, %v5341_v1  ;;  %v10815_v10 = vadd.f32 %v10605_v5, %v5339_v54 }
 0xd48   : > { %v6550_v44 = vpop.eup %6549  ;;  %6569 = vrcp.f32 %v5515_v45  ;;  %11368 = vst [vmem:[#allocation8_spill] sm:$0xff] %v10809_v53  ;;  %v5522_v45 = vadd.f32 1.0, %v6542_v3  ;;  %v10818_v8 = vadd.f32 %v10605_v5, %v5344_v15  ;;  %v10821_v2 = vadd.f32 %v10605_v5, %v5342_v59 }
 0xd49   : > { %v6552_v17 = vpop.eup %6551  ;;  %6571 = vrcp.f32 %v5516_v63  ;;  %11369 = vst [vmem:[#allocation43_spill] sm:$0xff] %v10812_v55  ;;  %11370 = vst [vmem:[#allocation19_spill] sm:$0xff] %v10815_v10  ;;  %v5523_v48 = vadd.f32 1.0, %v6544_v6  ;;  %v10824_v11 = vadd.f32 %v10605_v5, %v5345_v24  ;;  %v2625_v3 = vadd.f32 %v10562_v36, %v10714_v19 }
 0xd4a   : > { %v6554_v32 = vpop.eup %6553  ;;  %6573 = vrcp.f32 %v5517_v47  ;;  %11371 = vst [vmem:[#allocation44_spill] sm:$0xff] %v10818_v8  ;;  %11372 = vst [vmem:[#allocation45_spill] sm:$0xff] %v10821_v2  ;;  %v5343_v47 = vmul.f32 %v10594_v18, %v10357_v58  ;;  %v5524_v54 = vadd.f32 1.0, %v6546_v35  ;;  %v5525_v59 = vadd.f32 1.0, %v6548_v60 }
 0xd4b   : > { %v6556_v16 = vpop.eup %6555  ;;  %6575 = vrcp.f32 %v5518_v40  ;;  %11373 = vst [vmem:[#allocation35_spill] sm:$0xff] %v10824_v11  ;;  %v10831_v40 = vmul.f32 -1.442695, %v10809_v53  ;;  %v10834_v6 = vmul.f32 -1.442695, %v10812_v55  ;;  %v5526_v58 = vadd.f32 1.0, %v6550_v44 }
 0xd4c   : > { %v6558_v63 = vpop.eup %6557  ;;  %6577 = vrcp.f32 %v5519_v0  ;;  %v10837_v0 = vmul.f32 -1.442695, %v10815_v10  ;;  %v10841_v36 = vmul.f32 -1.442695, %v10818_v8  ;;  %v10844_v35 = vmul.f32 -1.442695, %v10821_v2 }
 0xd4d   : > { %v6560_v1 = vpop.eup %6559  ;;  %6579 = vrcp.f32 %v5520_v22  ;;  %v5527_v53 = vadd.f32 1.0, %v6552_v17  ;;  %v10850_v60 = vadd.f32 %v10605_v5, %v5343_v47  ;;  %v5528_v55 = vadd.f32 1.0, %v6554_v32 }
 0xd4e   : > { %v6562_v15 = vpop.eup %6561  ;;  %6581 = vrcp.f32 %v5521_v4  ;;  %v10847_v4 = vmul.f32 -1.442695, %v10824_v11  ;;  %v5529_v17 = vadd.f32 1.0, %v6556_v16  ;;  %v5346_v47 = vmul.f32 %v10594_v18, %v10379_v27 }
 0xd4f   : > { %v6564_v24 = vpop.eup %6563  ;;  %6583 = vrcp.f32 %v5522_v45  ;;  %v5348_v45 = vmul.f32 %v10594_v18, %v10393_v12  ;;  %v5531_v11 = vadd.f32 1.0, %v6560_v1 }
 0xd50   : > { %v6566_v22 = vpop.eup %6565  ;;  %6585 = vrcp.f32 %v5523_v48 }
 0xd51   : > { %v6568_v10 = vpop.eup %6567  ;;  %6587 = vrcp.f32 %v5524_v54  ;;  %v5600_v44 = vmul.f32 %v6566_v22, %v10621_v41  ;;  %v5530_v54 = vadd.f32 1.0, %v6558_v63 }
 0xd52   : > { %v6570_v8 = vpop.eup %6569  ;;  %6589 = vrcp.f32 %v5525_v59  ;;  %v5610_v48 = vmul.f32 %v6568_v10, %v10616_v38  ;;  %v5532_v38 = vadd.f32 1.0, %v6562_v15 }
 0xd53   : > { %v6572_v32 = vpop.eup %6571  ;;  %6591 = vrcp.f32 %v5526_v58  ;;  %v5611_v41 = vmul.f32 %v6570_v8, %v10624_v61  ;;  %v5632_v12 = vadd.f32 %v5600_v44, %v2625_v3  ;;  %v5533_v8 = vadd.f32 1.0, %v6564_v24 }
 0xd54   : > { %v6574_v22 = vpop.eup %6573  ;;  %6593 = vrcp.f32 %v5527_v53  ;;  %v5612_v2 = vmul.f32 %v6572_v32, %v10627_v26  ;;  %v5642_v16 = vadd.f32 %v5610_v48, %v10735_v37  ;;  %v11376_v48 = vld [vmem:[#allocation41_spill] sm:$0xff]  ;;  %v11377_v32 = vld [vmem:[#allocation14_spill] sm:$0xff] }
 0xd55   : > { %v6576_v59 = vpop.eup %6575  ;;  %6595 = vrcp.f32 %v5528_v55  ;;  %v5613_v27 = vmul.f32 %v6574_v22, %v10632_v42  ;;  %v5643_v10 = vadd.f32 %v5611_v41, %v10744_v39  ;;  %5664 = vst.msk [vmem:[%s10858_s9 + $0x10] sm:$0xff] %vm1413_vm8, %v5632_v12  ;;  %v6041_v39 = vmul.f32 -1.442695, %v10850_v60  ;;  %v11378_v22 = vld [vmem:[#allocation21_spill] sm:$0xff] }
 0xd56   : > { %v6578_v61 = vpop.eup %6577  ;;  %6597 = vrcp.f32 %v5529_v17  ;;  %v5614_v53 = vmul.f32 %v6576_v59, %v10637_v25  ;;  %v5644_v26 = vadd.f32 %v5612_v2, %v10730_v21  ;;  %5674 = vst.msk [vmem:[%s10858_s9 + $0x60] sm:$0xff] %vm1413_vm8, %v5642_v16  ;;  %v5349_v2 = vmul.f32 %v10594_v18, %v10400_v9  ;;  %v11379_v59 = vld [vmem:[#allocation12_spill] sm:$0xff] }
 0xd57   : > { %v6580_v37 = vpop.eup %6579  ;;  %6599 = vrcp.f32 %v5530_v54  ;;  %v5615_v55 = vmul.f32 %v6578_v61, %v10642_v20  ;;  %v5645_v42 = vadd.f32 %v5613_v27, %v10739_v52  ;;  %5675 = vst.msk [vmem:[%s10858_s9 + $0x68] sm:$0xff] %vm1413_vm8, %v5643_v10  ;;  %v10896_v9 = vadd.f32 %v10605_v5, %v5348_v45  ;;  %v11381_v61 = vld [vmem:[#allocation37_spill] sm:$0xff] }
 0xd58   : > { %v6582_v63 = vpop.eup %6581  ;;  %6601 = vrcp.f32 %v5531_v11  ;;  %v5616_v25 = vmul.f32 %v6580_v37, %v10649_v49  ;;  %v5646_v21 = vadd.f32 %v5614_v53, %v10753_v30  ;;  %5676 = vst.msk [vmem:[%s10858_s9 + $0x70] sm:$0xff] %vm1413_vm8, %v5644_v26  ;;  %v5347_v11 = vmul.f32 %v10594_v18, %v10386_v33 }
 0xd59   : > { %v6584_v20 = vpop.eup %6583  ;;  %6603 = vrcp.f32 %v5532_v38  ;;  %v5617_v52 = vmul.f32 %v6582_v63, %v10656_v29  ;;  %v5647_v1 = vadd.f32 %v5615_v55, %v10762_v46  ;;  %5677 = vst.msk [vmem:[%s10858_s9 + $0x78] sm:$0xff] %vm1413_vm8, %v5645_v42  ;;  %v10904_v33 = vadd.f32 %v10605_v5, %v5346_v47  ;;  %v11380_v38 = vld [vmem:[#allocation39_spill] sm:$0xff] }
 0xd5a   : > { %v6586_v49 = vpop.eup %6585  ;;  %6605 = vrcp.f32 %v5533_v8  ;;  %v5618_v30 = vmul.f32 %v6584_v20, %v10662_v31  ;;  %v5648_v3 = vadd.f32 %v5616_v25, %v10748_v50  ;;  %5678 = vst.msk [vmem:[%s10858_s9 + $0x80] sm:$0xff] %vm1413_vm8, %v5646_v21  ;;  %v2729_v16 = vadd.f32 %v10714_v19, %v11378_v22  ;;  %v11382_v8 = vld [vmem:[#allocation17_spill] sm:$0xff]  ;;  %v11383_v55 = vld [vmem:[#allocation31_spill] sm:$0xff]  ;;  %v11386_v20 = vld [vmem:[#allocation42_spill] sm:$0xff] }
 0xd5b   : > { %v6588_v29 = vpop.eup %6587  ;;  %v5619_v46 = vmul.f32 %v6586_v49, %v10668_v14  ;;  %v5649_v15 = vadd.f32 %v5617_v52, %v10757_v43  ;;  %5679 = vst.msk [vmem:[%s10858_s9 + $0x88] sm:$0xff] %vm1413_vm8, %v5647_v1  ;;  %6607 = vpow2.f32 %v10831_v40  ;;  %v10912_v14 = vadd.f32 %v10605_v5, %v5349_v2  ;;  %v11385_v2 = vld [vmem:[#allocation33_spill] sm:$0xff] }
 0xd5c   : > { %v6590_v18 = vpop.eup %6589  ;;  %v5620_v31 = vmul.f32 %v6588_v29, %v10674_v57  ;;  %v5650_v50 = vadd.f32 %v5618_v30, %v10770_v34  ;;  %5680 = vst.msk [vmem:[%s10858_s9 + $0x90] sm:$0xff] %vm1413_vm8, %v5648_v3  ;;  %6609 = vpow2.f32 %v10834_v6  ;;  %v10920_v57 = vadd.f32 %v10605_v5, %v5347_v11 }
 0xd5d   : > { %v6592_v43 = vpop.eup %6591  ;;  %v5621_v40 = vmul.f32 %v6590_v18, %v10680_v56  ;;  %v5651_v24 = vadd.f32 %v5619_v46, %v10778_v28  ;;  %5681 = vst.msk [vmem:[%s10858_s9 + $0x98] sm:$0xff] %vm1413_vm8, %v5649_v15  ;;  %6611 = vpow2.f32 %v10837_v0  ;;  %v6046_v56 = vmul.f32 -1.442695, %v10896_v9  ;;  %v11374_v0 = vld [vmem:[#allocation7_spill] sm:$0xff] }
 0xd5e   : > { %v6594_v34 = vpop.eup %6593  ;;  %v5622_v6 = vmul.f32 %v6592_v43, %v10686_v51  ;;  %v5652_v58 = vadd.f32 %v5620_v31, %v10766_v23  ;;  %5682 = vst.msk [vmem:[%s10858_s9 + $0xa0] sm:$0xff] %vm1413_vm8, %v5650_v50  ;;  %6613 = vpow2.f32 %v10841_v36  ;;  %v6044_v5 = vmul.f32 -1.442695, %v10904_v33  ;;  %v11375_v23 = vld [vmem:[#allocation13_spill] sm:$0xff] }
 0xd5f   : > { %v6596_v28 = vpop.eup %6595  ;;  %v5623_v44 = vmul.f32 %v6594_v34, %v10692_v7  ;;  %v5653_v45 = vadd.f32 %v5621_v40, %v11374_v0  ;;  %5683 = vst.msk [vmem:[%s10858_s9 + $0xa8] sm:$0xff] %vm1413_vm8, %v5651_v24  ;;  %6615 = vpow2.f32 %v10844_v35  ;;  %v6047_v7 = vmul.f32 -1.442695, %v10912_v14 }
 0xd60   : > { %v6598_v51 = vpop.eup %6597  ;;  %v5624_v17 = vmul.f32 %v6596_v28, %v11375_v23  ;;  %v5654_v36 = vadd.f32 %v5622_v6, %v11376_v48  ;;  %5684 = vst.msk [vmem:[%s10858_s9 + $0xb0] sm:$0xff] %vm1413_vm8, %v5652_v58  ;;  %6617 = vpow2.f32 %v10847_v4  ;;  %v6045_v41 = vmul.f32 -1.442695, %v10920_v57  ;;  %v11387_v48 = vld [vmem:[#allocation32_spill] sm:$0xff] }
 0xd61   : > { %v6600_v47 = vpop.eup %6599  ;;  %v5625_v54 = vmul.f32 %v6598_v51, %v11377_v32  ;;  %v5655_v35 = vadd.f32 %v5623_v44, %v10806_v62  ;;  %5685 = vst.msk [vmem:[%s10858_s9 + $0xb8] sm:$0xff] %vm1413_vm8, %v5653_v45  ;;  %6619 = vpow2.f32 %v6041_v39  ;;  %v2732_v62 = vadd.f32 %v10714_v19, %v11381_v61  ;;  %v11384_v39 = vld [vmem:[#allocation34_spill] sm:$0xff] }
 0xd62   : > { %v6602_v12 = vpop.eup %6601  ;;  %v5626_v4 = vmul.f32 %v6600_v47, %v11379_v59  ;;  %v5656_v27 = vadd.f32 %v5624_v17, %v11380_v38  ;;  %5686 = vst.msk [vmem:[%s10858_s9 + $0xc0] sm:$0xff] %vm1413_vm8, %v5654_v36  ;;  %6621 = vpow2.f32 %v6046_v56  ;;  %v2737_v42 = vadd.f32 %v11383_v55, %v10714_v19  ;;  %v11391_v59 = vld [vmem:[#allocation9_spill] sm:$0xff]  ;;  %v11392_v38 = vld [vmem:[#allocation19_spill] sm:$0xff] }
 0xd63   : > { %v6604_v10 = vpop.eup %6603  ;;  %v5627_v53 = vmul.f32 %v6602_v12, %v11382_v8  ;;  %v5657_v26 = vadd.f32 %v5625_v54, %v10800_v13  ;;  %5687 = vst.msk [vmem:[%s10858_s9 + $0xc8] sm:$0xff] %vm1413_vm8, %v5655_v35  ;;  %6623 = vpow2.f32 %v6044_v5  ;;  %v2740_v13 = vadd.f32 %v11385_v2, %v10714_v19  ;;  %v11389_v54 = vld [vmem:[#allocation22_spill] sm:$0xff] }
 0xd64   : > { %v6606_v37 = vpop.eup %6605  ;;  %v5628_v63 = vmul.f32 %v6604_v10, %v11384_v39  ;;  %v5658_v25 = vadd.f32 %v5626_v4, %v2729_v16  ;;  %5688 = vst.msk [vmem:[%s10858_s9 + $0xd0] sm:$0xff] %vm1413_vm8, %v5656_v27  ;;  %6625 = vpow2.f32 %v6047_v7  ;;  %v2617_v36 = vadd.f32 %v10714_v19, %v11387_v48  ;;  %v11388_v7 = vld [vmem:[#allocation8_spill] sm:$0xff] }
 0xd65   : > { %v6608_v21 = vpop.eup %6607  ;;  %v5629_v52 = vmul.f32 %v6606_v37, %v11386_v20  ;;  %v5659_v1 = vadd.f32 %v5627_v53, %v2732_v62  ;;  %5689 = vst.msk [vmem:[%s10858_s9 + $0xd8] sm:$0xff] %vm1413_vm8, %v5657_v26  ;;  %6627 = vpow2.f32 %v6045_v41  ;;  %v2628_v35 = vadd.f32 %v11389_v54, %v10714_v19  ;;  %v11390_v41 = vld [vmem:[#allocation43_spill] sm:$0xff]  ;;  %v11393_v62 = vld [vmem:[#allocation10_spill] sm:$0xff]  ;;  %v11394_v53 = vld [vmem:[#allocation44_spill] sm:$0xff] }
 0xd66   : > { %v6610_v11 = vpop.eup %6609  ;;  %v5660_v49 = vadd.f32 %v5628_v63, %v2737_v42  ;;  %5690 = vst.msk [vmem:[%s10858_s9 + $0xe0] sm:$0xff] %vm1413_vm8, %v5658_v25  ;;  %v5502_v30 = vadd.f32 1.0, %v6608_v21  ;;  %v2620_v4 = vadd.f32 %v10714_v19, %v11391_v59  ;;  %v2641_v8 = vadd.f32 %v11393_v62, %v10714_v19  ;;  %v11395_v42 = vld [vmem:[#allocation11_spill] sm:$0xff]  ;;  %v11396_v63 = vld [vmem:[#allocation45_spill] sm:$0xff] }
 0xd67   : > { %v6612_v3 = vpop.eup %6611  ;;  %v5661_v29 = vadd.f32 %v5629_v52, %v2740_v13  ;;  %5691 = vst.msk [vmem:[%s10858_s9 + $0xe8] sm:$0xff] %vm1413_vm8, %v5659_v1  ;;  %v5505_v46 = vadd.f32 1.0, %v6610_v11  ;;  %v2633_v39 = vadd.f32 %v10714_v19, %v11395_v42  ;;  %v11397_v13 = vld [vmem:[#allocation5_spill] sm:$0xff]  ;;  %v11398_v52 = vld [vmem:[#allocation35_spill] sm:$0xff] }
 0xd68   : > { %v6614_v15 = vpop.eup %6613  ;;  %5692 = vst.msk [vmem:[%s10858_s9 + $0xf0] sm:$0xff] %vm1413_vm8, %v5660_v49  ;;  %6629 = vrcp.f32 %v5502_v30  ;;  %v5503_v18 = vadd.f32 1.0, %v6612_v3  ;;  %v2644_v20 = vadd.f32 %v11397_v13, %v10714_v19  ;;  %v11399_v30 = vld [vmem:[#allocation15_spill] sm:$0xff] }
 0xd69   : > { %v6616_v31 = vpop.eup %6615  ;;  %5693 = vst.msk [vmem:[%s10858_s9 + $0xf8] sm:$0xff] %vm1413_vm8, %v5661_v29  ;;  %6631 = vrcp.f32 %v5505_v46  ;;  %v5508_v50 = vadd.f32 1.0, %v6614_v15  ;;  %v2636_v3 = vadd.f32 %v10714_v19, %v11399_v30 }
 0xd6a   : > { %v6618_v43 = vpop.eup %6617  ;;  %6633 = vrcp.f32 %v5503_v18  ;;  %v5506_v40 = vadd.f32 1.0, %v6616_v31  ;;  %v11400_v18 = vld [vmem:[#allocation4_spill] sm:$0xff] }
 0xd6b   : > { %v6620_v24 = vpop.eup %6619  ;;  %6635 = vrcp.f32 %v5508_v50  ;;  %v5509_v34 = vadd.f32 1.0, %v6618_v43  ;;  %v2657_v31 = vadd.f32 %v11400_v18, %v10714_v19 }
 0xd6c   : > { %v6622_v6 = vpop.eup %6621  ;;  %6637 = vrcp.f32 %v5506_v40  ;;  %v5507_v58 = vadd.f32 1.0, %v6620_v24  ;;  %v11401_v24 = vld [vmem:[#allocation28_spill] sm:$0xff] }
 0xd6d   : > { %v6624_v56 = vpop.eup %6623  ;;  %6639 = vrcp.f32 %v5509_v34  ;;  %v5512_v28 = vadd.f32 1.0, %v6622_v6 }
 0xd6e   : > { %v6626_v44 = vpop.eup %6625  ;;  %6641 = vrcp.f32 %v5507_v58  ;;  %v5510_v0 = vadd.f32 1.0, %v6624_v56  ;;  %v11402_v56 = vld [vmem:[#allocation27_spill] sm:$0xff] }
 0xd6f   : > { %v6628_v45 = vpop.eup %6627  ;;  %6643 = vrcp.f32 %v5512_v28  ;;  %v5513_v5 = vadd.f32 1.0, %v6626_v44  ;;  %v2660_v28 = vadd.f32 %v11402_v56, %v10714_v19 }
 0xd70   : > { %6645 = vrcp.f32 %v5510_v0  ;;  %v5511_v51 = vadd.f32 1.0, %v6628_v45  ;;  %v11403_v0 = vld [vmem:[#allocation6_spill] sm:$0xff] }
 0xd71   : > { %6647 = vrcp.f32 %v5513_v5  ;;  %v2652_v45 = vadd.f32 %v10714_v19, %v11403_v0 }
 0xd72   : > { %v6630_v23 = vpop.eup %6629  ;;  %6649 = vrcp.f32 %v5511_v51 }
 0xd73   : > { %v6632_v17 = vpop.eup %6631  ;;  %v5598_v47 = vmul.f32 %v6630_v23, %v11388_v7 }
 0xd74   : > { %v6634_v32 = vpop.eup %6633  ;;  %v5601_v12 = vmul.f32 %v6632_v17, %v11390_v41 }
 0xd75   : > { %v6636_v22 = vpop.eup %6635  ;;  %v5630_v16 = vadd.f32 %v5598_v47, %v2617_v36  ;;  %v5599_v27 = vmul.f32 %v6634_v32, %v11392_v38 }
 0xd76   : > { %v6638_v10 = vpop.eup %6637  ;;  %v5633_v61 = vadd.f32 %v5601_v12, %v2628_v35  ;;  %v5604_v26 = vmul.f32 %v6636_v22, %v11394_v53 }
 0xd77   : > { %v6640_v37 = vpop.eup %6639  ;;  %5662 = vst.msk [vmem:[%s10858_s9] sm:$0xff] %vm1413_vm8, %v5630_v16  ;;  %v5631_v55 = vadd.f32 %v5599_v27, %v2620_v4  ;;  %v5602_v25 = vmul.f32 %v6638_v10, %v11396_v63 }
 0xd78   : > { %v6642_v21 = vpop.eup %6641  ;;  %5665 = vst.msk [vmem:[%s10858_s9 + $0x18] sm:$0xff] %vm1413_vm8, %v5633_v61  ;;  %v5636_v2 = vadd.f32 %v5604_v26, %v2641_v8  ;;  %v5605_v1 = vmul.f32 %v6640_v37, %v11398_v52 }
 0xd79   : > { %v6644_v11 = vpop.eup %6643  ;;  %5663 = vst.msk [vmem:[%s10858_s9 + $0x8] sm:$0xff] %vm1413_vm8, %v5631_v55  ;;  %v5634_v49 = vadd.f32 %v5602_v25, %v2633_v39  ;;  %v5603_v29 = vmul.f32 %v6642_v21, %v10850_v60  ;;  %v2649_v60 = vadd.f32 %v10714_v19, %v11401_v24 }
 0xd7a   : > { %v6646_v46 = vpop.eup %6645  ;;  %5668 = vst.msk [vmem:[%s10858_s9 + $0x30] sm:$0xff] %vm1413_vm8, %v5636_v2  ;;  %v5637_v15 = vadd.f32 %v5605_v1, %v2644_v20  ;;  %v5608_v50 = vmul.f32 %v6644_v11, %v10896_v9 }
 0xd7b   : > { %v6648_v43 = vpop.eup %6647  ;;  %5666 = vst.msk [vmem:[%s10858_s9 + $0x20] sm:$0xff] %vm1413_vm8, %v5634_v49  ;;  %v5635_v40 = vadd.f32 %v5603_v29, %v2636_v3  ;;  %v5606_v34 = vmul.f32 %v6646_v46, %v10904_v33 }
 0xd7c   : > { %v6650_v6 = vpop.eup %6649  ;;  %5669 = vst.msk [vmem:[%s10858_s9 + $0x38] sm:$0xff] %vm1413_vm8, %v5637_v15  ;;  %v5640_v58 = vadd.f32 %v5608_v50, %v2657_v31  ;;  %v5609_v9 = vmul.f32 %v6648_v43, %v10912_v14 }
 0xd7d   : > { %5667 = vst.msk [vmem:[%s10858_s9 + $0x28] sm:$0xff] %vm1413_vm8, %v5635_v40  ;;  %v5638_v44 = vadd.f32 %v5606_v34, %v2649_v60  ;;  %v5607_v5 = vmul.f32 %v6650_v6, %v10920_v57 }
 0xd7e   : > { %5672 = vst.msk [vmem:[%s10858_s9 + $0x50] sm:$0xff] %vm1413_vm8, %v5640_v58  ;;  %v5641_v33 = vadd.f32 %v5609_v9, %v2660_v28 }
 0xd7f   : > { %5670 = vst.msk [vmem:[%s10858_s9 + $0x40] sm:$0xff] %vm1413_vm8, %v5638_v44  ;;  %v5639_v51 = vadd.f32 %v5607_v5, %v2652_v45 }
 0xd80   : > { %5673 = vst.msk [vmem:[%s10858_s9 + $0x58] sm:$0xff] %vm1413_vm8, %v5641_v33 }
 0xd81   : > { %5671 = vst.msk [vmem:[%s10858_s9 + $0x48] sm:$0xff] %vm1413_vm8, %v5639_v51 }
 0xd82 PF: > { %s16_s21 = sadd.s32 1, %s6675_s21  }
 0xd83   : > { %p13_p4 = scmp.ge.s32.totalorder %s16_s21, 4  }
 0xd85   :  { %15 = sbr.rel (!%p13_p4) target bundleno = 1 (0x1), region = 79 }

</bundles_post_ra>
